<compile_context>
chip_gen: v7x
topology: tpu7x:2x2x1
jax: 0.10.0
libtpu: 0.0.40
codegen_flags: <defaults>
</compile_context>

<pallas_src>
import jax
import jax.numpy as jnp
from jax.experimental import pallas as pl
from jax.experimental.pallas import tpu as pltpu


# ----------------------------------------------------------------------------
# Single fused kernel: 3 LSTM branches (interleaved recurrences) + fc heads +
# shared text Linear + normalize + image head, all in one grid step.
# ----------------------------------------------------------------------------
def _fused_kernel(emb_ref, w_ih_ref, w_hh_ref, b_ref,
                  w_fc_ref, b_fc_ref, w_text_ref, b_text_ref,
                  img_ref, w_im1_ref, b_im1_ref, w_im2_ref, b_im2_ref,
                  txt_out_ref, img_out_ref):
    G, TB, E = emb_ref.shape            # (branches, T*B, embed)  time-major rows
    H = w_hh_ref.shape[1]
    B = txt_out_ref.shape[1]
    T = TB // B
    H3 = 3 * H
    f32 = jnp.float32
    bf16 = jnp.bfloat16

    # ---- Hoisted input projection: one (T*B, E) @ (E, 4H) GEMM per branch
    #      covers every timestep at once (off the recurrent critical path).
    #      Rows are time-major, so the per-step read below is a static slice.
    zins = [jnp.dot(emb_ref[g], w_ih_ref[g], preferred_element_type=f32)
            + b_ref[g] for g in range(G)]                    # G x (T*B, 4H) f32

    hs = [jnp.zeros((B, H), f32) for _ in range(G)]
    cs = [jnp.zeros((B, H), f32) for _ in range(G)]

    # ---- Interleaved recurrences: loop over t once and issue the three
    #      independent (B,H)@(H,4H) dots + gate math per iteration so the
    #      chains overlap each other's MXU/EUP latency (single-TC friendly).
    # TODO(synk): at production T/H, switch to lax.fori_loop(unroll=small) and
    # hold w_hh in MXU weight regs via pltpu.matmul_push_rhs/acc_lhs.
    for t in range(T):
        for g in range(G):
            z = (zins[g][t * B:(t + 1) * B, :]
                 + jnp.dot(hs[g].astype(bf16), w_hh_ref[g],
                           preferred_element_type=f32))              # (B, 4H)
            # Gate columns packed [i, f, o, g] at init: one sigmoid over 3H
            # lanes + one tanh over H lanes per step (halves EUP dispatches).
            sg = jax.nn.sigmoid(z[:, :H3])
            g_gate = jnp.tanh(z[:, H3:])
            cs[g] = sg[:, H:2 * H] * cs[g] + sg[:, :H] * g_gate
            hs[g] = sg[:, 2 * H:H3] * jnp.tanh(cs[g])

    # ---- Per-branch LSTMEncoder.fc + shared text Linear + L2 normalize.
    for g in range(G):
        enc = (jnp.dot(hs[g].astype(bf16), w_fc_ref[g],
                       preferred_element_type=f32) + b_fc_ref[g])    # (B, O)
        y = (jnp.dot(enc.astype(bf16), w_text_ref[...],
                     preferred_element_type=f32) + b_text_ref[...])  # (B, M)
        ss = jnp.sum(y * y, axis=-1, keepdims=True)
        # F.normalize(dim=-1, eps=1e-12): y / max(||y||, 1e-12)
        txt_out_ref[g] = y * jax.lax.rsqrt(jnp.maximum(ss, 1e-24))

    # ---- Image head: Linear -> ReLU -> Dropout(identity, eval) -> Linear
    #      -> L2 normalize. Fused here to avoid a second kernel launch.
    # TODO(synk): nn.Dropout(p=0.5) treated as identity (eval-mode semantics).
    h_img = jnp.maximum(
        jnp.dot(img_ref[...], w_im1_ref[...], preferred_element_type=f32)
        + b_im1_ref[...], 0.0)
    y_img = (jnp.dot(h_img.astype(bf16), w_im2_ref[...],
                     preferred_element_type=f32) + b_im2_ref[...])
    ss_i = jnp.sum(y_img * y_img, axis=-1, keepdims=True)
    img_out_ref[...] = y_img * jax.lax.rsqrt(jnp.maximum(ss_i, 1e-24))


def _full_spec(shape):
    nd = len(shape)
    return pl.BlockSpec(shape, lambda *_: (0,) * nd)


def fused_forward(emb_tb, images, params, *, batch):
    """emb_tb: (3, T*B, E) bf16 time-major rows; images: (Bi, F) bf16."""
    G = emb_tb.shape[0]
    M = params["w_text"].shape[1]
    Bi = images.shape[0]
    operands = (emb_tb, params["w_ih"], params["w_hh"], params["b"],
                params["w_fc"], params["b_fc"],
                params["w_text"], params["b_text"],
                images, params["w_im1"], params["b_im1"],
                params["w_im2"], params["b_im2"])
    # TODO(synk): at production sizes (E=H=2048) the full-weight BlockSpecs
    # must be re-planned: tile the 4H/O columns on a grid axis, keep weights
    # bf16, use pipeline_mode=pl.Buffered(1) on reused weight specs and raise
    # vmem_limit_bytes explicitly (v7x VMEM is 64 MiB).
    return pl.pallas_call(
        _fused_kernel,
        out_shape=(jax.ShapeDtypeStruct((G, batch, M), jnp.float32),
                   jax.ShapeDtypeStruct((Bi, M), jnp.float32)),
        grid=(1,),
        in_specs=[_full_spec(a.shape) for a in operands],
        out_specs=(_full_spec((G, batch, M)), _full_spec((Bi, M))),
        compiler_params=pltpu.CompilerParams(
            dimension_semantics=("arbitrary",)),
    )(*operands)


# ----------------------------------------------------------------------------
# Parameter init (deterministic, PyTorch-style uniform fan-in bounds).
# Branch weights are pre-stacked along a leading axis of size 3.
# Matmul weights are stored bf16; biases and all elementwise math stay f32.
# ----------------------------------------------------------------------------
def _uniform(key, shape, bound, dtype=jnp.float32):
    return jax.random.uniform(key, shape, jnp.float32, -bound, bound).astype(dtype)


def make_params(key, *, G, V, E, H, M, F, EMB):
    O = 3 * M                      # LSTM output_size must equal 3*metric_dim
    ks = jax.random.split(key, 13)
    bh = 1.0 / (H ** 0.5)
    bt = 1.0 / (O ** 0.5)
    bf = 1.0 / (F ** 0.5)
    be = 1.0 / (EMB ** 0.5)
    wdt = jnp.bfloat16
    emb = _uniform(ks[0], (G, V, E), 1.0, wdt)
    emb = emb.at[:, 0, :].set(0.0)                  # padding_idx=0
    return dict(
        emb=emb,
        # NOTE: LSTM gate columns are packed [i, f, o, g] (PyTorch order is
        # [i, f, g, o]); loading real PyTorch weights would need a column
        # permutation. Init here is random, so packing is free.
        w_ih=_uniform(ks[1], (G, E, 4 * H), bh, wdt),
        w_hh=_uniform(ks[2], (G, H, 4 * H), bh, wdt),
        # combined b_ih + b_hh (PyTorch adds both)
        b=_uniform(ks[3], (G, 1, 4 * H), bh) + _uniform(ks[4], (G, 1, 4 * H), bh),
        w_fc=_uniform(ks[5], (G, H, O), bh, wdt),
        b_fc=_uniform(ks[6], (G, 1, O), bh),
        w_text=_uniform(ks[7], (O, M), bt, wdt),
        b_text=_uniform(ks[8], (1, M), bt),
        w_im1=_uniform(ks[9], (F, EMB), bf, wdt),
        b_im1=_uniform(ks[10], (1, EMB), bf),
        w_im2=_uniform(ks[11], (EMB, M), be, wdt),
        b_im2=_uniform(ks[12], (1, M), be),
    )


def forward(params, name_of_item, name_of_collection, notes, images):
    B, T = name_of_item.shape
    seqs = jnp.stack([name_of_item, name_of_collection, notes])      # (3, B, T)
    # Embedding lookup kept as plain-JAX gather glue (bf16 table).
    # TODO(synk): at production sizes (E=2048) move this gather into the kernel
    # via PrefetchScalarGridSpec scalar-prefetched token ids + pl.Element rows.
    emb = jax.vmap(lambda tbl, s: tbl[s])(params["emb"], seqs)       # (3,B,T,E)
    # Time-major flattened rows so the kernel's per-step read is a static slice.
    emb_tb = jnp.transpose(emb, (0, 2, 1, 3)).reshape(3, T * B, emb.shape[-1])

    txt, img = fused_forward(emb_tb, images.astype(jnp.bfloat16), params,
                             batch=B)                                # (3,B,M), (Bi,M)
    # matches torch.cat((a[None],b[None],c[None]),1) -> Linear -> norm -> flat
    textual_representations = txt.reshape(-1)
    image_representations = img.reshape(-1)
    return textual_representations, image_representations


if __name__ == "__main__":
    # Small, lane-dense shapes consistent with the module (scaled from 2048).
    B, T = 2, 8          # batch, sequence length
    V = 320              # LSTMEncoder default input_size (vocab)
    E = 128              # embed_size
    H = 128              # hidden_size  (4H = 512 -> 128-aligned gate slices)
    M = 128              # metric_dim   (LSTM output_size = 3*M = 384)
    F = 256              # image_feat_dim (scaled from 2048)
    EMB = 128            # embed_dim of EmbedBranch
    B_IMG = 2

    root = jax.random.PRNGKey(0)
    k_par, k_in = jax.random.split(root)
    params = make_params(k_par, G=3, V=V, E=E, H=H, M=M, F=F, EMB=EMB)

    ks = jax.random.split(k_in, 4)
    name_of_item = jax.random.randint(ks[0], (B, T), 0, V, dtype=jnp.int32)
    name_of_collection = jax.random.randint(ks[1], (B, T), 0, V, dtype=jnp.int32)
    notes = jax.random.randint(ks[2], (B, T), 0, V, dtype=jnp.int32)
    images = jax.random.normal(ks[3], (B_IMG, F), jnp.float32)

    textual, image = jax.jit(forward)(params, name_of_item,
                                      name_of_collection, notes, images)
    jax.block_until_ready((textual, image))
    assert textual.shape == (3 * B * M,) and image.shape == (B_IMG * M,)
    assert bool(jnp.all(jnp.isfinite(textual))) and bool(jnp.all(jnp.isfinite(image)))
    print("KERNEL_OK")
</pallas_src>

<mosaic_0001>
module attributes {stable_mosaic.version = 11 : i64} {
  func.func @_fused_kernel(%arg0: i32, %arg1: memref<3x16x128xbf16, #tpu.memory_space<vmem>>, %arg2: memref<3x128x512xbf16, #tpu.memory_space<vmem>>, %arg3: memref<3x128x512xbf16, #tpu.memory_space<vmem>>, %arg4: memref<3x1x512xf32, #tpu.memory_space<vmem>>, %arg5: memref<3x128x384xbf16, #tpu.memory_space<vmem>>, %arg6: memref<3x1x384xf32, #tpu.memory_space<vmem>>, %arg7: memref<384x128xbf16, #tpu.memory_space<vmem>>, %arg8: memref<1x128xf32, #tpu.memory_space<vmem>>, %arg9: memref<2x256xbf16, #tpu.memory_space<vmem>>, %arg10: memref<256x128xbf16, #tpu.memory_space<vmem>>, %arg11: memref<1x128xf32, #tpu.memory_space<vmem>>, %arg12: memref<128x128xbf16, #tpu.memory_space<vmem>>, %arg13: memref<1x128xf32, #tpu.memory_space<vmem>>, %arg14: memref<3x2x128xf32, #tpu.memory_space<vmem>>, %arg15: memref<2x128xf32, #tpu.memory_space<vmem>>) attributes {dimension_semantics = [#tpu.dimension_semantics<arbitrary>], iteration_bounds = array<i64: 1>, scalar_prefetch = 0 : i64, scratch_operands = 0 : i64, tpu.core_type = #tpu.core_type<tc>, window_params = [{pipeline_mode = #tpu.pipeline_mode<synchronous>, transform_indices = @transform_0, window_bounds = array<i64: 3, 16, 128>}, {pipeline_mode = #tpu.pipeline_mode<synchronous>, transform_indices = @transform_1, window_bounds = array<i64: 3, 128, 512>}, {pipeline_mode = #tpu.pipeline_mode<synchronous>, transform_indices = @transform_2, window_bounds = array<i64: 3, 128, 512>}, {pipeline_mode = #tpu.pipeline_mode<synchronous>, transform_indices = @transform_3, window_bounds = array<i64: 3, 1, 512>}, {pipeline_mode = #tpu.pipeline_mode<synchronous>, transform_indices = @transform_4, window_bounds = array<i64: 3, 128, 384>}, {pipeline_mode = #tpu.pipeline_mode<synchronous>, transform_indices = @transform_5, window_bounds = array<i64: 3, 1, 384>}, {pipeline_mode = #tpu.pipeline_mode<synchronous>, transform_indices = @transform_6, window_bounds = array<i64: 384, 128>}, {pipeline_mode = #tpu.pipeline_mode<synchronous>, transform_indices = @transform_7, window_bounds = array<i64: 1, 128>}, {pipeline_mode = #tpu.pipeline_mode<synchronous>, transform_indices = @transform_8, window_bounds = array<i64: 2, 256>}, {pipeline_mode = #tpu.pipeline_mode<synchronous>, transform_indices = @transform_9, window_bounds = array<i64: 256, 128>}, {pipeline_mode = #tpu.pipeline_mode<synchronous>, transform_indices = @transform_10, window_bounds = array<i64: 1, 128>}, {pipeline_mode = #tpu.pipeline_mode<synchronous>, transform_indices = @transform_11, window_bounds = array<i64: 128, 128>}, {pipeline_mode = #tpu.pipeline_mode<synchronous>, transform_indices = @transform_12, window_bounds = array<i64: 1, 128>}, {pipeline_mode = #tpu.pipeline_mode<synchronous>, transform_indices = @transform_13, window_bounds = array<i64: 3, 2, 128>}, {pipeline_mode = #tpu.pipeline_mode<synchronous>, transform_indices = @transform_14, window_bounds = array<i64: 2, 128>}]} {
    %c0 = arith.constant 0 : index
    %c0_0 = arith.constant 0 : index
    %c0_1 = arith.constant 0 : index
    %0 = vector.load %arg1[%c0, %c0_0, %c0_1] : memref<3x16x128xbf16, #tpu.memory_space<vmem>>, vector<1x16x128xbf16>
    %1 = vector.shape_cast %0 : vector<1x16x128xbf16> to vector<16x128xbf16>
    %c0_2 = arith.constant 0 : index
    %c0_3 = arith.constant 0 : index
    %c0_4 = arith.constant 0 : index
    %2 = vector.load %arg2[%c0_2, %c0_3, %c0_4] : memref<3x128x512xbf16, #tpu.memory_space<vmem>>, vector<1x128x512xbf16>
    %3 = vector.shape_cast %2 : vector<1x128x512xbf16> to vector<128x512xbf16>
    %cst = arith.constant dense<0.000000e+00> : vector<16x512xf32>
    %4 = tpu.matmul %1, %3, %cst {dimension_numbers = #tpu.dot_dimension_numbers<[1], [0], [0], [1], [0, 0, 1, 1], [], []>} : vector<16x128xbf16>, vector<128x512xbf16>, vector<16x512xf32> -> vector<16x512xf32>
    %c0_5 = arith.constant 0 : index
    %c0_6 = arith.constant 0 : index
    %c0_7 = arith.constant 0 : index
    %5 = vector.load %arg4[%c0_5, %c0_6, %c0_7] : memref<3x1x512xf32, #tpu.memory_space<vmem>>, vector<1x1x512xf32>
    %6 = vector.shape_cast %5 : vector<1x1x512xf32> to vector<1x512xf32>
    %7 = vector.broadcast %6 : vector<1x512xf32> to vector<16x512xf32>
    %8 = arith.addf %4, %7 : vector<16x512xf32>
    %c1 = arith.constant 1 : index
    %c0_8 = arith.constant 0 : index
    %c0_9 = arith.constant 0 : index
    %9 = vector.load %arg1[%c1, %c0_8, %c0_9] : memref<3x16x128xbf16, #tpu.memory_space<vmem>>, vector<1x16x128xbf16>
    %10 = vector.shape_cast %9 : vector<1x16x128xbf16> to vector<16x128xbf16>
    %c1_10 = arith.constant 1 : index
    %c0_11 = arith.constant 0 : index
    %c0_12 = arith.constant 0 : index
    %11 = vector.load %arg2[%c1_10, %c0_11, %c0_12] : memref<3x128x512xbf16, #tpu.memory_space<vmem>>, vector<1x128x512xbf16>
    %12 = vector.shape_cast %11 : vector<1x128x512xbf16> to vector<128x512xbf16>
    %cst_13 = arith.constant dense<0.000000e+00> : vector<16x512xf32>
    %13 = tpu.matmul %10, %12, %cst_13 {dimension_numbers = #tpu.dot_dimension_numbers<[1], [0], [0], [1], [0, 0, 1, 1], [], []>} : vector<16x128xbf16>, vector<128x512xbf16>, vector<16x512xf32> -> vector<16x512xf32>
    %c1_14 = arith.constant 1 : index
    %c0_15 = arith.constant 0 : index
    %c0_16 = arith.constant 0 : index
    %14 = vector.load %arg4[%c1_14, %c0_15, %c0_16] : memref<3x1x512xf32, #tpu.memory_space<vmem>>, vector<1x1x512xf32>
    %15 = vector.shape_cast %14 : vector<1x1x512xf32> to vector<1x512xf32>
    %16 = vector.broadcast %15 : vector<1x512xf32> to vector<16x512xf32>
    %17 = arith.addf %13, %16 : vector<16x512xf32>
    %c2 = arith.constant 2 : index
    %c0_17 = arith.constant 0 : index
    %c0_18 = arith.constant 0 : index
    %18 = vector.load %arg1[%c2, %c0_17, %c0_18] : memref<3x16x128xbf16, #tpu.memory_space<vmem>>, vector<1x16x128xbf16>
    %19 = vector.shape_cast %18 : vector<1x16x128xbf16> to vector<16x128xbf16>
    %c2_19 = arith.constant 2 : index
    %c0_20 = arith.constant 0 : index
    %c0_21 = arith.constant 0 : index
    %20 = vector.load %arg2[%c2_19, %c0_20, %c0_21] : memref<3x128x512xbf16, #tpu.memory_space<vmem>>, vector<1x128x512xbf16>
    %21 = vector.shape_cast %20 : vector<1x128x512xbf16> to vector<128x512xbf16>
    %cst_22 = arith.constant dense<0.000000e+00> : vector<16x512xf32>
    %22 = tpu.matmul %19, %21, %cst_22 {dimension_numbers = #tpu.dot_dimension_numbers<[1], [0], [0], [1], [0, 0, 1, 1], [], []>} : vector<16x128xbf16>, vector<128x512xbf16>, vector<16x512xf32> -> vector<16x512xf32>
    %c2_23 = arith.constant 2 : index
    %c0_24 = arith.constant 0 : index
    %c0_25 = arith.constant 0 : index
    %23 = vector.load %arg4[%c2_23, %c0_24, %c0_25] : memref<3x1x512xf32, #tpu.memory_space<vmem>>, vector<1x1x512xf32>
    %24 = vector.shape_cast %23 : vector<1x1x512xf32> to vector<1x512xf32>
    %25 = vector.broadcast %24 : vector<1x512xf32> to vector<16x512xf32>
    %26 = arith.addf %22, %25 : vector<16x512xf32>
    %cst_26 = arith.constant 0.000000e+00 : f32
    %27 = vector.broadcast %cst_26 : f32 to vector<2x128xf32>
    %cst_27 = arith.constant 0.000000e+00 : f32
    %28 = vector.broadcast %cst_27 : f32 to vector<2x128xf32>
    %cst_28 = arith.constant 0.000000e+00 : f32
    %29 = vector.broadcast %cst_28 : f32 to vector<2x128xf32>
    %cst_29 = arith.constant 0.000000e+00 : f32
    %30 = vector.broadcast %cst_29 : f32 to vector<2x128xf32>
    %cst_30 = arith.constant 0.000000e+00 : f32
    %31 = vector.broadcast %cst_30 : f32 to vector<2x128xf32>
    %cst_31 = arith.constant 0.000000e+00 : f32
    %32 = vector.broadcast %cst_31 : f32 to vector<2x128xf32>
    %33 = vector.extract_strided_slice %8 {offsets = [0, 0], sizes = [2, 512], strides = [1, 1]} : vector<16x512xf32> to vector<2x512xf32>
    %34 = arith.truncf %27 : vector<2x128xf32> to vector<2x128xbf16>
    %c0_32 = arith.constant 0 : index
    %c0_33 = arith.constant 0 : index
    %c0_34 = arith.constant 0 : index
    %35 = vector.load %arg3[%c0_32, %c0_33, %c0_34] : memref<3x128x512xbf16, #tpu.memory_space<vmem>>, vector<1x128x512xbf16>
    %36 = vector.shape_cast %35 : vector<1x128x512xbf16> to vector<128x512xbf16>
    %cst_35 = arith.constant dense<0.000000e+00> : vector<2x512xf32>
    %37 = tpu.matmul %34, %36, %cst_35 {dimension_numbers = #tpu.dot_dimension_numbers<[1], [0], [0], [1], [0, 0, 1, 1], [], []>} : vector<2x128xbf16>, vector<128x512xbf16>, vector<2x512xf32> -> vector<2x512xf32>
    %38 = arith.addf %33, %37 : vector<2x512xf32>
    %39 = vector.extract_strided_slice %38 {offsets = [0, 0], sizes = [2, 384], strides = [1, 1]} : vector<2x512xf32> to vector<2x384xf32>
    %40 = arith.negf %39 : vector<2x384xf32>
    %41 = math.exp %40 : vector<2x384xf32>
    %cst_36 = arith.constant 1.000000e+00 : f32
    %42 = vector.broadcast %cst_36 : f32 to vector<2x384xf32>
    %43 = arith.addf %42, %41 : vector<2x384xf32>
    %44 = arith.divf %42, %43 : vector<2x384xf32>
    %45 = vector.extract_strided_slice %38 {offsets = [0, 384], sizes = [2, 128], strides = [1, 1]} : vector<2x512xf32> to vector<2x128xf32>
    %46 = math.tanh %45 : vector<2x128xf32>
    %47 = vector.extract_strided_slice %44 {offsets = [0, 128], sizes = [2, 128], strides = [1, 1]} : vector<2x384xf32> to vector<2x128xf32>
    %48 = arith.mulf %47, %30 : vector<2x128xf32>
    %49 = vector.extract_strided_slice %44 {offsets = [0, 0], sizes = [2, 128], strides = [1, 1]} : vector<2x384xf32> to vector<2x128xf32>
    %50 = arith.mulf %49, %46 : vector<2x128xf32>
    %51 = arith.addf %48, %50 : vector<2x128xf32>
    %52 = vector.extract_strided_slice %44 {offsets = [0, 256], sizes = [2, 128], strides = [1, 1]} : vector<2x384xf32> to vector<2x128xf32>
    %53 = math.tanh %51 : vector<2x128xf32>
    %54 = arith.mulf %52, %53 : vector<2x128xf32>
    %55 = vector.extract_strided_slice %17 {offsets = [0, 0], sizes = [2, 512], strides = [1, 1]} : vector<16x512xf32> to vector<2x512xf32>
    %56 = arith.truncf %28 : vector<2x128xf32> to vector<2x128xbf16>
    %c1_37 = arith.constant 1 : index
    %c0_38 = arith.constant 0 : index
    %c0_39 = arith.constant 0 : index
    %57 = vector.load %arg3[%c1_37, %c0_38, %c0_39] : memref<3x128x512xbf16, #tpu.memory_space<vmem>>, vector<1x128x512xbf16>
    %58 = vector.shape_cast %57 : vector<1x128x512xbf16> to vector<128x512xbf16>
    %cst_40 = arith.constant dense<0.000000e+00> : vector<2x512xf32>
    %59 = tpu.matmul %56, %58, %cst_40 {dimension_numbers = #tpu.dot_dimension_numbers<[1], [0], [0], [1], [0, 0, 1, 1], [], []>} : vector<2x128xbf16>, vector<128x512xbf16>, vector<2x512xf32> -> vector<2x512xf32>
    %60 = arith.addf %55, %59 : vector<2x512xf32>
    %61 = vector.extract_strided_slice %60 {offsets = [0, 0], sizes = [2, 384], strides = [1, 1]} : vector<2x512xf32> to vector<2x384xf32>
    %62 = arith.negf %61 : vector<2x384xf32>
    %63 = math.exp %62 : vector<2x384xf32>
    %cst_41 = arith.constant 1.000000e+00 : f32
    %64 = vector.broadcast %cst_41 : f32 to vector<2x384xf32>
    %65 = arith.addf %64, %63 : vector<2x384xf32>
    %66 = arith.divf %64, %65 : vector<2x384xf32>
    %67 = vector.extract_strided_slice %60 {offsets = [0, 384], sizes = [2, 128], strides = [1, 1]} : vector<2x512xf32> to vector<2x128xf32>
    %68 = math.tanh %67 : vector<2x128xf32>
    %69 = vector.extract_strided_slice %66 {offsets = [0, 128], sizes = [2, 128], strides = [1, 1]} : vector<2x384xf32> to vector<2x128xf32>
    %70 = arith.mulf %69, %31 : vector<2x128xf32>
    %71 = vector.extract_strided_slice %66 {offsets = [0, 0], sizes = [2, 128], strides = [1, 1]} : vector<2x384xf32> to vector<2x128xf32>
    %72 = arith.mulf %71, %68 : vector<2x128xf32>
    %73 = arith.addf %70, %72 : vector<2x128xf32>
    %74 = vector.extract_strided_slice %66 {offsets = [0, 256], sizes = [2, 128], strides = [1, 1]} : vector<2x384xf32> to vector<2x128xf32>
    %75 = math.tanh %73 : vector<2x128xf32>
    %76 = arith.mulf %74, %75 : vector<2x128xf32>
    %77 = vector.extract_strided_slice %26 {offsets = [0, 0], sizes = [2, 512], strides = [1, 1]} : vector<16x512xf32> to vector<2x512xf32>
    %78 = arith.truncf %29 : vector<2x128xf32> to vector<2x128xbf16>
    %c2_42 = arith.constant 2 : index
    %c0_43 = arith.constant 0 : index
    %c0_44 = arith.constant 0 : index
    %79 = vector.load %arg3[%c2_42, %c0_43, %c0_44] : memref<3x128x512xbf16, #tpu.memory_space<vmem>>, vector<1x128x512xbf16>
    %80 = vector.shape_cast %79 : vector<1x128x512xbf16> to vector<128x512xbf16>
    %cst_45 = arith.constant dense<0.000000e+00> : vector<2x512xf32>
    %81 = tpu.matmul %78, %80, %cst_45 {dimension_numbers = #tpu.dot_dimension_numbers<[1], [0], [0], [1], [0, 0, 1, 1], [], []>} : vector<2x128xbf16>, vector<128x512xbf16>, vector<2x512xf32> -> vector<2x512xf32>
    %82 = arith.addf %77, %81 : vector<2x512xf32>
    %83 = vector.extract_strided_slice %82 {offsets = [0, 0], sizes = [2, 384], strides = [1, 1]} : vector<2x512xf32> to vector<2x384xf32>
    %84 = arith.negf %83 : vector<2x384xf32>
    %85 = math.exp %84 : vector<2x384xf32>
    %cst_46 = arith.constant 1.000000e+00 : f32
    %86 = vector.broadcast %cst_46 : f32 to vector<2x384xf32>
    %87 = arith.addf %86, %85 : vector<2x384xf32>
    %88 = arith.divf %86, %87 : vector<2x384xf32>
    %89 = vector.extract_strided_slice %82 {offsets = [0, 384], sizes = [2, 128], strides = [1, 1]} : vector<2x512xf32> to vector<2x128xf32>
    %90 = math.tanh %89 : vector<2x128xf32>
    %91 = vector.extract_strided_slice %88 {offsets = [0, 128], sizes = [2, 128], strides = [1, 1]} : vector<2x384xf32> to vector<2x128xf32>
    %92 = arith.mulf %91, %32 : vector<2x128xf32>
    %93 = vector.extract_strided_slice %88 {offsets = [0, 0], sizes = [2, 128], strides = [1, 1]} : vector<2x384xf32> to vector<2x128xf32>
    %94 = arith.mulf %93, %90 : vector<2x128xf32>
    %95 = arith.addf %92, %94 : vector<2x128xf32>
    %96 = vector.extract_strided_slice %88 {offsets = [0, 256], sizes = [2, 128], strides = [1, 1]} : vector<2x384xf32> to vector<2x128xf32>
    %97 = math.tanh %95 : vector<2x128xf32>
    %98 = arith.mulf %96, %97 : vector<2x128xf32>
    %99 = vector.extract_strided_slice %8 {offsets = [2, 0], sizes = [2, 512], strides = [1, 1]} : vector<16x512xf32> to vector<2x512xf32>
    %100 = arith.truncf %54 : vector<2x128xf32> to vector<2x128xbf16>
    %c0_47 = arith.constant 0 : index
    %c0_48 = arith.constant 0 : index
    %c0_49 = arith.constant 0 : index
    %101 = vector.load %arg3[%c0_47, %c0_48, %c0_49] : memref<3x128x512xbf16, #tpu.memory_space<vmem>>, vector<1x128x512xbf16>
    %102 = vector.shape_cast %101 : vector<1x128x512xbf16> to vector<128x512xbf16>
    %cst_50 = arith.constant dense<0.000000e+00> : vector<2x512xf32>
    %103 = tpu.matmul %100, %102, %cst_50 {dimension_numbers = #tpu.dot_dimension_numbers<[1], [0], [0], [1], [0, 0, 1, 1], [], []>} : vector<2x128xbf16>, vector<128x512xbf16>, vector<2x512xf32> -> vector<2x512xf32>
    %104 = arith.addf %99, %103 : vector<2x512xf32>
    %105 = vector.extract_strided_slice %104 {offsets = [0, 0], sizes = [2, 384], strides = [1, 1]} : vector<2x512xf32> to vector<2x384xf32>
    %106 = arith.negf %105 : vector<2x384xf32>
    %107 = math.exp %106 : vector<2x384xf32>
    %cst_51 = arith.constant 1.000000e+00 : f32
    %108 = vector.broadcast %cst_51 : f32 to vector<2x384xf32>
    %109 = arith.addf %108, %107 : vector<2x384xf32>
    %110 = arith.divf %108, %109 : vector<2x384xf32>
    %111 = vector.extract_strided_slice %104 {offsets = [0, 384], sizes = [2, 128], strides = [1, 1]} : vector<2x512xf32> to vector<2x128xf32>
    %112 = math.tanh %111 : vector<2x128xf32>
    %113 = vector.extract_strided_slice %110 {offsets = [0, 128], sizes = [2, 128], strides = [1, 1]} : vector<2x384xf32> to vector<2x128xf32>
    %114 = arith.mulf %113, %51 : vector<2x128xf32>
    %115 = vector.extract_strided_slice %110 {offsets = [0, 0], sizes = [2, 128], strides = [1, 1]} : vector<2x384xf32> to vector<2x128xf32>
    %116 = arith.mulf %115, %112 : vector<2x128xf32>
    %117 = arith.addf %114, %116 : vector<2x128xf32>
    %118 = vector.extract_strided_slice %110 {offsets = [0, 256], sizes = [2, 128], strides = [1, 1]} : vector<2x384xf32> to vector<2x128xf32>
    %119 = math.tanh %117 : vector<2x128xf32>
    %120 = arith.mulf %118, %119 : vector<2x128xf32>
    %121 = vector.extract_strided_slice %17 {offsets = [2, 0], sizes = [2, 512], strides = [1, 1]} : vector<16x512xf32> to vector<2x512xf32>
    %122 = arith.truncf %76 : vector<2x128xf32> to vector<2x128xbf16>
    %c1_52 = arith.constant 1 : index
    %c0_53 = arith.constant 0 : index
    %c0_54 = arith.constant 0 : index
    %123 = vector.load %arg3[%c1_52, %c0_53, %c0_54] : memref<3x128x512xbf16, #tpu.memory_space<vmem>>, vector<1x128x512xbf16>
    %124 = vector.shape_cast %123 : vector<1x128x512xbf16> to vector<128x512xbf16>
    %cst_55 = arith.constant dense<0.000000e+00> : vector<2x512xf32>
    %125 = tpu.matmul %122, %124, %cst_55 {dimension_numbers = #tpu.dot_dimension_numbers<[1], [0], [0], [1], [0, 0, 1, 1], [], []>} : vector<2x128xbf16>, vector<128x512xbf16>, vector<2x512xf32> -> vector<2x512xf32>
    %126 = arith.addf %121, %125 : vector<2x512xf32>
    %127 = vector.extract_strided_slice %126 {offsets = [0, 0], sizes = [2, 384], strides = [1, 1]} : vector<2x512xf32> to vector<2x384xf32>
    %128 = arith.negf %127 : vector<2x384xf32>
    %129 = math.exp %128 : vector<2x384xf32>
    %cst_56 = arith.constant 1.000000e+00 : f32
    %130 = vector.broadcast %cst_56 : f32 to vector<2x384xf32>
    %131 = arith.addf %130, %129 : vector<2x384xf32>
    %132 = arith.divf %130, %131 : vector<2x384xf32>
    %133 = vector.extract_strided_slice %126 {offsets = [0, 384], sizes = [2, 128], strides = [1, 1]} : vector<2x512xf32> to vector<2x128xf32>
    %134 = math.tanh %133 : vector<2x128xf32>
    %135 = vector.extract_strided_slice %132 {offsets = [0, 128], sizes = [2, 128], strides = [1, 1]} : vector<2x384xf32> to vector<2x128xf32>
    %136 = arith.mulf %135, %73 : vector<2x128xf32>
    %137 = vector.extract_strided_slice %132 {offsets = [0, 0], sizes = [2, 128], strides = [1, 1]} : vector<2x384xf32> to vector<2x128xf32>
    %138 = arith.mulf %137, %134 : vector<2x128xf32>
    %139 = arith.addf %136, %138 : vector<2x128xf32>
    %140 = vector.extract_strided_slice %132 {offsets = [0, 256], sizes = [2, 128], strides = [1, 1]} : vector<2x384xf32> to vector<2x128xf32>
    %141 = math.tanh %139 : vector<2x128xf32>
    %142 = arith.mulf %140, %141 : vector<2x128xf32>
    %143 = vector.extract_strided_slice %26 {offsets = [2, 0], sizes = [2, 512], strides = [1, 1]} : vector<16x512xf32> to vector<2x512xf32>
    %144 = arith.truncf %98 : vector<2x128xf32> to vector<2x128xbf16>
    %c2_57 = arith.constant 2 : index
    %c0_58 = arith.constant 0 : index
    %c0_59 = arith.constant 0 : index
    %145 = vector.load %arg3[%c2_57, %c0_58, %c0_59] : memref<3x128x512xbf16, #tpu.memory_space<vmem>>, vector<1x128x512xbf16>
    %146 = vector.shape_cast %145 : vector<1x128x512xbf16> to vector<128x512xbf16>
    %cst_60 = arith.constant dense<0.000000e+00> : vector<2x512xf32>
    %147 = tpu.matmul %144, %146, %cst_60 {dimension_numbers = #tpu.dot_dimension_numbers<[1], [0], [0], [1], [0, 0, 1, 1], [], []>} : vector<2x128xbf16>, vector<128x512xbf16>, vector<2x512xf32> -> vector<2x512xf32>
    %148 = arith.addf %143, %147 : vector<2x512xf32>
    %149 = vector.extract_strided_slice %148 {offsets = [0, 0], sizes = [2, 384], strides = [1, 1]} : vector<2x512xf32> to vector<2x384xf32>
    %150 = arith.negf %149 : vector<2x384xf32>
    %151 = math.exp %150 : vector<2x384xf32>
    %cst_61 = arith.constant 1.000000e+00 : f32
    %152 = vector.broadcast %cst_61 : f32 to vector<2x384xf32>
    %153 = arith.addf %152, %151 : vector<2x384xf32>
    %154 = arith.divf %152, %153 : vector<2x384xf32>
    %155 = vector.extract_strided_slice %148 {offsets = [0, 384], sizes = [2, 128], strides = [1, 1]} : vector<2x512xf32> to vector<2x128xf32>
    %156 = math.tanh %155 : vector<2x128xf32>
    %157 = vector.extract_strided_slice %154 {offsets = [0, 128], sizes = [2, 128], strides = [1, 1]} : vector<2x384xf32> to vector<2x128xf32>
    %158 = arith.mulf %157, %95 : vector<2x128xf32>
    %159 = vector.extract_strided_slice %154 {offsets = [0, 0], sizes = [2, 128], strides = [1, 1]} : vector<2x384xf32> to vector<2x128xf32>
    %160 = arith.mulf %159, %156 : vector<2x128xf32>
    %161 = arith.addf %158, %160 : vector<2x128xf32>
    %162 = vector.extract_strided_slice %154 {offsets = [0, 256], sizes = [2, 128], strides = [1, 1]} : vector<2x384xf32> to vector<2x128xf32>
    %163 = math.tanh %161 : vector<2x128xf32>
    %164 = arith.mulf %162, %163 : vector<2x128xf32>
    %165 = vector.extract_strided_slice %8 {offsets = [4, 0], sizes = [2, 512], strides = [1, 1]} : vector<16x512xf32> to vector<2x512xf32>
    %166 = arith.truncf %120 : vector<2x128xf32> to vector<2x128xbf16>
    %c0_62 = arith.constant 0 : index
    %c0_63 = arith.constant 0 : index
    %c0_64 = arith.constant 0 : index
    %167 = vector.load %arg3[%c0_62, %c0_63, %c0_64] : memref<3x128x512xbf16, #tpu.memory_space<vmem>>, vector<1x128x512xbf16>
    %168 = vector.shape_cast %167 : vector<1x128x512xbf16> to vector<128x512xbf16>
    %cst_65 = arith.constant dense<0.000000e+00> : vector<2x512xf32>
    %169 = tpu.matmul %166, %168, %cst_65 {dimension_numbers = #tpu.dot_dimension_numbers<[1], [0], [0], [1], [0, 0, 1, 1], [], []>} : vector<2x128xbf16>, vector<128x512xbf16>, vector<2x512xf32> -> vector<2x512xf32>
    %170 = arith.addf %165, %169 : vector<2x512xf32>
    %171 = vector.extract_strided_slice %170 {offsets = [0, 0], sizes = [2, 384], strides = [1, 1]} : vector<2x512xf32> to vector<2x384xf32>
    %172 = arith.negf %171 : vector<2x384xf32>
    %173 = math.exp %172 : vector<2x384xf32>
    %cst_66 = arith.constant 1.000000e+00 : f32
    %174 = vector.broadcast %cst_66 : f32 to vector<2x384xf32>
    %175 = arith.addf %174, %173 : vector<2x384xf32>
    %176 = arith.divf %174, %175 : vector<2x384xf32>
    %177 = vector.extract_strided_slice %170 {offsets = [0, 384], sizes = [2, 128], strides = [1, 1]} : vector<2x512xf32> to vector<2x128xf32>
    %178 = math.tanh %177 : vector<2x128xf32>
    %179 = vector.extract_strided_slice %176 {offsets = [0, 128], sizes = [2, 128], strides = [1, 1]} : vector<2x384xf32> to vector<2x128xf32>
    %180 = arith.mulf %179, %117 : vector<2x128xf32>
    %181 = vector.extract_strided_slice %176 {offsets = [0, 0], sizes = [2, 128], strides = [1, 1]} : vector<2x384xf32> to vector<2x128xf32>
    %182 = arith.mulf %181, %178 : vector<2x128xf32>
    %183 = arith.addf %180, %182 : vector<2x128xf32>
    %184 = vector.extract_strided_slice %176 {offsets = [0, 256], sizes = [2, 128], strides = [1, 1]} : vector<2x384xf32> to vector<2x128xf32>
    %185 = math.tanh %183 : vector<2x128xf32>
    %186 = arith.mulf %184, %185 : vector<2x128xf32>
    %187 = vector.extract_strided_slice %17 {offsets = [4, 0], sizes = [2, 512], strides = [1, 1]} : vector<16x512xf32> to vector<2x512xf32>
    %188 = arith.truncf %142 : vector<2x128xf32> to vector<2x128xbf16>
    %c1_67 = arith.constant 1 : index
    %c0_68 = arith.constant 0 : index
    %c0_69 = arith.constant 0 : index
    %189 = vector.load %arg3[%c1_67, %c0_68, %c0_69] : memref<3x128x512xbf16, #tpu.memory_space<vmem>>, vector<1x128x512xbf16>
    %190 = vector.shape_cast %189 : vector<1x128x512xbf16> to vector<128x512xbf16>
    %cst_70 = arith.constant dense<0.000000e+00> : vector<2x512xf32>
    %191 = tpu.matmul %188, %190, %cst_70 {dimension_numbers = #tpu.dot_dimension_numbers<[1], [0], [0], [1], [0, 0, 1, 1], [], []>} : vector<2x128xbf16>, vector<128x512xbf16>, vector<2x512xf32> -> vector<2x512xf32>
    %192 = arith.addf %187, %191 : vector<2x512xf32>
    %193 = vector.extract_strided_slice %192 {offsets = [0, 0], sizes = [2, 384], strides = [1, 1]} : vector<2x512xf32> to vector<2x384xf32>
    %194 = arith.negf %193 : vector<2x384xf32>
    %195 = math.exp %194 : vector<2x384xf32>
    %cst_71 = arith.constant 1.000000e+00 : f32
    %196 = vector.broadcast %cst_71 : f32 to vector<2x384xf32>
    %197 = arith.addf %196, %195 : vector<2x384xf32>
    %198 = arith.divf %196, %197 : vector<2x384xf32>
    %199 = vector.extract_strided_slice %192 {offsets = [0, 384], sizes = [2, 128], strides = [1, 1]} : vector<2x512xf32> to vector<2x128xf32>
    %200 = math.tanh %199 : vector<2x128xf32>
    %201 = vector.extract_strided_slice %198 {offsets = [0, 128], sizes = [2, 128], strides = [1, 1]} : vector<2x384xf32> to vector<2x128xf32>
    %202 = arith.mulf %201, %139 : vector<2x128xf32>
    %203 = vector.extract_strided_slice %198 {offsets = [0, 0], sizes = [2, 128], strides = [1, 1]} : vector<2x384xf32> to vector<2x128xf32>
    %204 = arith.mulf %203, %200 : vector<2x128xf32>
    %205 = arith.addf %202, %204 : vector<2x128xf32>
    %206 = vector.extract_strided_slice %198 {offsets = [0, 256], sizes = [2, 128], strides = [1, 1]} : vector<2x384xf32> to vector<2x128xf32>
    %207 = math.tanh %205 : vector<2x128xf32>
    %208 = arith.mulf %206, %207 : vector<2x128xf32>
    %209 = vector.extract_strided_slice %26 {offsets = [4, 0], sizes = [2, 512], strides = [1, 1]} : vector<16x512xf32> to vector<2x512xf32>
    %210 = arith.truncf %164 : vector<2x128xf32> to vector<2x128xbf16>
    %c2_72 = arith.constant 2 : index
    %c0_73 = arith.constant 0 : index
    %c0_74 = arith.constant 0 : index
    %211 = vector.load %arg3[%c2_72, %c0_73, %c0_74] : memref<3x128x512xbf16, #tpu.memory_space<vmem>>, vector<1x128x512xbf16>
    %212 = vector.shape_cast %211 : vector<1x128x512xbf16> to vector<128x512xbf16>
    %cst_75 = arith.constant dense<0.000000e+00> : vector<2x512xf32>
    %213 = tpu.matmul %210, %212, %cst_75 {dimension_numbers = #tpu.dot_dimension_numbers<[1], [0], [0], [1], [0, 0, 1, 1], [], []>} : vector<2x128xbf16>, vector<128x512xbf16>, vector<2x512xf32> -> vector<2x512xf32>
    %214 = arith.addf %209, %213 : vector<2x512xf32>
    %215 = vector.extract_strided_slice %214 {offsets = [0, 0], sizes = [2, 384], strides = [1, 1]} : vector<2x512xf32> to vector<2x384xf32>
    %216 = arith.negf %215 : vector<2x384xf32>
    %217 = math.exp %216 : vector<2x384xf32>
    %cst_76 = arith.constant 1.000000e+00 : f32
    %218 = vector.broadcast %cst_76 : f32 to vector<2x384xf32>
    %219 = arith.addf %218, %217 : vector<2x384xf32>
    %220 = arith.divf %218, %219 : vector<2x384xf32>
    %221 = vector.extract_strided_slice %214 {offsets = [0, 384], sizes = [2, 128], strides = [1, 1]} : vector<2x512xf32> to vector<2x128xf32>
    %222 = math.tanh %221 : vector<2x128xf32>
    %223 = vector.extract_strided_slice %220 {offsets = [0, 128], sizes = [2, 128], strides = [1, 1]} : vector<2x384xf32> to vector<2x128xf32>
    %224 = arith.mulf %223, %161 : vector<2x128xf32>
    %225 = vector.extract_strided_slice %220 {offsets = [0, 0], sizes = [2, 128], strides = [1, 1]} : vector<2x384xf32> to vector<2x128xf32>
    %226 = arith.mulf %225, %222 : vector<2x128xf32>
    %227 = arith.addf %224, %226 : vector<2x128xf32>
    %228 = vector.extract_strided_slice %220 {offsets = [0, 256], sizes = [2, 128], strides = [1, 1]} : vector<2x384xf32> to vector<2x128xf32>
    %229 = math.tanh %227 : vector<2x128xf32>
    %230 = arith.mulf %228, %229 : vector<2x128xf32>
    %231 = vector.extract_strided_slice %8 {offsets = [6, 0], sizes = [2, 512], strides = [1, 1]} : vector<16x512xf32> to vector<2x512xf32>
    %232 = arith.truncf %186 : vector<2x128xf32> to vector<2x128xbf16>
    %c0_77 = arith.constant 0 : index
    %c0_78 = arith.constant 0 : index
    %c0_79 = arith.constant 0 : index
    %233 = vector.load %arg3[%c0_77, %c0_78, %c0_79] : memref<3x128x512xbf16, #tpu.memory_space<vmem>>, vector<1x128x512xbf16>
    %234 = vector.shape_cast %233 : vector<1x128x512xbf16> to vector<128x512xbf16>
    %cst_80 = arith.constant dense<0.000000e+00> : vector<2x512xf32>
    %235 = tpu.matmul %232, %234, %cst_80 {dimension_numbers = #tpu.dot_dimension_numbers<[1], [0], [0], [1], [0, 0, 1, 1], [], []>} : vector<2x128xbf16>, vector<128x512xbf16>, vector<2x512xf32> -> vector<2x512xf32>
    %236 = arith.addf %231, %235 : vector<2x512xf32>
    %237 = vector.extract_strided_slice %236 {offsets = [0, 0], sizes = [2, 384], strides = [1, 1]} : vector<2x512xf32> to vector<2x384xf32>
    %238 = arith.negf %237 : vector<2x384xf32>
    %239 = math.exp %238 : vector<2x384xf32>
    %cst_81 = arith.constant 1.000000e+00 : f32
    %240 = vector.broadcast %cst_81 : f32 to vector<2x384xf32>
    %241 = arith.addf %240, %239 : vector<2x384xf32>
    %242 = arith.divf %240, %241 : vector<2x384xf32>
    %243 = vector.extract_strided_slice %236 {offsets = [0, 384], sizes = [2, 128], strides = [1, 1]} : vector<2x512xf32> to vector<2x128xf32>
    %244 = math.tanh %243 : vector<2x128xf32>
    %245 = vector.extract_strided_slice %242 {offsets = [0, 128], sizes = [2, 128], strides = [1, 1]} : vector<2x384xf32> to vector<2x128xf32>
    %246 = arith.mulf %245, %183 : vector<2x128xf32>
    %247 = vector.extract_strided_slice %242 {offsets = [0, 0], sizes = [2, 128], strides = [1, 1]} : vector<2x384xf32> to vector<2x128xf32>
    %248 = arith.mulf %247, %244 : vector<2x128xf32>
    %249 = arith.addf %246, %248 : vector<2x128xf32>
    %250 = vector.extract_strided_slice %242 {offsets = [0, 256], sizes = [2, 128], strides = [1, 1]} : vector<2x384xf32> to vector<2x128xf32>
    %251 = math.tanh %249 : vector<2x128xf32>
    %252 = arith.mulf %250, %251 : vector<2x128xf32>
    %253 = vector.extract_strided_slice %17 {offsets = [6, 0], sizes = [2, 512], strides = [1, 1]} : vector<16x512xf32> to vector<2x512xf32>
    %254 = arith.truncf %208 : vector<2x128xf32> to vector<2x128xbf16>
    %c1_82 = arith.constant 1 : index
    %c0_83 = arith.constant 0 : index
    %c0_84 = arith.constant 0 : index
    %255 = vector.load %arg3[%c1_82, %c0_83, %c0_84] : memref<3x128x512xbf16, #tpu.memory_space<vmem>>, vector<1x128x512xbf16>
    %256 = vector.shape_cast %255 : vector<1x128x512xbf16> to vector<128x512xbf16>
    %cst_85 = arith.constant dense<0.000000e+00> : vector<2x512xf32>
    %257 = tpu.matmul %254, %256, %cst_85 {dimension_numbers = #tpu.dot_dimension_numbers<[1], [0], [0], [1], [0, 0, 1, 1], [], []>} : vector<2x128xbf16>, vector<128x512xbf16>, vector<2x512xf32> -> vector<2x512xf32>
    %258 = arith.addf %253, %257 : vector<2x512xf32>
    %259 = vector.extract_strided_slice %258 {offsets = [0, 0], sizes = [2, 384], strides = [1, 1]} : vector<2x512xf32> to vector<2x384xf32>
    %260 = arith.negf %259 : vector<2x384xf32>
    %261 = math.exp %260 : vector<2x384xf32>
    %cst_86 = arith.constant 1.000000e+00 : f32
    %262 = vector.broadcast %cst_86 : f32 to vector<2x384xf32>
    %263 = arith.addf %262, %261 : vector<2x384xf32>
    %264 = arith.divf %262, %263 : vector<2x384xf32>
    %265 = vector.extract_strided_slice %258 {offsets = [0, 384], sizes = [2, 128], strides = [1, 1]} : vector<2x512xf32> to vector<2x128xf32>
    %266 = math.tanh %265 : vector<2x128xf32>
    %267 = vector.extract_strided_slice %264 {offsets = [0, 128], sizes = [2, 128], strides = [1, 1]} : vector<2x384xf32> to vector<2x128xf32>
    %268 = arith.mulf %267, %205 : vector<2x128xf32>
    %269 = vector.extract_strided_slice %264 {offsets = [0, 0], sizes = [2, 128], strides = [1, 1]} : vector<2x384xf32> to vector<2x128xf32>
    %270 = arith.mulf %269, %266 : vector<2x128xf32>
    %271 = arith.addf %268, %270 : vector<2x128xf32>
    %272 = vector.extract_strided_slice %264 {offsets = [0, 256], sizes = [2, 128], strides = [1, 1]} : vector<2x384xf32> to vector<2x128xf32>
    %273 = math.tanh %271 : vector<2x128xf32>
    %274 = arith.mulf %272, %273 : vector<2x128xf32>
    %275 = vector.extract_strided_slice %26 {offsets = [6, 0], sizes = [2, 512], strides = [1, 1]} : vector<16x512xf32> to vector<2x512xf32>
    %276 = arith.truncf %230 : vector<2x128xf32> to vector<2x128xbf16>
    %c2_87 = arith.constant 2 : index
    %c0_88 = arith.constant 0 : index
    %c0_89 = arith.constant 0 : index
    %277 = vector.load %arg3[%c2_87, %c0_88, %c0_89] : memref<3x128x512xbf16, #tpu.memory_space<vmem>>, vector<1x128x512xbf16>
    %278 = vector.shape_cast %277 : vector<1x128x512xbf16> to vector<128x512xbf16>
    %cst_90 = arith.constant dense<0.000000e+00> : vector<2x512xf32>
    %279 = tpu.matmul %276, %278, %cst_90 {dimension_numbers = #tpu.dot_dimension_numbers<[1], [0], [0], [1], [0, 0, 1, 1], [], []>} : vector<2x128xbf16>, vector<128x512xbf16>, vector<2x512xf32> -> vector<2x512xf32>
    %280 = arith.addf %275, %279 : vector<2x512xf32>
    %281 = vector.extract_strided_slice %280 {offsets = [0, 0], sizes = [2, 384], strides = [1, 1]} : vector<2x512xf32> to vector<2x384xf32>
    %282 = arith.negf %281 : vector<2x384xf32>
    %283 = math.exp %282 : vector<2x384xf32>
    %cst_91 = arith.constant 1.000000e+00 : f32
    %284 = vector.broadcast %cst_91 : f32 to vector<2x384xf32>
    %285 = arith.addf %284, %283 : vector<2x384xf32>
    %286 = arith.divf %284, %285 : vector<2x384xf32>
    %287 = vector.extract_strided_slice %280 {offsets = [0, 384], sizes = [2, 128], strides = [1, 1]} : vector<2x512xf32> to vector<2x128xf32>
    %288 = math.tanh %287 : vector<2x128xf32>
    %289 = vector.extract_strided_slice %286 {offsets = [0, 128], sizes = [2, 128], strides = [1, 1]} : vector<2x384xf32> to vector<2x128xf32>
    %290 = arith.mulf %289, %227 : vector<2x128xf32>
    %291 = vector.extract_strided_slice %286 {offsets = [0, 0], sizes = [2, 128], strides = [1, 1]} : vector<2x384xf32> to vector<2x128xf32>
    %292 = arith.mulf %291, %288 : vector<2x128xf32>
    %293 = arith.addf %290, %292 : vector<2x128xf32>
    %294 = vector.extract_strided_slice %286 {offsets = [0, 256], sizes = [2, 128], strides = [1, 1]} : vector<2x384xf32> to vector<2x128xf32>
    %295 = math.tanh %293 : vector<2x128xf32>
    %296 = arith.mulf %294, %295 : vector<2x128xf32>
    %297 = vector.extract_strided_slice %8 {offsets = [8, 0], sizes = [2, 512], strides = [1, 1]} : vector<16x512xf32> to vector<2x512xf32>
    %298 = arith.truncf %252 : vector<2x128xf32> to vector<2x128xbf16>
    %c0_92 = arith.constant 0 : index
    %c0_93 = arith.constant 0 : index
    %c0_94 = arith.constant 0 : index
    %299 = vector.load %arg3[%c0_92, %c0_93, %c0_94] : memref<3x128x512xbf16, #tpu.memory_space<vmem>>, vector<1x128x512xbf16>
    %300 = vector.shape_cast %299 : vector<1x128x512xbf16> to vector<128x512xbf16>
    %cst_95 = arith.constant dense<0.000000e+00> : vector<2x512xf32>
    %301 = tpu.matmul %298, %300, %cst_95 {dimension_numbers = #tpu.dot_dimension_numbers<[1], [0], [0], [1], [0, 0, 1, 1], [], []>} : vector<2x128xbf16>, vector<128x512xbf16>, vector<2x512xf32> -> vector<2x512xf32>
    %302 = arith.addf %297, %301 : vector<2x512xf32>
    %303 = vector.extract_strided_slice %302 {offsets = [0, 0], sizes = [2, 384], strides = [1, 1]} : vector<2x512xf32> to vector<2x384xf32>
    %304 = arith.negf %303 : vector<2x384xf32>
    %305 = math.exp %304 : vector<2x384xf32>
    %cst_96 = arith.constant 1.000000e+00 : f32
    %306 = vector.broadcast %cst_96 : f32 to vector<2x384xf32>
    %307 = arith.addf %306, %305 : vector<2x384xf32>
    %308 = arith.divf %306, %307 : vector<2x384xf32>
    %309 = vector.extract_strided_slice %302 {offsets = [0, 384], sizes = [2, 128], strides = [1, 1]} : vector<2x512xf32> to vector<2x128xf32>
    %310 = math.tanh %309 : vector<2x128xf32>
    %311 = vector.extract_strided_slice %308 {offsets = [0, 128], sizes = [2, 128], strides = [1, 1]} : vector<2x384xf32> to vector<2x128xf32>
    %312 = arith.mulf %311, %249 : vector<2x128xf32>
    %313 = vector.extract_strided_slice %308 {offsets = [0, 0], sizes = [2, 128], strides = [1, 1]} : vector<2x384xf32> to vector<2x128xf32>
    %314 = arith.mulf %313, %310 : vector<2x128xf32>
    %315 = arith.addf %312, %314 : vector<2x128xf32>
    %316 = vector.extract_strided_slice %308 {offsets = [0, 256], sizes = [2, 128], strides = [1, 1]} : vector<2x384xf32> to vector<2x128xf32>
    %317 = math.tanh %315 : vector<2x128xf32>
    %318 = arith.mulf %316, %317 : vector<2x128xf32>
    %319 = vector.extract_strided_slice %17 {offsets = [8, 0], sizes = [2, 512], strides = [1, 1]} : vector<16x512xf32> to vector<2x512xf32>
    %320 = arith.truncf %274 : vector<2x128xf32> to vector<2x128xbf16>
    %c1_97 = arith.constant 1 : index
    %c0_98 = arith.constant 0 : index
    %c0_99 = arith.constant 0 : index
    %321 = vector.load %arg3[%c1_97, %c0_98, %c0_99] : memref<3x128x512xbf16, #tpu.memory_space<vmem>>, vector<1x128x512xbf16>
    %322 = vector.shape_cast %321 : vector<1x128x512xbf16> to vector<128x512xbf16>
    %cst_100 = arith.constant dense<0.000000e+00> : vector<2x512xf32>
    %323 = tpu.matmul %320, %322, %cst_100 {dimension_numbers = #tpu.dot_dimension_numbers<[1], [0], [0], [1], [0, 0, 1, 1], [], []>} : vector<2x128xbf16>, vector<128x512xbf16>, vector<2x512xf32> -> vector<2x512xf32>
    %324 = arith.addf %319, %323 : vector<2x512xf32>
    %325 = vector.extract_strided_slice %324 {offsets = [0, 0], sizes = [2, 384], strides = [1, 1]} : vector<2x512xf32> to vector<2x384xf32>
    %326 = arith.negf %325 : vector<2x384xf32>
    %327 = math.exp %326 : vector<2x384xf32>
    %cst_101 = arith.constant 1.000000e+00 : f32
    %328 = vector.broadcast %cst_101 : f32 to vector<2x384xf32>
    %329 = arith.addf %328, %327 : vector<2x384xf32>
    %330 = arith.divf %328, %329 : vector<2x384xf32>
    %331 = vector.extract_strided_slice %324 {offsets = [0, 384], sizes = [2, 128], strides = [1, 1]} : vector<2x512xf32> to vector<2x128xf32>
    %332 = math.tanh %331 : vector<2x128xf32>
    %333 = vector.extract_strided_slice %330 {offsets = [0, 128], sizes = [2, 128], strides = [1, 1]} : vector<2x384xf32> to vector<2x128xf32>
    %334 = arith.mulf %333, %271 : vector<2x128xf32>
    %335 = vector.extract_strided_slice %330 {offsets = [0, 0], sizes = [2, 128], strides = [1, 1]} : vector<2x384xf32> to vector<2x128xf32>
    %336 = arith.mulf %335, %332 : vector<2x128xf32>
    %337 = arith.addf %334, %336 : vector<2x128xf32>
    %338 = vector.extract_strided_slice %330 {offsets = [0, 256], sizes = [2, 128], strides = [1, 1]} : vector<2x384xf32> to vector<2x128xf32>
    %339 = math.tanh %337 : vector<2x128xf32>
    %340 = arith.mulf %338, %339 : vector<2x128xf32>
    %341 = vector.extract_strided_slice %26 {offsets = [8, 0], sizes = [2, 512], strides = [1, 1]} : vector<16x512xf32> to vector<2x512xf32>
    %342 = arith.truncf %296 : vector<2x128xf32> to vector<2x128xbf16>
    %c2_102 = arith.constant 2 : index
    %c0_103 = arith.constant 0 : index
    %c0_104 = arith.constant 0 : index
    %343 = vector.load %arg3[%c2_102, %c0_103, %c0_104] : memref<3x128x512xbf16, #tpu.memory_space<vmem>>, vector<1x128x512xbf16>
    %344 = vector.shape_cast %343 : vector<1x128x512xbf16> to vector<128x512xbf16>
    %cst_105 = arith.constant dense<0.000000e+00> : vector<2x512xf32>
    %345 = tpu.matmul %342, %344, %cst_105 {dimension_numbers = #tpu.dot_dimension_numbers<[1], [0], [0], [1], [0, 0, 1, 1], [], []>} : vector<2x128xbf16>, vector<128x512xbf16>, vector<2x512xf32> -> vector<2x512xf32>
    %346 = arith.addf %341, %345 : vector<2x512xf32>
    %347 = vector.extract_strided_slice %346 {offsets = [0, 0], sizes = [2, 384], strides = [1, 1]} : vector<2x512xf32> to vector<2x384xf32>
    %348 = arith.negf %347 : vector<2x384xf32>
    %349 = math.exp %348 : vector<2x384xf32>
    %cst_106 = arith.constant 1.000000e+00 : f32
    %350 = vector.broadcast %cst_106 : f32 to vector<2x384xf32>
    %351 = arith.addf %350, %349 : vector<2x384xf32>
    %352 = arith.divf %350, %351 : vector<2x384xf32>
    %353 = vector.extract_strided_slice %346 {offsets = [0, 384], sizes = [2, 128], strides = [1, 1]} : vector<2x512xf32> to vector<2x128xf32>
    %354 = math.tanh %353 : vector<2x128xf32>
    %355 = vector.extract_strided_slice %352 {offsets = [0, 128], sizes = [2, 128], strides = [1, 1]} : vector<2x384xf32> to vector<2x128xf32>
    %356 = arith.mulf %355, %293 : vector<2x128xf32>
    %357 = vector.extract_strided_slice %352 {offsets = [0, 0], sizes = [2, 128], strides = [1, 1]} : vector<2x384xf32> to vector<2x128xf32>
    %358 = arith.mulf %357, %354 : vector<2x128xf32>
    %359 = arith.addf %356, %358 : vector<2x128xf32>
    %360 = vector.extract_strided_slice %352 {offsets = [0, 256], sizes = [2, 128], strides = [1, 1]} : vector<2x384xf32> to vector<2x128xf32>
    %361 = math.tanh %359 : vector<2x128xf32>
    %362 = arith.mulf %360, %361 : vector<2x128xf32>
    %363 = vector.extract_strided_slice %8 {offsets = [10, 0], sizes = [2, 512], strides = [1, 1]} : vector<16x512xf32> to vector<2x512xf32>
    %364 = arith.truncf %318 : vector<2x128xf32> to vector<2x128xbf16>
    %c0_107 = arith.constant 0 : index
    %c0_108 = arith.constant 0 : index
    %c0_109 = arith.constant 0 : index
    %365 = vector.load %arg3[%c0_107, %c0_108, %c0_109] : memref<3x128x512xbf16, #tpu.memory_space<vmem>>, vector<1x128x512xbf16>
    %366 = vector.shape_cast %365 : vector<1x128x512xbf16> to vector<128x512xbf16>
    %cst_110 = arith.constant dense<0.000000e+00> : vector<2x512xf32>
    %367 = tpu.matmul %364, %366, %cst_110 {dimension_numbers = #tpu.dot_dimension_numbers<[1], [0], [0], [1], [0, 0, 1, 1], [], []>} : vector<2x128xbf16>, vector<128x512xbf16>, vector<2x512xf32> -> vector<2x512xf32>
    %368 = arith.addf %363, %367 : vector<2x512xf32>
    %369 = vector.extract_strided_slice %368 {offsets = [0, 0], sizes = [2, 384], strides = [1, 1]} : vector<2x512xf32> to vector<2x384xf32>
    %370 = arith.negf %369 : vector<2x384xf32>
    %371 = math.exp %370 : vector<2x384xf32>
    %cst_111 = arith.constant 1.000000e+00 : f32
    %372 = vector.broadcast %cst_111 : f32 to vector<2x384xf32>
    %373 = arith.addf %372, %371 : vector<2x384xf32>
    %374 = arith.divf %372, %373 : vector<2x384xf32>
    %375 = vector.extract_strided_slice %368 {offsets = [0, 384], sizes = [2, 128], strides = [1, 1]} : vector<2x512xf32> to vector<2x128xf32>
    %376 = math.tanh %375 : vector<2x128xf32>
    %377 = vector.extract_strided_slice %374 {offsets = [0, 128], sizes = [2, 128], strides = [1, 1]} : vector<2x384xf32> to vector<2x128xf32>
    %378 = arith.mulf %377, %315 : vector<2x128xf32>
    %379 = vector.extract_strided_slice %374 {offsets = [0, 0], sizes = [2, 128], strides = [1, 1]} : vector<2x384xf32> to vector<2x128xf32>
    %380 = arith.mulf %379, %376 : vector<2x128xf32>
    %381 = arith.addf %378, %380 : vector<2x128xf32>
    %382 = vector.extract_strided_slice %374 {offsets = [0, 256], sizes = [2, 128], strides = [1, 1]} : vector<2x384xf32> to vector<2x128xf32>
    %383 = math.tanh %381 : vector<2x128xf32>
    %384 = arith.mulf %382, %383 : vector<2x128xf32>
    %385 = vector.extract_strided_slice %17 {offsets = [10, 0], sizes = [2, 512], strides = [1, 1]} : vector<16x512xf32> to vector<2x512xf32>
    %386 = arith.truncf %340 : vector<2x128xf32> to vector<2x128xbf16>
    %c1_112 = arith.constant 1 : index
    %c0_113 = arith.constant 0 : index
    %c0_114 = arith.constant 0 : index
    %387 = vector.load %arg3[%c1_112, %c0_113, %c0_114] : memref<3x128x512xbf16, #tpu.memory_space<vmem>>, vector<1x128x512xbf16>
    %388 = vector.shape_cast %387 : vector<1x128x512xbf16> to vector<128x512xbf16>
    %cst_115 = arith.constant dense<0.000000e+00> : vector<2x512xf32>
    %389 = tpu.matmul %386, %388, %cst_115 {dimension_numbers = #tpu.dot_dimension_numbers<[1], [0], [0], [1], [0, 0, 1, 1], [], []>} : vector<2x128xbf16>, vector<128x512xbf16>, vector<2x512xf32> -> vector<2x512xf32>
    %390 = arith.addf %385, %389 : vector<2x512xf32>
    %391 = vector.extract_strided_slice %390 {offsets = [0, 0], sizes = [2, 384], strides = [1, 1]} : vector<2x512xf32> to vector<2x384xf32>
    %392 = arith.negf %391 : vector<2x384xf32>
    %393 = math.exp %392 : vector<2x384xf32>
    %cst_116 = arith.constant 1.000000e+00 : f32
    %394 = vector.broadcast %cst_116 : f32 to vector<2x384xf32>
    %395 = arith.addf %394, %393 : vector<2x384xf32>
    %396 = arith.divf %394, %395 : vector<2x384xf32>
    %397 = vector.extract_strided_slice %390 {offsets = [0, 384], sizes = [2, 128], strides = [1, 1]} : vector<2x512xf32> to vector<2x128xf32>
    %398 = math.tanh %397 : vector<2x128xf32>
    %399 = vector.extract_strided_slice %396 {offsets = [0, 128], sizes = [2, 128], strides = [1, 1]} : vector<2x384xf32> to vector<2x128xf32>
    %400 = arith.mulf %399, %337 : vector<2x128xf32>
    %401 = vector.extract_strided_slice %396 {offsets = [0, 0], sizes = [2, 128], strides = [1, 1]} : vector<2x384xf32> to vector<2x128xf32>
    %402 = arith.mulf %401, %398 : vector<2x128xf32>
    %403 = arith.addf %400, %402 : vector<2x128xf32>
    %404 = vector.extract_strided_slice %396 {offsets = [0, 256], sizes = [2, 128], strides = [1, 1]} : vector<2x384xf32> to vector<2x128xf32>
    %405 = math.tanh %403 : vector<2x128xf32>
    %406 = arith.mulf %404, %405 : vector<2x128xf32>
    %407 = vector.extract_strided_slice %26 {offsets = [10, 0], sizes = [2, 512], strides = [1, 1]} : vector<16x512xf32> to vector<2x512xf32>
    %408 = arith.truncf %362 : vector<2x128xf32> to vector<2x128xbf16>
    %c2_117 = arith.constant 2 : index
    %c0_118 = arith.constant 0 : index
    %c0_119 = arith.constant 0 : index
    %409 = vector.load %arg3[%c2_117, %c0_118, %c0_119] : memref<3x128x512xbf16, #tpu.memory_space<vmem>>, vector<1x128x512xbf16>
    %410 = vector.shape_cast %409 : vector<1x128x512xbf16> to vector<128x512xbf16>
    %cst_120 = arith.constant dense<0.000000e+00> : vector<2x512xf32>
    %411 = tpu.matmul %408, %410, %cst_120 {dimension_numbers = #tpu.dot_dimension_numbers<[1], [0], [0], [1], [0, 0, 1, 1], [], []>} : vector<2x128xbf16>, vector<128x512xbf16>, vector<2x512xf32> -> vector<2x512xf32>
    %412 = arith.addf %407, %411 : vector<2x512xf32>
    %413 = vector.extract_strided_slice %412 {offsets = [0, 0], sizes = [2, 384], strides = [1, 1]} : vector<2x512xf32> to vector<2x384xf32>
    %414 = arith.negf %413 : vector<2x384xf32>
    %415 = math.exp %414 : vector<2x384xf32>
    %cst_121 = arith.constant 1.000000e+00 : f32
    %416 = vector.broadcast %cst_121 : f32 to vector<2x384xf32>
    %417 = arith.addf %416, %415 : vector<2x384xf32>
    %418 = arith.divf %416, %417 : vector<2x384xf32>
    %419 = vector.extract_strided_slice %412 {offsets = [0, 384], sizes = [2, 128], strides = [1, 1]} : vector<2x512xf32> to vector<2x128xf32>
    %420 = math.tanh %419 : vector<2x128xf32>
    %421 = vector.extract_strided_slice %418 {offsets = [0, 128], sizes = [2, 128], strides = [1, 1]} : vector<2x384xf32> to vector<2x128xf32>
    %422 = arith.mulf %421, %359 : vector<2x128xf32>
    %423 = vector.extract_strided_slice %418 {offsets = [0, 0], sizes = [2, 128], strides = [1, 1]} : vector<2x384xf32> to vector<2x128xf32>
    %424 = arith.mulf %423, %420 : vector<2x128xf32>
    %425 = arith.addf %422, %424 : vector<2x128xf32>
    %426 = vector.extract_strided_slice %418 {offsets = [0, 256], sizes = [2, 128], strides = [1, 1]} : vector<2x384xf32> to vector<2x128xf32>
    %427 = math.tanh %425 : vector<2x128xf32>
    %428 = arith.mulf %426, %427 : vector<2x128xf32>
    %429 = vector.extract_strided_slice %8 {offsets = [12, 0], sizes = [2, 512], strides = [1, 1]} : vector<16x512xf32> to vector<2x512xf32>
    %430 = arith.truncf %384 : vector<2x128xf32> to vector<2x128xbf16>
    %c0_122 = arith.constant 0 : index
    %c0_123 = arith.constant 0 : index
    %c0_124 = arith.constant 0 : index
    %431 = vector.load %arg3[%c0_122, %c0_123, %c0_124] : memref<3x128x512xbf16, #tpu.memory_space<vmem>>, vector<1x128x512xbf16>
    %432 = vector.shape_cast %431 : vector<1x128x512xbf16> to vector<128x512xbf16>
    %cst_125 = arith.constant dense<0.000000e+00> : vector<2x512xf32>
    %433 = tpu.matmul %430, %432, %cst_125 {dimension_numbers = #tpu.dot_dimension_numbers<[1], [0], [0], [1], [0, 0, 1, 1], [], []>} : vector<2x128xbf16>, vector<128x512xbf16>, vector<2x512xf32> -> vector<2x512xf32>
    %434 = arith.addf %429, %433 : vector<2x512xf32>
    %435 = vector.extract_strided_slice %434 {offsets = [0, 0], sizes = [2, 384], strides = [1, 1]} : vector<2x512xf32> to vector<2x384xf32>
    %436 = arith.negf %435 : vector<2x384xf32>
    %437 = math.exp %436 : vector<2x384xf32>
    %cst_126 = arith.constant 1.000000e+00 : f32
    %438 = vector.broadcast %cst_126 : f32 to vector<2x384xf32>
    %439 = arith.addf %438, %437 : vector<2x384xf32>
    %440 = arith.divf %438, %439 : vector<2x384xf32>
    %441 = vector.extract_strided_slice %434 {offsets = [0, 384], sizes = [2, 128], strides = [1, 1]} : vector<2x512xf32> to vector<2x128xf32>
    %442 = math.tanh %441 : vector<2x128xf32>
    %443 = vector.extract_strided_slice %440 {offsets = [0, 128], sizes = [2, 128], strides = [1, 1]} : vector<2x384xf32> to vector<2x128xf32>
    %444 = arith.mulf %443, %381 : vector<2x128xf32>
    %445 = vector.extract_strided_slice %440 {offsets = [0, 0], sizes = [2, 128], strides = [1, 1]} : vector<2x384xf32> to vector<2x128xf32>
    %446 = arith.mulf %445, %442 : vector<2x128xf32>
    %447 = arith.addf %444, %446 : vector<2x128xf32>
    %448 = vector.extract_strided_slice %440 {offsets = [0, 256], sizes = [2, 128], strides = [1, 1]} : vector<2x384xf32> to vector<2x128xf32>
    %449 = math.tanh %447 : vector<2x128xf32>
    %450 = arith.mulf %448, %449 : vector<2x128xf32>
    %451 = vector.extract_strided_slice %17 {offsets = [12, 0], sizes = [2, 512], strides = [1, 1]} : vector<16x512xf32> to vector<2x512xf32>
    %452 = arith.truncf %406 : vector<2x128xf32> to vector<2x128xbf16>
    %c1_127 = arith.constant 1 : index
    %c0_128 = arith.constant 0 : index
    %c0_129 = arith.constant 0 : index
    %453 = vector.load %arg3[%c1_127, %c0_128, %c0_129] : memref<3x128x512xbf16, #tpu.memory_space<vmem>>, vector<1x128x512xbf16>
    %454 = vector.shape_cast %453 : vector<1x128x512xbf16> to vector<128x512xbf16>
    %cst_130 = arith.constant dense<0.000000e+00> : vector<2x512xf32>
    %455 = tpu.matmul %452, %454, %cst_130 {dimension_numbers = #tpu.dot_dimension_numbers<[1], [0], [0], [1], [0, 0, 1, 1], [], []>} : vector<2x128xbf16>, vector<128x512xbf16>, vector<2x512xf32> -> vector<2x512xf32>
    %456 = arith.addf %451, %455 : vector<2x512xf32>
    %457 = vector.extract_strided_slice %456 {offsets = [0, 0], sizes = [2, 384], strides = [1, 1]} : vector<2x512xf32> to vector<2x384xf32>
    %458 = arith.negf %457 : vector<2x384xf32>
    %459 = math.exp %458 : vector<2x384xf32>
    %cst_131 = arith.constant 1.000000e+00 : f32
    %460 = vector.broadcast %cst_131 : f32 to vector<2x384xf32>
    %461 = arith.addf %460, %459 : vector<2x384xf32>
    %462 = arith.divf %460, %461 : vector<2x384xf32>
    %463 = vector.extract_strided_slice %456 {offsets = [0, 384], sizes = [2, 128], strides = [1, 1]} : vector<2x512xf32> to vector<2x128xf32>
    %464 = math.tanh %463 : vector<2x128xf32>
    %465 = vector.extract_strided_slice %462 {offsets = [0, 128], sizes = [2, 128], strides = [1, 1]} : vector<2x384xf32> to vector<2x128xf32>
    %466 = arith.mulf %465, %403 : vector<2x128xf32>
    %467 = vector.extract_strided_slice %462 {offsets = [0, 0], sizes = [2, 128], strides = [1, 1]} : vector<2x384xf32> to vector<2x128xf32>
    %468 = arith.mulf %467, %464 : vector<2x128xf32>
    %469 = arith.addf %466, %468 : vector<2x128xf32>
    %470 = vector.extract_strided_slice %462 {offsets = [0, 256], sizes = [2, 128], strides = [1, 1]} : vector<2x384xf32> to vector<2x128xf32>
    %471 = math.tanh %469 : vector<2x128xf32>
    %472 = arith.mulf %470, %471 : vector<2x128xf32>
    %473 = vector.extract_strided_slice %26 {offsets = [12, 0], sizes = [2, 512], strides = [1, 1]} : vector<16x512xf32> to vector<2x512xf32>
    %474 = arith.truncf %428 : vector<2x128xf32> to vector<2x128xbf16>
    %c2_132 = arith.constant 2 : index
    %c0_133 = arith.constant 0 : index
    %c0_134 = arith.constant 0 : index
    %475 = vector.load %arg3[%c2_132, %c0_133, %c0_134] : memref<3x128x512xbf16, #tpu.memory_space<vmem>>, vector<1x128x512xbf16>
    %476 = vector.shape_cast %475 : vector<1x128x512xbf16> to vector<128x512xbf16>
    %cst_135 = arith.constant dense<0.000000e+00> : vector<2x512xf32>
    %477 = tpu.matmul %474, %476, %cst_135 {dimension_numbers = #tpu.dot_dimension_numbers<[1], [0], [0], [1], [0, 0, 1, 1], [], []>} : vector<2x128xbf16>, vector<128x512xbf16>, vector<2x512xf32> -> vector<2x512xf32>
    %478 = arith.addf %473, %477 : vector<2x512xf32>
    %479 = vector.extract_strided_slice %478 {offsets = [0, 0], sizes = [2, 384], strides = [1, 1]} : vector<2x512xf32> to vector<2x384xf32>
    %480 = arith.negf %479 : vector<2x384xf32>
    %481 = math.exp %480 : vector<2x384xf32>
    %cst_136 = arith.constant 1.000000e+00 : f32
    %482 = vector.broadcast %cst_136 : f32 to vector<2x384xf32>
    %483 = arith.addf %482, %481 : vector<2x384xf32>
    %484 = arith.divf %482, %483 : vector<2x384xf32>
    %485 = vector.extract_strided_slice %478 {offsets = [0, 384], sizes = [2, 128], strides = [1, 1]} : vector<2x512xf32> to vector<2x128xf32>
    %486 = math.tanh %485 : vector<2x128xf32>
    %487 = vector.extract_strided_slice %484 {offsets = [0, 128], sizes = [2, 128], strides = [1, 1]} : vector<2x384xf32> to vector<2x128xf32>
    %488 = arith.mulf %487, %425 : vector<2x128xf32>
    %489 = vector.extract_strided_slice %484 {offsets = [0, 0], sizes = [2, 128], strides = [1, 1]} : vector<2x384xf32> to vector<2x128xf32>
    %490 = arith.mulf %489, %486 : vector<2x128xf32>
    %491 = arith.addf %488, %490 : vector<2x128xf32>
    %492 = vector.extract_strided_slice %484 {offsets = [0, 256], sizes = [2, 128], strides = [1, 1]} : vector<2x384xf32> to vector<2x128xf32>
    %493 = math.tanh %491 : vector<2x128xf32>
    %494 = arith.mulf %492, %493 : vector<2x128xf32>
    %495 = vector.extract_strided_slice %8 {offsets = [14, 0], sizes = [2, 512], strides = [1, 1]} : vector<16x512xf32> to vector<2x512xf32>
    %496 = arith.truncf %450 : vector<2x128xf32> to vector<2x128xbf16>
    %c0_137 = arith.constant 0 : index
    %c0_138 = arith.constant 0 : index
    %c0_139 = arith.constant 0 : index
    %497 = vector.load %arg3[%c0_137, %c0_138, %c0_139] : memref<3x128x512xbf16, #tpu.memory_space<vmem>>, vector<1x128x512xbf16>
    %498 = vector.shape_cast %497 : vector<1x128x512xbf16> to vector<128x512xbf16>
    %cst_140 = arith.constant dense<0.000000e+00> : vector<2x512xf32>
    %499 = tpu.matmul %496, %498, %cst_140 {dimension_numbers = #tpu.dot_dimension_numbers<[1], [0], [0], [1], [0, 0, 1, 1], [], []>} : vector<2x128xbf16>, vector<128x512xbf16>, vector<2x512xf32> -> vector<2x512xf32>
    %500 = arith.addf %495, %499 : vector<2x512xf32>
    %501 = vector.extract_strided_slice %500 {offsets = [0, 0], sizes = [2, 384], strides = [1, 1]} : vector<2x512xf32> to vector<2x384xf32>
    %502 = arith.negf %501 : vector<2x384xf32>
    %503 = math.exp %502 : vector<2x384xf32>
    %cst_141 = arith.constant 1.000000e+00 : f32
    %504 = vector.broadcast %cst_141 : f32 to vector<2x384xf32>
    %505 = arith.addf %504, %503 : vector<2x384xf32>
    %506 = arith.divf %504, %505 : vector<2x384xf32>
    %507 = vector.extract_strided_slice %500 {offsets = [0, 384], sizes = [2, 128], strides = [1, 1]} : vector<2x512xf32> to vector<2x128xf32>
    %508 = math.tanh %507 : vector<2x128xf32>
    %509 = vector.extract_strided_slice %506 {offsets = [0, 128], sizes = [2, 128], strides = [1, 1]} : vector<2x384xf32> to vector<2x128xf32>
    %510 = arith.mulf %509, %447 : vector<2x128xf32>
    %511 = vector.extract_strided_slice %506 {offsets = [0, 0], sizes = [2, 128], strides = [1, 1]} : vector<2x384xf32> to vector<2x128xf32>
    %512 = arith.mulf %511, %508 : vector<2x128xf32>
    %513 = arith.addf %510, %512 : vector<2x128xf32>
    %514 = vector.extract_strided_slice %506 {offsets = [0, 256], sizes = [2, 128], strides = [1, 1]} : vector<2x384xf32> to vector<2x128xf32>
    %515 = math.tanh %513 : vector<2x128xf32>
    %516 = arith.mulf %514, %515 : vector<2x128xf32>
    %517 = vector.extract_strided_slice %17 {offsets = [14, 0], sizes = [2, 512], strides = [1, 1]} : vector<16x512xf32> to vector<2x512xf32>
    %518 = arith.truncf %472 : vector<2x128xf32> to vector<2x128xbf16>
    %c1_142 = arith.constant 1 : index
    %c0_143 = arith.constant 0 : index
    %c0_144 = arith.constant 0 : index
    %519 = vector.load %arg3[%c1_142, %c0_143, %c0_144] : memref<3x128x512xbf16, #tpu.memory_space<vmem>>, vector<1x128x512xbf16>
    %520 = vector.shape_cast %519 : vector<1x128x512xbf16> to vector<128x512xbf16>
    %cst_145 = arith.constant dense<0.000000e+00> : vector<2x512xf32>
    %521 = tpu.matmul %518, %520, %cst_145 {dimension_numbers = #tpu.dot_dimension_numbers<[1], [0], [0], [1], [0, 0, 1, 1], [], []>} : vector<2x128xbf16>, vector<128x512xbf16>, vector<2x512xf32> -> vector<2x512xf32>
    %522 = arith.addf %517, %521 : vector<2x512xf32>
    %523 = vector.extract_strided_slice %522 {offsets = [0, 0], sizes = [2, 384], strides = [1, 1]} : vector<2x512xf32> to vector<2x384xf32>
    %524 = arith.negf %523 : vector<2x384xf32>
    %525 = math.exp %524 : vector<2x384xf32>
    %cst_146 = arith.constant 1.000000e+00 : f32
    %526 = vector.broadcast %cst_146 : f32 to vector<2x384xf32>
    %527 = arith.addf %526, %525 : vector<2x384xf32>
    %528 = arith.divf %526, %527 : vector<2x384xf32>
    %529 = vector.extract_strided_slice %522 {offsets = [0, 384], sizes = [2, 128], strides = [1, 1]} : vector<2x512xf32> to vector<2x128xf32>
    %530 = math.tanh %529 : vector<2x128xf32>
    %531 = vector.extract_strided_slice %528 {offsets = [0, 128], sizes = [2, 128], strides = [1, 1]} : vector<2x384xf32> to vector<2x128xf32>
    %532 = arith.mulf %531, %469 : vector<2x128xf32>
    %533 = vector.extract_strided_slice %528 {offsets = [0, 0], sizes = [2, 128], strides = [1, 1]} : vector<2x384xf32> to vector<2x128xf32>
    %534 = arith.mulf %533, %530 : vector<2x128xf32>
    %535 = arith.addf %532, %534 : vector<2x128xf32>
    %536 = vector.extract_strided_slice %528 {offsets = [0, 256], sizes = [2, 128], strides = [1, 1]} : vector<2x384xf32> to vector<2x128xf32>
    %537 = math.tanh %535 : vector<2x128xf32>
    %538 = arith.mulf %536, %537 : vector<2x128xf32>
    %539 = vector.extract_strided_slice %26 {offsets = [14, 0], sizes = [2, 512], strides = [1, 1]} : vector<16x512xf32> to vector<2x512xf32>
    %540 = arith.truncf %494 : vector<2x128xf32> to vector<2x128xbf16>
    %c2_147 = arith.constant 2 : index
    %c0_148 = arith.constant 0 : index
    %c0_149 = arith.constant 0 : index
    %541 = vector.load %arg3[%c2_147, %c0_148, %c0_149] : memref<3x128x512xbf16, #tpu.memory_space<vmem>>, vector<1x128x512xbf16>
    %542 = vector.shape_cast %541 : vector<1x128x512xbf16> to vector<128x512xbf16>
    %cst_150 = arith.constant dense<0.000000e+00> : vector<2x512xf32>
    %543 = tpu.matmul %540, %542, %cst_150 {dimension_numbers = #tpu.dot_dimension_numbers<[1], [0], [0], [1], [0, 0, 1, 1], [], []>} : vector<2x128xbf16>, vector<128x512xbf16>, vector<2x512xf32> -> vector<2x512xf32>
    %544 = arith.addf %539, %543 : vector<2x512xf32>
    %545 = vector.extract_strided_slice %544 {offsets = [0, 0], sizes = [2, 384], strides = [1, 1]} : vector<2x512xf32> to vector<2x384xf32>
    %546 = arith.negf %545 : vector<2x384xf32>
    %547 = math.exp %546 : vector<2x384xf32>
    %cst_151 = arith.constant 1.000000e+00 : f32
    %548 = vector.broadcast %cst_151 : f32 to vector<2x384xf32>
    %549 = arith.addf %548, %547 : vector<2x384xf32>
    %550 = arith.divf %548, %549 : vector<2x384xf32>
    %551 = vector.extract_strided_slice %544 {offsets = [0, 384], sizes = [2, 128], strides = [1, 1]} : vector<2x512xf32> to vector<2x128xf32>
    %552 = math.tanh %551 : vector<2x128xf32>
    %553 = vector.extract_strided_slice %550 {offsets = [0, 128], sizes = [2, 128], strides = [1, 1]} : vector<2x384xf32> to vector<2x128xf32>
    %554 = arith.mulf %553, %491 : vector<2x128xf32>
    %555 = vector.extract_strided_slice %550 {offsets = [0, 0], sizes = [2, 128], strides = [1, 1]} : vector<2x384xf32> to vector<2x128xf32>
    %556 = arith.mulf %555, %552 : vector<2x128xf32>
    %557 = arith.addf %554, %556 : vector<2x128xf32>
    %558 = vector.extract_strided_slice %550 {offsets = [0, 256], sizes = [2, 128], strides = [1, 1]} : vector<2x384xf32> to vector<2x128xf32>
    %559 = math.tanh %557 : vector<2x128xf32>
    %560 = arith.mulf %558, %559 : vector<2x128xf32>
    %561 = arith.truncf %516 : vector<2x128xf32> to vector<2x128xbf16>
    %c0_152 = arith.constant 0 : index
    %c0_153 = arith.constant 0 : index
    %c0_154 = arith.constant 0 : index
    %562 = vector.load %arg5[%c0_152, %c0_153, %c0_154] : memref<3x128x384xbf16, #tpu.memory_space<vmem>>, vector<1x128x384xbf16>
    %563 = vector.shape_cast %562 : vector<1x128x384xbf16> to vector<128x384xbf16>
    %cst_155 = arith.constant dense<0.000000e+00> : vector<2x384xf32>
    %564 = tpu.matmul %561, %563, %cst_155 {dimension_numbers = #tpu.dot_dimension_numbers<[1], [0], [0], [1], [0, 0, 1, 1], [], []>} : vector<2x128xbf16>, vector<128x384xbf16>, vector<2x384xf32> -> vector<2x384xf32>
    %c0_156 = arith.constant 0 : index
    %c0_157 = arith.constant 0 : index
    %c0_158 = arith.constant 0 : index
    %565 = vector.load %arg6[%c0_156, %c0_157, %c0_158] : memref<3x1x384xf32, #tpu.memory_space<vmem>>, vector<1x1x384xf32>
    %566 = vector.shape_cast %565 : vector<1x1x384xf32> to vector<1x384xf32>
    %567 = vector.broadcast %566 : vector<1x384xf32> to vector<2x384xf32>
    %568 = arith.addf %564, %567 : vector<2x384xf32>
    %569 = arith.truncf %568 : vector<2x384xf32> to vector<2x384xbf16>
    %c0_159 = arith.constant 0 : index
    %c0_160 = arith.constant 0 : index
    %570 = vector.load %arg7[%c0_159, %c0_160] : memref<384x128xbf16, #tpu.memory_space<vmem>>, vector<384x128xbf16>
    %cst_161 = arith.constant dense<0.000000e+00> : vector<2x128xf32>
    %571 = tpu.matmul %569, %570, %cst_161 {dimension_numbers = #tpu.dot_dimension_numbers<[1], [0], [0], [1], [0, 0, 1, 1], [], []>} : vector<2x384xbf16>, vector<384x128xbf16>, vector<2x128xf32> -> vector<2x128xf32>
    %c0_162 = arith.constant 0 : index
    %c0_163 = arith.constant 0 : index
    %572 = vector.load %arg8[%c0_162, %c0_163] : memref<1x128xf32, #tpu.memory_space<vmem>>, vector<1x128xf32>
    %573 = vector.broadcast %572 : vector<1x128xf32> to vector<2x128xf32>
    %574 = arith.addf %571, %573 : vector<2x128xf32>
    %575 = arith.mulf %574, %574 : vector<2x128xf32>
    %cst_164 = arith.constant dense<0.000000e+00> : vector<2xf32>
    %576 = vector.multi_reduction <add>, %575, %cst_164 [1] : vector<2x128xf32> to vector<2xf32>
    %577 = vector.shape_cast %576 : vector<2xf32> to vector<2x1xf32>
    %cst_165 = arith.constant 1.000000e-24 : f32
    %578 = vector.broadcast %cst_165 : f32 to vector<2x1xf32>
    %579 = arith.maximumf %577, %578 : vector<2x1xf32>
    %580 = math.rsqrt %579 : vector<2x1xf32>
    %581 = vector.broadcast %580 : vector<2x1xf32> to vector<2x128xf32>
    %582 = arith.mulf %574, %581 : vector<2x128xf32>
    %c0_166 = arith.constant 0 : index
    %c0_167 = arith.constant 0 : index
    %c0_168 = arith.constant 0 : index
    %583 = vector.load %arg14[%c0_166, %c0_167, %c0_168] : memref<3x2x128xf32, #tpu.memory_space<vmem>>, vector<1x2x128xf32>
    %584 = vector.shape_cast %583 : vector<1x2x128xf32> to vector<2x128xf32>
    %585 = vector.shape_cast %582 : vector<2x128xf32> to vector<1x2x128xf32>
    tpu.vector_store %arg14[%c0_166, %c0_167, %c0_168], %585 {strides = array<i32>} : memref<3x2x128xf32, #tpu.memory_space<vmem>>, vector<1x2x128xf32>,
    %586 = arith.truncf %538 : vector<2x128xf32> to vector<2x128xbf16>
    %c1_169 = arith.constant 1 : index
    %c0_170 = arith.constant 0 : index
    %c0_171 = arith.constant 0 : index
    %587 = vector.load %arg5[%c1_169, %c0_170, %c0_171] : memref<3x128x384xbf16, #tpu.memory_space<vmem>>, vector<1x128x384xbf16>
    %588 = vector.shape_cast %587 : vector<1x128x384xbf16> to vector<128x384xbf16>
    %cst_172 = arith.constant dense<0.000000e+00> : vector<2x384xf32>
    %589 = tpu.matmul %586, %588, %cst_172 {dimension_numbers = #tpu.dot_dimension_numbers<[1], [0], [0], [1], [0, 0, 1, 1], [], []>} : vector<2x128xbf16>, vector<128x384xbf16>, vector<2x384xf32> -> vector<2x384xf32>
    %c1_173 = arith.constant 1 : index
    %c0_174 = arith.constant 0 : index
    %c0_175 = arith.constant 0 : index
    %590 = vector.load %arg6[%c1_173, %c0_174, %c0_175] : memref<3x1x384xf32, #tpu.memory_space<vmem>>, vector<1x1x384xf32>
    %591 = vector.shape_cast %590 : vector<1x1x384xf32> to vector<1x384xf32>
    %592 = vector.broadcast %591 : vector<1x384xf32> to vector<2x384xf32>
    %593 = arith.addf %589, %592 : vector<2x384xf32>
    %594 = arith.truncf %593 : vector<2x384xf32> to vector<2x384xbf16>
    %c0_176 = arith.constant 0 : index
    %c0_177 = arith.constant 0 : index
    %595 = vector.load %arg7[%c0_176, %c0_177] : memref<384x128xbf16, #tpu.memory_space<vmem>>, vector<384x128xbf16>
    %cst_178 = arith.constant dense<0.000000e+00> : vector<2x128xf32>
    %596 = tpu.matmul %594, %595, %cst_178 {dimension_numbers = #tpu.dot_dimension_numbers<[1], [0], [0], [1], [0, 0, 1, 1], [], []>} : vector<2x384xbf16>, vector<384x128xbf16>, vector<2x128xf32> -> vector<2x128xf32>
    %c0_179 = arith.constant 0 : index
    %c0_180 = arith.constant 0 : index
    %597 = vector.load %arg8[%c0_179, %c0_180] : memref<1x128xf32, #tpu.memory_space<vmem>>, vector<1x128xf32>
    %598 = vector.broadcast %597 : vector<1x128xf32> to vector<2x128xf32>
    %599 = arith.addf %596, %598 : vector<2x128xf32>
    %600 = arith.mulf %599, %599 : vector<2x128xf32>
    %cst_181 = arith.constant dense<0.000000e+00> : vector<2xf32>
    %601 = vector.multi_reduction <add>, %600, %cst_181 [1] : vector<2x128xf32> to vector<2xf32>
    %602 = vector.shape_cast %601 : vector<2xf32> to vector<2x1xf32>
    %cst_182 = arith.constant 1.000000e-24 : f32
    %603 = vector.broadcast %cst_182 : f32 to vector<2x1xf32>
    %604 = arith.maximumf %602, %603 : vector<2x1xf32>
    %605 = math.rsqrt %604 : vector<2x1xf32>
    %606 = vector.broadcast %605 : vector<2x1xf32> to vector<2x128xf32>
    %607 = arith.mulf %599, %606 : vector<2x128xf32>
    %c1_183 = arith.constant 1 : index
    %c0_184 = arith.constant 0 : index
    %c0_185 = arith.constant 0 : index
    %608 = vector.load %arg14[%c1_183, %c0_184, %c0_185] : memref<3x2x128xf32, #tpu.memory_space<vmem>>, vector<1x2x128xf32>
    %609 = vector.shape_cast %608 : vector<1x2x128xf32> to vector<2x128xf32>
    %610 = vector.shape_cast %607 : vector<2x128xf32> to vector<1x2x128xf32>
    tpu.vector_store %arg14[%c1_183, %c0_184, %c0_185], %610 {strides = array<i32>} : memref<3x2x128xf32, #tpu.memory_space<vmem>>, vector<1x2x128xf32>,
    %611 = arith.truncf %560 : vector<2x128xf32> to vector<2x128xbf16>
    %c2_186 = arith.constant 2 : index
    %c0_187 = arith.constant 0 : index
    %c0_188 = arith.constant 0 : index
    %612 = vector.load %arg5[%c2_186, %c0_187, %c0_188] : memref<3x128x384xbf16, #tpu.memory_space<vmem>>, vector<1x128x384xbf16>
    %613 = vector.shape_cast %612 : vector<1x128x384xbf16> to vector<128x384xbf16>
    %cst_189 = arith.constant dense<0.000000e+00> : vector<2x384xf32>
    %614 = tpu.matmul %611, %613, %cst_189 {dimension_numbers = #tpu.dot_dimension_numbers<[1], [0], [0], [1], [0, 0, 1, 1], [], []>} : vector<2x128xbf16>, vector<128x384xbf16>, vector<2x384xf32> -> vector<2x384xf32>
    %c2_190 = arith.constant 2 : index
    %c0_191 = arith.constant 0 : index
    %c0_192 = arith.constant 0 : index
    %615 = vector.load %arg6[%c2_190, %c0_191, %c0_192] : memref<3x1x384xf32, #tpu.memory_space<vmem>>, vector<1x1x384xf32>
    %616 = vector.shape_cast %615 : vector<1x1x384xf32> to vector<1x384xf32>
    %617 = vector.broadcast %616 : vector<1x384xf32> to vector<2x384xf32>
    %618 = arith.addf %614, %617 : vector<2x384xf32>
    %619 = arith.truncf %618 : vector<2x384xf32> to vector<2x384xbf16>
    %c0_193 = arith.constant 0 : index
    %c0_194 = arith.constant 0 : index
    %620 = vector.load %arg7[%c0_193, %c0_194] : memref<384x128xbf16, #tpu.memory_space<vmem>>, vector<384x128xbf16>
    %cst_195 = arith.constant dense<0.000000e+00> : vector<2x128xf32>
    %621 = tpu.matmul %619, %620, %cst_195 {dimension_numbers = #tpu.dot_dimension_numbers<[1], [0], [0], [1], [0, 0, 1, 1], [], []>} : vector<2x384xbf16>, vector<384x128xbf16>, vector<2x128xf32> -> vector<2x128xf32>
    %c0_196 = arith.constant 0 : index
    %c0_197 = arith.constant 0 : index
    %622 = vector.load %arg8[%c0_196, %c0_197] : memref<1x128xf32, #tpu.memory_space<vmem>>, vector<1x128xf32>
    %623 = vector.broadcast %622 : vector<1x128xf32> to vector<2x128xf32>
    %624 = arith.addf %621, %623 : vector<2x128xf32>
    %625 = arith.mulf %624, %624 : vector<2x128xf32>
    %cst_198 = arith.constant dense<0.000000e+00> : vector<2xf32>
    %626 = vector.multi_reduction <add>, %625, %cst_198 [1] : vector<2x128xf32> to vector<2xf32>
    %627 = vector.shape_cast %626 : vector<2xf32> to vector<2x1xf32>
    %cst_199 = arith.constant 1.000000e-24 : f32
    %628 = vector.broadcast %cst_199 : f32 to vector<2x1xf32>
    %629 = arith.maximumf %627, %628 : vector<2x1xf32>
    %630 = math.rsqrt %629 : vector<2x1xf32>
    %631 = vector.broadcast %630 : vector<2x1xf32> to vector<2x128xf32>
    %632 = arith.mulf %624, %631 : vector<2x128xf32>
    %c2_200 = arith.constant 2 : index
    %c0_201 = arith.constant 0 : index
    %c0_202 = arith.constant 0 : index
    %633 = vector.load %arg14[%c2_200, %c0_201, %c0_202] : memref<3x2x128xf32, #tpu.memory_space<vmem>>, vector<1x2x128xf32>
    %634 = vector.shape_cast %633 : vector<1x2x128xf32> to vector<2x128xf32>
    %635 = vector.shape_cast %632 : vector<2x128xf32> to vector<1x2x128xf32>
    tpu.vector_store %arg14[%c2_200, %c0_201, %c0_202], %635 {strides = array<i32>} : memref<3x2x128xf32, #tpu.memory_space<vmem>>, vector<1x2x128xf32>,
    %c0_203 = arith.constant 0 : index
    %c0_204 = arith.constant 0 : index
    %636 = vector.load %arg9[%c0_203, %c0_204] : memref<2x256xbf16, #tpu.memory_space<vmem>>, vector<2x256xbf16>
    %c0_205 = arith.constant 0 : index
    %c0_206 = arith.constant 0 : index
    %637 = vector.load %arg10[%c0_205, %c0_206] : memref<256x128xbf16, #tpu.memory_space<vmem>>, vector<256x128xbf16>
    %cst_207 = arith.constant dense<0.000000e+00> : vector<2x128xf32>
    %638 = tpu.matmul %636, %637, %cst_207 {dimension_numbers = #tpu.dot_dimension_numbers<[1], [0], [0], [1], [0, 0, 1, 1], [], []>} : vector<2x256xbf16>, vector<256x128xbf16>, vector<2x128xf32> -> vector<2x128xf32>
    %c0_208 = arith.constant 0 : index
    %c0_209 = arith.constant 0 : index
    %639 = vector.load %arg11[%c0_208, %c0_209] : memref<1x128xf32, #tpu.memory_space<vmem>>, vector<1x128xf32>
    %640 = vector.broadcast %639 : vector<1x128xf32> to vector<2x128xf32>
    %641 = arith.addf %638, %640 : vector<2x128xf32>
    %cst_210 = arith.constant 0.000000e+00 : f32
    %642 = vector.broadcast %cst_210 : f32 to vector<2x128xf32>
    %643 = arith.maximumf %641, %642 : vector<2x128xf32>
    %644 = arith.truncf %643 : vector<2x128xf32> to vector<2x128xbf16>
    %c0_211 = arith.constant 0 : index
    %c0_212 = arith.constant 0 : index
    %645 = vector.load %arg12[%c0_211, %c0_212] : memref<128x128xbf16, #tpu.memory_space<vmem>>, vector<128x128xbf16>
    %cst_213 = arith.constant dense<0.000000e+00> : vector<2x128xf32>
    %646 = tpu.matmul %644, %645, %cst_213 {dimension_numbers = #tpu.dot_dimension_numbers<[1], [0], [0], [1], [0, 0, 1, 1], [], []>} : vector<2x128xbf16>, vector<128x128xbf16>, vector<2x128xf32> -> vector<2x128xf32>
    %c0_214 = arith.constant 0 : index
    %c0_215 = arith.constant 0 : index
    %647 = vector.load %arg13[%c0_214, %c0_215] : memref<1x128xf32, #tpu.memory_space<vmem>>, vector<1x128xf32>
    %648 = vector.broadcast %647 : vector<1x128xf32> to vector<2x128xf32>
    %649 = arith.addf %646, %648 : vector<2x128xf32>
    %650 = arith.mulf %649, %649 : vector<2x128xf32>
    %cst_216 = arith.constant dense<0.000000e+00> : vector<2xf32>
    %651 = vector.multi_reduction <add>, %650, %cst_216 [1] : vector<2x128xf32> to vector<2xf32>
    %652 = vector.shape_cast %651 : vector<2xf32> to vector<2x1xf32>
    %cst_217 = arith.constant 1.000000e-24 : f32
    %653 = vector.broadcast %cst_217 : f32 to vector<2x1xf32>
    %654 = arith.maximumf %652, %653 : vector<2x1xf32>
    %655 = math.rsqrt %654 : vector<2x1xf32>
    %656 = vector.broadcast %655 : vector<2x1xf32> to vector<2x128xf32>
    %657 = arith.mulf %649, %656 : vector<2x128xf32>
    %c0_218 = arith.constant 0 : index
    %c0_219 = arith.constant 0 : index
    %658 = vector.load %arg15[%c0_218, %c0_219] : memref<2x128xf32, #tpu.memory_space<vmem>>, vector<2x128xf32>
    tpu.vector_store %arg15[%c0_218, %c0_219], %657 {strides = array<i32>} : memref<2x128xf32, #tpu.memory_space<vmem>>, vector<2x128xf32>,
    return
  }
  func.func @transform_0(%arg0: i32) -> (i32, i32, i32) {
    %c0_i32 = arith.constant 0 : i32
    %c0_i32_0 = arith.constant 0 : i32
    %c0_i32_1 = arith.constant 0 : i32
    %c0_i32_2 = arith.constant 0 : i32
    return %c0_i32, %c0_i32_0, %c0_i32_1 : i32, i32, i32
  }
  func.func @transform_1(%arg0: i32) -> (i32, i32, i32) {
    %c0_i32 = arith.constant 0 : i32
    %c0_i32_0 = arith.constant 0 : i32
    %c0_i32_1 = arith.constant 0 : i32
    %c0_i32_2 = arith.constant 0 : i32
    return %c0_i32, %c0_i32_0, %c0_i32_1 : i32, i32, i32
  }
  func.func @transform_2(%arg0: i32) -> (i32, i32, i32) {
    %c0_i32 = arith.constant 0 : i32
    %c0_i32_0 = arith.constant 0 : i32
    %c0_i32_1 = arith.constant 0 : i32
    %c0_i32_2 = arith.constant 0 : i32
    return %c0_i32, %c0_i32_0, %c0_i32_1 : i32, i32, i32
  }
  func.func @transform_3(%arg0: i32) -> (i32, i32, i32) {
    %c0_i32 = arith.constant 0 : i32
    %c0_i32_0 = arith.constant 0 : i32
    %c0_i32_1 = arith.constant 0 : i32
    %c0_i32_2 = arith.constant 0 : i32
    return %c0_i32, %c0_i32_0, %c0_i32_1 : i32, i32, i32
  }
  func.func @transform_4(%arg0: i32) -> (i32, i32, i32) {
    %c0_i32 = arith.constant 0 : i32
    %c0_i32_0 = arith.constant 0 : i32
    %c0_i32_1 = arith.constant 0 : i32
    %c0_i32_2 = arith.constant 0 : i32
    return %c0_i32, %c0_i32_0, %c0_i32_1 : i32, i32, i32
  }
  func.func @transform_5(%arg0: i32) -> (i32, i32, i32) {
    %c0_i32 = arith.constant 0 : i32
    %c0_i32_0 = arith.constant 0 : i32
    %c0_i32_1 = arith.constant 0 : i32
    %c0_i32_2 = arith.constant 0 : i32
    return %c0_i32, %c0_i32_0, %c0_i32_1 : i32, i32, i32
  }
  func.func @transform_6(%arg0: i32) -> (i32, i32) {
    %c0_i32 = arith.constant 0 : i32
    %c0_i32_0 = arith.constant 0 : i32
    %c0_i32_1 = arith.constant 0 : i32
    return %c0_i32, %c0_i32_0 : i32, i32
  }
  func.func @transform_7(%arg0: i32) -> (i32, i32) {
    %c0_i32 = arith.constant 0 : i32
    %c0_i32_0 = arith.constant 0 : i32
    %c0_i32_1 = arith.constant 0 : i32
    return %c0_i32, %c0_i32_0 : i32, i32
  }
  func.func @transform_8(%arg0: i32) -> (i32, i32) {
    %c0_i32 = arith.constant 0 : i32
    %c0_i32_0 = arith.constant 0 : i32
    %c0_i32_1 = arith.constant 0 : i32
    return %c0_i32, %c0_i32_0 : i32, i32
  }
  func.func @transform_9(%arg0: i32) -> (i32, i32) {
    %c0_i32 = arith.constant 0 : i32
    %c0_i32_0 = arith.constant 0 : i32
    %c0_i32_1 = arith.constant 0 : i32
    return %c0_i32, %c0_i32_0 : i32, i32
  }
  func.func @transform_10(%arg0: i32) -> (i32, i32) {
    %c0_i32 = arith.constant 0 : i32
    %c0_i32_0 = arith.constant 0 : i32
    %c0_i32_1 = arith.constant 0 : i32
    return %c0_i32, %c0_i32_0 : i32, i32
  }
  func.func @transform_11(%arg0: i32) -> (i32, i32) {
    %c0_i32 = arith.constant 0 : i32
    %c0_i32_0 = arith.constant 0 : i32
    %c0_i32_1 = arith.constant 0 : i32
    return %c0_i32, %c0_i32_0 : i32, i32
  }
  func.func @transform_12(%arg0: i32) -> (i32, i32) {
    %c0_i32 = arith.constant 0 : i32
    %c0_i32_0 = arith.constant 0 : i32
    %c0_i32_1 = arith.constant 0 : i32
    return %c0_i32, %c0_i32_0 : i32, i32
  }
  func.func @transform_13(%arg0: i32) -> (i32, i32, i32) {
    %c0_i32 = arith.constant 0 : i32
    %c0_i32_0 = arith.constant 0 : i32
    %c0_i32_1 = arith.constant 0 : i32
    %c0_i32_2 = arith.constant 0 : i32
    return %c0_i32, %c0_i32_0, %c0_i32_1 : i32, i32, i32
  }
  func.func @transform_14(%arg0: i32) -> (i32, i32) {
    %c0_i32 = arith.constant 0 : i32
    %c0_i32_0 = arith.constant 0 : i32
    %c0_i32_1 = arith.constant 0 : i32
    return %c0_i32, %c0_i32_0 : i32, i32
  }
}

</mosaic_0001>

<bundles_post_ra>
// kernel: forward.1
= control target key start
LH: loop header
LB: loop body
LE: loop exit
PB: predicated region body
PF: predicated region fallthrough
CT: control target
= control target key end

     0   :  { %20 = vsyncpa [#allocation3], 0  ;;  %s10725_s0 = inlined_call_operand.vmem [shape: bf16[3,16,128], index: 0, kind: input, shape index: {}]   ;;  %s10726_s1 = inlined_call_operand.hbm [shape: bf16[3,128,512], index: 1, kind: input, shape index: {}]   ;;  %s10727_s2 = inlined_call_operand.hbm [shape: bf16[3,128,512], index: 2, kind: input, shape index: {}]   ;;  %s10728_s3 = inlined_call_operand.vmem [shape: f32[3,1,512], index: 3, kind: input, shape index: {}]   ;;  %s10729_s4 = inlined_call_operand.hbm [shape: bf16[3,128,384], index: 4, kind: input, shape index: {}]   ;;  %s10730_s5 = inlined_call_operand.vmem [shape: f32[3,1,384], index: 5, kind: input, shape index: {}]   ;;  %s10731_s6 = inlined_call_operand.vmem [shape: bf16[384,128], index: 6, kind: input, shape index: {}]   ;;  %s10732_s7 = inlined_call_operand.vmem [shape: f32[1,128], index: 7, kind: input, shape index: {}]   ;;  %s10733_s8 = inlined_call_operand.vmem [shape: bf16[2,256], index: 8, kind: input, shape index: {}]   ;;  %s10734_s9 = inlined_call_operand.vmem [shape: bf16[256,128], index: 9, kind: input, shape index: {}]   ;;  %s10735_s10 = inlined_call_operand.vmem [shape: f32[1,128], index: 10, kind: input, shape index: {}]   ;;  %s10736_s11 = inlined_call_operand.hbm [shape: bf16[128,128], index: 11, kind: input, shape index: {}]   ;;  %s10737_s12 = inlined_call_operand.vmem [shape: f32[1,128], index: 12, kind: input, shape index: {}]   ;;  %s10738_s13 = inlined_call_operand.vmem [shape: f32[3,2,128], index: 13, kind: output, shape index: {0}]   ;;  %s10739_s14 = inlined_call_operand.hbm [shape: f32[2,128], index: 14, kind: output, shape index: {1}]  }
   0x1   :  { %21 = vsyncpa [#allocation6], 0 }
   0x2   :  { %22 = vsyncpa [#allocation9], 0 }
   0x3   :  { %23 = vsyncpa [#allocation4], 0  ;;  %s8582_s29 = smov [#allocation5]   ;;  %s8583_s15 = smov [#allocation2]  }
   0x4   :  { %s43_s30 = sshll.u32 %s8582_s29, 4  ;;  %s31_s16 = sshll.u32 %s8583_s15, 4  ;;  %s44_s30 = int_to_ptr.vmem [resolvable:$true] %s43_s30  ;;  %s8672_s16 = int_to_ptr.vmem [resolvable:$true] %s31_s16 }
   0x5   :  { %s8464_s19 = scalar_lea.hbm %s10727_s2, 12288 }
   0x6   :  { %p8465_p0 = scmp.ne.s32.totalorder %s10727_s2, %s8464_s19  ;;  %p8468_p1 = scmp.lt.u32.totalorder %s8464_s19, %s10727_s2 }
   0x8   :  { %p8470_p2 = pnand %p8468_p1, %p8465_p0 }
   0xa   :  { %8473 = shalt.err (!%p8470_p2)
}
   0xb   :  { %s8474_s24 = scalar_lea.vmem %s44_s30, 12288  ;;  %p8479_p4 = scmp.lt.s32.totalorder %s44_s30, %s44_s30 }
   0xc   :  { %p8475_p3 = scmp.ne.s32.totalorder %s44_s30, %s8474_s24  ;;  %p8480_p5 = scmp.lt.s32.totalorder %s8474_s24, %s8474_s24 }
   0xe   :  { %p8481_p6 = por %p8480_p5, %p8479_p4 }
  0x10   :  { %p8482_p7 = pnand %p8481_p6, %p8475_p3 }
  0x12   :  { %8485 = shalt.err (!%p8482_p7)
}
  0x13   :  { %s8584_s25 = smov 256   ;;  %s8585_s26 = smov 16  }
  0x14   :  { %49 = dma.hbm_to_vmem [thread:$0]  %s10727_s2, 12288, %s44_s30, [#allocation6], %s8584_s25, %s8584_s25, %s8585_s26  }
  0x15   :  { %s8486_s17 = scalar_lea.hbm %s10726_s1, 12288 }
  0x16   :  { %p8487_p8 = scmp.ne.s32.totalorder %s10726_s1, %s8486_s17  ;;  %p8490_p9 = scmp.lt.u32.totalorder %s8486_s17, %s10726_s1 }
  0x18   :  { %p8492_p10 = pnand %p8490_p9, %p8487_p8 }
  0x1a   :  { %8495 = shalt.err (!%p8492_p10)
}
  0x1b   :  { %s8496_s22 = scalar_lea.vmem %s8672_s16, 12288  ;;  %p8501_p12 = scmp.lt.s32.totalorder %s8672_s16, %s8672_s16 }
  0x1c   :  { %p8497_p11 = scmp.ne.s32.totalorder %s8672_s16, %s8496_s22  ;;  %p8502_p13 = scmp.lt.s32.totalorder %s8496_s22, %s8496_s22 }
  0x1e   :  { %p8503_p0 = por %p8502_p13, %p8501_p12 }
  0x20   :  { %p8504_p1 = pnand %p8503_p0, %p8497_p11 }
  0x22   :  { %8507 = shalt.err (!%p8504_p1)
}
  0x23   :  { %37 = dma.hbm_to_vmem [thread:$0]  %s10726_s1, 12288, %s8672_s16, [#allocation3], %s8584_s25, %s8584_s25, %s8585_s26  }
  0x24   :  { %s8586_s23 = smov [#allocation7]   ;;  %s8508_s29 = scalar_lea.hbm %s10729_s4, 9216 }
  0x25   :  { %s57_s24 = sshll.u32 %s8586_s23, 4  ;;  %p8509_p2 = scmp.ne.s32.totalorder %s10729_s4, %s8508_s29  ;;  %s58_s24 = int_to_ptr.vmem [resolvable:$true] %s57_s24 }
  0x26   :  { %p8512_p3 = scmp.lt.u32.totalorder %s8508_s29, %s10729_s4 }
  0x28   :  { %p8514_p4 = pnand %p8512_p3, %p8509_p2 }
  0x2a   :  { %8517 = shalt.err (!%p8514_p4)
}
  0x2b   :  { %s8518_s20 = scalar_lea.vmem %s58_s24, 9216  ;;  %p8523_p6 = scmp.lt.s32.totalorder %s58_s24, %s58_s24 }
  0x2c   :  { %p8519_p5 = scmp.ne.s32.totalorder %s58_s24, %s8518_s20  ;;  %p8524_p7 = scmp.lt.s32.totalorder %s8518_s20, %s8518_s20 }
  0x2e   :  { %p8525_p8 = por %p8524_p7, %p8523_p6 }
  0x30   :  { %p8526_p9 = pnand %p8525_p8, %p8519_p5 }
  0x32   :  { %8529 = shalt.err (!%p8526_p9)
}
  0x33   :  { %s8587_s1 = smov 192   ;;  %s8588_s16 = smov 12  }
  0x34   :  { %63 = dma.hbm_to_vmem [thread:$0]  %s10729_s4, 9216, %s58_s24, [#allocation6], %s8587_s1, %s8587_s1, %s8588_s16  }
  0x35   :  { %s8589_s21 = smov [#allocation8]   ;;  %s8530_s23 = scalar_lea.hbm %s10736_s11, 1024 }
  0x36   :  { %s81_s22 = sshll.u32 %s8589_s21, 4  ;;  %p8531_p10 = scmp.ne.s32.totalorder %s10736_s11, %s8530_s23  ;;  %s82_s22 = int_to_ptr.vmem [resolvable:$true] %s81_s22 }
  0x37   :  { %p8534_p11 = scmp.lt.u32.totalorder %s8530_s23, %s10736_s11 }
  0x39   :  { %p8536_p12 = pnand %p8534_p11, %p8531_p10 }
  0x3b   :  { %8539 = shalt.err (!%p8536_p12)
}
  0x3c   :  { %s8540_s17 = scalar_lea.vmem %s82_s22, 1024  ;;  %p8545_p0 = scmp.lt.s32.totalorder %s82_s22, %s82_s22 }
  0x3d   :  { %p8541_p13 = scmp.ne.s32.totalorder %s82_s22, %s8540_s17  ;;  %p8546_p1 = scmp.lt.s32.totalorder %s8540_s17, %s8540_s17 }
  0x3f   :  { %p8547_p2 = por %p8546_p1, %p8545_p0 }
  0x41   :  { %p8548_p3 = pnand %p8547_p2, %p8541_p13 }
  0x43   :  { %8551 = shalt.err (!%p8548_p3)
}
  0x44   :  { %s8590_s4 = smov 64   ;;  %s8591_s24 = smov 4  }
  0x45   :  { %87 = dma.hbm_to_vmem [thread:$0]  %s10736_s11, 1024, %s82_s22, [#allocation9], %s8590_s4, %s8590_s4, %s8591_s24  }
  0x46   :  { %8574 = dma.done.wait [#allocation3], 12288  }
  0x47   :  { %8575 = vsyncadd [#allocation3], 4294955008 }
  0x48   :  { %8576 = dma.done.wait [#allocation6], 21504  }
  0x49   :  { %8577 = vsyncadd [#allocation6], 4294945792 }
  0x4a   :  { %8578 = dma.done.wait [#allocation9], 1024  }
  0x4b   :  { %8579 = vsyncadd [#allocation9], 4294966272  ;;  %v10740_v0 = vmov 0   ;;  %v7359_v1 = vld [vmem:[#allocation2 + $0x4] ss:$16 sps:$4 sm:$0xff]   ;;  %vm8594_vm0 = vmmov 0  }
  0x4c   :  { %357 = vmatprep.mubr.bf16.mxu0 %v10740_v0  ;;  %400 = vmatprep.mubr.bf16.mxu1 %v10740_v0  ;;  %v7361_v2 = vld [vmem:[#allocation2 + $0xc] ss:$16 sps:$4 sm:$0xff]   ;;  %v7363_v3 = vld [vmem:[#allocation2] ss:$16 sps:$4 sm:$0xff]   ;;  %v7364_v4 = vld [vmem:[#allocation2 + $0x8] ss:$16 sps:$4 sm:$0xff]  }
  0x4d   :  { %325 = vmatprep.subr.bf16.mxu0 %v7359_v1  ;;  %368 = vmatprep.subr.bf16.mxu1 %v7361_v2  ;;  %v7365_v5 = vld [vmem:[#allocation2 + $0x24] ss:$16 sps:$4 sm:$0xff]   ;;  %v7367_v6 = vld [vmem:[#allocation2 + $0x2c] ss:$16 sps:$4 sm:$0xff]   ;;  %v7369_v7 = vld [vmem:[#allocation2 + $0x20] ss:$16 sps:$4 sm:$0xff]  }
  0x4e   :  { %326 = vmatpush1.bf16.msra.mxu0 %v7363_v3  ;;  %369 = vmatpush1.bf16.msra.mxu1 %v7364_v4  ;;  %v7370_v8 = vld [vmem:[#allocation2 + $0x28] ss:$16 sps:$4 sm:$0xff]   ;;  %v7371_v9 = vld [vmem:[#allocation2 + $0x44] ss:$16 sps:$4 sm:$0xff]   ;;  %v7373_v10 = vld [vmem:[#allocation2 + $0x4c] ss:$16 sps:$4 sm:$0xff]  }
  0x4f   :  { %327 = vmatprep.subr.bf16.mxu0 %v7365_v5  ;;  %370 = vmatprep.subr.bf16.mxu1 %v7367_v6  ;;  %v7375_v11 = vld [vmem:[#allocation2 + $0x40] ss:$16 sps:$4 sm:$0xff]   ;;  %v7376_v12 = vld [vmem:[#allocation2 + $0x48] ss:$16 sps:$4 sm:$0xff]   ;;  %v7377_v13 = vld [vmem:[#allocation2 + $0x64] ss:$16 sps:$4 sm:$0xff]  }
  0x50   :  { %v7379_v14 = vld [vmem:[#allocation2 + $0x6c] ss:$16 sps:$4 sm:$0xff]   ;;  %v7381_v15 = vld [vmem:[#allocation2 + $0x60] ss:$16 sps:$4 sm:$0xff]   ;;  %v7382_v16 = vld [vmem:[#allocation2 + $0x68] ss:$16 sps:$4 sm:$0xff]  }
  0x51   :  { %v7383_v17 = vld [vmem:[#allocation2 + $0x84] ss:$16 sps:$4 sm:$0xff]   ;;  %v7385_v18 = vld [vmem:[#allocation2 + $0x8c] ss:$16 sps:$4 sm:$0xff]   ;;  %v7387_v19 = vld [vmem:[#allocation2 + $0x80] ss:$16 sps:$4 sm:$0xff]  }
  0x52   :  { %328 = vmatpush1.bf16.msra.mxu0 %v7369_v7  ;;  %371 = vmatpush1.bf16.msra.mxu1 %v7370_v8  ;;  %v7388_v20 = vld [vmem:[#allocation2 + $0x88] ss:$16 sps:$4 sm:$0xff]   ;;  %v7389_v21 = vld [vmem:[#allocation2 + $0xa4] ss:$16 sps:$4 sm:$0xff]   ;;  %v7391_v22 = vld [vmem:[#allocation2 + $0xac] ss:$16 sps:$4 sm:$0xff]  }
  0x53   :  { %329 = vmatprep.subr.bf16.mxu0 %v7371_v9  ;;  %372 = vmatprep.subr.bf16.mxu1 %v7373_v10  ;;  %v7393_v23 = vld [vmem:[#allocation2 + $0xa0] ss:$16 sps:$4 sm:$0xff]   ;;  %v7394_v24 = vld [vmem:[#allocation2 + $0xa8] ss:$16 sps:$4 sm:$0xff]   ;;  %v7395_v25 = vld [vmem:[#allocation2 + $0xc4] ss:$16 sps:$4 sm:$0xff]  }
  0x54   :  { %v7397_v26 = vld [vmem:[#allocation2 + $0xcc] ss:$16 sps:$4 sm:$0xff]   ;;  %v7399_v27 = vld [vmem:[#allocation2 + $0xc0] ss:$16 sps:$4 sm:$0xff]   ;;  %v7400_v28 = vld [vmem:[#allocation2 + $0xc8] ss:$16 sps:$4 sm:$0xff]  }
  0x55   :  { %v7401_v29 = vld [vmem:[#allocation2 + $0xe4] ss:$16 sps:$4 sm:$0xff]   ;;  %v7403_v30 = vld [vmem:[#allocation2 + $0xec] ss:$16 sps:$4 sm:$0xff]   ;;  %v7405_v31 = vld [vmem:[#allocation2 + $0xe0] ss:$16 sps:$4 sm:$0xff]  }
  0x56   :  { %330 = vmatpush1.bf16.msra.mxu0 %v7375_v11  ;;  %373 = vmatpush1.bf16.msra.mxu1 %v7376_v12  ;;  %v7406_v32 = vld [vmem:[#allocation2 + $0xe8] ss:$16 sps:$4 sm:$0xff]   ;;  %v7410_v33 = vld [vmem:[#allocation2 + $0x104] ss:$16 sps:$4 sm:$0xff]   ;;  %v7413_v34 = vld [vmem:[#allocation2 + $0x10c] ss:$16 sps:$4 sm:$0xff]  }
  0x57   :  { %331 = vmatprep.subr.bf16.mxu0 %v7377_v13  ;;  %374 = vmatprep.subr.bf16.mxu1 %v7379_v14  ;;  %v7407_v35 = vld [vmem:[%s10725_s0] sm:$0xff]   ;;  %v7411_v37 = vld [vmem:[#allocation2 + $0x108] ss:$16 sps:$4 sm:$0xff]   ;;  %v7419_v39 = vld [vmem:[#allocation2 + $0x12c] ss:$16 sps:$4 sm:$0xff]   ;;  %vm5141_vm1 = vcmask 1041408  }
  0x58   :  { %v7408_v36 = vld [vmem:[#allocation2 + $0x100] ss:$16 sps:$4 sm:$0xff]   ;;  %v7416_v38 = vld [vmem:[#allocation2 + $0x124] ss:$16 sps:$4 sm:$0xff]   ;;  %v7417_v41 = vld [vmem:[#allocation2 + $0x128] ss:$16 sps:$4 sm:$0xff]  }
  0x59   :  { %v7414_v40 = vld [vmem:[#allocation2 + $0x120] ss:$16 sps:$4 sm:$0xff]   ;;  %v7422_v42 = vld [vmem:[#allocation2 + $0x144] ss:$16 sps:$4 sm:$0xff]   ;;  %v7425_v43 = vld [vmem:[#allocation2 + $0x14c] ss:$16 sps:$4 sm:$0xff]  }
  0x5a   :  { %332 = vmatpush1.bf16.msra.mxu0 %v7381_v15  ;;  %375 = vmatpush1.bf16.msra.mxu1 %v7382_v16  ;;  %v7420_v44 = vld [vmem:[#allocation2 + $0x140] ss:$16 sps:$4 sm:$0xff]   ;;  %v7423_v45 = vld [vmem:[#allocation2 + $0x148] ss:$16 sps:$4 sm:$0xff]   ;;  %v7428_v46 = vld [vmem:[#allocation2 + $0x164] ss:$16 sps:$4 sm:$0xff]  }
  0x5b   :  { %333 = vmatprep.subr.bf16.mxu0 %v7383_v17  ;;  %376 = vmatprep.subr.bf16.mxu1 %v7385_v18  ;;  %v7431_v47 = vld [vmem:[#allocation2 + $0x16c] ss:$16 sps:$4 sm:$0xff]   ;;  %v7426_v48 = vld [vmem:[#allocation2 + $0x160] ss:$16 sps:$4 sm:$0xff]   ;;  %v7429_v49 = vld [vmem:[#allocation2 + $0x168] ss:$16 sps:$4 sm:$0xff]  }
  0x5c   :  { %v7434_v50 = vld [vmem:[#allocation2 + $0x184] ss:$16 sps:$4 sm:$0xff]   ;;  %v7437_v51 = vld [vmem:[#allocation2 + $0x18c] ss:$16 sps:$4 sm:$0xff]   ;;  %v7432_v52 = vld [vmem:[#allocation2 + $0x180] ss:$16 sps:$4 sm:$0xff]  }
  0x5d   :  { %v7435_v53 = vld [vmem:[#allocation2 + $0x188] ss:$16 sps:$4 sm:$0xff]   ;;  %v7440_v54 = vld [vmem:[#allocation2 + $0x1a4] ss:$16 sps:$4 sm:$0xff]   ;;  %v7443_v55 = vld [vmem:[#allocation2 + $0x1ac] ss:$16 sps:$4 sm:$0xff]  }
  0x5e   :  { %334 = vmatpush1.bf16.msra.mxu0 %v7387_v19  ;;  %377 = vmatpush1.bf16.msra.mxu1 %v7388_v20  ;;  %v7438_v56 = vld [vmem:[#allocation2 + $0x1a0] ss:$16 sps:$4 sm:$0xff]   ;;  %v7441_v57 = vld [vmem:[#allocation2 + $0x1a8] ss:$16 sps:$4 sm:$0xff]   ;;  %v7446_v58 = vld [vmem:[#allocation2 + $0x1c4] ss:$16 sps:$4 sm:$0xff]  }
  0x5f   :  { %335 = vmatprep.subr.bf16.mxu0 %v7389_v21  ;;  %378 = vmatprep.subr.bf16.mxu1 %v7391_v22  ;;  %v7449_v59 = vld [vmem:[#allocation2 + $0x1cc] ss:$16 sps:$4 sm:$0xff]   ;;  %v7444_v60 = vld [vmem:[#allocation2 + $0x1c0] ss:$16 sps:$4 sm:$0xff]   ;;  %v7447_v61 = vld [vmem:[#allocation2 + $0x1c8] ss:$16 sps:$4 sm:$0xff]  }
  0x60   :  { %v7452_v62 = vld [vmem:[#allocation2 + $0x1e4] ss:$16 sps:$4 sm:$0xff]   ;;  %v7455_v63 = vld [vmem:[#allocation2 + $0x1ec] ss:$16 sps:$4 sm:$0xff]   ;;  %v7450_v1 = vld [vmem:[#allocation2 + $0x1e0] ss:$16 sps:$4 sm:$0xff]  }
  0x61   :  { %v7453_v2 = vld [vmem:[#allocation2 + $0x1e8] ss:$16 sps:$4 sm:$0xff]   ;;  %v7459_v3 = vld [vmem:[#allocation2 + $0x204] ss:$16 sps:$4 sm:$0xff]   ;;  %v7462_v4 = vld [vmem:[#allocation2 + $0x20c] ss:$16 sps:$4 sm:$0xff]  }
  0x62   :  { %336 = vmatpush1.bf16.msra.mxu0 %v7393_v23  ;;  %379 = vmatpush1.bf16.msra.mxu1 %v7394_v24  ;;  %v7456_v5 = vld [vmem:[%s10725_s0 + $0x8] sm:$0xff]   ;;  %v7457_v6 = vld [vmem:[#allocation2 + $0x200] ss:$16 sps:$4 sm:$0xff]   ;;  %v7465_v8 = vld [vmem:[#allocation2 + $0x224] ss:$16 sps:$4 sm:$0xff]  }
  0x63   :  { %337 = vmatprep.subr.bf16.mxu0 %v7395_v25  ;;  %380 = vmatprep.subr.bf16.mxu1 %v7397_v26  ;;  %v7460_v7 = vld [vmem:[#allocation2 + $0x208] ss:$16 sps:$4 sm:$0xff]   ;;  %v7468_v9 = vld [vmem:[#allocation2 + $0x22c] ss:$16 sps:$4 sm:$0xff]   ;;  %v7463_v10 = vld [vmem:[#allocation2 + $0x220] ss:$16 sps:$4 sm:$0xff]  }
  0x64   :  { %v7466_v11 = vld [vmem:[#allocation2 + $0x228] ss:$16 sps:$4 sm:$0xff]   ;;  %v7471_v12 = vld [vmem:[#allocation2 + $0x244] ss:$16 sps:$4 sm:$0xff]   ;;  %v7474_v13 = vld [vmem:[#allocation2 + $0x24c] ss:$16 sps:$4 sm:$0xff]  }
  0x65   :  { %v7469_v14 = vld [vmem:[#allocation2 + $0x240] ss:$16 sps:$4 sm:$0xff]   ;;  %v7472_v15 = vld [vmem:[#allocation2 + $0x248] ss:$16 sps:$4 sm:$0xff]   ;;  %v7477_v16 = vld [vmem:[#allocation2 + $0x264] ss:$16 sps:$4 sm:$0xff]  }
  0x66   :  { %338 = vmatpush1.bf16.msra.mxu0 %v7399_v27  ;;  %381 = vmatpush1.bf16.msra.mxu1 %v7400_v28  ;;  %v7480_v17 = vld [vmem:[#allocation2 + $0x26c] ss:$16 sps:$4 sm:$0xff]   ;;  %v7475_v18 = vld [vmem:[#allocation2 + $0x260] ss:$16 sps:$4 sm:$0xff]   ;;  %v7478_v19 = vld [vmem:[#allocation2 + $0x268] ss:$16 sps:$4 sm:$0xff]  }
  0x67   :  { %339 = vmatprep.subr.bf16.mxu0 %v7401_v29  ;;  %382 = vmatprep.subr.bf16.mxu1 %v7403_v30  ;;  %v7483_v20 = vld [vmem:[#allocation2 + $0x284] ss:$16 sps:$4 sm:$0xff]   ;;  %v7486_v21 = vld [vmem:[#allocation2 + $0x28c] ss:$16 sps:$4 sm:$0xff]   ;;  %v7481_v22 = vld [vmem:[#allocation2 + $0x280] ss:$16 sps:$4 sm:$0xff]  }
  0x68   :  { %v7484_v23 = vld [vmem:[#allocation2 + $0x288] ss:$16 sps:$4 sm:$0xff]   ;;  %v7489_v24 = vld [vmem:[#allocation2 + $0x2a4] ss:$16 sps:$4 sm:$0xff]   ;;  %v7492_v25 = vld [vmem:[#allocation2 + $0x2ac] ss:$16 sps:$4 sm:$0xff]  }
  0x69   :  { %v7487_v26 = vld [vmem:[#allocation2 + $0x2a0] ss:$16 sps:$4 sm:$0xff]   ;;  %v7490_v27 = vld [vmem:[#allocation2 + $0x2a8] ss:$16 sps:$4 sm:$0xff]   ;;  %v7495_v28 = vld [vmem:[#allocation2 + $0x2c4] ss:$16 sps:$4 sm:$0xff]  }
  0x6a   :  { %340 = vmatpush1.bf16.msra.mxu0 %v7405_v31  ;;  %383 = vmatpush1.bf16.msra.mxu1 %v7406_v32  ;;  %v7498_v29 = vld [vmem:[#allocation2 + $0x2cc] ss:$16 sps:$4 sm:$0xff]   ;;  %v7493_v30 = vld [vmem:[#allocation2 + $0x2c0] ss:$16 sps:$4 sm:$0xff]   ;;  %v7496_v31 = vld [vmem:[#allocation2 + $0x2c8] ss:$16 sps:$4 sm:$0xff]  }
  0x6b   :  { %636 = vmatprep.subr.bf16.mxu0 %v7410_v33  ;;  %679 = vmatprep.subr.bf16.mxu1 %v7413_v34  ;;  %v7501_v32 = vld [vmem:[#allocation2 + $0x2e4] ss:$16 sps:$4 sm:$0xff]   ;;  %v7504_v33 = vld [vmem:[#allocation2 + $0x2ec] ss:$16 sps:$4 sm:$0xff]   ;;  %v7499_v34 = vld [vmem:[#allocation2 + $0x2e0] ss:$16 sps:$4 sm:$0xff]  }
  0x6d   :  { %358 = vmatmul.mubr.bf16.vlgmr.msra.gmra.mrb[0].mxu0 %v7407_v35  ;;  %401 = vmatmul.mubr.bf16.vlgmr.msra.gmra.mrb[0].mxu1 %v7407_v35  ;;  %v7502_v35 = vld [vmem:[#allocation2 + $0x2e8] ss:$16 sps:$4 sm:$0xff]  }
  0x6e   :  { %637 = vmatpush1.bf16.msra.mxu0 %v7408_v36  ;;  %680 = vmatpush1.bf16.msra.mxu1 %v7411_v37  ;;  %v8739_v36 = vld [vmem:[#allocation5 + $0x4] ss:$16 sps:$4 sm:$0xff]   ;;  %v8741_v37 = vld [vmem:[#allocation5 + $0xc] ss:$16 sps:$4 sm:$0xff]  }
  0x6f   :  { %638 = vmatprep.subr.bf16.mxu0 %v7416_v38  ;;  %681 = vmatprep.subr.bf16.mxu1 %v7419_v39  ;;  %v7505_v38 = vld [vmem:[%s10725_s0 + $0x10] sm:$0xff]  }
  0x70   :  { %668 = vmatprep.mubr.bf16.mxu0 %v10740_v0  ;;  %711 = vmatprep.mubr.bf16.mxu1 %v10740_v0  ;;  %v8746_v39 = vld [vmem:[#allocation5] ss:$16 sps:$4 sm:$0xff]  }
  0x72   :  { %639 = vmatpush1.bf16.msra.mxu0 %v7414_v40  ;;  %682 = vmatpush1.bf16.msra.mxu1 %v7417_v41  ;;  %v8748_v40 = vld [vmem:[#allocation5 + $0x8] ss:$16 sps:$4 sm:$0xff]   ;;  %v8750_v41 = vld [vmem:[#allocation5 + $0x24] ss:$16 sps:$4 sm:$0xff]  }
  0x73   :  { %640 = vmatprep.subr.bf16.mxu0 %v7422_v42  ;;  %683 = vmatprep.subr.bf16.mxu1 %v7425_v43  ;;  %v8754_v42 = vld [vmem:[#allocation5 + $0x2c] ss:$16 sps:$4 sm:$0xff]   ;;  %v8756_v43 = vld [vmem:[#allocation5 + $0x20] ss:$16 sps:$4 sm:$0xff]  }
  0x76   :  { %641 = vmatpush1.bf16.msra.mxu0 %v7420_v44  ;;  %684 = vmatpush1.bf16.msra.mxu1 %v7423_v45  ;;  %v8760_v44 = vld [vmem:[#allocation5 + $0x28] ss:$16 sps:$4 sm:$0xff]   ;;  %v8764_v45 = vld [vmem:[#allocation5 + $0x44] ss:$16 sps:$4 sm:$0xff]  }
  0x77   :  { %642 = vmatprep.subr.bf16.mxu0 %v7428_v46  ;;  %685 = vmatprep.subr.bf16.mxu1 %v7431_v47  ;;  %v8766_v46 = vld [vmem:[#allocation5 + $0x4c] ss:$16 sps:$4 sm:$0xff]   ;;  %v8770_v47 = vld [vmem:[#allocation5 + $0x40] ss:$16 sps:$4 sm:$0xff]  }
  0x7a   :  { %643 = vmatpush1.bf16.msra.mxu0 %v7426_v48  ;;  %686 = vmatpush1.bf16.msra.mxu1 %v7429_v49  ;;  %v8772_v48 = vld [vmem:[#allocation5 + $0x48] ss:$16 sps:$4 sm:$0xff]   ;;  %v8776_v49 = vld [vmem:[#allocation5 + $0x64] ss:$16 sps:$4 sm:$0xff]  }
  0x7b   :  { %644 = vmatprep.subr.bf16.mxu0 %v7434_v50  ;;  %687 = vmatprep.subr.bf16.mxu1 %v7437_v51  ;;  %v8780_v50 = vld [vmem:[#allocation5 + $0x6c] ss:$16 sps:$4 sm:$0xff]   ;;  %v8782_v51 = vld [vmem:[#allocation5 + $0x60] ss:$16 sps:$4 sm:$0xff]  }
  0x7e   :  { %645 = vmatpush1.bf16.msra.mxu0 %v7432_v52  ;;  %688 = vmatpush1.bf16.msra.mxu1 %v7435_v53  ;;  %v8786_v52 = vld [vmem:[#allocation5 + $0x68] ss:$16 sps:$4 sm:$0xff]   ;;  %v8790_v53 = vld [vmem:[#allocation5 + $0x84] ss:$16 sps:$4 sm:$0xff]  }
  0x7f   :  { %646 = vmatprep.subr.bf16.mxu0 %v7440_v54  ;;  %689 = vmatprep.subr.bf16.mxu1 %v7443_v55  ;;  %v8792_v54 = vld [vmem:[#allocation5 + $0x8c] ss:$16 sps:$4 sm:$0xff]   ;;  %v8794_v55 = vld [vmem:[#allocation5 + $0x80] ss:$16 sps:$4 sm:$0xff]  }
  0x82   :  { %647 = vmatpush1.bf16.msra.mxu0 %v7438_v56  ;;  %690 = vmatpush1.bf16.msra.mxu1 %v7441_v57  ;;  %v8796_v56 = vld [vmem:[#allocation5 + $0x88] ss:$16 sps:$4 sm:$0xff]   ;;  %v8800_v57 = vld [vmem:[#allocation5 + $0xa4] ss:$16 sps:$4 sm:$0xff]  }
  0x83   :  { %648 = vmatprep.subr.bf16.mxu0 %v7446_v58  ;;  %691 = vmatprep.subr.bf16.mxu1 %v7449_v59  ;;  %v8804_v58 = vld [vmem:[#allocation5 + $0xac] ss:$16 sps:$4 sm:$0xff]   ;;  %v8806_v59 = vld [vmem:[#allocation5 + $0xa0] ss:$16 sps:$4 sm:$0xff]  }
  0x86   :  { %649 = vmatpush1.bf16.msra.mxu0 %v7444_v60  ;;  %692 = vmatpush1.bf16.msra.mxu1 %v7447_v61  ;;  %v8810_v60 = vld [vmem:[#allocation5 + $0xa8] ss:$16 sps:$4 sm:$0xff]   ;;  %v8814_v61 = vld [vmem:[#allocation5 + $0xc4] ss:$16 sps:$4 sm:$0xff]  }
  0x87   :  { %650 = vmatprep.subr.bf16.mxu0 %v7452_v62  ;;  %693 = vmatprep.subr.bf16.mxu1 %v7455_v63  ;;  %v8816_v62 = vld [vmem:[#allocation5 + $0xcc] ss:$16 sps:$4 sm:$0xff]   ;;  %v8818_v63 = vld [vmem:[#allocation5 + $0xc0] ss:$16 sps:$4 sm:$0xff]  }
  0x8a   :  { %651 = vmatpush1.bf16.msra.mxu0 %v7450_v1  ;;  %694 = vmatpush1.bf16.msra.mxu1 %v7453_v2  ;;  %v8820_v1 = vld [vmem:[#allocation5 + $0xc8] ss:$16 sps:$4 sm:$0xff]   ;;  %v8824_v2 = vld [vmem:[#allocation5 + $0xe4] ss:$16 sps:$4 sm:$0xff]  }
  0x8b   :  { %947 = vmatprep.subr.bf16.mxu0 %v7459_v3  ;;  %990 = vmatprep.subr.bf16.mxu1 %v7462_v4  ;;  %v8828_v3 = vld [vmem:[#allocation5 + $0xec] ss:$16 sps:$4 sm:$0xff]   ;;  %v8830_v4 = vld [vmem:[#allocation5 + $0xe0] ss:$16 sps:$4 sm:$0xff]  }
  0x8d   :  { %669 = vmatmul.mubr.bf16.vlgmr.msra.gmra.mrb[4].mxu0 %v7456_v5  ;;  %712 = vmatmul.mubr.bf16.vlgmr.msra.gmra.mrb[4].mxu1 %v7456_v5  ;;  %v8834_v5 = vld [vmem:[#allocation5 + $0xe8] ss:$16 sps:$4 sm:$0xff]  }
  0x8e   :  { %948 = vmatpush1.bf16.msra.mxu0 %v7457_v6  ;;  %991 = vmatpush1.bf16.msra.mxu1 %v7460_v7  ;;  %v8838_v6 = vld [vmem:[#allocation5 + $0x104] ss:$16 sps:$4 sm:$0xff]   ;;  %v8840_v7 = vld [vmem:[#allocation5 + $0x10c] ss:$16 sps:$4 sm:$0xff]  }
  0x8f   :  { %949 = vmatprep.subr.bf16.mxu0 %v7465_v8  ;;  %992 = vmatprep.subr.bf16.mxu1 %v7468_v9  ;;  %v7558_v8 = vld [vmem:[#allocation5 + $0x100] ss:$16 sps:$4 sm:$0xff]   ;;  %v7559_v9 = vld [vmem:[#allocation5 + $0x108] ss:$16 sps:$4 sm:$0xff]  }
  0x90   :  { %979 = vmatprep.mubr.bf16.mxu0 %v10740_v0  ;;  %1022 = vmatprep.mubr.bf16.mxu1 %v10740_v0 }
  0x92   :  { %950 = vmatpush1.bf16.msra.mxu0 %v7463_v10  ;;  %993 = vmatpush1.bf16.msra.mxu1 %v7466_v11  ;;  %v7560_v10 = vld [vmem:[#allocation5 + $0x124] ss:$16 sps:$4 sm:$0xff]   ;;  %v7562_v11 = vld [vmem:[#allocation5 + $0x12c] ss:$16 sps:$4 sm:$0xff]  }
  0x93   :  { %951 = vmatprep.subr.bf16.mxu0 %v7471_v12  ;;  %994 = vmatprep.subr.bf16.mxu1 %v7474_v13  ;;  %v7564_v12 = vld [vmem:[#allocation5 + $0x120] ss:$16 sps:$4 sm:$0xff]   ;;  %v7565_v13 = vld [vmem:[#allocation5 + $0x128] ss:$16 sps:$4 sm:$0xff]  }
  0x96   :  { %952 = vmatpush1.bf16.msra.mxu0 %v7469_v14  ;;  %995 = vmatpush1.bf16.msra.mxu1 %v7472_v15  ;;  %v7566_v14 = vld [vmem:[#allocation5 + $0x144] ss:$16 sps:$4 sm:$0xff]   ;;  %v7568_v15 = vld [vmem:[#allocation5 + $0x14c] ss:$16 sps:$4 sm:$0xff]  }
  0x97   :  { %953 = vmatprep.subr.bf16.mxu0 %v7477_v16  ;;  %996 = vmatprep.subr.bf16.mxu1 %v7480_v17  ;;  %v7570_v16 = vld [vmem:[#allocation5 + $0x140] ss:$16 sps:$4 sm:$0xff]   ;;  %v7571_v17 = vld [vmem:[#allocation5 + $0x148] ss:$16 sps:$4 sm:$0xff]  }
  0x9a   :  { %954 = vmatpush1.bf16.msra.mxu0 %v7475_v18  ;;  %997 = vmatpush1.bf16.msra.mxu1 %v7478_v19  ;;  %v7572_v18 = vld [vmem:[#allocation5 + $0x164] ss:$16 sps:$4 sm:$0xff]   ;;  %v7574_v19 = vld [vmem:[#allocation5 + $0x16c] ss:$16 sps:$4 sm:$0xff]  }
  0x9b   :  { %955 = vmatprep.subr.bf16.mxu0 %v7483_v20  ;;  %998 = vmatprep.subr.bf16.mxu1 %v7486_v21  ;;  %v7576_v20 = vld [vmem:[#allocation5 + $0x160] ss:$16 sps:$4 sm:$0xff]   ;;  %v7577_v21 = vld [vmem:[#allocation5 + $0x168] ss:$16 sps:$4 sm:$0xff]  }
  0x9e   :  { %956 = vmatpush1.bf16.msra.mxu0 %v7481_v22  ;;  %999 = vmatpush1.bf16.msra.mxu1 %v7484_v23  ;;  %v7578_v22 = vld [vmem:[#allocation5 + $0x184] ss:$16 sps:$4 sm:$0xff]   ;;  %v7580_v23 = vld [vmem:[#allocation5 + $0x18c] ss:$16 sps:$4 sm:$0xff]  }
  0x9f   :  { %957 = vmatprep.subr.bf16.mxu0 %v7489_v24  ;;  %1000 = vmatprep.subr.bf16.mxu1 %v7492_v25  ;;  %v7582_v24 = vld [vmem:[#allocation5 + $0x180] ss:$16 sps:$4 sm:$0xff]   ;;  %v7583_v25 = vld [vmem:[#allocation5 + $0x188] ss:$16 sps:$4 sm:$0xff]  }
  0xa2   :  { %958 = vmatpush1.bf16.msra.mxu0 %v7487_v26  ;;  %1001 = vmatpush1.bf16.msra.mxu1 %v7490_v27  ;;  %v7584_v26 = vld [vmem:[#allocation5 + $0x1a4] ss:$16 sps:$4 sm:$0xff]   ;;  %v7586_v27 = vld [vmem:[#allocation5 + $0x1ac] ss:$16 sps:$4 sm:$0xff]  }
  0xa3   :  { %959 = vmatprep.subr.bf16.mxu0 %v7495_v28  ;;  %1002 = vmatprep.subr.bf16.mxu1 %v7498_v29  ;;  %v7588_v28 = vld [vmem:[#allocation5 + $0x1a0] ss:$16 sps:$4 sm:$0xff]   ;;  %v7589_v29 = vld [vmem:[#allocation5 + $0x1a8] ss:$16 sps:$4 sm:$0xff]  }
  0xa6   :  { %960 = vmatpush1.bf16.msra.mxu0 %v7493_v30  ;;  %1003 = vmatpush1.bf16.msra.mxu1 %v7496_v31  ;;  %v7590_v30 = vld [vmem:[#allocation5 + $0x1c4] ss:$16 sps:$4 sm:$0xff]   ;;  %v7592_v31 = vld [vmem:[#allocation5 + $0x1cc] ss:$16 sps:$4 sm:$0xff]  }
  0xa7   :  { %961 = vmatprep.subr.bf16.mxu0 %v7501_v32  ;;  %1004 = vmatprep.subr.bf16.mxu1 %v7504_v33  ;;  %v7594_v32 = vld [vmem:[#allocation5 + $0x1c0] ss:$16 sps:$4 sm:$0xff]   ;;  %v7595_v33 = vld [vmem:[#allocation5 + $0x1c8] ss:$16 sps:$4 sm:$0xff]  }
  0xaa   :  { %962 = vmatpush1.bf16.msra.mxu0 %v7499_v34  ;;  %1005 = vmatpush1.bf16.msra.mxu1 %v7502_v35  ;;  %v7596_v34 = vld [vmem:[#allocation5 + $0x1e4] ss:$16 sps:$4 sm:$0xff]   ;;  %v7598_v35 = vld [vmem:[#allocation5 + $0x1ec] ss:$16 sps:$4 sm:$0xff]  }
  0xab   :  { %1225 = vmatprep.subr.bf16.mxu0 %v8739_v36  ;;  %1266 = vmatprep.subr.bf16.mxu1 %v8741_v37 }
  0xad   :  { %980 = vmatmul.mubr.bf16.vlgmr.msra.gmra.mrb[8].mxu0 %v7505_v38  ;;  %1023 = vmatmul.mubr.bf16.vlgmr.msra.gmra.mrb[8].mxu1 %v7505_v38  ;;  %v7600_v38 = vld [vmem:[#allocation5 + $0x1e0] ss:$16 sps:$4 sm:$0xff]  }
  0xae   :  { %1226 = vmatpush1.bf16.msra.mxu0 %v8746_v39  ;;  %1267 = vmatpush1.bf16.msra.mxu1 %v8748_v40 }
  0xaf   :  { %1227 = vmatprep.subr.bf16.mxu0 %v8750_v41  ;;  %1268 = vmatprep.subr.bf16.mxu1 %v8754_v42 }
  0xb0   :  { %1257 = vmatprep.mubr.bf16.mxu0 %v10740_v0  ;;  %1298 = vmatprep.mubr.bf16.mxu1 %v10740_v0 }
  0xb2   :  { %1228 = vmatpush1.bf16.msra.mxu0 %v8756_v43  ;;  %1269 = vmatpush1.bf16.msra.mxu1 %v8760_v44 }
  0xb3   :  { %1229 = vmatprep.subr.bf16.mxu0 %v8764_v45  ;;  %1270 = vmatprep.subr.bf16.mxu1 %v8766_v46 }
  0xb6   :  { %1230 = vmatpush1.bf16.msra.mxu0 %v8770_v47  ;;  %1271 = vmatpush1.bf16.msra.mxu1 %v8772_v48 }
  0xb7   :  { %1231 = vmatprep.subr.bf16.mxu0 %v8776_v49  ;;  %1272 = vmatprep.subr.bf16.mxu1 %v8780_v50 }
  0xba   :  { %1232 = vmatpush1.bf16.msra.mxu0 %v8782_v51  ;;  %1273 = vmatpush1.bf16.msra.mxu1 %v8786_v52 }
  0xbb   :  { %1233 = vmatprep.subr.bf16.mxu0 %v8790_v53  ;;  %1274 = vmatprep.subr.bf16.mxu1 %v8792_v54 }
  0xbe   :  { %1234 = vmatpush1.bf16.msra.mxu0 %v8794_v55  ;;  %1275 = vmatpush1.bf16.msra.mxu1 %v8796_v56 }
  0xbf   :  { %1235 = vmatprep.subr.bf16.mxu0 %v8800_v57  ;;  %1276 = vmatprep.subr.bf16.mxu1 %v8804_v58 }
  0xc2   :  { %1236 = vmatpush1.bf16.msra.mxu0 %v8806_v59  ;;  %1277 = vmatpush1.bf16.msra.mxu1 %v8810_v60 }
  0xc3   :  { %1237 = vmatprep.subr.bf16.mxu0 %v8814_v61  ;;  %1278 = vmatprep.subr.bf16.mxu1 %v8816_v62 }
  0xc6   :  { %1238 = vmatpush1.bf16.msra.mxu0 %v8818_v63  ;;  %1279 = vmatpush1.bf16.msra.mxu1 %v8820_v1 }
  0xc7   :  { %1239 = vmatprep.subr.bf16.mxu0 %v8824_v2  ;;  %1280 = vmatprep.subr.bf16.mxu1 %v8828_v3 }
  0xca   :  { %1240 = vmatpush1.bf16.msra.mxu0 %v8830_v4  ;;  %1281 = vmatpush1.bf16.msra.mxu1 %v8834_v5 }
  0xcb   :  { %1528 = vmatprep.subr.bf16.mxu0 %v8838_v6  ;;  %1569 = vmatprep.subr.bf16.mxu1 %v8840_v7 }
  0xcd   :  { %1258 = vmatmul.mubr.bf16.vlgmr.msra.gmra.mrb[12].mxu0 %v10740_v0  ;;  %1299 = vmatmul.mubr.bf16.vlgmr.msra.gmra.mrb[12].mxu1 %v10740_v0 }
  0xce   :  { %1529 = vmatpush1.bf16.msra.mxu0 %v7558_v8  ;;  %1570 = vmatpush1.bf16.msra.mxu1 %v7559_v9  ;;  %v7601_v8 = vld [vmem:[#allocation5 + $0x1e8] ss:$16 sps:$4 sm:$0xff]   ;;  %v7602_v9 = vld [vmem:[#allocation5 + $0x204] ss:$16 sps:$4 sm:$0xff]  }
  0xcf   :  { %1530 = vmatprep.subr.bf16.mxu0 %v7560_v10  ;;  %1571 = vmatprep.subr.bf16.mxu1 %v7562_v11  ;;  %v7604_v10 = vld [vmem:[#allocation5 + $0x20c] ss:$16 sps:$4 sm:$0xff]   ;;  %v7606_v11 = vld [vmem:[#allocation5 + $0x200] ss:$16 sps:$4 sm:$0xff]  }
  0xd0   :  { %1560 = vmatprep.mubr.bf16.mxu0 %v10740_v0  ;;  %1601 = vmatprep.mubr.bf16.mxu1 %v10740_v0 }
  0xd2   :  { %1531 = vmatpush1.bf16.msra.mxu0 %v7564_v12  ;;  %1572 = vmatpush1.bf16.msra.mxu1 %v7565_v13  ;;  %v7607_v12 = vld [vmem:[#allocation5 + $0x208] ss:$16 sps:$4 sm:$0xff]   ;;  %v7608_v13 = vld [vmem:[#allocation5 + $0x224] ss:$16 sps:$4 sm:$0xff]  }
  0xd3   :  { %1532 = vmatprep.subr.bf16.mxu0 %v7566_v14  ;;  %1573 = vmatprep.subr.bf16.mxu1 %v7568_v15  ;;  %v7610_v14 = vld [vmem:[#allocation5 + $0x22c] ss:$16 sps:$4 sm:$0xff]   ;;  %v7612_v15 = vld [vmem:[#allocation5 + $0x220] ss:$16 sps:$4 sm:$0xff]  }
  0xd6   :  { %1533 = vmatpush1.bf16.msra.mxu0 %v7570_v16  ;;  %1574 = vmatpush1.bf16.msra.mxu1 %v7571_v17  ;;  %v7613_v16 = vld [vmem:[#allocation5 + $0x228] ss:$16 sps:$4 sm:$0xff]   ;;  %v8852_v17 = vld [vmem:[#allocation5 + $0x244] ss:$16 sps:$4 sm:$0xff]  }
  0xd7   :  { %1534 = vmatprep.subr.bf16.mxu0 %v7572_v18  ;;  %1575 = vmatprep.subr.bf16.mxu1 %v7574_v19  ;;  %v8854_v18 = vld [vmem:[#allocation5 + $0x24c] ss:$16 sps:$4 sm:$0xff]   ;;  %v8856_v19 = vld [vmem:[#allocation5 + $0x240] ss:$16 sps:$4 sm:$0xff]  }
  0xda   :  { %1535 = vmatpush1.bf16.msra.mxu0 %v7576_v20  ;;  %1576 = vmatpush1.bf16.msra.mxu1 %v7577_v21  ;;  %v8858_v20 = vld [vmem:[#allocation5 + $0x248] ss:$16 sps:$4 sm:$0xff]   ;;  %v8862_v21 = vld [vmem:[#allocation5 + $0x264] ss:$16 sps:$4 sm:$0xff]  }
  0xdb   :  { %1536 = vmatprep.subr.bf16.mxu0 %v7578_v22  ;;  %1577 = vmatprep.subr.bf16.mxu1 %v7580_v23  ;;  %v8864_v22 = vld [vmem:[#allocation5 + $0x26c] ss:$16 sps:$4 sm:$0xff]   ;;  %v8868_v23 = vld [vmem:[#allocation5 + $0x260] ss:$16 sps:$4 sm:$0xff]  }
  0xde   :  { %1537 = vmatpush1.bf16.msra.mxu0 %v7582_v24  ;;  %1578 = vmatpush1.bf16.msra.mxu1 %v7583_v25  ;;  %v8870_v24 = vld [vmem:[#allocation5 + $0x268] ss:$16 sps:$4 sm:$0xff]   ;;  %v8872_v25 = vld [vmem:[#allocation5 + $0x284] ss:$16 sps:$4 sm:$0xff]  }
  0xdf   :  { %1538 = vmatprep.subr.bf16.mxu0 %v7584_v26  ;;  %1579 = vmatprep.subr.bf16.mxu1 %v7586_v27  ;;  %v8874_v26 = vld [vmem:[#allocation5 + $0x28c] ss:$16 sps:$4 sm:$0xff]   ;;  %v8880_v27 = vld [vmem:[#allocation5 + $0x280] ss:$16 sps:$4 sm:$0xff]  }
  0xe2   :  { %1539 = vmatpush1.bf16.msra.mxu0 %v7588_v28  ;;  %1580 = vmatpush1.bf16.msra.mxu1 %v7589_v29  ;;  %v8882_v28 = vld [vmem:[#allocation5 + $0x288] ss:$16 sps:$4 sm:$0xff]   ;;  %v8884_v29 = vld [vmem:[#allocation5 + $0x2a4] ss:$16 sps:$4 sm:$0xff]  }
  0xe3   :  { %1540 = vmatprep.subr.bf16.mxu0 %v7590_v30  ;;  %1581 = vmatprep.subr.bf16.mxu1 %v7592_v31  ;;  %v8886_v30 = vld [vmem:[#allocation5 + $0x2ac] ss:$16 sps:$4 sm:$0xff]   ;;  %v8892_v31 = vld [vmem:[#allocation5 + $0x2a0] ss:$16 sps:$4 sm:$0xff]  }
  0xe6   :  { %1541 = vmatpush1.bf16.msra.mxu0 %v7594_v32  ;;  %1582 = vmatpush1.bf16.msra.mxu1 %v7595_v33  ;;  %v8894_v32 = vld [vmem:[#allocation5 + $0x2a8] ss:$16 sps:$4 sm:$0xff]   ;;  %v8896_v33 = vld [vmem:[#allocation5 + $0x2c4] ss:$16 sps:$4 sm:$0xff]  }
  0xe7   :  { %1542 = vmatprep.subr.bf16.mxu0 %v7596_v34  ;;  %1583 = vmatprep.subr.bf16.mxu1 %v7598_v35  ;;  %v8898_v34 = vld [vmem:[#allocation5 + $0x2cc] ss:$16 sps:$4 sm:$0xff]   ;;  %v8904_v35 = vld [vmem:[#allocation5 + $0x2c0] ss:$16 sps:$4 sm:$0xff]  }
  0xea   :  { %1543 = vmatpush1.bf16.msra.mxu0 %v7600_v38  ;;  %1584 = vmatpush1.bf16.msra.mxu1 %v7601_v8  ;;  %v8906_v38 = vld [vmem:[#allocation5 + $0x2c8] ss:$16 sps:$4 sm:$0xff]   ;;  %v8908_v8 = vld [vmem:[#allocation5 + $0x2e4] ss:$16 sps:$4 sm:$0xff]  }
  0xeb   :  { %1831 = vmatprep.subr.bf16.mxu0 %v7602_v9  ;;  %1872 = vmatprep.subr.bf16.mxu1 %v7604_v10  ;;  %v8910_v9 = vld [vmem:[#allocation5 + $0x2ec] ss:$16 sps:$4 sm:$0xff]   ;;  %v8916_v10 = vld [vmem:[#allocation5 + $0x2e0] ss:$16 sps:$4 sm:$0xff]  }
  0xed   :  { %1561 = vmatmul.mubr.bf16.vlgmr.msra.gmra.mrb[16].mxu0 %v10740_v0  ;;  %1602 = vmatmul.mubr.bf16.vlgmr.msra.gmra.mrb[16].mxu1 %v10740_v0 }
  0xee   :  { %1832 = vmatpush1.bf16.msra.mxu0 %v7606_v11  ;;  %1873 = vmatpush1.bf16.msra.mxu1 %v7607_v12  ;;  %v8918_v11 = vld [vmem:[#allocation5 + $0x2e8] ss:$16 sps:$4 sm:$0xff]  }
  0xef   :  { %1833 = vmatprep.subr.bf16.mxu0 %v7608_v13  ;;  %1874 = vmatprep.subr.bf16.mxu1 %v7610_v14 }
  0xf0   :  { %1863 = vmatprep.mubr.bf16.mxu0 %v10740_v0  ;;  %1904 = vmatprep.mubr.bf16.mxu1 %v10740_v0 }
  0xf2   :  { %1834 = vmatpush1.bf16.msra.mxu0 %v7612_v15  ;;  %1875 = vmatpush1.bf16.msra.mxu1 %v7613_v16 }
  0xf3   :  { %1835 = vmatprep.subr.bf16.mxu0 %v8852_v17  ;;  %1876 = vmatprep.subr.bf16.mxu1 %v8854_v18 }
  0xf6   :  { %1836 = vmatpush1.bf16.msra.mxu0 %v8856_v19  ;;  %1877 = vmatpush1.bf16.msra.mxu1 %v8858_v20 }
  0xf7   :  { %1837 = vmatprep.subr.bf16.mxu0 %v8862_v21  ;;  %1878 = vmatprep.subr.bf16.mxu1 %v8864_v22 }
  0xfa   :  { %1838 = vmatpush1.bf16.msra.mxu0 %v8868_v23  ;;  %1879 = vmatpush1.bf16.msra.mxu1 %v8870_v24 }
  0xfb   :  { %1839 = vmatprep.subr.bf16.mxu0 %v8872_v25  ;;  %1880 = vmatprep.subr.bf16.mxu1 %v8874_v26 }
  0xfe   :  { %1840 = vmatpush1.bf16.msra.mxu0 %v8880_v27  ;;  %1881 = vmatpush1.bf16.msra.mxu1 %v8882_v28 }
  0xff   :  { %1841 = vmatprep.subr.bf16.mxu0 %v8884_v29  ;;  %1882 = vmatprep.subr.bf16.mxu1 %v8886_v30 }
 0x102   :  { %1842 = vmatpush1.bf16.msra.mxu0 %v8892_v31  ;;  %1883 = vmatpush1.bf16.msra.mxu1 %v8894_v32 }
 0x103   :  { %1843 = vmatprep.subr.bf16.mxu0 %v8896_v33  ;;  %1884 = vmatprep.subr.bf16.mxu1 %v8898_v34 }
 0x106   :  { %1844 = vmatpush1.bf16.msra.mxu0 %v8904_v35  ;;  %1885 = vmatpush1.bf16.msra.mxu1 %v8906_v38 }
 0x107   :  { %1845 = vmatprep.subr.bf16.mxu0 %v8908_v8  ;;  %1886 = vmatprep.subr.bf16.mxu1 %v8910_v9 }
 0x10a   :  { %1846 = vmatpush1.bf16.msra.mxu0 %v8916_v10  ;;  %1887 = vmatpush1.bf16.msra.mxu1 %v8918_v11 }
 0x10b   :  { %1942 = vmatprep.subr.bf16.mxu0 %v8739_v36  ;;  %1983 = vmatprep.subr.bf16.mxu1 %v8741_v37  ;;  %v139_v36 = vlaneseq }
 0x10d   :  { %1864 = vmatmul.mubr.bf16.vlgmr.msra.gmra.mrb[20].mxu0 %v10740_v0  ;;  %1905 = vmatmul.mubr.bf16.vlgmr.msra.gmra.mrb[20].mxu1 %v10740_v0  ;;  %v8964_v37 = vshrl.u32 %v139_v36, 7 }
 0x10e   :  { %1943 = vmatpush1.bf16.msra.mxu0 %v8746_v39  ;;  %1984 = vmatpush1.bf16.msra.mxu1 %v8748_v40 }
 0x10f   :  { %1944 = vmatprep.subr.bf16.mxu0 %v8750_v41  ;;  %1985 = vmatprep.subr.bf16.mxu1 %v8754_v42  ;;  %11027 = vst [vmem:[#allocation15_spill] sm:$0xff] %v8964_v37  ;;  %v8967_v39 = vsub.s32 0, %v8964_v37  ;;  %v8970_v40 = vsub.s32 2, %v8964_v37  ;;  %v137_v41 = vld [vmem:[%s10728_s3] sm:$0xf]  ;;  %v153_v42 = vsub.s32 3, %v8964_v37 }
 0x110   :  { %1974 = vmatprep.mubr.bf16.mxu0 %v10740_v0  ;;  %2015 = vmatprep.mubr.bf16.mxu1 %v10740_v0 }
 0x111   :  { %11028 = vst [vmem:[#allocation16_spill] sm:$0xff] %v8967_v39  ;;  %11029 = vst [vmem:[#allocation17_spill] sm:$0xff] %v8970_v40 }
 0x112   :  { %1945 = vmatpush1.bf16.msra.mxu0 %v8756_v43  ;;  %1986 = vmatpush1.bf16.msra.mxu1 %v8760_v44  ;;  %v8977_v43 = vsub.s32 1, %v8964_v37  ;;  %v142_v44 = vrot.slane %v137_v41, %v8967_v39 }
 0x113   :  { %1946 = vmatprep.subr.bf16.mxu0 %v8764_v45  ;;  %1987 = vmatprep.subr.bf16.mxu1 %v8766_v46  ;;  %v8981_v45 = vrot.slane %v137_v41, %v8970_v40 }
 0x114   :  { %11030 = vst [vmem:[#allocation18_spill] sm:$0xff] %v8977_v43 }
 0x116   :  { %1947 = vmatpush1.bf16.msra.mxu0 %v8770_v47  ;;  %1988 = vmatpush1.bf16.msra.mxu1 %v8772_v48  ;;  %v8985_v48 = vrot.slane %v137_v41, %v153_v42 }
 0x117   :  { %1948 = vmatprep.subr.bf16.mxu0 %v8776_v49  ;;  %1989 = vmatprep.subr.bf16.mxu1 %v8780_v50 }
 0x11a   :  { %1949 = vmatpush1.bf16.msra.mxu0 %v8782_v51  ;;  %1990 = vmatpush1.bf16.msra.mxu1 %v8786_v52  ;;  %v146_v51 = vrot.slane %v137_v41, %v8977_v43  ;;  %v6673_v41 = vld [vmem:[%s10728_s3 + $0x8] sm:$0xf] }
 0x11b   :  { %1950 = vmatprep.subr.bf16.mxu0 %v8790_v53  ;;  %1991 = vmatprep.subr.bf16.mxu1 %v8792_v54 }
 0x11e   :  { %1951 = vmatpush1.bf16.msra.mxu0 %v8794_v55  ;;  %1992 = vmatpush1.bf16.msra.mxu1 %v8796_v56 }
 0x11f   :  { %1952 = vmatprep.subr.bf16.mxu0 %v8800_v57  ;;  %1993 = vmatprep.subr.bf16.mxu1 %v8804_v58 }
 0x122   :  { %1953 = vmatpush1.bf16.msra.mxu0 %v8806_v59  ;;  %1994 = vmatpush1.bf16.msra.mxu1 %v8810_v60  ;;  %v6637_v60 = vld [vmem:[%s10728_s3 + $0x4] sm:$0xf] }
 0x123   :  { %1954 = vmatprep.subr.bf16.mxu0 %v8814_v61  ;;  %1995 = vmatprep.subr.bf16.mxu1 %v8816_v62  ;;  %v9004_v61 = vrot.slane %v6637_v60, %v8967_v39  ;;  %v9007_v62 = vrot.slane %v6637_v60, %v8970_v40 }
 0x126   :  { %1955 = vmatpush1.bf16.msra.mxu0 %v8818_v63  ;;  %1996 = vmatpush1.bf16.msra.mxu1 %v8820_v1 }
 0x127   :  { %1956 = vmatprep.subr.bf16.mxu0 %v8824_v2  ;;  %1997 = vmatprep.subr.bf16.mxu1 %v8828_v3  ;;  %v9013_v2 = vrot.slane %v6637_v60, %v153_v42 }
 0x12a   :  { %1957 = vmatpush1.bf16.msra.mxu0 %v8830_v4  ;;  %1998 = vmatpush1.bf16.msra.mxu1 %v8834_v5  ;;  %v9020_v5 = vrot.slane %v6637_v60, %v8977_v43 }
 0x12b   :  { %2068 = vmatprep.subr.bf16.mxu0 %v8838_v6  ;;  %2109 = vmatprep.subr.bf16.mxu1 %v8840_v7 }
 0x140   :  { %v359_v46 = vpop.f32.mrb[0].mxu0  ;;  %v8983_v47 = vpop.f32.mrb[0].mxu1 }
 0x141   :  { %v361_v49 = vpop.f32.mrb[1].mxu0  ;;  %v8987_v50 = vpop.f32.mrb[1].mxu1 }
 0x142   :  { %v363_v52 = vpop.f32.mrb[2].mxu0  ;;  %v406_v53 = vpop.f32.mrb[2].mxu1 }
 0x143   :  { %v8990_v54 = vadd.f32 %v363_v52, %v142_v44  ;;  %v365_v55 = vpop.f32.mrb[3].mxu0  ;;  %v8993_v56 = vadd.f32 %v406_v53, %v8981_v45  ;;  %v408_v57 = vpop.f32.mrb[3].mxu1  ;;  %v776_v52 = vrot.slane %v6673_v41, %v153_v42  ;;  %v9038_v53 = vrot.slane %v6673_v41, %v8967_v39 }
 0x144   :  { %v8995_v58 = vadd.f32 %v365_v55, %v146_v51  ;;  %v8998_v59 = vadd.f32 %v408_v57, %v8985_v48  ;;  %v9041_v55 = vrot.slane %v6673_v41, %v8970_v40 }
 0x145   :  { %11031 = vst [vmem:[#allocation19_spill] sm:$0xff] %v8990_v54  ;;  %11032 = vst [vmem:[#allocation20_spill] sm:$0xff] %v8993_v56 }
 0x146   :  { %11033 = vst [vmem:[#allocation21_spill] sm:$0xff] %v8995_v58  ;;  %11034 = vst [vmem:[#allocation22_spill] sm:$0xff] %v8998_v59 }
 0x160   :  { %v9009_v63 = vpop.f32.mrb[4].mxu0  ;;  %v9011_v1 = vpop.f32.mrb[4].mxu1 }
 0x161   :  { %v9015_v3 = vpop.f32.mrb[5].mxu0  ;;  %v9017_v4 = vpop.f32.mrb[5].mxu1 }
 0x162   :  { %v674_v6 = vpop.f32.mrb[6].mxu0  ;;  %v717_v7 = vpop.f32.mrb[6].mxu1 }
 0x163   :  { %v9023_v12 = vadd.f32 %v674_v6, %v9004_v61  ;;  %v676_v13 = vpop.f32.mrb[7].mxu0  ;;  %v9026_v14 = vadd.f32 %v717_v7, %v9007_v62  ;;  %v719_v15 = vpop.f32.mrb[7].mxu1 }
 0x164   :  { %v9029_v16 = vadd.f32 %v676_v13, %v9020_v5  ;;  %v9032_v36 = vadd.f32 %v719_v15, %v9013_v2  ;;  %v9050_v13 = vrot.slane %v6673_v41, %v8977_v43  ;;  %v9067_v41 = vadd.f32 %v361_v49, %v146_v51 }
 0x165   :  { %11035 = vst [vmem:[#allocation23_spill] sm:$0xff] %v9023_v12  ;;  %11036 = vst [vmem:[#allocation24_spill] sm:$0xff] %v9026_v14  ;;  %v9065_v12 = vadd.f32 %v359_v46, %v142_v44  ;;  %v9073_v44 = vadd.f32 %v8983_v47, %v8981_v45  ;;  %v9078_v49 = vadd.f32 %v8987_v50, %v8985_v48 }
 0x166   :  { %11037 = vst [vmem:[#allocation25_spill] sm:$0xff] %v9029_v16  ;;  %11038 = vst [vmem:[#allocation26_spill] sm:$0xff] %v9032_v36  ;;  %v9083_v48 = vadd.f32 %v9009_v63, %v9004_v61  ;;  %v9087_v50 = vadd.f32 %v9015_v3, %v9020_v5  ;;  %v9096_v5 = vadd.f32 %v9011_v1, %v9007_v62  ;;  %v9104_v1 = vld [vmem:[#allocation5 + $0x100] ss:$16 sps:$4 sm:$0xff]  }
 0x167   :  { %11044 = vst [vmem:[#allocation32_spill] sm:$0xff] %v9073_v44  ;;  %11045 = vst [vmem:[#allocation33_spill] sm:$0xff] %v9078_v49 }
 0x180   :  { %v9043_v57 = vpop.f32.mrb[8].mxu0  ;;  %v9045_v60 = vpop.f32.mrb[8].mxu1 }
 0x181   :  { %v9047_v6 = vpop.f32.mrb[9].mxu0  ;;  %v1026_v7 = vpop.f32.mrb[9].mxu1 }
 0x182   :  { %v985_v15 = vpop.f32.mrb[10].mxu0  ;;  %v9052_v0 = vadd.f32 %v1026_v7, %v776_v52  ;;  %v1028_v42 = vpop.f32.mrb[10].mxu1 }
 0x183   :  { %v9055_v37 = vadd.f32 %v985_v15, %v9038_v53  ;;  %v987_v39 = vpop.f32.mrb[11].mxu0  ;;  %v9058_v40 = vadd.f32 %v1028_v42, %v9041_v55  ;;  %v1030_v36 = vpop.f32.mrb[11].mxu1 }
 0x184   :  { %11039 = vst [vmem:[#allocation27_spill] sm:$0xff] %v9052_v0  ;;  %v9061_v14 = vadd.f32 %v987_v39, %v9050_v13  ;;  %v9063_v16 = vadd.f32 %v1030_v36, %v776_v52 }
 0x185   :  { %11040 = vst [vmem:[#allocation28_spill] sm:$0xff] %v9055_v37  ;;  %11041 = vst [vmem:[#allocation29_spill] sm:$0xff] %v9058_v40 }
 0x186   :  { %11042 = vst [vmem:[#allocation30_spill] sm:$0xff] %v9061_v14  ;;  %11043 = vst [vmem:[#allocation31_spill] sm:$0xff] %v9063_v16  ;;  %v9154_v16 = vadd.f32 %v9047_v6, %v9050_v13 }
 0x1a0   :  { %v1259_v7 = vpop.f32.mrb[12].mxu0  ;;  %v1300_v43 = vpop.f32.mrb[12].mxu1 }
 0x1a1   :  { %v1307_v59 = vadd.f32 %v1259_v7, %v9065_v12  ;;  %v1261_v15 = vpop.f32.mrb[13].mxu0  ;;  %v1302_v37 = vpop.f32.mrb[13].mxu1  ;;  %v1309_v46 = vadd.f32 %v1300_v43, %v9073_v44 }
 0x1a2   :  { %v1308_v56 = vadd.f32 %v1261_v15, %v9067_v41  ;;  %v1263_v42 = vpop.f32.mrb[14].mxu0  ;;  %v1304_v40 = vpop.f32.mrb[14].mxu1  ;;  %v1310_v51 = vadd.f32 %v1302_v37, %v9078_v49 }
 0x1a3   :  { %v6739_v58 = vmul.f32 -1.442695, %v1307_v59  ;;  %v1264_v54 = vpop.f32.mrb[15].mxu0  ;;  %v1305_v39 = vpop.f32.mrb[15].mxu1  ;;  %v6741_v36 = vmul.f32 -1.442695, %v1309_v46 }
 0x1a4   :  { %v6740_v14 = vmul.f32 -1.442695, %v1308_v56 }
 0x1a5   :  { %7842 = vpow2.f32 %v6739_v58 }
 0x1a6   :  { %7844 = vpow2.f32 %v6740_v14 }
 0x1a7   :  { %7846 = vtanh.f32 %v1310_v51 }
 0x1a8   :  { %7848 = vpow2.f32 %v6741_v36 }
 0x1af   :  { %v7843_v40 = vpop.eup %7842 }
 0x1b0   :  { %v1320_v59 = vadd.f32 1.0, %v7843_v40  ;;  %v7845_v54 = vpop.eup %7844 }
 0x1b1   :  { %v1321_v56 = vadd.f32 1.0, %v7845_v54  ;;  %v7847_v45 = vpop.eup %7846 }
 0x1b2   :  { %7850 = vrcp.f32 %v1320_v59  ;;  %v7849_v47 = vpop.eup %7848 }
 0x1b3   :  { %7852 = vrcp.f32 %v1321_v56  ;;  %v1322_v52 = vadd.f32 1.0, %v7849_v47 }
 0x1b5   :  { %7854 = vrcp.f32 %v1322_v52 }
 0x1bc   :  { %v7851_v58 = vpop.eup %7850 }
 0x1bd   :  { %v1331_v14 = vmul.f32 %v7851_v58, %v7847_v45  ;;  %v7853_v43 = vpop.eup %7852  ;;  %v9101_v45 = vadd.f32 %v9017_v4, %v9013_v2  ;;  %v9107_v2 = vld [vmem:[#allocation5 + $0x108] ss:$16 sps:$4 sm:$0xff]   ;;  %v9110_v4 = vld [vmem:[#allocation5 + $0x124] ss:$16 sps:$4 sm:$0xff]  }
 0x1be   :  { %v1330_v37 = vmul.f32 0.0, %v7853_v43 }
 0x1bf   :  { %v7855_v47 = vpop.eup %7854 }
 0x1c0   :  { %v1562_v7 = vpop.f32.mrb[16].mxu0  ;;  %v1603_v15 = vpop.f32.mrb[16].mxu1  ;;  %v9089_v42 = vadd.f32 %v1331_v14, %v1330_v37 }
 0x1c1   :  { %v1610_v39 = vadd.f32 %v1562_v7, %v9083_v48  ;;  %v1564_v46 = vpop.f32.mrb[17].mxu0  ;;  %v1605_v51 = vpop.f32.mrb[17].mxu1  ;;  %v1612_v56 = vadd.f32 %v1603_v15, %v9096_v5  ;;  %v9113_v15 = vld [vmem:[#allocation5 + $0x12c] ss:$16 sps:$4 sm:$0xff]  }
 0x1c2   :  { %v1611_v36 = vadd.f32 %v1564_v46, %v9087_v50  ;;  %v1566_v40 = vpop.f32.mrb[18].mxu0  ;;  %v1607_v59 = vpop.f32.mrb[18].mxu1  ;;  %7856 = vtanh.f32 %v9089_v42  ;;  %v1613_v58 = vadd.f32 %v1605_v51, %v9101_v45  ;;  %v11046_v51 = vmov 0  }
 0x1c3   :  { %v6774_v61 = vmul.f32 -1.442695, %v1610_v39  ;;  %v1567_v63 = vpop.f32.mrb[19].mxu0  ;;  %v1608_v3 = vpop.f32.mrb[19].mxu1  ;;  %v6776_v43 = vmul.f32 -1.442695, %v1612_v56 }
 0x1c4   :  { %v6775_v54 = vmul.f32 -1.442695, %v1611_v36  ;;  %v9118_v36 = vld [vmem:[#allocation5 + $0x120] ss:$16 sps:$4 sm:$0xff]   ;;  %v9121_v40 = vld [vmem:[#allocation5 + $0x128] ss:$16 sps:$4 sm:$0xff]  }
 0x1c5   :  { %7858 = vpow2.f32 %v6774_v61  ;;  %v9124_v59 = vld [vmem:[#allocation5 + $0x144] ss:$16 sps:$4 sm:$0xff]   ;;  %v9127_v61 = vld [vmem:[#allocation5 + $0x14c] ss:$16 sps:$4 sm:$0xff]   ;;  %v9130_v3 = vld [vmem:[#allocation5 + $0x140] ss:$16 sps:$4 sm:$0xff]  }
 0x1c6   :  { %7860 = vpow2.f32 %v6775_v54  ;;  %v9133_v56 = vld [vmem:[#allocation5 + $0x148] ss:$16 sps:$4 sm:$0xff]  }
 0x1c7   :  { %7862 = vtanh.f32 %v1613_v58  ;;  %11047 = vst [vmem:[#allocation34_spill] sm:$0xff] %v9133_v56  ;;  %v9136_v58 = vld [vmem:[#allocation5 + $0x164] ss:$16 sps:$4 sm:$0xff]  }
 0x1c8   :  { %7864 = vpow2.f32 %v6776_v43  ;;  %11048 = vst [vmem:[#allocation35_spill] sm:$0xff] %v9136_v58 }
 0x1cc   :  { %v7857_v14 = vpop.eup %7856 }
 0x1cd   :  { %v1334_v52 = vmul.f32 %v7857_v14, %v7855_v47  ;;  %v9139_v14 = vld [vmem:[#allocation5 + $0x16c] ss:$16 sps:$4 sm:$0xff]  }
 0x1ce   :  { %11049 = vst [vmem:[#allocation36_spill] sm:$0xff] %v9139_v14 }
 0x1cf   :  { %v7859_v37 = vpop.eup %7858  ;;  %v1941_v39 = vpack.c.bf16 %v1334_v52, %v1334_v52 }
 0x1d0   :  { %v1623_v7 = vadd.f32 1.0, %v7859_v37  ;;  %v7861_v46 = vpop.eup %7860 }
 0x1d1   :  { %v1624_v62 = vadd.f32 1.0, %v7861_v46  ;;  %1975 = vmatmul.mubr.bf16.vlgmr.msra.gmra.mrb[24].mxu0 %v1941_v39  ;;  %2016 = vmatmul.mubr.bf16.vlgmr.msra.gmra.mrb[24].mxu1 %v1941_v39  ;;  %v7863_v63 = vpop.eup %7862  ;;  %v9146_v46 = vld [vmem:[#allocation5 + $0x160] ss:$16 sps:$4 sm:$0xff]  }
 0x1d2   :  { %7866 = vrcp.f32 %v1623_v7  ;;  %2069 = vmatpush1.bf16.msra.mxu0 %v9104_v1  ;;  %2110 = vmatpush1.bf16.msra.mxu1 %v9107_v2  ;;  %v7865_v54 = vpop.eup %7864  ;;  %v9144_v7 = vadd.f32 %v9043_v57, %v9038_v53  ;;  %11050 = vst [vmem:[#allocation37_spill] sm:$0xff] %v9146_v46  ;;  %v9159_v53 = vld [vmem:[#allocation5 + $0x18c] ss:$16 sps:$4 sm:$0xff]  }
 0x1d3   :  { %7868 = vrcp.f32 %v1624_v62  ;;  %2070 = vmatprep.subr.bf16.mxu0 %v9110_v4  ;;  %2111 = vmatprep.subr.bf16.mxu1 %v9113_v15  ;;  %v1625_v37 = vadd.f32 1.0, %v7865_v54  ;;  %v9149_v62 = vld [vmem:[#allocation5 + $0x168] ss:$16 sps:$4 sm:$0xff]   ;;  %v9156_v54 = vld [vmem:[#allocation5 + $0x184] ss:$16 sps:$4 sm:$0xff]  }
 0x1d4   :  { %2100 = vmatprep.mubr.bf16.mxu0 %v11046_v51  ;;  %2141 = vmatprep.mubr.bf16.mxu1 %v11046_v51  ;;  %11051 = vst [vmem:[#allocation38_spill] sm:$0xff] %v9149_v62  ;;  %11052 = vst [vmem:[#allocation39_spill] sm:$0xff] %v9156_v54 }
 0x1d5   :  { %7870 = vrcp.f32 %v1625_v37  ;;  %v9176_v37 = vld [vmem:[#allocation5 + $0x1ac] ss:$16 sps:$4 sm:$0xff]  }
 0x1d6   :  { %2071 = vmatpush1.bf16.msra.mxu0 %v9118_v36  ;;  %2112 = vmatpush1.bf16.msra.mxu1 %v9121_v40  ;;  %11053 = vst [vmem:[#allocation40_spill] sm:$0xff] %v9176_v37 }
 0x1d7   :  { %2072 = vmatprep.subr.bf16.mxu0 %v9124_v59  ;;  %2113 = vmatprep.subr.bf16.mxu1 %v9127_v61 }
 0x1da   :  { %2073 = vmatpush1.bf16.msra.mxu0 %v9130_v3  ;;  %2114 = vmatpush1.bf16.msra.mxu1 %v9133_v56  ;;  %v9167_v56 = vld [vmem:[#allocation5 + $0x180] ss:$16 sps:$4 sm:$0xff]  }
 0x1db   :  { %2074 = vmatprep.subr.bf16.mxu0 %v9136_v58  ;;  %2115 = vmatprep.subr.bf16.mxu1 %v9139_v14 }
 0x1dc   :  { %v7867_v47 = vpop.eup %7866 }
 0x1dd   :  { %v1634_v43 = vmul.f32 %v7867_v47, %v7863_v63  ;;  %v7869_v52 = vpop.eup %7868 }
 0x1de   :  { %v1633_v39 = vmul.f32 0.0, %v7869_v52  ;;  %2075 = vmatpush1.bf16.msra.mxu0 %v9146_v46  ;;  %2116 = vmatpush1.bf16.msra.mxu1 %v9149_v62 }
 0x1df   :  { %2076 = vmatprep.subr.bf16.mxu0 %v9156_v54  ;;  %2117 = vmatprep.subr.bf16.mxu1 %v9159_v53  ;;  %v9170_v54 = vld [vmem:[#allocation5 + $0x188] ss:$16 sps:$4 sm:$0xff]  }
 0x1e0   :  { %v1865_v63 = vpop.f32.mrb[20].mxu0  ;;  %v1906_v47 = vpop.f32.mrb[20].mxu1  ;;  %v9162_v57 = vadd.f32 %v1634_v43, %v1633_v39 }
 0x1e1   :  { %v1913_v52 = vadd.f32 %v1865_v63, %v9144_v7  ;;  %v1867_v46 = vpop.f32.mrb[21].mxu0  ;;  %v1908_v62 = vpop.f32.mrb[21].mxu1  ;;  %v9173_v63 = vld [vmem:[#allocation5 + $0x1a4] ss:$16 sps:$4 sm:$0xff]  }
 0x1e2   :  { %v1914_v6 = vadd.f32 %v1867_v46, %v9154_v16  ;;  %v1869_v13 = vpop.f32.mrb[22].mxu0  ;;  %v1910_v14 = vpop.f32.mrb[22].mxu1  ;;  %7872 = vtanh.f32 %v9162_v57  ;;  %2077 = vmatpush1.bf16.msra.mxu0 %v9167_v56  ;;  %2118 = vmatpush1.bf16.msra.mxu1 %v9170_v54  ;;  %v9181_v46 = vadd.f32 %v9045_v60, %v9041_v55  ;;  %v9196_v60 = vld [vmem:[#allocation5 + $0x1c0] ss:$16 sps:$4 sm:$0xff]  }
 0x1e3   :  { %v6809_v58 = vmul.f32 -1.442695, %v1913_v52  ;;  %v1870_v43 = vpop.f32.mrb[23].mxu0  ;;  %2078 = vmatprep.subr.bf16.mxu0 %v9173_v63  ;;  %2119 = vmatprep.subr.bf16.mxu1 %v9176_v37  ;;  %v1911_v14 = vpop.f32.mrb[23].mxu1  ;;  %v9183_v52 = vld [vmem:[#allocation5 + $0x1a0] ss:$16 sps:$4 sm:$0xff]  }
 0x1e4   :  { %v6810_v39 = vmul.f32 -1.442695, %v1914_v6  ;;  %11054 = vst [vmem:[#allocation41_spill] sm:$0xff] %v9181_v46  ;;  %11055 = vst [vmem:[#allocation42_spill] sm:$0xff] %v9183_v52  ;;  %v9186_v6 = vld [vmem:[#allocation5 + $0x1a8] ss:$16 sps:$4 sm:$0xff]   ;;  %v1915_v55 = vadd.f32 %v1906_v47, %v9181_v46  ;;  %v1916_v14 = vadd.f32 %v1908_v62, %v9052_v0 }
 0x1e5   :  { %7874 = vpow2.f32 %v6809_v58  ;;  %11056 = vst [vmem:[#allocation43_spill] sm:$0xff] %v9186_v6  ;;  %v9189_v13 = vld [vmem:[#allocation5 + $0x1c4] ss:$16 sps:$4 sm:$0xff]   ;;  %v9192_v43 = vld [vmem:[#allocation5 + $0x1cc] ss:$16 sps:$4 sm:$0xff]   ;;  %11059 = vst [vmem:[#allocation46_spill] sm:$0xff] %v9196_v60 }
 0x1e6   :  { %7876 = vpow2.f32 %v6810_v39  ;;  %2079 = vmatpush1.bf16.msra.mxu0 %v9183_v52  ;;  %2120 = vmatpush1.bf16.msra.mxu1 %v9186_v6  ;;  %11057 = vst [vmem:[#allocation44_spill] sm:$0xff] %v9189_v13  ;;  %11058 = vst [vmem:[#allocation45_spill] sm:$0xff] %v9192_v43  ;;  %v9199_v58 = vld [vmem:[#allocation5 + $0x1c8] ss:$16 sps:$4 sm:$0xff]   ;;  %v7871_v39 = vpop.eup %7870  ;;  %v9203_v6 = vld [vmem:[#allocation5 + $0x1e4] ss:$16 sps:$4 sm:$0xff]  }
 0x1e7   :  { %2080 = vmatprep.subr.bf16.mxu0 %v9189_v13  ;;  %2121 = vmatprep.subr.bf16.mxu1 %v9192_v43  ;;  %11060 = vst [vmem:[#allocation47_spill] sm:$0xff] %v9199_v58  ;;  %11061 = vst [vmem:[#allocation48_spill] sm:$0xff] %v9203_v6  ;;  %v9206_v13 = vld [vmem:[#allocation5 + $0x1ec] ss:$16 sps:$4 sm:$0xff]   ;;  %v6811_v43 = vmul.f32 -1.442695, %v1915_v55  ;;  %7878 = vtanh.f32 %v1916_v14 }
 0x1e8   :  { %11062 = vst [vmem:[#allocation49_spill] sm:$0xff] %v9206_v13  ;;  %v9230_v14 = vld [vmem:[#allocation5 + $0x22c] ss:$16 sps:$4 sm:$0xff]  }
 0x1e9   :  { %7880 = vpow2.f32 %v6811_v43  ;;  %11065 = vst [vmem:[#allocation52_spill] sm:$0xff] %v9230_v14  ;;  %v9238_v43 = vld [vmem:[#allocation5 + $0x228] ss:$16 sps:$4 sm:$0xff]  }
 0x1ea   :  { %2081 = vmatpush1.bf16.msra.mxu0 %v9196_v60  ;;  %2122 = vmatpush1.bf16.msra.mxu1 %v9199_v58  ;;  %v9209_v60 = vld [vmem:[#allocation5 + $0x1e0] ss:$16 sps:$4 sm:$0xff]   ;;  %v9212_v58 = vld [vmem:[#allocation5 + $0x1e8] ss:$16 sps:$4 sm:$0xff]   ;;  %11067 = vst [vmem:[#allocation54_spill] sm:$0xff] %v9238_v43 }
 0x1eb   :  { %2082 = vmatprep.subr.bf16.mxu0 %v9203_v6  ;;  %2123 = vmatprep.subr.bf16.mxu1 %v9206_v13  ;;  %v9215_v6 = vld [vmem:[#allocation5 + $0x204] ss:$16 sps:$4 sm:$0xff]   ;;  %v9218_v13 = vld [vmem:[#allocation5 + $0x20c] ss:$16 sps:$4 sm:$0xff]  }
 0x1ec   :  { %v7873_v47 = vpop.eup %7872 }
 0x1ed   :  { %v1637_v52 = vmul.f32 %v7873_v47, %v7871_v39  ;;  %v9221_v47 = vld [vmem:[#allocation5 + $0x200] ss:$16 sps:$4 sm:$0xff]  }
 0x1ee   :  { %2083 = vmatpush1.bf16.msra.mxu0 %v9209_v60  ;;  %2124 = vmatpush1.bf16.msra.mxu1 %v9212_v58 }
 0x1ef   :  { %v7875_v46 = vpop.eup %7874  ;;  %v2067_v0 = vpack.c.bf16 %v1637_v52, %v1637_v52  ;;  %2194 = vmatprep.subr.bf16.mxu0 %v9215_v6  ;;  %2235 = vmatprep.subr.bf16.mxu1 %v9218_v13  ;;  %v9227_v52 = vld [vmem:[#allocation5 + $0x224] ss:$16 sps:$4 sm:$0xff]  }
 0x1f0   :  { %v1926_v62 = vadd.f32 1.0, %v7875_v46  ;;  %v7877_v55 = vpop.eup %7876  ;;  %v9224_v46 = vld [vmem:[#allocation5 + $0x208] ss:$16 sps:$4 sm:$0xff]   ;;  %11064 = vst [vmem:[#allocation51_spill] sm:$0xff] %v9227_v52 }
 0x1f1   :  { %v1927_v39 = vadd.f32 1.0, %v7877_v55  ;;  %2101 = vmatmul.mubr.bf16.vlgmr.msra.gmra.mrb[28].mxu0 %v2067_v0  ;;  %2142 = vmatmul.mubr.bf16.vlgmr.msra.gmra.mrb[28].mxu1 %v2067_v0  ;;  %11063 = vst [vmem:[#allocation50_spill] sm:$0xff] %v9224_v46  ;;  %v9235_v0 = vld [vmem:[#allocation5 + $0x220] ss:$16 sps:$4 sm:$0xff]  }
 0x1f2   :  { %7882 = vrcp.f32 %v1926_v62  ;;  %2195 = vmatpush1.bf16.msra.mxu0 %v9221_v47  ;;  %2236 = vmatpush1.bf16.msra.mxu1 %v9224_v46  ;;  %11066 = vst [vmem:[#allocation53_spill] sm:$0xff] %v9235_v0  ;;  %v7879_v62 = vpop.eup %7878 }
 0x1f3   :  { %7884 = vrcp.f32 %v1927_v39  ;;  %2196 = vmatprep.subr.bf16.mxu0 %v9227_v52  ;;  %2237 = vmatprep.subr.bf16.mxu1 %v9230_v14  ;;  %v7881_v55 = vpop.eup %7880 }
 0x1f4   :  { %2226 = vmatprep.mubr.bf16.mxu0 %v11046_v51  ;;  %2267 = vmatprep.mubr.bf16.mxu1 %v11046_v51  ;;  %v1928_v52 = vadd.f32 1.0, %v7881_v55  ;;  %v9342_v55 = vld [vmem:[#allocation5 + $0xc4] ss:$16 sps:$4 sm:$0xff]  }
 0x1f5   :  { %11092 = vst [vmem:[#allocation79_spill] sm:$0xff] %v9342_v55 }
 0x1f6   :  { %2197 = vmatpush1.bf16.msra.mxu0 %v9235_v0  ;;  %2238 = vmatpush1.bf16.msra.mxu1 %v9238_v43  ;;  %7886 = vrcp.f32 %v1928_v52  ;;  %v9330_v52 = vld [vmem:[#allocation5 + $0xa4] ss:$16 sps:$4 sm:$0xff]  }
 0x1f7   :  { %2198 = vmatprep.subr.bf16.mxu0 %v8852_v17  ;;  %2239 = vmatprep.subr.bf16.mxu1 %v8854_v18  ;;  %11088 = vst [vmem:[#allocation75_spill] sm:$0xff] %v9330_v52 }
 0x1fa   :  { %2199 = vmatpush1.bf16.msra.mxu0 %v8856_v19  ;;  %2240 = vmatpush1.bf16.msra.mxu1 %v8858_v20 }
 0x1fb   :  { %2200 = vmatprep.subr.bf16.mxu0 %v8862_v21  ;;  %2241 = vmatprep.subr.bf16.mxu1 %v8864_v22  ;;  %v9268_v22 = vld [vmem:[#allocation5 + $0x4] ss:$16 sps:$4 sm:$0xff]  }
 0x1fc   :  { %v7883_v39 = vpop.eup %7882  ;;  %11068 = vst [vmem:[#allocation55_spill] sm:$0xff] %v9268_v22 }
 0x1fd   :  { %v1937_v0 = vmul.f32 %v7883_v39, %v7879_v62  ;;  %v7885_v14 = vpop.eup %7884  ;;  %v9339_v62 = vld [vmem:[#allocation5 + $0xa8] ss:$16 sps:$4 sm:$0xff]   ;;  %v9345_v39 = vld [vmem:[#allocation5 + $0xcc] ss:$16 sps:$4 sm:$0xff]  }
 0x1fe   :  { %v1936_v46 = vmul.f32 0.0, %v7885_v14  ;;  %2201 = vmatpush1.bf16.msra.mxu0 %v8868_v23  ;;  %2242 = vmatpush1.bf16.msra.mxu1 %v8870_v24  ;;  %v9271_v23 = vld [vmem:[#allocation5 + $0xc] ss:$16 sps:$4 sm:$0xff]   ;;  %v9274_v24 = vld [vmem:[#allocation5] ss:$16 sps:$4 sm:$0xff]   ;;  %11091 = vst [vmem:[#allocation78_spill] sm:$0xff] %v9339_v62 }
 0x1ff   :  { %2202 = vmatprep.subr.bf16.mxu0 %v8872_v25  ;;  %2243 = vmatprep.subr.bf16.mxu1 %v8874_v26  ;;  %11069 = vst [vmem:[#allocation56_spill] sm:$0xff] %v9271_v23  ;;  %11070 = vst [vmem:[#allocation57_spill] sm:$0xff] %v9274_v24  ;;  %v9277_v25 = vld [vmem:[#allocation5 + $0x8] ss:$16 sps:$4 sm:$0xff]   ;;  %v9280_v26 = vld [vmem:[#allocation5 + $0x24] ss:$16 sps:$4 sm:$0xff]  }
 0x200   :  { %v9251_v17 = vadd.f32 %v1937_v0, %v1936_v46  ;;  %v7887_v18 = vpop.eup %7886  ;;  %11071 = vst [vmem:[#allocation58_spill] sm:$0xff] %v9277_v25  ;;  %11072 = vst [vmem:[#allocation59_spill] sm:$0xff] %v9280_v26  ;;  %v9327_v46 = vld [vmem:[#allocation5 + $0x88] ss:$16 sps:$4 sm:$0xff]   ;;  %v9333_v14 = vld [vmem:[#allocation5 + $0xac] ss:$16 sps:$4 sm:$0xff]  }
 0x201   :  { %11087 = vst [vmem:[#allocation74_spill] sm:$0xff] %v9327_v46  ;;  %11089 = vst [vmem:[#allocation76_spill] sm:$0xff] %v9333_v14  ;;  %v9336_v0 = vld [vmem:[#allocation5 + $0xa0] ss:$16 sps:$4 sm:$0xff]  }
 0x202   :  { %7888 = vtanh.f32 %v9251_v17  ;;  %2203 = vmatpush1.bf16.msra.mxu0 %v8880_v27  ;;  %2244 = vmatpush1.bf16.msra.mxu1 %v8882_v28  ;;  %v9283_v27 = vld [vmem:[#allocation5 + $0x2c] ss:$16 sps:$4 sm:$0xff]   ;;  %v9288_v28 = vld [vmem:[#allocation5 + $0x20] ss:$16 sps:$4 sm:$0xff]   ;;  %11090 = vst [vmem:[#allocation77_spill] sm:$0xff] %v9336_v0  ;;  %11093 = vst [vmem:[#allocation80_spill] sm:$0xff] %v9345_v39 }
 0x203   :  { %2204 = vmatprep.subr.bf16.mxu0 %v8884_v29  ;;  %2245 = vmatprep.subr.bf16.mxu1 %v8886_v30  ;;  %11073 = vst [vmem:[#allocation60_spill] sm:$0xff] %v9283_v27  ;;  %11074 = vst [vmem:[#allocation61_spill] sm:$0xff] %v9288_v28  ;;  %v9291_v29 = vld [vmem:[#allocation5 + $0x28] ss:$16 sps:$4 sm:$0xff]   ;;  %v9294_v30 = vld [vmem:[#allocation5 + $0x44] ss:$16 sps:$4 sm:$0xff]  }
 0x204   :  { %11075 = vst [vmem:[#allocation62_spill] sm:$0xff] %v9291_v29  ;;  %11076 = vst [vmem:[#allocation63_spill] sm:$0xff] %v9294_v30 }
 0x206   :  { %2205 = vmatpush1.bf16.msra.mxu0 %v8892_v31  ;;  %2246 = vmatpush1.bf16.msra.mxu1 %v8894_v32  ;;  %v9297_v31 = vld [vmem:[#allocation5 + $0x4c] ss:$16 sps:$4 sm:$0xff]   ;;  %v9300_v32 = vld [vmem:[#allocation5 + $0x40] ss:$16 sps:$4 sm:$0xff]  }
 0x207   :  { %2206 = vmatprep.subr.bf16.mxu0 %v8896_v33  ;;  %2247 = vmatprep.subr.bf16.mxu1 %v8898_v34  ;;  %11077 = vst [vmem:[#allocation64_spill] sm:$0xff] %v9297_v31  ;;  %11078 = vst [vmem:[#allocation65_spill] sm:$0xff] %v9300_v32  ;;  %v9303_v33 = vld [vmem:[#allocation5 + $0x48] ss:$16 sps:$4 sm:$0xff]   ;;  %v9306_v34 = vld [vmem:[#allocation5 + $0x64] ss:$16 sps:$4 sm:$0xff]  }
 0x208   :  { %11079 = vst [vmem:[#allocation66_spill] sm:$0xff] %v9303_v33  ;;  %11080 = vst [vmem:[#allocation67_spill] sm:$0xff] %v9306_v34 }
 0x20a   :  { %2207 = vmatpush1.bf16.msra.mxu0 %v8904_v35  ;;  %2248 = vmatpush1.bf16.msra.mxu1 %v8906_v38  ;;  %v9309_v35 = vld [vmem:[#allocation5 + $0x6c] ss:$16 sps:$4 sm:$0xff]   ;;  %v9312_v38 = vld [vmem:[#allocation5 + $0x60] ss:$16 sps:$4 sm:$0xff]  }
 0x20b   :  { %2208 = vmatprep.subr.bf16.mxu0 %v8908_v8  ;;  %2249 = vmatprep.subr.bf16.mxu1 %v8910_v9  ;;  %11081 = vst [vmem:[#allocation68_spill] sm:$0xff] %v9309_v35  ;;  %11082 = vst [vmem:[#allocation69_spill] sm:$0xff] %v9312_v38  ;;  %v9315_v8 = vld [vmem:[#allocation5 + $0x68] ss:$16 sps:$4 sm:$0xff]   ;;  %v9318_v9 = vld [vmem:[#allocation5 + $0x84] ss:$16 sps:$4 sm:$0xff]  }
 0x20c   :  { %v7889_v19 = vpop.eup %7888  ;;  %11083 = vst [vmem:[#allocation70_spill] sm:$0xff] %v9315_v8  ;;  %11084 = vst [vmem:[#allocation71_spill] sm:$0xff] %v9318_v9 }
 0x20d   :  { %v1940_v20 = vmul.f32 %v7889_v19, %v7887_v18  ;;  %v9348_v18 = vld [vmem:[#allocation5 + $0xc0] ss:$16 sps:$4 sm:$0xff]   ;;  %v9351_v19 = vld [vmem:[#allocation5 + $0xc8] ss:$16 sps:$4 sm:$0xff]  }
 0x20e   :  { %2209 = vmatpush1.bf16.msra.mxu0 %v8916_v10  ;;  %2250 = vmatpush1.bf16.msra.mxu1 %v8918_v11  ;;  %v9321_v10 = vld [vmem:[#allocation5 + $0x8c] ss:$16 sps:$4 sm:$0xff]   ;;  %v9324_v11 = vld [vmem:[#allocation5 + $0x80] ss:$16 sps:$4 sm:$0xff]   ;;  %11094 = vst [vmem:[#allocation81_spill] sm:$0xff] %v9348_v18  ;;  %11095 = vst [vmem:[#allocation82_spill] sm:$0xff] %v9351_v19 }
 0x20f   :  { %v2193_v21 = vpack.c.bf16 %v1940_v20, %v1940_v20  ;;  %2323 = vmatprep.subr.bf16.mxu0 %v9268_v22  ;;  %2364 = vmatprep.subr.bf16.mxu1 %v9271_v23  ;;  %11085 = vst [vmem:[#allocation72_spill] sm:$0xff] %v9321_v10  ;;  %11086 = vst [vmem:[#allocation73_spill] sm:$0xff] %v9324_v11  ;;  %v9354_v20 = vld [vmem:[#allocation5 + $0xe4] ss:$16 sps:$4 sm:$0xff]  }
 0x210   :  { %11096 = vst [vmem:[#allocation83_spill] sm:$0xff] %v9354_v20 }
 0x211   :  { %2227 = vmatmul.mubr.bf16.vlgmr.msra.gmra.mrb[32].mxu0 %v2193_v21  ;;  %2268 = vmatmul.mubr.bf16.vlgmr.msra.gmra.mrb[32].mxu1 %v2193_v21  ;;  %v9357_v21 = vld [vmem:[#allocation5 + $0xec] ss:$16 sps:$4 sm:$0xff]  }
 0x212   :  { %2324 = vmatpush1.bf16.msra.mxu0 %v9274_v24  ;;  %2365 = vmatpush1.bf16.msra.mxu1 %v9277_v25  ;;  %11097 = vst [vmem:[#allocation84_spill] sm:$0xff] %v9357_v21 }
 0x213   :  { %2325 = vmatprep.subr.bf16.mxu0 %v9280_v26  ;;  %2366 = vmatprep.subr.bf16.mxu1 %v9283_v27 }
 0x214   :  { %2355 = vmatprep.mubr.bf16.mxu0 %v11046_v51  ;;  %2396 = vmatprep.mubr.bf16.mxu1 %v11046_v51 }
 0x216   :  { %2326 = vmatpush1.bf16.msra.mxu0 %v9288_v28  ;;  %2367 = vmatpush1.bf16.msra.mxu1 %v9291_v29 }
 0x217   :  { %2327 = vmatprep.subr.bf16.mxu0 %v9294_v30  ;;  %2368 = vmatprep.subr.bf16.mxu1 %v9297_v31 }
 0x21a   :  { %2328 = vmatpush1.bf16.msra.mxu0 %v9300_v32  ;;  %2369 = vmatpush1.bf16.msra.mxu1 %v9303_v33 }
 0x21b   :  { %2329 = vmatprep.subr.bf16.mxu0 %v9306_v34  ;;  %2370 = vmatprep.subr.bf16.mxu1 %v9309_v35 }
 0x21e   :  { %2330 = vmatpush1.bf16.msra.mxu0 %v9312_v38  ;;  %2371 = vmatpush1.bf16.msra.mxu1 %v9315_v8 }
 0x21f   :  { %2331 = vmatprep.subr.bf16.mxu0 %v9318_v9  ;;  %2372 = vmatprep.subr.bf16.mxu1 %v9321_v10 }
 0x222   :  { %2332 = vmatpush1.bf16.msra.mxu0 %v9324_v11  ;;  %2373 = vmatpush1.bf16.msra.mxu1 %v9327_v46 }
 0x223   :  { %2333 = vmatprep.subr.bf16.mxu0 %v9330_v52  ;;  %2374 = vmatprep.subr.bf16.mxu1 %v9333_v14 }
 0x226   :  { %2334 = vmatpush1.bf16.msra.mxu0 %v9336_v0  ;;  %2375 = vmatpush1.bf16.msra.mxu1 %v9339_v62 }
 0x227   :  { %2335 = vmatprep.subr.bf16.mxu0 %v9342_v55  ;;  %2376 = vmatprep.subr.bf16.mxu1 %v9345_v39  ;;  %v9360_v55 = vld [vmem:[#allocation5 + $0xe0] ss:$16 sps:$4 sm:$0xff]   ;;  %v9363_v39 = vld [vmem:[#allocation5 + $0xe8] ss:$16 sps:$4 sm:$0xff]  }
 0x228   :  { %11098 = vst [vmem:[#allocation85_spill] sm:$0xff] %v9360_v55  ;;  %11099 = vst [vmem:[#allocation86_spill] sm:$0xff] %v9363_v39 }
 0x22a   :  { %2336 = vmatpush1.bf16.msra.mxu0 %v9348_v18  ;;  %2377 = vmatpush1.bf16.msra.mxu1 %v9351_v19  ;;  %v9366_v18 = vld [vmem:[#allocation5 + $0x104] ss:$16 sps:$4 sm:$0xff]   ;;  %v9369_v19 = vld [vmem:[#allocation5 + $0x10c] ss:$16 sps:$4 sm:$0xff]  }
 0x22b   :  { %2337 = vmatprep.subr.bf16.mxu0 %v9354_v20  ;;  %2378 = vmatprep.subr.bf16.mxu1 %v9357_v21  ;;  %11100 = vst [vmem:[#allocation87_spill] sm:$0xff] %v9366_v18  ;;  %11101 = vst [vmem:[#allocation88_spill] sm:$0xff] %v9369_v19 }
 0x22e   :  { %2338 = vmatpush1.bf16.msra.mxu0 %v9360_v55  ;;  %2379 = vmatpush1.bf16.msra.mxu1 %v9363_v39 }
 0x22f   :  { %2452 = vmatprep.subr.bf16.mxu0 %v9366_v18  ;;  %2493 = vmatprep.subr.bf16.mxu1 %v9369_v19 }
 0x2a4   :  { %v1976_v20 = vpop.f32.mrb[24].mxu0  ;;  %v2017_v62 = vpop.f32.mrb[24].mxu1 }
 0x2a5   :  { %v2028_v0 = vrot.slane %v1976_v20, 6  ;;  %v1978_v21 = vpop.f32.mrb[25].mxu0  ;;  %v2019_v14 = vpop.f32.mrb[25].mxu1  ;;  %v2030_v38 = vrot.slane %v2017_v62, 6 }
 0x2a6   :  { %v2029_v52 = vrot.slane %v1978_v21, 6  ;;  %v1980_v46 = vpop.f32.mrb[26].mxu0  ;;  %v2021_v55 = vpop.f32.mrb[26].mxu1  ;;  %v2031_v19 = vrot.slane %v2019_v14, 6 }
 0x2a7   :  { %v2036_v11 = vadd.f32 %v2028_v0, %v9065_v12  ;;  %v1981_v10 = vpop.f32.mrb[27].mxu0  ;;  %v2022_v39 = vpop.f32.mrb[27].mxu1  ;;  %v2038_v35 = vadd.f32 %v2030_v38, %v9073_v44 }
 0x2a8   :  { %v2037_v9 = vadd.f32 %v2029_v52, %v9067_v41  ;;  %v2039_v20 = vadd.f32 %v2031_v19, %v9078_v49 }
 0x2a9   :  { %v6812_v8 = vmul.f32 -1.442695, %v2036_v11  ;;  %v6814_v34 = vmul.f32 -1.442695, %v2038_v35 }
 0x2aa   :  { %v6813_v18 = vmul.f32 -1.442695, %v2037_v9 }
 0x2ab   :  { %7890 = vpow2.f32 %v6812_v8  ;;  %v2060_v8 = vrot.slane %v9089_v42, 6 }
 0x2ac   :  { %7892 = vpow2.f32 %v6813_v18 }
 0x2ad   :  { %7894 = vtanh.f32 %v2039_v20 }
 0x2ae   :  { %7896 = vpow2.f32 %v6814_v34 }
 0x2b5   :  { %v7891_v21 = vpop.eup %7890 }
 0x2b6   :  { %v2049_v46 = vadd.f32 1.0, %v7891_v21  ;;  %v7893_v55 = vpop.eup %7892 }
 0x2b7   :  { %v2050_v10 = vadd.f32 1.0, %v7893_v55  ;;  %v7895_v52 = vpop.eup %7894 }
 0x2b8   :  { %7898 = vrcp.f32 %v2049_v46  ;;  %v7897_v11 = vpop.eup %7896 }
 0x2b9   :  { %7900 = vrcp.f32 %v2050_v10  ;;  %v2051_v62 = vadd.f32 1.0, %v7897_v11 }
 0x2bb   :  { %7902 = vrcp.f32 %v2051_v62 }
 0x2c2   :  { %v7899_v9 = vpop.eup %7898 }
 0x2c3   :  { %v2063_v0 = vmul.f32 %v7899_v9, %v7895_v52  ;;  %v7901_v14 = vpop.eup %7900 }
 0x2c4   :  { %v2102_v38 = vpop.f32.mrb[28].mxu0  ;;  %v2143_v39 = vpop.f32.mrb[28].mxu1  ;;  %v2062_v18 = vmul.f32 %v7901_v14, %v2060_v8 }
 0x2c5   :  { %v2154_v35 = vrot.slane %v2102_v38, 6  ;;  %v2104_v19 = vpop.f32.mrb[29].mxu0  ;;  %v2145_v21 = vpop.f32.mrb[29].mxu1  ;;  %v2156_v9 = vrot.slane %v2143_v39, 6 }
 0x2c6   :  { %v2155_v20 = vrot.slane %v2104_v19, 6  ;;  %v2106_v49 = vpop.f32.mrb[30].mxu0  ;;  %v2147_v34 = vpop.f32.mrb[30].mxu1  ;;  %v9377_v46 = vadd.f32 %v2063_v0, %v2062_v18  ;;  %v2157_v8 = vrot.slane %v2145_v21, 6 }
 0x2c7   :  { %v2162_v55 = vadd.f32 %v2154_v35, %v9083_v48  ;;  %v2107_v10 = vpop.f32.mrb[31].mxu0  ;;  %v2148_v44 = vpop.f32.mrb[31].mxu1  ;;  %v2164_v49 = vadd.f32 %v2156_v9, %v9096_v5 }
 0x2c8   :  { %v2163_v42 = vadd.f32 %v2155_v20, %v9087_v50  ;;  %7904 = vtanh.f32 %v9377_v46  ;;  %v7903_v14 = vpop.eup %7902  ;;  %v2165_v0 = vadd.f32 %v2157_v8, %v9101_v45 }
 0x2c9   :  { %v6815_v52 = vmul.f32 -1.442695, %v2162_v55  ;;  %v6817_v18 = vmul.f32 -1.442695, %v2164_v49 }
 0x2ca   :  { %v6816_v11 = vmul.f32 -1.442695, %v2163_v42  ;;  %v2186_v42 = vrot.slane %v9162_v57, 6 }
 0x2cb   :  { %7906 = vpow2.f32 %v6815_v52 }
 0x2cc   :  { %7908 = vpow2.f32 %v6816_v11  ;;  %v11102_v11 = vld [vmem:[#allocation34_spill] sm:$0xff] }
 0x2cd   :  { %7910 = vtanh.f32 %v2165_v0  ;;  %v11103_v0 = vld [vmem:[#allocation35_spill] sm:$0xff] }
 0x2ce   :  { %7912 = vpow2.f32 %v6817_v18 }
 0x2d2   :  { %v7905_v38 = vpop.eup %7904 }
 0x2d3   :  { %v2066_v35 = vmul.f32 %v7905_v38, %v7903_v14  ;;  %v11104_v38 = vld [vmem:[#allocation36_spill] sm:$0xff] }
 0x2d5   :  { %v7907_v44 = vpop.eup %7906  ;;  %v2319_v19 = vpack.c.bf16 %v2066_v35, %v2066_v35 }
 0x2d6   :  { %v2175_v62 = vadd.f32 1.0, %v7907_v44  ;;  %v7909_v20 = vpop.eup %7908 }
 0x2d7   :  { %v2176_v34 = vadd.f32 1.0, %v7909_v20  ;;  %v2321_v55 = vrot.slane %v2319_v19, 1  ;;  %v7911_v39 = vpop.eup %7910 }
 0x2d8   :  { %7914 = vrcp.f32 %v2175_v62  ;;  %v7913_v21 = vpop.eup %7912 }
 0x2d9   :  { %7916 = vrcp.f32 %v2176_v34  ;;  %2356 = vmatmul.mubr.bf16.vlgmr.msra.gmra.mrb[36].mxu0 %v2321_v55  ;;  %2397 = vmatmul.mubr.bf16.vlgmr.msra.gmra.mrb[36].mxu1 %v2321_v55  ;;  %v2177_v8 = vadd.f32 1.0, %v7913_v21  ;;  %v11106_v21 = vld [vmem:[#allocation38_spill] sm:$0xff] }
 0x2da   :  { %2453 = vmatpush1.bf16.msra.mxu0 %v9104_v1  ;;  %2494 = vmatpush1.bf16.msra.mxu1 %v9107_v2 }
 0x2db   :  { %2454 = vmatprep.subr.bf16.mxu0 %v9110_v4  ;;  %2495 = vmatprep.subr.bf16.mxu1 %v9113_v15  ;;  %7918 = vrcp.f32 %v2177_v8  ;;  %v11108_v8 = vld [vmem:[#allocation41_spill] sm:$0xff] }
 0x2dc   :  { %2484 = vmatprep.mubr.bf16.mxu0 %v11046_v51  ;;  %2525 = vmatprep.mubr.bf16.mxu1 %v11046_v51 }
 0x2de   :  { %2455 = vmatpush1.bf16.msra.mxu0 %v9118_v36  ;;  %2496 = vmatpush1.bf16.msra.mxu1 %v9121_v40 }
 0x2df   :  { %2456 = vmatprep.subr.bf16.mxu0 %v9124_v59  ;;  %2497 = vmatprep.subr.bf16.mxu1 %v9127_v61 }
 0x2e2   :  { %v7915_v10 = vpop.eup %7914  ;;  %2457 = vmatpush1.bf16.msra.mxu0 %v9130_v3  ;;  %2498 = vmatpush1.bf16.msra.mxu1 %v11102_v11 }
 0x2e3   :  { %v2189_v52 = vmul.f32 %v7915_v10, %v7911_v39  ;;  %v7917_v9 = vpop.eup %7916  ;;  %2458 = vmatprep.subr.bf16.mxu0 %v11103_v0  ;;  %2499 = vmatprep.subr.bf16.mxu1 %v11104_v38  ;;  %v11105_v39 = vld [vmem:[#allocation37_spill] sm:$0xff] }
 0x2e4   :  { %v2228_v49 = vpop.f32.mrb[32].mxu0  ;;  %v2269_v14 = vpop.f32.mrb[32].mxu1  ;;  %v2188_v18 = vmul.f32 %v7917_v9, %v2186_v42  ;;  %v11107_v42 = vld [vmem:[#allocation39_spill] sm:$0xff] }
 0x2e5   :  { %v2280_v35 = vrot.slane %v2228_v49, 6  ;;  %v2230_v44 = vpop.f32.mrb[33].mxu0  ;;  %v2271_v62 = vpop.f32.mrb[33].mxu1  ;;  %v2282_v49 = vrot.slane %v2269_v14, 6 }
 0x2e6   :  { %v2281_v19 = vrot.slane %v2230_v44, 6  ;;  %v2232_v20 = vpop.f32.mrb[34].mxu0  ;;  %v2273_v57 = vpop.f32.mrb[34].mxu1  ;;  %v9399_v34 = vadd.f32 %v2189_v52, %v2188_v18  ;;  %2459 = vmatpush1.bf16.msra.mxu0 %v11105_v39  ;;  %2500 = vmatpush1.bf16.msra.mxu1 %v11106_v21  ;;  %v11110_v44 = vld [vmem:[#allocation43_spill] sm:$0xff] }
 0x2e7   :  { %v2288_v55 = vadd.f32 %v2280_v35, %v9144_v7  ;;  %v2233_v10 = vpop.f32.mrb[35].mxu0  ;;  %v2274_v11 = vpop.f32.mrb[35].mxu1  ;;  %2460 = vmatprep.subr.bf16.mxu0 %v11107_v42  ;;  %2501 = vmatprep.subr.bf16.mxu1 %v9159_v53  ;;  %v2290_v18 = vadd.f32 %v2282_v49, %v11108_v8  ;;  %v11109_v35 = vld [vmem:[#allocation42_spill] sm:$0xff]  ;;  %v11113_v20 = vld [vmem:[#allocation27_spill] sm:$0xff] }
 0x2e8   :  { %v2289_v38 = vadd.f32 %v2281_v19, %v9154_v16  ;;  %7920 = vtanh.f32 %v9399_v34  ;;  %v2283_v11 = vrot.slane %v2271_v62, 6  ;;  %v11111_v19 = vld [vmem:[#allocation44_spill] sm:$0xff]  ;;  %v7919_v14 = vpop.eup %7918 }
 0x2e9   :  { %v6818_v9 = vmul.f32 -1.442695, %v2288_v55  ;;  %v6820_v10 = vmul.f32 -1.442695, %v2290_v18  ;;  %v11116_v62 = vld [vmem:[#allocation48_spill] sm:$0xff] }
 0x2ea   :  { %v6819_v52 = vmul.f32 -1.442695, %v2289_v38  ;;  %2461 = vmatpush1.bf16.msra.mxu0 %v9167_v56  ;;  %2502 = vmatpush1.bf16.msra.mxu1 %v9170_v54  ;;  %v11112_v38 = vld [vmem:[#allocation45_spill] sm:$0xff]  ;;  %v2291_v57 = vadd.f32 %v2283_v11, %v11113_v20 }
 0x2eb   :  { %7922 = vpow2.f32 %v6818_v9  ;;  %2462 = vmatprep.subr.bf16.mxu0 %v9173_v63  ;;  %2503 = vmatprep.subr.bf16.mxu1 %v9176_v37  ;;  %v11114_v9 = vld [vmem:[#allocation46_spill] sm:$0xff]  ;;  %v11115_v37 = vld [vmem:[#allocation47_spill] sm:$0xff] }
 0x2ec   :  { %7924 = vpow2.f32 %v6819_v52  ;;  %v11117_v52 = vld [vmem:[#allocation49_spill] sm:$0xff] }
 0x2ed   :  { %7926 = vtanh.f32 %v2291_v57  ;;  %v11120_v57 = vld [vmem:[#allocation52_spill] sm:$0xff] }
 0x2ee   :  { %2463 = vmatpush1.bf16.msra.mxu0 %v11109_v35  ;;  %2504 = vmatpush1.bf16.msra.mxu1 %v11110_v44  ;;  %7928 = vpow2.f32 %v6820_v10 }
 0x2ef   :  { %2464 = vmatprep.subr.bf16.mxu0 %v11111_v19  ;;  %2505 = vmatprep.subr.bf16.mxu1 %v11112_v38 }
 0x2f2   :  { %v7921_v55 = vpop.eup %7920  ;;  %2465 = vmatpush1.bf16.msra.mxu0 %v11114_v9  ;;  %2506 = vmatpush1.bf16.msra.mxu1 %v11115_v37 }
 0x2f3   :  { %2466 = vmatprep.subr.bf16.mxu0 %v11116_v62  ;;  %2507 = vmatprep.subr.bf16.mxu1 %v11117_v52  ;;  %v2192_v49 = vmul.f32 %v7921_v55, %v7919_v14  ;;  %v11119_v14 = vld [vmem:[#allocation51_spill] sm:$0xff]  ;;  %v9437_v55 = vld [vmem:[#allocation5 + $0x24c] ss:$16 sps:$4 sm:$0xff]  }
 0x2f4   :  { %11123 = vst [vmem:[#allocation37_spill] sm:$0xff] %v9437_v55 }
 0x2f5   :  { %v7923_v35 = vpop.eup %7922  ;;  %v2448_v19 = vpack.c.bf16 %v2192_v49, %v2192_v49 }
 0x2f6   :  { %v2301_v44 = vadd.f32 1.0, %v7923_v35  ;;  %v7925_v8 = vpop.eup %7924  ;;  %2467 = vmatpush1.bf16.msra.mxu0 %v9209_v60  ;;  %2508 = vmatpush1.bf16.msra.mxu1 %v9212_v58  ;;  %v11118_v35 = vld [vmem:[#allocation50_spill] sm:$0xff] }
 0x2f7   :  { %v2302_v11 = vadd.f32 1.0, %v7925_v8  ;;  %v2450_v18 = vrot.slane %v2448_v19, 1  ;;  %2581 = vmatprep.subr.bf16.mxu0 %v9215_v6  ;;  %2622 = vmatprep.subr.bf16.mxu1 %v9218_v13  ;;  %v11121_v8 = vld [vmem:[#allocation53_spill] sm:$0xff] }
 0x2f8   :  { %7930 = vrcp.f32 %v2301_v44  ;;  %v7927_v44 = vpop.eup %7926  ;;  %v9434_v19 = vld [vmem:[#allocation5 + $0x244] ss:$16 sps:$4 sm:$0xff]  }
 0x2f9   :  { %7932 = vrcp.f32 %v2302_v11  ;;  %2485 = vmatmul.mubr.bf16.vlgmr.msra.gmra.mrb[40].mxu0 %v2450_v18  ;;  %2526 = vmatmul.mubr.bf16.vlgmr.msra.gmra.mrb[40].mxu1 %v2450_v18  ;;  %11122 = vst [vmem:[#allocation35_spill] sm:$0xff] %v9434_v19  ;;  %v7929_v10 = vpop.eup %7928  ;;  %v2312_v11 = vrot.slane %v9251_v17, 6 }
 0x2fa   :  { %2582 = vmatpush1.bf16.msra.mxu0 %v9221_v47  ;;  %2623 = vmatpush1.bf16.msra.mxu1 %v11118_v35 }
 0x2fb   :  { %2583 = vmatprep.subr.bf16.mxu0 %v11119_v14  ;;  %2624 = vmatprep.subr.bf16.mxu1 %v11120_v57  ;;  %v9441_v57 = vld [vmem:[#allocation5 + $0x240] ss:$16 sps:$4 sm:$0xff]   ;;  %v2303_v14 = vadd.f32 1.0, %v7929_v10  ;;  %v9461_v10 = vld [vmem:[#allocation5 + $0x284] ss:$16 sps:$4 sm:$0xff]  }
 0x2fc   :  { %2613 = vmatprep.mubr.bf16.mxu0 %v11046_v51  ;;  %2654 = vmatprep.mubr.bf16.mxu1 %v11046_v51  ;;  %11124 = vst [vmem:[#allocation38_spill] sm:$0xff] %v9441_v57  ;;  %11129 = vst [vmem:[#allocation47_spill] sm:$0xff] %v9461_v10 }
 0x2fd   :  { %7934 = vrcp.f32 %v2303_v14  ;;  %v9477_v14 = vld [vmem:[#allocation5 + $0x2ac] ss:$16 sps:$4 sm:$0xff]  }
 0x2fe   :  { %2584 = vmatpush1.bf16.msra.mxu0 %v11121_v8  ;;  %2625 = vmatpush1.bf16.msra.mxu1 %v9238_v43  ;;  %v9444_v8 = vld [vmem:[#allocation5 + $0x248] ss:$16 sps:$4 sm:$0xff]   ;;  %11134 = vst [vmem:[#allocation90_spill] sm:$0xff] %v9477_v14 }
 0x2ff   :  { %2585 = vmatprep.subr.bf16.mxu0 %v9434_v19  ;;  %2626 = vmatprep.subr.bf16.mxu1 %v9437_v55  ;;  %v9447_v19 = vld [vmem:[#allocation5 + $0x264] ss:$16 sps:$4 sm:$0xff]   ;;  %v9450_v55 = vld [vmem:[#allocation5 + $0x26c] ss:$16 sps:$4 sm:$0xff]  }
 0x300   :  { %11125 = vst [vmem:[#allocation39_spill] sm:$0xff] %v9447_v19  ;;  %11126 = vst [vmem:[#allocation45_spill] sm:$0xff] %v9450_v55 }
 0x302   :  { %v7931_v49 = vpop.eup %7930  ;;  %2586 = vmatpush1.bf16.msra.mxu0 %v9441_v57  ;;  %2627 = vmatpush1.bf16.msra.mxu1 %v9444_v8  ;;  %v9458_v57 = vld [vmem:[#allocation5 + $0x268] ss:$16 sps:$4 sm:$0xff]  }
 0x303   :  { %v2315_v18 = vmul.f32 %v7931_v49, %v7927_v44  ;;  %v7933_v43 = vpop.eup %7932  ;;  %2587 = vmatprep.subr.bf16.mxu0 %v9447_v19  ;;  %2628 = vmatprep.subr.bf16.mxu1 %v9450_v55  ;;  %v9455_v49 = vld [vmem:[#allocation5 + $0x260] ss:$16 sps:$4 sm:$0xff]   ;;  %11128 = vst [vmem:[#allocation46_spill] sm:$0xff] %v9458_v57  ;;  %v9464_v19 = vld [vmem:[#allocation5 + $0x28c] ss:$16 sps:$4 sm:$0xff]  }
 0x304   :  { %v2314_v17 = vmul.f32 %v7933_v43, %v2312_v11  ;;  %11127 = vst [vmem:[#allocation27_spill] sm:$0xff] %v9455_v49  ;;  %11130 = vst [vmem:[#allocation48_spill] sm:$0xff] %v9464_v19  ;;  %v9468_v43 = vld [vmem:[#allocation5 + $0x280] ss:$16 sps:$4 sm:$0xff]   ;;  %v9471_v11 = vld [vmem:[#allocation5 + $0x288] ss:$16 sps:$4 sm:$0xff]  }
 0x305   :  { %11131 = vst [vmem:[#allocation49_spill] sm:$0xff] %v9468_v43  ;;  %11132 = vst [vmem:[#allocation50_spill] sm:$0xff] %v9471_v11  ;;  %v9507_v55 = vld [vmem:[#allocation5 + $0x2e8] ss:$16 sps:$4 sm:$0xff]  }
 0x306   :  { %v9453_v44 = vadd.f32 %v2315_v18, %v2314_v17  ;;  %2588 = vmatpush1.bf16.msra.mxu0 %v9455_v49  ;;  %2629 = vmatpush1.bf16.msra.mxu1 %v9458_v57  ;;  %v9474_v18 = vld [vmem:[#allocation5 + $0x2a4] ss:$16 sps:$4 sm:$0xff]   ;;  %v9480_v17 = vld [vmem:[#allocation5 + $0x2a0] ss:$16 sps:$4 sm:$0xff]   ;;  %11142 = vst [vmem:[#allocation98_spill] sm:$0xff] %v9507_v55 }
 0x307   :  { %2589 = vmatprep.subr.bf16.mxu0 %v9461_v10  ;;  %2630 = vmatprep.subr.bf16.mxu1 %v9464_v19  ;;  %11133 = vst [vmem:[#allocation89_spill] sm:$0xff] %v9474_v18  ;;  %11135 = vst [vmem:[#allocation91_spill] sm:$0xff] %v9480_v17  ;;  %v9483_v19 = vld [vmem:[#allocation5 + $0x2a8] ss:$16 sps:$4 sm:$0xff]   ;;  %v9492_v57 = vld [vmem:[#allocation5 + $0x2c0] ss:$16 sps:$4 sm:$0xff]  }
 0x308   :  { %7936 = vtanh.f32 %v9453_v44  ;;  %11136 = vst [vmem:[#allocation92_spill] sm:$0xff] %v9483_v19  ;;  %11139 = vst [vmem:[#allocation95_spill] sm:$0xff] %v9492_v57  ;;  %v9504_v49 = vld [vmem:[#allocation5 + $0x2e0] ss:$16 sps:$4 sm:$0xff]  }
 0x309   :  { %11141 = vst [vmem:[#allocation97_spill] sm:$0xff] %v9504_v49 }
 0x30a   :  { %2590 = vmatpush1.bf16.msra.mxu0 %v9468_v43  ;;  %2631 = vmatpush1.bf16.msra.mxu1 %v9471_v11  ;;  %v9486_v43 = vld [vmem:[#allocation5 + $0x2c4] ss:$16 sps:$4 sm:$0xff]   ;;  %v9489_v11 = vld [vmem:[#allocation5 + $0x2cc] ss:$16 sps:$4 sm:$0xff]  }
 0x30b   :  { %2591 = vmatprep.subr.bf16.mxu0 %v9474_v18  ;;  %2632 = vmatprep.subr.bf16.mxu1 %v9477_v14  ;;  %11137 = vst [vmem:[#allocation93_spill] sm:$0xff] %v9486_v43  ;;  %11138 = vst [vmem:[#allocation94_spill] sm:$0xff] %v9489_v11  ;;  %v7935_v18 = vpop.eup %7934  ;;  %v9495_v14 = vld [vmem:[#allocation5 + $0x2c8] ss:$16 sps:$4 sm:$0xff]  }
 0x30e   :  { %2592 = vmatpush1.bf16.msra.mxu0 %v9480_v17  ;;  %2633 = vmatpush1.bf16.msra.mxu1 %v9483_v19  ;;  %v9498_v17 = vld [vmem:[#allocation5 + $0x2e4] ss:$16 sps:$4 sm:$0xff]   ;;  %v9501_v19 = vld [vmem:[#allocation5 + $0x2ec] ss:$16 sps:$4 sm:$0xff]  }
 0x30f   :  { %2593 = vmatprep.subr.bf16.mxu0 %v9486_v43  ;;  %2634 = vmatprep.subr.bf16.mxu1 %v9489_v11  ;;  %11140 = vst [vmem:[#allocation96_spill] sm:$0xff] %v9501_v19 }
 0x312   :  { %v7937_v10 = vpop.eup %7936  ;;  %2594 = vmatpush1.bf16.msra.mxu0 %v9492_v57  ;;  %2635 = vmatpush1.bf16.msra.mxu1 %v9495_v14 }
 0x313   :  { %2595 = vmatprep.subr.bf16.mxu0 %v9498_v17  ;;  %2636 = vmatprep.subr.bf16.mxu1 %v9501_v19  ;;  %v2318_v43 = vmul.f32 %v7937_v10, %v7935_v18  ;;  %v11144_v10 = vld [vmem:[#allocation68_spill] sm:$0xff]  ;;  %v11147_v18 = vld [vmem:[#allocation71_spill] sm:$0xff] }
 0x315   :  { %v2577_v11 = vpack.c.bf16 %v2318_v43, %v2318_v43  ;;  %v11145_v43 = vld [vmem:[#allocation69_spill] sm:$0xff] }
 0x316   :  { %2596 = vmatpush1.bf16.msra.mxu0 %v9504_v49  ;;  %2637 = vmatpush1.bf16.msra.mxu1 %v9507_v55 }
 0x317   :  { %v2579_v57 = vrot.slane %v2577_v11, 1  ;;  %2710 = vmatprep.subr.bf16.mxu0 %v9268_v22  ;;  %2751 = vmatprep.subr.bf16.mxu1 %v9271_v23  ;;  %v11146_v11 = vld [vmem:[#allocation70_spill] sm:$0xff]  ;;  %v11165_v22 = vld [vmem:[#allocation32_spill] sm:$0xff] }
 0x319   :  { %2614 = vmatmul.mubr.bf16.vlgmr.msra.gmra.mrb[44].mxu0 %v2579_v57  ;;  %2655 = vmatmul.mubr.bf16.vlgmr.msra.gmra.mrb[44].mxu1 %v2579_v57  ;;  %v11143_v57 = vld [vmem:[#allocation67_spill] sm:$0xff] }
 0x31a   :  { %2711 = vmatpush1.bf16.msra.mxu0 %v9274_v24  ;;  %2752 = vmatpush1.bf16.msra.mxu1 %v9277_v25 }
 0x31b   :  { %2712 = vmatprep.subr.bf16.mxu0 %v9280_v26  ;;  %2753 = vmatprep.subr.bf16.mxu1 %v9283_v27 }
 0x31c   :  { %2742 = vmatprep.mubr.bf16.mxu0 %v11046_v51  ;;  %2783 = vmatprep.mubr.bf16.mxu1 %v11046_v51 }
 0x31e   :  { %2713 = vmatpush1.bf16.msra.mxu0 %v9288_v28  ;;  %2754 = vmatpush1.bf16.msra.mxu1 %v9291_v29  ;;  %v11148_v28 = vld [vmem:[#allocation72_spill] sm:$0xff]  ;;  %v11149_v29 = vld [vmem:[#allocation73_spill] sm:$0xff] }
 0x31f   :  { %2714 = vmatprep.subr.bf16.mxu0 %v9294_v30  ;;  %2755 = vmatprep.subr.bf16.mxu1 %v9297_v31  ;;  %v11150_v30 = vld [vmem:[#allocation74_spill] sm:$0xff]  ;;  %v11151_v31 = vld [vmem:[#allocation75_spill] sm:$0xff] }
 0x322   :  { %2715 = vmatpush1.bf16.msra.mxu0 %v9300_v32  ;;  %2756 = vmatpush1.bf16.msra.mxu1 %v9303_v33  ;;  %v11152_v32 = vld [vmem:[#allocation76_spill] sm:$0xff]  ;;  %v11153_v33 = vld [vmem:[#allocation77_spill] sm:$0xff] }
 0x323   :  { %2716 = vmatprep.subr.bf16.mxu0 %v11143_v57  ;;  %2757 = vmatprep.subr.bf16.mxu1 %v11144_v10  ;;  %v11154_v57 = vld [vmem:[#allocation78_spill] sm:$0xff]  ;;  %v11155_v10 = vld [vmem:[#allocation79_spill] sm:$0xff] }
 0x326   :  { %2717 = vmatpush1.bf16.msra.mxu0 %v11145_v43  ;;  %2758 = vmatpush1.bf16.msra.mxu1 %v11146_v11  ;;  %v11156_v43 = vld [vmem:[#allocation80_spill] sm:$0xff]  ;;  %v11157_v11 = vld [vmem:[#allocation81_spill] sm:$0xff] }
 0x327   :  { %2718 = vmatprep.subr.bf16.mxu0 %v11147_v18  ;;  %2759 = vmatprep.subr.bf16.mxu1 %v11148_v28  ;;  %v11158_v18 = vld [vmem:[#allocation82_spill] sm:$0xff]  ;;  %v11159_v28 = vld [vmem:[#allocation83_spill] sm:$0xff] }
 0x32a   :  { %2719 = vmatpush1.bf16.msra.mxu0 %v11149_v29  ;;  %2760 = vmatpush1.bf16.msra.mxu1 %v11150_v30  ;;  %v11160_v29 = vld [vmem:[#allocation84_spill] sm:$0xff]  ;;  %v11161_v30 = vld [vmem:[#allocation85_spill] sm:$0xff] }
 0x32b   :  { %2720 = vmatprep.subr.bf16.mxu0 %v11151_v31  ;;  %2761 = vmatprep.subr.bf16.mxu1 %v11152_v32  ;;  %v11162_v31 = vld [vmem:[#allocation86_spill] sm:$0xff]  ;;  %v11163_v32 = vld [vmem:[#allocation87_spill] sm:$0xff] }
 0x32e   :  { %2721 = vmatpush1.bf16.msra.mxu0 %v11153_v33  ;;  %2762 = vmatpush1.bf16.msra.mxu1 %v11154_v57  ;;  %v11164_v33 = vld [vmem:[#allocation88_spill] sm:$0xff] }
 0x32f   :  { %2722 = vmatprep.subr.bf16.mxu0 %v11155_v10  ;;  %2763 = vmatprep.subr.bf16.mxu1 %v11156_v43 }
 0x332   :  { %2723 = vmatpush1.bf16.msra.mxu0 %v11157_v11  ;;  %2764 = vmatpush1.bf16.msra.mxu1 %v11158_v18 }
 0x333   :  { %2724 = vmatprep.subr.bf16.mxu0 %v11159_v28  ;;  %2765 = vmatprep.subr.bf16.mxu1 %v11160_v29 }
 0x336   :  { %2725 = vmatpush1.bf16.msra.mxu0 %v11161_v30  ;;  %2766 = vmatpush1.bf16.msra.mxu1 %v11162_v31 }
 0x337   :  { %2839 = vmatprep.subr.bf16.mxu0 %v11163_v32  ;;  %2880 = vmatprep.subr.bf16.mxu1 %v11164_v33 }
 0x3ac   :  { %v2357_v57 = vpop.f32.mrb[36].mxu0  ;;  %v2398_v10 = vpop.f32.mrb[36].mxu1 }
 0x3ad   :  { %v2409_v27 = vrot.slane %v2357_v57, 4  ;;  %v2359_v43 = vpop.f32.mrb[37].mxu0  ;;  %v2400_v26 = vpop.f32.mrb[37].mxu1  ;;  %v2411_v32 = vrot.slane %v2398_v10, 4  ;;  %v11166_v57 = vld [vmem:[#allocation33_spill] sm:$0xff] }
 0x3ae   :  { %v2410_v11 = vrot.slane %v2359_v43, 4  ;;  %v2361_v25 = vpop.f32.mrb[38].mxu0  ;;  %v2402_v18 = vpop.f32.mrb[38].mxu1  ;;  %v2412_v33 = vrot.slane %v2400_v26, 4 }
 0x3af   :  { %v2417_v28 = vadd.f32 %v2409_v27, %v9065_v12  ;;  %v2362_v24 = vpop.f32.mrb[39].mxu0  ;;  %v2403_v29 = vpop.f32.mrb[39].mxu1  ;;  %v2419_v55 = vadd.f32 %v2411_v32, %v11165_v22 }
 0x3b0   :  { %v2418_v30 = vadd.f32 %v2410_v11, %v9067_v41  ;;  %v2420_v49 = vadd.f32 %v2412_v33, %v11166_v57 }
 0x3b1   :  { %v6821_v23 = vmul.f32 -1.442695, %v2417_v28  ;;  %v6823_v19 = vmul.f32 -1.442695, %v2419_v55 }
 0x3b2   :  { %v6822_v31 = vmul.f32 -1.442695, %v2418_v30 }
 0x3b3   :  { %7938 = vpow2.f32 %v6821_v23  ;;  %v2441_v23 = vrot.slane %v9377_v46, 6 }
 0x3b4   :  { %7940 = vpow2.f32 %v6822_v31 }
 0x3b5   :  { %7942 = vtanh.f32 %v2420_v49 }
 0x3b6   :  { %7944 = vpow2.f32 %v6823_v19 }
 0x3bd   :  { %v7939_v43 = vpop.eup %7938 }
 0x3be   :  { %v2430_v25 = vadd.f32 1.0, %v7939_v43  ;;  %v7941_v18 = vpop.eup %7940 }
 0x3bf   :  { %v2431_v24 = vadd.f32 1.0, %v7941_v18  ;;  %v7943_v27 = vpop.eup %7942 }
 0x3c0   :  { %7946 = vrcp.f32 %v2430_v25  ;;  %v7945_v28 = vpop.eup %7944 }
 0x3c1   :  { %7948 = vrcp.f32 %v2431_v24  ;;  %v2432_v31 = vadd.f32 1.0, %v7945_v28 }
 0x3c3   :  { %7950 = vrcp.f32 %v2432_v31 }
 0x3ca   :  { %v7947_v29 = vpop.eup %7946 }
 0x3cb   :  { %v2444_v30 = vmul.f32 %v7947_v29, %v7943_v27  ;;  %v7949_v26 = vpop.eup %7948 }
 0x3cc   :  { %v2486_v32 = vpop.f32.mrb[40].mxu0  ;;  %v2527_v10 = vpop.f32.mrb[40].mxu1  ;;  %v2443_v33 = vmul.f32 %v7949_v26, %v2441_v23 }
 0x3cd   :  { %v2538_v55 = vrot.slane %v2486_v32, 4  ;;  %v2488_v11 = vpop.f32.mrb[41].mxu0  ;;  %v2529_v43 = vpop.f32.mrb[41].mxu1  ;;  %v2540_v29 = vrot.slane %v2527_v10, 4 }
 0x3ce   :  { %v2539_v49 = vrot.slane %v2488_v11, 4  ;;  %v2490_v57 = vpop.f32.mrb[42].mxu0  ;;  %v2531_v19 = vpop.f32.mrb[42].mxu1  ;;  %v9551_v25 = vadd.f32 %v2444_v30, %v2443_v33  ;;  %v2541_v23 = vrot.slane %v2529_v43, 4 }
 0x3cf   :  { %v2546_v18 = vadd.f32 %v2538_v55, %v9083_v48  ;;  %v2491_v24 = vpop.f32.mrb[43].mxu0  ;;  %v2532_v22 = vpop.f32.mrb[43].mxu1  ;;  %v2548_v57 = vadd.f32 %v2540_v29, %v9096_v5 }
 0x3d0   :  { %v2547_v46 = vadd.f32 %v2539_v49, %v9087_v50  ;;  %7952 = vtanh.f32 %v9551_v25  ;;  %v7951_v26 = vpop.eup %7950  ;;  %v2549_v30 = vadd.f32 %v2541_v23, %v9101_v45 }
 0x3d1   :  { %v6824_v27 = vmul.f32 -1.442695, %v2546_v18  ;;  %v6826_v33 = vmul.f32 -1.442695, %v2548_v57 }
 0x3d2   :  { %v6825_v28 = vmul.f32 -1.442695, %v2547_v46 }
 0x3d3   :  { %7954 = vpow2.f32 %v6824_v27 }
 0x3d4   :  { %7956 = vpow2.f32 %v6825_v28 }
 0x3d5   :  { %7958 = vtanh.f32 %v2549_v30 }
 0x3d6   :  { %7960 = vpow2.f32 %v6826_v33 }
 0x3da   :  { %v7953_v32 = vpop.eup %7952 }
 0x3db   :  { %v2447_v55 = vmul.f32 %v7953_v32, %v7951_v26 }
 0x3dd   :  { %v7955_v22 = vpop.eup %7954  ;;  %v2706_v11 = vpack.c.bf16 %v2447_v55, %v2447_v55 }
 0x3de   :  { %v2559_v31 = vadd.f32 1.0, %v7955_v22  ;;  %v7957_v49 = vpop.eup %7956 }
 0x3df   :  { %v2560_v19 = vadd.f32 1.0, %v7957_v49  ;;  %v2708_v18 = vrot.slane %v2706_v11, 2  ;;  %v7959_v10 = vpop.eup %7958  ;;  %v11171_v11 = vld [vmem:[#allocation42_spill] sm:$0xff]  ;;  %v11173_v49 = vld [vmem:[#allocation44_spill] sm:$0xff] }
 0x3e0   :  { %7962 = vrcp.f32 %v2559_v31  ;;  %v11170_v31 = vld [vmem:[#allocation41_spill] sm:$0xff] }
 0x3e1   :  { %7964 = vrcp.f32 %v2560_v19  ;;  %2743 = vmatmul.mubr.bf16.vlgmr.msra.gmra.mrb[48].mxu0 %v2708_v18  ;;  %2784 = vmatmul.mubr.bf16.vlgmr.msra.gmra.mrb[48].mxu1 %v2708_v18 }
 0x3e2   :  { %2840 = vmatpush1.bf16.msra.mxu0 %v9104_v1  ;;  %2881 = vmatpush1.bf16.msra.mxu1 %v9107_v2  ;;  %v7961_v1 = vpop.eup %7960  ;;  %v2570_v2 = vrot.slane %v9399_v34, 6 }
 0x3e3   :  { %2841 = vmatprep.subr.bf16.mxu0 %v9110_v4  ;;  %2882 = vmatprep.subr.bf16.mxu1 %v9113_v15  ;;  %v11167_v15 = vld [vmem:[#allocation34_spill] sm:$0xff]  ;;  %v2561_v46 = vadd.f32 1.0, %v7961_v1 }
 0x3e4   :  { %2871 = vmatprep.mubr.bf16.mxu0 %v11046_v51  ;;  %2912 = vmatprep.mubr.bf16.mxu1 %v11046_v51 }
 0x3e5   :  { %7966 = vrcp.f32 %v2561_v46 }
 0x3e6   :  { %2842 = vmatpush1.bf16.msra.mxu0 %v9118_v36  ;;  %2883 = vmatpush1.bf16.msra.mxu1 %v9121_v40  ;;  %v11168_v40 = vld [vmem:[#allocation36_spill] sm:$0xff] }
 0x3e7   :  { %2843 = vmatprep.subr.bf16.mxu0 %v9124_v59  ;;  %2884 = vmatprep.subr.bf16.mxu1 %v9127_v61 }
 0x3ea   :  { %v7963_v43 = vpop.eup %7962  ;;  %2844 = vmatpush1.bf16.msra.mxu0 %v9130_v3  ;;  %2885 = vmatpush1.bf16.msra.mxu1 %v11167_v15 }
 0x3eb   :  { %v2573_v4 = vmul.f32 %v7963_v43, %v7959_v10  ;;  %v7965_v24 = vpop.eup %7964  ;;  %2845 = vmatprep.subr.bf16.mxu0 %v11103_v0  ;;  %2886 = vmatprep.subr.bf16.mxu1 %v11168_v40  ;;  %v11182_v40 = vld [vmem:[#allocation45_spill] sm:$0xff] }
 0x3ec   :  { %v2615_v27 = vpop.f32.mrb[44].mxu0  ;;  %v2656_v36 = vpop.f32.mrb[44].mxu1  ;;  %v2572_v59 = vmul.f32 %v7965_v24, %v2570_v2  ;;  %v11180_v24 = vld [vmem:[#allocation38_spill] sm:$0xff] }
 0x3ed   :  { %v2667_v28 = vrot.slane %v2615_v27, 4  ;;  %v2617_v61 = vpop.f32.mrb[45].mxu0  ;;  %v2658_v29 = vpop.f32.mrb[45].mxu1  ;;  %v2669_v22 = vrot.slane %v2656_v36, 4  ;;  %v11181_v36 = vld [vmem:[#allocation39_spill] sm:$0xff] }
 0x3ee   :  { %v2668_v23 = vrot.slane %v2617_v61, 4  ;;  %v2619_v57 = vpop.f32.mrb[46].mxu0  ;;  %v2660_v34 = vpop.f32.mrb[46].mxu1  ;;  %v9573_v26 = vadd.f32 %v2573_v4, %v2572_v59  ;;  %2846 = vmatpush1.bf16.msra.mxu0 %v11105_v39  ;;  %2887 = vmatpush1.bf16.msra.mxu1 %v11106_v21  ;;  %v11169_v39 = vld [vmem:[#allocation40_spill] sm:$0xff]  ;;  %v2670_v21 = vrot.slane %v2658_v29, 4  ;;  %v11183_v61 = vld [vmem:[#allocation27_spill] sm:$0xff] }
 0x3ef   :  { %v2675_v3 = vadd.f32 %v2667_v28, %v9144_v7  ;;  %v2620_v30 = vpop.f32.mrb[47].mxu0  ;;  %v2661_v32 = vpop.f32.mrb[47].mxu1  ;;  %2847 = vmatprep.subr.bf16.mxu0 %v11107_v42  ;;  %2888 = vmatprep.subr.bf16.mxu1 %v9159_v53  ;;  %v2677_v42 = vadd.f32 %v2669_v22, %v11170_v31  ;;  %v11172_v53 = vld [vmem:[#allocation43_spill] sm:$0xff]  ;;  %v11184_v29 = vld [vmem:[#allocation46_spill] sm:$0xff]  ;;  %v11187_v57 = vld [vmem:[#allocation49_spill] sm:$0xff] }
 0x3f0   :  { %v2676_v0 = vadd.f32 %v2668_v23, %v9154_v16  ;;  %7968 = vtanh.f32 %v9573_v26  ;;  %v7967_v19 = vpop.eup %7966  ;;  %v11186_v23 = vld [vmem:[#allocation48_spill] sm:$0xff]  ;;  %v11188_v34 = vld [vmem:[#allocation50_spill] sm:$0xff]  ;;  %v11191_v32 = vld [vmem:[#allocation91_spill] sm:$0xff] }
 0x3f1   :  { %v6827_v33 = vmul.f32 -1.442695, %v2675_v3  ;;  %v6829_v18 = vmul.f32 -1.442695, %v2677_v42  ;;  %v11189_v3 = vld [vmem:[#allocation89_spill] sm:$0xff]  ;;  %v11190_v30 = vld [vmem:[#allocation90_spill] sm:$0xff] }
 0x3f2   :  { %v6828_v55 = vmul.f32 -1.442695, %v2676_v0  ;;  %2848 = vmatpush1.bf16.msra.mxu0 %v9167_v56  ;;  %2889 = vmatpush1.bf16.msra.mxu1 %v9170_v54  ;;  %v2678_v56 = vadd.f32 %v2670_v21, %v11113_v20  ;;  %v11192_v0 = vld [vmem:[#allocation92_spill] sm:$0xff]  ;;  %v11195_v21 = vld [vmem:[#allocation95_spill] sm:$0xff] }
 0x3f3   :  { %7970 = vpow2.f32 %v6827_v33  ;;  %2849 = vmatprep.subr.bf16.mxu0 %v9173_v63  ;;  %2890 = vmatprep.subr.bf16.mxu1 %v11169_v39  ;;  %v11193_v33 = vld [vmem:[#allocation93_spill] sm:$0xff]  ;;  %v11196_v42 = vld [vmem:[#allocation96_spill] sm:$0xff] }
 0x3f4   :  { %7972 = vpow2.f32 %v6828_v55  ;;  %v11194_v55 = vld [vmem:[#allocation94_spill] sm:$0xff] }
 0x3f5   :  { %7974 = vtanh.f32 %v2678_v56 }
 0x3f6   :  { %2850 = vmatpush1.bf16.msra.mxu0 %v11171_v11  ;;  %2891 = vmatpush1.bf16.msra.mxu1 %v11172_v53  ;;  %7976 = vpow2.f32 %v6829_v18  ;;  %v11200_v18 = vld [vmem:[#allocation56_spill] sm:$0xff] }
 0x3f7   :  { %2851 = vmatprep.subr.bf16.mxu0 %v11173_v49  ;;  %2892 = vmatprep.subr.bf16.mxu1 %v11112_v38  ;;  %v11197_v49 = vld [vmem:[#allocation97_spill] sm:$0xff] }
 0x3fa   :  { %v7969_v54 = vpop.eup %7968  ;;  %2852 = vmatpush1.bf16.msra.mxu0 %v11114_v9  ;;  %2893 = vmatpush1.bf16.msra.mxu1 %v11115_v37  ;;  %v11174_v37 = vld [vmem:[#allocation51_spill] sm:$0xff] }
 0x3fb   :  { %2853 = vmatprep.subr.bf16.mxu0 %v11116_v62  ;;  %2894 = vmatprep.subr.bf16.mxu1 %v11117_v52  ;;  %v2576_v63 = vmul.f32 %v7969_v54, %v7967_v19  ;;  %v11175_v62 = vld [vmem:[#allocation52_spill] sm:$0xff]  ;;  %v11179_v52 = vld [vmem:[#allocation37_spill] sm:$0xff]  ;;  %v11198_v19 = vld [vmem:[#allocation98_spill] sm:$0xff] }
 0x3fc   :  { %v11199_v54 = vld [vmem:[#allocation55_spill] sm:$0xff] }
 0x3fd   :  { %v7971_v10 = vpop.eup %7970  ;;  %v2835_v43 = vpack.c.bf16 %v2576_v63, %v2576_v63  ;;  %v11201_v63 = vld [vmem:[#allocation57_spill] sm:$0xff] }
 0x3fe   :  { %v2688_v1 = vadd.f32 1.0, %v7971_v10  ;;  %v7973_v2 = vpop.eup %7972  ;;  %2854 = vmatpush1.bf16.msra.mxu0 %v9209_v60  ;;  %2895 = vmatpush1.bf16.msra.mxu1 %v9212_v58  ;;  %v11176_v60 = vld [vmem:[#allocation53_spill] sm:$0xff]  ;;  %v11178_v58 = vld [vmem:[#allocation35_spill] sm:$0xff]  ;;  %v11202_v10 = vld [vmem:[#allocation58_spill] sm:$0xff] }
 0x3ff   :  { %v2689_v38 = vadd.f32 1.0, %v7973_v2  ;;  %v2837_v9 = vrot.slane %v2835_v43, 2  ;;  %2968 = vmatprep.subr.bf16.mxu0 %v9215_v6  ;;  %3009 = vmatprep.subr.bf16.mxu1 %v9218_v13  ;;  %v11177_v6 = vld [vmem:[#allocation54_spill] sm:$0xff]  ;;  %v7975_v13 = vpop.eup %7974  ;;  %v11204_v43 = vld [vmem:[#allocation60_spill] sm:$0xff]  ;;  %v11205_v2 = vld [vmem:[#allocation61_spill] sm:$0xff] }
 0x400   :  { %7978 = vrcp.f32 %v2688_v1  ;;  %v11203_v1 = vld [vmem:[#allocation59_spill] sm:$0xff] }
 0x401   :  { %7980 = vrcp.f32 %v2689_v38  ;;  %2872 = vmatmul.mubr.bf16.vlgmr.msra.gmra.mrb[52].mxu0 %v2837_v9  ;;  %2913 = vmatmul.mubr.bf16.vlgmr.msra.gmra.mrb[52].mxu1 %v2837_v9  ;;  %v11206_v38 = vld [vmem:[#allocation62_spill] sm:$0xff]  ;;  %v11207_v9 = vld [vmem:[#allocation63_spill] sm:$0xff] }
 0x402   :  { %2969 = vmatpush1.bf16.msra.mxu0 %v9221_v47  ;;  %3010 = vmatpush1.bf16.msra.mxu1 %v11118_v35  ;;  %v7977_v47 = vpop.eup %7976  ;;  %v2699_v35 = vrot.slane %v9453_v44, 6  ;;  %v11185_v44 = vld [vmem:[#allocation47_spill] sm:$0xff] }
 0x403   :  { %2970 = vmatprep.subr.bf16.mxu0 %v11174_v37  ;;  %3011 = vmatprep.subr.bf16.mxu1 %v11175_v62  ;;  %v2690_v27 = vadd.f32 1.0, %v7977_v47  ;;  %v11208_v37 = vld [vmem:[#allocation64_spill] sm:$0xff]  ;;  %v11209_v62 = vld [vmem:[#allocation65_spill] sm:$0xff] }
 0x404   :  { %3000 = vmatprep.mubr.bf16.mxu0 %v11046_v51  ;;  %3041 = vmatprep.mubr.bf16.mxu1 %v11046_v51  ;;  %v11213_v47 = vld [vmem:[#allocation69_spill] sm:$0xff] }
 0x405   :  { %7982 = vrcp.f32 %v2690_v27  ;;  %v11218_v27 = vld [vmem:[#allocation74_spill] sm:$0xff] }
 0x406   :  { %2971 = vmatpush1.bf16.msra.mxu0 %v11176_v60  ;;  %3012 = vmatpush1.bf16.msra.mxu1 %v11177_v6  ;;  %v11210_v60 = vld [vmem:[#allocation66_spill] sm:$0xff]  ;;  %v11211_v6 = vld [vmem:[#allocation67_spill] sm:$0xff] }
 0x407   :  { %2972 = vmatprep.subr.bf16.mxu0 %v11178_v58  ;;  %3013 = vmatprep.subr.bf16.mxu1 %v11179_v52 }
 0x40a   :  { %v7979_v4 = vpop.eup %7978  ;;  %2973 = vmatpush1.bf16.msra.mxu0 %v11180_v24  ;;  %3014 = vmatpush1.bf16.msra.mxu1 %v9444_v8 }
 0x40b   :  { %v2702_v15 = vmul.f32 %v7979_v4, %v7975_v13  ;;  %v7981_v46 = vpop.eup %7980  ;;  %2974 = vmatprep.subr.bf16.mxu0 %v11181_v36  ;;  %3015 = vmatprep.subr.bf16.mxu1 %v11182_v40  ;;  %v11212_v13 = vld [vmem:[#allocation68_spill] sm:$0xff]  ;;  %v11214_v4 = vld [vmem:[#allocation70_spill] sm:$0xff] }
 0x40c   :  { %v2701_v59 = vmul.f32 %v7981_v46, %v2699_v35  ;;  %v11215_v35 = vld [vmem:[#allocation71_spill] sm:$0xff]  ;;  %v11217_v46 = vld [vmem:[#allocation73_spill] sm:$0xff] }
 0x40e   :  { %v9615_v28 = vadd.f32 %v2702_v15, %v2701_v59  ;;  %2975 = vmatpush1.bf16.msra.mxu0 %v11183_v61  ;;  %3016 = vmatpush1.bf16.msra.mxu1 %v11184_v29  ;;  %v11216_v15 = vld [vmem:[#allocation72_spill] sm:$0xff]  ;;  %v11219_v59 = vld [vmem:[#allocation75_spill] sm:$0xff] }
 0x40f   :  { %2976 = vmatprep.subr.bf16.mxu0 %v11185_v44  ;;  %3017 = vmatprep.subr.bf16.mxu1 %v11186_v23  ;;  %v7983_v22 = vpop.eup %7982 }
 0x410   :  { %7984 = vtanh.f32 %v9615_v28 }
 0x412   :  { %2977 = vmatpush1.bf16.msra.mxu0 %v11187_v57  ;;  %3018 = vmatpush1.bf16.msra.mxu1 %v11188_v34 }
 0x413   :  { %2978 = vmatprep.subr.bf16.mxu0 %v11189_v3  ;;  %3019 = vmatprep.subr.bf16.mxu1 %v11190_v30 }
 0x416   :  { %2979 = vmatpush1.bf16.msra.mxu0 %v11191_v32  ;;  %3020 = vmatpush1.bf16.msra.mxu1 %v11192_v0 }
 0x417   :  { %2980 = vmatprep.subr.bf16.mxu0 %v11193_v33  ;;  %3021 = vmatprep.subr.bf16.mxu1 %v11194_v55 }
 0x41a   :  { %v7985_v39 = vpop.eup %7984  ;;  %2981 = vmatpush1.bf16.msra.mxu0 %v11195_v21  ;;  %3022 = vmatpush1.bf16.msra.mxu1 %v9495_v14 }
 0x41b   :  { %2982 = vmatprep.subr.bf16.mxu0 %v9498_v17  ;;  %3023 = vmatprep.subr.bf16.mxu1 %v11196_v42  ;;  %v2705_v11 = vmul.f32 %v7985_v39, %v7983_v22  ;;  %v11220_v22 = vld [vmem:[#allocation76_spill] sm:$0xff]  ;;  %v11221_v39 = vld [vmem:[#allocation77_spill] sm:$0xff] }
 0x41d   :  { %v2964_v53 = vpack.c.bf16 %v2705_v11, %v2705_v11  ;;  %v11222_v11 = vld [vmem:[#allocation78_spill] sm:$0xff] }
 0x41e   :  { %2983 = vmatpush1.bf16.msra.mxu0 %v11197_v49  ;;  %3024 = vmatpush1.bf16.msra.mxu1 %v11198_v19 }
 0x41f   :  { %v2966_v56 = vrot.slane %v2964_v53, 2  ;;  %3097 = vmatprep.subr.bf16.mxu0 %v11199_v54  ;;  %3138 = vmatprep.subr.bf16.mxu1 %v11200_v18  ;;  %v11223_v53 = vld [vmem:[#allocation79_spill] sm:$0xff]  ;;  %v11225_v54 = vld [vmem:[#allocation81_spill] sm:$0xff]  ;;  %v11226_v18 = vld [vmem:[#allocation82_spill] sm:$0xff] }
 0x421   :  { %3001 = vmatmul.mubr.bf16.vlgmr.msra.gmra.mrb[56].mxu0 %v2966_v56  ;;  %3042 = vmatmul.mubr.bf16.vlgmr.msra.gmra.mrb[56].mxu1 %v2966_v56  ;;  %v11224_v56 = vld [vmem:[#allocation80_spill] sm:$0xff] }
 0x422   :  { %3098 = vmatpush1.bf16.msra.mxu0 %v11201_v63  ;;  %3139 = vmatpush1.bf16.msra.mxu1 %v11202_v10  ;;  %v11227_v63 = vld [vmem:[#allocation83_spill] sm:$0xff]  ;;  %v11228_v10 = vld [vmem:[#allocation84_spill] sm:$0xff] }
 0x423   :  { %3099 = vmatprep.subr.bf16.mxu0 %v11203_v1  ;;  %3140 = vmatprep.subr.bf16.mxu1 %v11204_v43  ;;  %v11229_v1 = vld [vmem:[#allocation85_spill] sm:$0xff]  ;;  %v11230_v43 = vld [vmem:[#allocation86_spill] sm:$0xff] }
 0x424   :  { %3129 = vmatprep.mubr.bf16.mxu0 %v11046_v51  ;;  %3170 = vmatprep.mubr.bf16.mxu1 %v11046_v51 }
 0x426   :  { %3100 = vmatpush1.bf16.msra.mxu0 %v11205_v2  ;;  %3141 = vmatpush1.bf16.msra.mxu1 %v11206_v38  ;;  %v11231_v2 = vld [vmem:[#allocation87_spill] sm:$0xff]  ;;  %v11232_v38 = vld [vmem:[#allocation88_spill] sm:$0xff] }
 0x427   :  { %3101 = vmatprep.subr.bf16.mxu0 %v11207_v9  ;;  %3142 = vmatprep.subr.bf16.mxu1 %v11208_v37 }
 0x42a   :  { %3102 = vmatpush1.bf16.msra.mxu0 %v11209_v62  ;;  %3143 = vmatpush1.bf16.msra.mxu1 %v11210_v60 }
 0x42b   :  { %3103 = vmatprep.subr.bf16.mxu0 %v11211_v6  ;;  %3144 = vmatprep.subr.bf16.mxu1 %v11212_v13 }
 0x42e   :  { %3104 = vmatpush1.bf16.msra.mxu0 %v11213_v47  ;;  %3145 = vmatpush1.bf16.msra.mxu1 %v11214_v4 }
 0x42f   :  { %3105 = vmatprep.subr.bf16.mxu0 %v11215_v35  ;;  %3146 = vmatprep.subr.bf16.mxu1 %v11216_v15 }
 0x432   :  { %3106 = vmatpush1.bf16.msra.mxu0 %v11217_v46  ;;  %3147 = vmatpush1.bf16.msra.mxu1 %v11218_v27 }
 0x433   :  { %3107 = vmatprep.subr.bf16.mxu0 %v11219_v59  ;;  %3148 = vmatprep.subr.bf16.mxu1 %v11220_v22 }
 0x436   :  { %3108 = vmatpush1.bf16.msra.mxu0 %v11221_v39  ;;  %3149 = vmatpush1.bf16.msra.mxu1 %v11222_v11 }
 0x437   :  { %3109 = vmatprep.subr.bf16.mxu0 %v11223_v53  ;;  %3150 = vmatprep.subr.bf16.mxu1 %v11224_v56  ;;  %v11233_v53 = vld [vmem:[#allocation32_spill] sm:$0xff] }
 0x43a   :  { %3110 = vmatpush1.bf16.msra.mxu0 %v11225_v54  ;;  %3151 = vmatpush1.bf16.msra.mxu1 %v11226_v18  ;;  %v11234_v54 = vld [vmem:[#allocation33_spill] sm:$0xff] }
 0x43b   :  { %3111 = vmatprep.subr.bf16.mxu0 %v11227_v63  ;;  %3152 = vmatprep.subr.bf16.mxu1 %v11228_v10 }
 0x43e   :  { %3112 = vmatpush1.bf16.msra.mxu0 %v11229_v1  ;;  %3153 = vmatpush1.bf16.msra.mxu1 %v11230_v43 }
 0x43f   :  { %3214 = vmatprep.subr.bf16.mxu0 %v11231_v2  ;;  %3255 = vmatprep.subr.bf16.mxu1 %v11232_v38 }
 0x4b4   :  { %v2744_v9 = vpop.f32.mrb[48].mxu0  ;;  %v2785_v37 = vpop.f32.mrb[48].mxu1 }
 0x4b5   :  { %v2796_v62 = vrot.slane %v2744_v9, 2  ;;  %v2746_v60 = vpop.f32.mrb[49].mxu0  ;;  %v2787_v6 = vpop.f32.mrb[49].mxu1  ;;  %v2798_v39 = vrot.slane %v2785_v37, 2  ;;  %v2828_v9 = vrot.slane %v9551_v25, 6 }
 0x4b6   :  { %v2797_v13 = vrot.slane %v2746_v60, 2  ;;  %v2748_v47 = vpop.f32.mrb[50].mxu0  ;;  %v2789_v4 = vpop.f32.mrb[50].mxu1  ;;  %v2799_v11 = vrot.slane %v2787_v6, 2 }
 0x4b7   :  { %v2804_v35 = vadd.f32 %v2796_v62, %v9065_v12  ;;  %v2749_v15 = vpop.f32.mrb[51].mxu0  ;;  %v2790_v46 = vpop.f32.mrb[51].mxu1  ;;  %v2806_v56 = vadd.f32 %v2798_v39, %v11233_v53 }
 0x4b8   :  { %v2805_v27 = vadd.f32 %v2797_v13, %v9067_v41  ;;  %v2807_v18 = vadd.f32 %v2799_v11, %v11234_v54 }
 0x4b9   :  { %v6830_v59 = vmul.f32 -1.442695, %v2804_v35  ;;  %v6832_v63 = vmul.f32 -1.442695, %v2806_v56 }
 0x4ba   :  { %v6831_v22 = vmul.f32 -1.442695, %v2805_v27 }
 0x4bb   :  { %7986 = vpow2.f32 %v6830_v59 }
 0x4bc   :  { %7988 = vpow2.f32 %v6831_v22 }
 0x4bd   :  { %7990 = vtanh.f32 %v2807_v18 }
 0x4be   :  { %7992 = vpow2.f32 %v6832_v63 }
 0x4c5   :  { %v7987_v10 = vpop.eup %7986 }
 0x4c6   :  { %v2817_v1 = vadd.f32 1.0, %v7987_v10  ;;  %v7989_v43 = vpop.eup %7988 }
 0x4c7   :  { %v2818_v12 = vadd.f32 1.0, %v7989_v43  ;;  %v7991_v41 = vpop.eup %7990 }
 0x4c8   :  { %7994 = vrcp.f32 %v2817_v1  ;;  %v7993_v2 = vpop.eup %7992 }
 0x4c9   :  { %7996 = vrcp.f32 %v2818_v12  ;;  %v2819_v60 = vadd.f32 1.0, %v7993_v2 }
 0x4cb   :  { %7998 = vrcp.f32 %v2819_v60  ;;  %v9684_v60 = vld [vmem:[#allocation5 + $0x100] ss:$16 sps:$4 sm:$0xff]  }
 0x4d2   :  { %v7995_v38 = vpop.eup %7994 }
 0x4d3   :  { %v2831_v37 = vmul.f32 %v7995_v38, %v7991_v41  ;;  %v7997_v62 = vpop.eup %7996 }
 0x4d4   :  { %v2873_v6 = vpop.f32.mrb[52].mxu0  ;;  %v2914_v13 = vpop.f32.mrb[52].mxu1  ;;  %v2830_v47 = vmul.f32 %v7997_v62, %v2828_v9 }
 0x4d5   :  { %v2925_v4 = vrot.slane %v2873_v6, 2  ;;  %v2875_v35 = vpop.f32.mrb[53].mxu0  ;;  %v2916_v15 = vpop.f32.mrb[53].mxu1  ;;  %v2927_v18 = vrot.slane %v2914_v13, 2  ;;  %v9693_v6 = vld [vmem:[#allocation5 + $0x12c] ss:$16 sps:$4 sm:$0xff]  }
 0x4d6   :  { %v2926_v46 = vrot.slane %v2875_v35, 2  ;;  %v2877_v27 = vpop.f32.mrb[54].mxu0  ;;  %v2918_v59 = vpop.f32.mrb[54].mxu1  ;;  %v9677_v22 = vadd.f32 %v2831_v37, %v2830_v47  ;;  %v2928_v63 = vrot.slane %v2916_v15, 2  ;;  %v9698_v13 = vld [vmem:[#allocation5 + $0x120] ss:$16 sps:$4 sm:$0xff]  }
 0x4d7   :  { %v2933_v39 = vadd.f32 %v2925_v4, %v9083_v48  ;;  %v2878_v11 = vpop.f32.mrb[55].mxu0  ;;  %v2919_v53 = vpop.f32.mrb[55].mxu1  ;;  %v2935_v10 = vadd.f32 %v2927_v18, %v9096_v5  ;;  %v9687_v5 = vld [vmem:[#allocation5 + $0x108] ss:$16 sps:$4 sm:$0xff]   ;;  %v9704_v35 = vld [vmem:[#allocation5 + $0x144] ss:$16 sps:$4 sm:$0xff]  }
 0x4d8   :  { %v2934_v25 = vadd.f32 %v2926_v46, %v9087_v50  ;;  %8000 = vtanh.f32 %v9677_v22  ;;  %v7999_v1 = vpop.eup %7998  ;;  %v2936_v43 = vadd.f32 %v2928_v63, %v9101_v45  ;;  %v9690_v45 = vld [vmem:[#allocation5 + $0x124] ss:$16 sps:$4 sm:$0xff]   ;;  %v9701_v47 = vld [vmem:[#allocation5 + $0x128] ss:$16 sps:$4 sm:$0xff]   ;;  %v9707_v15 = vld [vmem:[#allocation5 + $0x14c] ss:$16 sps:$4 sm:$0xff]  }
 0x4d9   :  { %v6833_v56 = vmul.f32 -1.442695, %v2933_v39  ;;  %v6835_v48 = vmul.f32 -1.442695, %v2935_v10  ;;  %v2957_v59 = vrot.slane %v9573_v26, 6 }
 0x4da   :  { %v6834_v54 = vmul.f32 -1.442695, %v2934_v25  ;;  %v9711_v11 = vld [vmem:[#allocation5 + $0x140] ss:$16 sps:$4 sm:$0xff]   ;;  %v9714_v53 = vld [vmem:[#allocation5 + $0x148] ss:$16 sps:$4 sm:$0xff]  }
 0x4db   :  { %8002 = vpow2.f32 %v6833_v56  ;;  %v9717_v63 = vld [vmem:[#allocation5 + $0x164] ss:$16 sps:$4 sm:$0xff]   ;;  %v9720_v10 = vld [vmem:[#allocation5 + $0x16c] ss:$16 sps:$4 sm:$0xff]  }
 0x4dc   :  { %8004 = vpow2.f32 %v6834_v54 }
 0x4dd   :  { %8006 = vtanh.f32 %v2936_v43 }
 0x4de   :  { %8008 = vpow2.f32 %v6835_v48 }
 0x4e2   :  { %v8001_v12 = vpop.eup %8000 }
 0x4e3   :  { %v2834_v41 = vmul.f32 %v8001_v12, %v7999_v1 }
 0x4e5   :  { %v8003_v2 = vpop.eup %8002  ;;  %v3093_v50 = vpack.c.bf16 %v2834_v41, %v2834_v41 }
 0x4e6   :  { %v2946_v38 = vadd.f32 1.0, %v8003_v2  ;;  %v8005_v9 = vpop.eup %8004 }
 0x4e7   :  { %v2947_v37 = vadd.f32 1.0, %v8005_v9  ;;  %v3095_v62 = vrot.slane %v3093_v50, 3  ;;  %v8007_v4 = vpop.eup %8006  ;;  %v9726_v9 = vld [vmem:[#allocation5 + $0x160] ss:$16 sps:$4 sm:$0xff]  }
 0x4e8   :  { %8010 = vrcp.f32 %v2946_v38  ;;  %v8009_v46 = vpop.eup %8008 }
 0x4e9   :  { %8012 = vrcp.f32 %v2947_v37  ;;  %3130 = vmatmul.mubr.bf16.vlgmr.msra.gmra.mrb[60].mxu0 %v3095_v62  ;;  %3171 = vmatmul.mubr.bf16.vlgmr.msra.gmra.mrb[60].mxu1 %v3095_v62  ;;  %v2948_v56 = vadd.f32 1.0, %v8009_v46  ;;  %v9729_v37 = vld [vmem:[#allocation5 + $0x168] ss:$16 sps:$4 sm:$0xff]  }
 0x4ea   :  { %3215 = vmatpush1.bf16.msra.mxu0 %v9684_v60  ;;  %3256 = vmatpush1.bf16.msra.mxu1 %v9687_v5 }
 0x4eb   :  { %3216 = vmatprep.subr.bf16.mxu0 %v9690_v45  ;;  %3257 = vmatprep.subr.bf16.mxu1 %v9693_v6  ;;  %8014 = vrcp.f32 %v2948_v56  ;;  %v9743_v56 = vld [vmem:[#allocation5 + $0x188] ss:$16 sps:$4 sm:$0xff]  }
 0x4ec   :  { %3246 = vmatprep.mubr.bf16.mxu0 %v11046_v51  ;;  %3287 = vmatprep.mubr.bf16.mxu1 %v11046_v51 }
 0x4ee   :  { %3217 = vmatpush1.bf16.msra.mxu0 %v9698_v13  ;;  %3258 = vmatpush1.bf16.msra.mxu1 %v9701_v47 }
 0x4ef   :  { %3218 = vmatprep.subr.bf16.mxu0 %v9704_v35  ;;  %3259 = vmatprep.subr.bf16.mxu1 %v9707_v15 }
 0x4f2   :  { %v8011_v27 = vpop.eup %8010  ;;  %3219 = vmatpush1.bf16.msra.mxu0 %v9711_v11  ;;  %3260 = vmatpush1.bf16.msra.mxu1 %v9714_v53 }
 0x4f3   :  { %v2960_v39 = vmul.f32 %v8011_v27, %v8007_v4  ;;  %v8013_v25 = vpop.eup %8012  ;;  %3220 = vmatprep.subr.bf16.mxu0 %v9717_v63  ;;  %3261 = vmatprep.subr.bf16.mxu1 %v9720_v10  ;;  %v9733_v27 = vld [vmem:[#allocation5 + $0x184] ss:$16 sps:$4 sm:$0xff]  }
 0x4f4   :  { %v3002_v54 = vpop.f32.mrb[56].mxu0  ;;  %v3043_v18 = vpop.f32.mrb[56].mxu1  ;;  %v2959_v26 = vmul.f32 %v8013_v25, %v2957_v59  ;;  %v9736_v59 = vld [vmem:[#allocation5 + $0x18c] ss:$16 sps:$4 sm:$0xff]  }
 0x4f5   :  { %v3054_v1 = vrot.slane %v3002_v54, 2  ;;  %v3004_v43 = vpop.f32.mrb[57].mxu0  ;;  %v3045_v12 = vpop.f32.mrb[57].mxu1  ;;  %v3056_v25 = vrot.slane %v3043_v18, 2  ;;  %v9740_v54 = vld [vmem:[#allocation5 + $0x180] ss:$16 sps:$4 sm:$0xff]  }
 0x4f6   :  { %v3055_v48 = vrot.slane %v3004_v43, 2  ;;  %v3006_v41 = vpop.f32.mrb[58].mxu0  ;;  %v3047_v2 = vpop.f32.mrb[58].mxu1  ;;  %v9723_v38 = vadd.f32 %v2960_v39, %v2959_v26  ;;  %3221 = vmatpush1.bf16.msra.mxu0 %v9726_v9  ;;  %3262 = vmatpush1.bf16.msra.mxu1 %v9729_v37  ;;  %v9749_v26 = vld [vmem:[#allocation5 + $0x1ac] ss:$16 sps:$4 sm:$0xff]  }
 0x4f7   :  { %v3062_v50 = vadd.f32 %v3054_v1, %v9144_v7  ;;  %v3007_v62 = vpop.f32.mrb[59].mxu0  ;;  %v3048_v4 = vpop.f32.mrb[59].mxu1  ;;  %3222 = vmatprep.subr.bf16.mxu0 %v9733_v27  ;;  %3263 = vmatprep.subr.bf16.mxu1 %v9736_v59  ;;  %v3057_v1 = vrot.slane %v3045_v12, 2  ;;  %v3064_v18 = vadd.f32 %v3056_v25, %v11170_v31  ;;  %v9753_v43 = vld [vmem:[#allocation5 + $0x1a0] ss:$16 sps:$4 sm:$0xff]  }
 0x4f8   :  { %v3063_v46 = vadd.f32 %v3055_v48, %v9154_v16  ;;  %8016 = vtanh.f32 %v9723_v38  ;;  %v9746_v16 = vld [vmem:[#allocation5 + $0x1a4] ss:$16 sps:$4 sm:$0xff]   ;;  %v9756_v48 = vld [vmem:[#allocation5 + $0x1a8] ss:$16 sps:$4 sm:$0xff]   ;;  %v9762_v2 = vld [vmem:[#allocation5 + $0x1cc] ss:$16 sps:$4 sm:$0xff]  }
 0x4f9   :  { %v6836_v7 = vmul.f32 -1.442695, %v3062_v50  ;;  %11235 = vst [vmem:[#allocation34_spill] sm:$0xff] %v9756_v48  ;;  %v9759_v41 = vld [vmem:[#allocation5 + $0x1c4] ss:$16 sps:$4 sm:$0xff]   ;;  %11237 = vst [vmem:[#allocation40_spill] sm:$0xff] %v9762_v2  ;;  %v8015_v50 = vpop.eup %8014  ;;  %v3065_v12 = vadd.f32 %v3057_v1, %v11113_v20 }
 0x4fa   :  { %v6837_v39 = vmul.f32 -1.442695, %v3063_v46  ;;  %3223 = vmatpush1.bf16.msra.mxu0 %v9740_v54  ;;  %3264 = vmatpush1.bf16.msra.mxu1 %v9743_v56  ;;  %11236 = vst [vmem:[#allocation36_spill] sm:$0xff] %v9759_v41  ;;  %v6838_v62 = vmul.f32 -1.442695, %v3064_v18 }
 0x4fb   :  { %8018 = vpow2.f32 %v6836_v7  ;;  %3224 = vmatprep.subr.bf16.mxu0 %v9746_v16  ;;  %3265 = vmatprep.subr.bf16.mxu1 %v9749_v26  ;;  %v9766_v4 = vld [vmem:[#allocation5 + $0x1c0] ss:$16 sps:$4 sm:$0xff]   ;;  %v9769_v46 = vld [vmem:[#allocation5 + $0x1c8] ss:$16 sps:$4 sm:$0xff]   ;;  %v9772_v7 = vld [vmem:[#allocation5 + $0x1e4] ss:$16 sps:$4 sm:$0xff]  }
 0x4fc   :  { %8020 = vpow2.f32 %v6837_v39  ;;  %11238 = vst [vmem:[#allocation41_spill] sm:$0xff] %v9766_v4  ;;  %11239 = vst [vmem:[#allocation42_spill] sm:$0xff] %v9769_v46  ;;  %v9775_v39 = vld [vmem:[#allocation5 + $0x1ec] ss:$16 sps:$4 sm:$0xff]  }
 0x4fd   :  { %11240 = vst [vmem:[#allocation43_spill] sm:$0xff] %v9772_v7  ;;  %8022 = vtanh.f32 %v3065_v12  ;;  %v9790_v12 = vld [vmem:[#allocation5 + $0x200] ss:$16 sps:$4 sm:$0xff]  }
 0x4fe   :  { %3225 = vmatpush1.bf16.msra.mxu0 %v9753_v43  ;;  %3266 = vmatpush1.bf16.msra.mxu1 %v9756_v48  ;;  %8024 = vpow2.f32 %v6838_v62  ;;  %v9784_v48 = vld [vmem:[#allocation5 + $0x204] ss:$16 sps:$4 sm:$0xff]   ;;  %11242 = vst [vmem:[#allocation51_spill] sm:$0xff] %v9790_v12  ;;  %v9799_v62 = vld [vmem:[#allocation5 + $0x22c] ss:$16 sps:$4 sm:$0xff]  }
 0x4ff   :  { %3226 = vmatprep.subr.bf16.mxu0 %v9759_v41  ;;  %3267 = vmatprep.subr.bf16.mxu1 %v9762_v2  ;;  %11245 = vst [vmem:[#allocation54_spill] sm:$0xff] %v9799_v62 }
 0x502   :  { %v8017_v31 = vpop.eup %8016  ;;  %3227 = vmatpush1.bf16.msra.mxu0 %v9766_v4  ;;  %3268 = vmatpush1.bf16.msra.mxu1 %v9769_v46  ;;  %v9778_v4 = vld [vmem:[#allocation5 + $0x1e0] ss:$16 sps:$4 sm:$0xff]   ;;  %v9781_v46 = vld [vmem:[#allocation5 + $0x1e8] ss:$16 sps:$4 sm:$0xff]  }
 0x503   :  { %3228 = vmatprep.subr.bf16.mxu0 %v9772_v7  ;;  %3269 = vmatprep.subr.bf16.mxu1 %v9775_v39  ;;  %v2963_v25 = vmul.f32 %v8017_v31, %v8015_v50  ;;  %v9787_v50 = vld [vmem:[#allocation5 + $0x20c] ss:$16 sps:$4 sm:$0xff]   ;;  %v9793_v31 = vld [vmem:[#allocation5 + $0x208] ss:$16 sps:$4 sm:$0xff]  }
 0x504   :  { %11241 = vst [vmem:[#allocation44_spill] sm:$0xff] %v9787_v50  ;;  %11243 = vst [vmem:[#allocation52_spill] sm:$0xff] %v9793_v31 }
 0x505   :  { %v8019_v20 = vpop.eup %8018  ;;  %v3210_v18 = vpack.c.bf16 %v2963_v25, %v2963_v25 }
 0x506   :  { %v3075_v1 = vadd.f32 1.0, %v8019_v20  ;;  %v8021_v2 = vpop.eup %8020  ;;  %3229 = vmatpush1.bf16.msra.mxu0 %v9778_v4  ;;  %3270 = vmatpush1.bf16.msra.mxu1 %v9781_v46 }
 0x507   :  { %v3076_v7 = vadd.f32 1.0, %v8021_v2  ;;  %v3212_v41 = vrot.slane %v3210_v18, 3  ;;  %3331 = vmatprep.subr.bf16.mxu0 %v9784_v48  ;;  %3372 = vmatprep.subr.bf16.mxu1 %v9787_v50  ;;  %v9796_v2 = vld [vmem:[#allocation5 + $0x224] ss:$16 sps:$4 sm:$0xff]   ;;  %v8023_v25 = vpop.eup %8022  ;;  %v3086_v18 = vrot.slane %v9615_v28, 6 }
 0x508   :  { %8026 = vrcp.f32 %v3075_v1  ;;  %11244 = vst [vmem:[#allocation53_spill] sm:$0xff] %v9796_v2  ;;  %v8025_v20 = vpop.eup %8024  ;;  %v9841_v28 = vld [vmem:[#allocation5 + $0xc] ss:$16 sps:$4 sm:$0xff]  }
 0x509   :  { %8028 = vrcp.f32 %v3076_v7  ;;  %3247 = vmatmul.mubr.bf16.vlgmr.msra.gmra.mrb[64].mxu0 %v3212_v41  ;;  %3288 = vmatmul.mubr.bf16.vlgmr.msra.gmra.mrb[64].mxu1 %v3212_v41  ;;  %v9804_v41 = vld [vmem:[#allocation5 + $0x220] ss:$16 sps:$4 sm:$0xff]   ;;  %v9807_v7 = vld [vmem:[#allocation5 + $0x228] ss:$16 sps:$4 sm:$0xff]   ;;  %11249 = vst [vmem:[#allocation39_spill] sm:$0xff] %v9841_v28 }
 0x50a   :  { %3332 = vmatpush1.bf16.msra.mxu0 %v9790_v12  ;;  %3373 = vmatpush1.bf16.msra.mxu1 %v9793_v31  ;;  %11246 = vst [vmem:[#allocation35_spill] sm:$0xff] %v9804_v41  ;;  %11247 = vst [vmem:[#allocation37_spill] sm:$0xff] %v9807_v7 }
 0x50b   :  { %3333 = vmatprep.subr.bf16.mxu0 %v9796_v2  ;;  %3374 = vmatprep.subr.bf16.mxu1 %v9799_v62 }
 0x50c   :  { %3363 = vmatprep.mubr.bf16.mxu0 %v11046_v51  ;;  %3404 = vmatprep.mubr.bf16.mxu1 %v11046_v51 }
 0x50e   :  { %3334 = vmatpush1.bf16.msra.mxu0 %v9804_v41  ;;  %3375 = vmatpush1.bf16.msra.mxu1 %v9807_v7  ;;  %v3077_v41 = vadd.f32 1.0, %v8025_v20  ;;  %v9915_v20 = vld [vmem:[#allocation5 + $0xcc] ss:$16 sps:$4 sm:$0xff]  }
 0x50f   :  { %3335 = vmatprep.subr.bf16.mxu0 %v11178_v58  ;;  %3376 = vmatprep.subr.bf16.mxu1 %v11179_v52  ;;  %11273 = vst [vmem:[#allocation61_spill] sm:$0xff] %v9915_v20 }
 0x510   :  { %8030 = vrcp.f32 %v3077_v41  ;;  %v9906_v41 = vld [vmem:[#allocation5 + $0xa0] ss:$16 sps:$4 sm:$0xff]  }
 0x511   :  { %11270 = vst [vmem:[#allocation58_spill] sm:$0xff] %v9906_v41 }
 0x512   :  { %v8027_v1 = vpop.eup %8026  ;;  %3336 = vmatpush1.bf16.msra.mxu0 %v11180_v24  ;;  %3377 = vmatpush1.bf16.msra.mxu1 %v9444_v8 }
 0x513   :  { %v3089_v62 = vmul.f32 %v8027_v1, %v8023_v25  ;;  %v8029_v2 = vpop.eup %8028  ;;  %3337 = vmatprep.subr.bf16.mxu0 %v11181_v36  ;;  %3378 = vmatprep.subr.bf16.mxu1 %v11182_v40  ;;  %v9838_v40 = vld [vmem:[#allocation5 + $0x4] ss:$16 sps:$4 sm:$0xff]   ;;  %v9918_v1 = vld [vmem:[#allocation5 + $0xc0] ss:$16 sps:$4 sm:$0xff]  }
 0x514   :  { %v3088_v7 = vmul.f32 %v8029_v2, %v3086_v18  ;;  %11248 = vst [vmem:[#allocation38_spill] sm:$0xff] %v9838_v40  ;;  %v9900_v2 = vld [vmem:[#allocation5 + $0xa4] ss:$16 sps:$4 sm:$0xff]   ;;  %11274 = vst [vmem:[#allocation62_spill] sm:$0xff] %v9918_v1  ;;  %v9921_v18 = vld [vmem:[#allocation5 + $0xc8] ss:$16 sps:$4 sm:$0xff]  }
 0x515   :  { %11268 = vst [vmem:[#allocation56_spill] sm:$0xff] %v9900_v2  ;;  %v9912_v25 = vld [vmem:[#allocation5 + $0xc4] ss:$16 sps:$4 sm:$0xff]   ;;  %11275 = vst [vmem:[#allocation63_spill] sm:$0xff] %v9921_v18 }
 0x516   :  { %v9817_v31 = vadd.f32 %v3089_v62, %v3088_v7  ;;  %3338 = vmatpush1.bf16.msra.mxu0 %v11183_v61  ;;  %3379 = vmatpush1.bf16.msra.mxu1 %v11184_v29  ;;  %v9850_v61 = vld [vmem:[#allocation5 + $0x24] ss:$16 sps:$4 sm:$0xff]   ;;  %v9853_v29 = vld [vmem:[#allocation5 + $0x2c] ss:$16 sps:$4 sm:$0xff]   ;;  %v9909_v7 = vld [vmem:[#allocation5 + $0xa8] ss:$16 sps:$4 sm:$0xff]  }
 0x517   :  { %3339 = vmatprep.subr.bf16.mxu0 %v11185_v44  ;;  %3380 = vmatprep.subr.bf16.mxu1 %v11186_v23  ;;  %11252 = vst [vmem:[#allocation46_spill] sm:$0xff] %v9850_v61  ;;  %11253 = vst [vmem:[#allocation47_spill] sm:$0xff] %v9853_v29  ;;  %v9858_v44 = vld [vmem:[#allocation5 + $0x20] ss:$16 sps:$4 sm:$0xff]   ;;  %v9861_v23 = vld [vmem:[#allocation5 + $0x28] ss:$16 sps:$4 sm:$0xff]  }
 0x518   :  { %8032 = vtanh.f32 %v9817_v31  ;;  %11254 = vst [vmem:[#allocation48_spill] sm:$0xff] %v9858_v44  ;;  %11255 = vst [vmem:[#allocation49_spill] sm:$0xff] %v9861_v23  ;;  %v9903_v62 = vld [vmem:[#allocation5 + $0xac] ss:$16 sps:$4 sm:$0xff]  }
 0x519   :  { %11269 = vst [vmem:[#allocation57_spill] sm:$0xff] %v9903_v62  ;;  %11271 = vst [vmem:[#allocation59_spill] sm:$0xff] %v9909_v7 }
 0x51a   :  { %3340 = vmatpush1.bf16.msra.mxu0 %v11187_v57  ;;  %3381 = vmatpush1.bf16.msra.mxu1 %v11188_v34  ;;  %v8031_v8 = vpop.eup %8030  ;;  %v9864_v57 = vld [vmem:[#allocation5 + $0x44] ss:$16 sps:$4 sm:$0xff]   ;;  %v9867_v34 = vld [vmem:[#allocation5 + $0x4c] ss:$16 sps:$4 sm:$0xff]   ;;  %11272 = vst [vmem:[#allocation60_spill] sm:$0xff] %v9912_v25 }
 0x51b   :  { %3341 = vmatprep.subr.bf16.mxu0 %v11189_v3  ;;  %3382 = vmatprep.subr.bf16.mxu1 %v11190_v30  ;;  %11256 = vst [vmem:[#allocation50_spill] sm:$0xff] %v9864_v57  ;;  %11257 = vst [vmem:[#allocation89_spill] sm:$0xff] %v9867_v34  ;;  %v9870_v3 = vld [vmem:[#allocation5 + $0x40] ss:$16 sps:$4 sm:$0xff]   ;;  %v9873_v30 = vld [vmem:[#allocation5 + $0x48] ss:$16 sps:$4 sm:$0xff]  }
 0x51c   :  { %11258 = vst [vmem:[#allocation90_spill] sm:$0xff] %v9870_v3  ;;  %11259 = vst [vmem:[#allocation91_spill] sm:$0xff] %v9873_v30 }
 0x51e   :  { %3342 = vmatpush1.bf16.msra.mxu0 %v11191_v32  ;;  %3383 = vmatpush1.bf16.msra.mxu1 %v11192_v0  ;;  %v9876_v32 = vld [vmem:[#allocation5 + $0x64] ss:$16 sps:$4 sm:$0xff]   ;;  %v9879_v0 = vld [vmem:[#allocation5 + $0x6c] ss:$16 sps:$4 sm:$0xff]  }
 0x51f   :  { %3343 = vmatprep.subr.bf16.mxu0 %v11193_v33  ;;  %3384 = vmatprep.subr.bf16.mxu1 %v11194_v55  ;;  %11260 = vst [vmem:[#allocation92_spill] sm:$0xff] %v9876_v32  ;;  %11261 = vst [vmem:[#allocation93_spill] sm:$0xff] %v9879_v0  ;;  %v9882_v33 = vld [vmem:[#allocation5 + $0x60] ss:$16 sps:$4 sm:$0xff]   ;;  %v9885_v55 = vld [vmem:[#allocation5 + $0x68] ss:$16 sps:$4 sm:$0xff]  }
 0x520   :  { %11262 = vst [vmem:[#allocation94_spill] sm:$0xff] %v9882_v33  ;;  %11263 = vst [vmem:[#allocation95_spill] sm:$0xff] %v9885_v55 }
 0x522   :  { %v8033_v58 = vpop.eup %8032  ;;  %3344 = vmatpush1.bf16.msra.mxu0 %v11195_v21  ;;  %3385 = vmatpush1.bf16.msra.mxu1 %v9495_v14  ;;  %v9844_v14 = vld [vmem:[#allocation5] ss:$16 sps:$4 sm:$0xff]   ;;  %v9888_v21 = vld [vmem:[#allocation5 + $0x84] ss:$16 sps:$4 sm:$0xff]  }
 0x523   :  { %3345 = vmatprep.subr.bf16.mxu0 %v9498_v17  ;;  %3386 = vmatprep.subr.bf16.mxu1 %v11196_v42  ;;  %v3092_v52 = vmul.f32 %v8033_v58, %v8031_v8  ;;  %11250 = vst [vmem:[#allocation45_spill] sm:$0xff] %v9844_v14  ;;  %v9847_v17 = vld [vmem:[#allocation5 + $0x8] ss:$16 sps:$4 sm:$0xff]   ;;  %11264 = vst [vmem:[#allocation96_spill] sm:$0xff] %v9888_v21  ;;  %v9891_v42 = vld [vmem:[#allocation5 + $0x8c] ss:$16 sps:$4 sm:$0xff]  }
 0x524   :  { %11251 = vst [vmem:[#allocation27_spill] sm:$0xff] %v9847_v17  ;;  %11265 = vst [vmem:[#allocation97_spill] sm:$0xff] %v9891_v42  ;;  %v9924_v8 = vld [vmem:[#allocation5 + $0xe4] ss:$16 sps:$4 sm:$0xff]   ;;  %v9927_v58 = vld [vmem:[#allocation5 + $0xec] ss:$16 sps:$4 sm:$0xff]  }
 0x525   :  { %v3327_v24 = vpack.c.bf16 %v3092_v52, %v3092_v52  ;;  %11276 = vst [vmem:[#allocation64_spill] sm:$0xff] %v9924_v8  ;;  %11277 = vst [vmem:[#allocation65_spill] sm:$0xff] %v9927_v58  ;;  %v9930_v52 = vld [vmem:[#allocation5 + $0xe0] ss:$16 sps:$4 sm:$0xff]  }
 0x526   :  { %3346 = vmatpush1.bf16.msra.mxu0 %v11197_v49  ;;  %3387 = vmatpush1.bf16.msra.mxu1 %v11198_v19  ;;  %v9894_v49 = vld [vmem:[#allocation5 + $0x80] ss:$16 sps:$4 sm:$0xff]   ;;  %v9897_v19 = vld [vmem:[#allocation5 + $0x88] ss:$16 sps:$4 sm:$0xff]   ;;  %11278 = vst [vmem:[#allocation66_spill] sm:$0xff] %v9930_v52 }
 0x527   :  { %v3329_v36 = vrot.slane %v3327_v24, 3  ;;  %3445 = vmatprep.subr.bf16.mxu0 %v9838_v40  ;;  %3486 = vmatprep.subr.bf16.mxu1 %v9841_v28  ;;  %11266 = vst [vmem:[#allocation98_spill] sm:$0xff] %v9894_v49  ;;  %11267 = vst [vmem:[#allocation55_spill] sm:$0xff] %v9897_v19  ;;  %v9933_v24 = vld [vmem:[#allocation5 + $0xe8] ss:$16 sps:$4 sm:$0xff]  }
 0x528   :  { %11279 = vst [vmem:[#allocation67_spill] sm:$0xff] %v9933_v24 }
 0x529   :  { %3364 = vmatmul.mubr.bf16.vlgmr.msra.gmra.mrb[68].mxu0 %v3329_v36  ;;  %3405 = vmatmul.mubr.bf16.vlgmr.msra.gmra.mrb[68].mxu1 %v3329_v36  ;;  %v9936_v36 = vld [vmem:[#allocation5 + $0x104] ss:$16 sps:$4 sm:$0xff]  }
 0x52a   :  { %3446 = vmatpush1.bf16.msra.mxu0 %v9844_v14  ;;  %3487 = vmatpush1.bf16.msra.mxu1 %v9847_v17  ;;  %11280 = vst [vmem:[#allocation68_spill] sm:$0xff] %v9936_v36 }
 0x52b   :  { %3447 = vmatprep.subr.bf16.mxu0 %v9850_v61  ;;  %3488 = vmatprep.subr.bf16.mxu1 %v9853_v29 }
 0x52c   :  { %3477 = vmatprep.mubr.bf16.mxu0 %v11046_v51  ;;  %3518 = vmatprep.mubr.bf16.mxu1 %v11046_v51 }
 0x52e   :  { %3448 = vmatpush1.bf16.msra.mxu0 %v9858_v44  ;;  %3489 = vmatpush1.bf16.msra.mxu1 %v9861_v23 }
 0x52f   :  { %3449 = vmatprep.subr.bf16.mxu0 %v9864_v57  ;;  %3490 = vmatprep.subr.bf16.mxu1 %v9867_v34 }
 0x532   :  { %3450 = vmatpush1.bf16.msra.mxu0 %v9870_v3  ;;  %3491 = vmatpush1.bf16.msra.mxu1 %v9873_v30 }
 0x533   :  { %3451 = vmatprep.subr.bf16.mxu0 %v9876_v32  ;;  %3492 = vmatprep.subr.bf16.mxu1 %v9879_v0 }
 0x536   :  { %3452 = vmatpush1.bf16.msra.mxu0 %v9882_v33  ;;  %3493 = vmatpush1.bf16.msra.mxu1 %v9885_v55  ;;  %v11285_v55 = vld [vmem:[#allocation22_spill] sm:$0xff] }
 0x537   :  { %3453 = vmatprep.subr.bf16.mxu0 %v9888_v21  ;;  %3494 = vmatprep.subr.bf16.mxu1 %v9891_v42 }
 0x53a   :  { %3454 = vmatpush1.bf16.msra.mxu0 %v9894_v49  ;;  %3495 = vmatpush1.bf16.msra.mxu1 %v9897_v19 }
 0x53b   :  { %3455 = vmatprep.subr.bf16.mxu0 %v9900_v2  ;;  %3496 = vmatprep.subr.bf16.mxu1 %v9903_v62 }
 0x53e   :  { %3456 = vmatpush1.bf16.msra.mxu0 %v9906_v41  ;;  %3497 = vmatpush1.bf16.msra.mxu1 %v9909_v7  ;;  %v11283_v41 = vld [vmem:[#allocation21_spill] sm:$0xff] }
 0x53f   :  { %3457 = vmatprep.subr.bf16.mxu0 %v9912_v25  ;;  %3498 = vmatprep.subr.bf16.mxu1 %v9915_v20  ;;  %v11282_v20 = vld [vmem:[#allocation19_spill] sm:$0xff] }
 0x542   :  { %3458 = vmatpush1.bf16.msra.mxu0 %v9918_v1  ;;  %3499 = vmatpush1.bf16.msra.mxu1 %v9921_v18  ;;  %v9939_v18 = vld [vmem:[#allocation5 + $0x10c] ss:$16 sps:$4 sm:$0xff]  }
 0x543   :  { %3459 = vmatprep.subr.bf16.mxu0 %v9924_v8  ;;  %3500 = vmatprep.subr.bf16.mxu1 %v9927_v58  ;;  %11281 = vst [vmem:[#allocation69_spill] sm:$0xff] %v9939_v18 }
 0x546   :  { %3460 = vmatpush1.bf16.msra.mxu0 %v9930_v52  ;;  %3501 = vmatpush1.bf16.msra.mxu1 %v9933_v24 }
 0x547   :  { %3571 = vmatprep.subr.bf16.mxu0 %v9936_v36  ;;  %3612 = vmatprep.subr.bf16.mxu1 %v9939_v18  ;;  %v11284_v36 = vld [vmem:[#allocation20_spill] sm:$0xff] }
 0x5bc   :  { %v3131_v8 = vpop.f32.mrb[60].mxu0  ;;  %v3172_v1 = vpop.f32.mrb[60].mxu1 }
 0x5bd   :  { %v3179_v58 = vadd.f32 %v3131_v8, %v11282_v20  ;;  %v3133_v25 = vpop.f32.mrb[61].mxu0  ;;  %v3174_v7 = vpop.f32.mrb[61].mxu1  ;;  %v3181_v21 = vadd.f32 %v3172_v1, %v11284_v36 }
 0x5be   :  { %v3180_v52 = vadd.f32 %v3133_v25, %v11283_v41  ;;  %v3135_v62 = vpop.f32.mrb[62].mxu0  ;;  %v3176_v2 = vpop.f32.mrb[62].mxu1  ;;  %v3182_v18 = vadd.f32 %v3174_v7, %v11285_v55 }
 0x5bf   :  { %v6839_v19 = vmul.f32 -1.442695, %v3179_v58  ;;  %v3136_v24 = vpop.f32.mrb[63].mxu0  ;;  %v3177_v49 = vpop.f32.mrb[63].mxu1  ;;  %v6841_v33 = vmul.f32 -1.442695, %v3181_v21 }
 0x5c0   :  { %v6840_v42 = vmul.f32 -1.442695, %v3180_v52  ;;  %v3203_v49 = vrot.slane %v9677_v22, 6 }
 0x5c1   :  { %8034 = vpow2.f32 %v6839_v19 }
 0x5c2   :  { %8036 = vpow2.f32 %v6840_v42 }
 0x5c3   :  { %8038 = vtanh.f32 %v3182_v18 }
 0x5c4   :  { %8040 = vpow2.f32 %v6841_v33 }
 0x5cb   :  { %v8035_v0 = vpop.eup %8034 }
 0x5cc   :  { %v3192_v32 = vadd.f32 1.0, %v8035_v0  ;;  %v8037_v8 = vpop.eup %8036  ;;  %v11286_v0 = vld [vmem:[#allocation23_spill] sm:$0xff] }
 0x5cd   :  { %v3193_v25 = vadd.f32 1.0, %v8037_v8  ;;  %v8039_v2 = vpop.eup %8038 }
 0x5ce   :  { %8042 = vrcp.f32 %v3192_v32  ;;  %v8041_v62 = vpop.eup %8040  ;;  %v11287_v32 = vld [vmem:[#allocation25_spill] sm:$0xff] }
 0x5cf   :  { %8044 = vrcp.f32 %v3193_v25  ;;  %v3194_v52 = vadd.f32 1.0, %v8041_v62 }
 0x5d1   :  { %8046 = vrcp.f32 %v3194_v52 }
 0x5d8   :  { %v8043_v58 = vpop.eup %8042 }
 0x5d9   :  { %v3206_v19 = vmul.f32 %v8043_v58, %v8039_v2  ;;  %v8045_v42 = vpop.eup %8044 }
 0x5da   :  { %v3205_v1 = vmul.f32 %v8045_v42, %v3203_v49  ;;  %v11288_v49 = vld [vmem:[#allocation24_spill] sm:$0xff] }
 0x5db   :  { %v8047_v42 = vpop.eup %8046 }
 0x5dc   :  { %v3248_v24 = vpop.f32.mrb[64].mxu0  ;;  %v3289_v7 = vpop.f32.mrb[64].mxu1  ;;  %v9947_v21 = vadd.f32 %v3206_v19, %v3205_v1  ;;  %v11289_v1 = vld [vmem:[#allocation26_spill] sm:$0xff] }
 0x5dd   :  { %v3296_v18 = vadd.f32 %v3248_v24, %v11286_v0  ;;  %v3250_v55 = vpop.f32.mrb[65].mxu0  ;;  %v3291_v33 = vpop.f32.mrb[65].mxu1  ;;  %v3298_v19 = vadd.f32 %v3289_v7, %v11288_v49 }
 0x5de   :  { %v3297_v8 = vadd.f32 %v3250_v55, %v11287_v32  ;;  %v3252_v25 = vpop.f32.mrb[66].mxu0  ;;  %v3293_v36 = vpop.f32.mrb[66].mxu1  ;;  %8048 = vtanh.f32 %v9947_v21  ;;  %v3299_v24 = vadd.f32 %v3291_v33, %v11289_v1 }
 0x5df   :  { %v6842_v22 = vmul.f32 -1.442695, %v3296_v18  ;;  %v3253_v2 = vpop.f32.mrb[67].mxu0  ;;  %v3294_v62 = vpop.f32.mrb[67].mxu1  ;;  %v6844_v41 = vmul.f32 -1.442695, %v3298_v19 }
 0x5e0   :  { %v6843_v58 = vmul.f32 -1.442695, %v3297_v8 }
 0x5e1   :  { %8050 = vpow2.f32 %v6842_v22 }
 0x5e2   :  { %8052 = vpow2.f32 %v6843_v58 }
 0x5e3   :  { %8054 = vtanh.f32 %v3299_v24 }
 0x5e4   :  { %8056 = vpow2.f32 %v6844_v41 }
 0x5e8   :  { %v8049_v0 = vpop.eup %8048 }
 0x5e9   :  { %v3209_v52 = vmul.f32 %v8049_v0, %v8047_v42  ;;  %v3320_v0 = vrot.slane %v9723_v38, 6  ;;  %v11290_v42 = vld [vmem:[#allocation28_spill] sm:$0xff] }
 0x5eb   :  { %v8051_v20 = vpop.eup %8050  ;;  %v3444_v36 = vpack.c.bf16 %v3209_v52, %v3209_v52 }
 0x5ec   :  { %v3309_v55 = vadd.f32 1.0, %v8051_v20  ;;  %v8053_v25 = vpop.eup %8052 }
 0x5ed   :  { %v3310_v18 = vadd.f32 1.0, %v8053_v25  ;;  %3478 = vmatmul.mubr.bf16.vlgmr.msra.gmra.mrb[72].mxu0 %v3444_v36  ;;  %3519 = vmatmul.mubr.bf16.vlgmr.msra.gmra.mrb[72].mxu1 %v3444_v36  ;;  %v8055_v41 = vpop.eup %8054 }
 0x5ee   :  { %8058 = vrcp.f32 %v3309_v55  ;;  %3572 = vmatpush1.bf16.msra.mxu0 %v9684_v60  ;;  %3613 = vmatpush1.bf16.msra.mxu1 %v9687_v5  ;;  %v8057_v20 = vpop.eup %8056  ;;  %v11291_v55 = vld [vmem:[#allocation30_spill] sm:$0xff] }
 0x5ef   :  { %8060 = vrcp.f32 %v3310_v18  ;;  %3573 = vmatprep.subr.bf16.mxu0 %v9690_v45  ;;  %3614 = vmatprep.subr.bf16.mxu1 %v9693_v6  ;;  %v3311_v22 = vadd.f32 1.0, %v8057_v20 }
 0x5f0   :  { %3603 = vmatprep.mubr.bf16.mxu0 %v11046_v51  ;;  %3644 = vmatprep.mubr.bf16.mxu1 %v11046_v51 }
 0x5f1   :  { %8062 = vrcp.f32 %v3311_v22  ;;  %v11294_v22 = vld [vmem:[#allocation40_spill] sm:$0xff] }
 0x5f2   :  { %3574 = vmatpush1.bf16.msra.mxu0 %v9698_v13  ;;  %3615 = vmatpush1.bf16.msra.mxu1 %v9701_v47 }
 0x5f3   :  { %3575 = vmatprep.subr.bf16.mxu0 %v9704_v35  ;;  %3616 = vmatprep.subr.bf16.mxu1 %v9707_v15 }
 0x5f6   :  { %3576 = vmatpush1.bf16.msra.mxu0 %v9711_v11  ;;  %3617 = vmatpush1.bf16.msra.mxu1 %v9714_v53 }
 0x5f7   :  { %3577 = vmatprep.subr.bf16.mxu0 %v9717_v63  ;;  %3618 = vmatprep.subr.bf16.mxu1 %v9720_v10 }
 0x5f8   :  { %v8059_v7 = vpop.eup %8058 }
 0x5f9   :  { %v3323_v33 = vmul.f32 %v8059_v7, %v8055_v41  ;;  %v8061_v8 = vpop.eup %8060 }
 0x5fa   :  { %v3322_v2 = vmul.f32 %v8061_v8, %v3320_v0  ;;  %3578 = vmatpush1.bf16.msra.mxu0 %v9726_v9  ;;  %3619 = vmatpush1.bf16.msra.mxu1 %v9729_v37  ;;  %v11293_v8 = vld [vmem:[#allocation36_spill] sm:$0xff] }
 0x5fb   :  { %3579 = vmatprep.subr.bf16.mxu0 %v9733_v27  ;;  %3620 = vmatprep.subr.bf16.mxu1 %v9736_v59 }
 0x5fc   :  { %v3365_v58 = vpop.f32.mrb[68].mxu0  ;;  %v3406_v62 = vpop.f32.mrb[68].mxu1  ;;  %v9973_v19 = vadd.f32 %v3323_v33, %v3322_v2  ;;  %v11292_v33 = vld [vmem:[#allocation34_spill] sm:$0xff]  ;;  %v11295_v2 = vld [vmem:[#allocation29_spill] sm:$0xff] }
 0x5fd   :  { %v3413_v24 = vadd.f32 %v3365_v58, %v11290_v42  ;;  %v3367_v52 = vpop.f32.mrb[69].mxu0  ;;  %v3408_v38 = vpop.f32.mrb[69].mxu1  ;;  %v3415_v58 = vadd.f32 %v3406_v62, %v11295_v2 }
 0x5fe   :  { %v3414_v36 = vadd.f32 %v3367_v52, %v11291_v55  ;;  %v3369_v25 = vpop.f32.mrb[70].mxu0  ;;  %v3410_v18 = vpop.f32.mrb[70].mxu1  ;;  %8064 = vtanh.f32 %v9973_v19  ;;  %3580 = vmatpush1.bf16.msra.mxu0 %v9740_v54  ;;  %3621 = vmatpush1.bf16.msra.mxu1 %v9743_v56  ;;  %v11297_v52 = vld [vmem:[#allocation42_spill] sm:$0xff] }
 0x5ff   :  { %v6845_v41 = vmul.f32 -1.442695, %v3413_v24  ;;  %v3370_v20 = vpop.f32.mrb[71].mxu0  ;;  %v3411_v0 = vpop.f32.mrb[71].mxu1  ;;  %3581 = vmatprep.subr.bf16.mxu0 %v9746_v16  ;;  %3622 = vmatprep.subr.bf16.mxu1 %v9749_v26  ;;  %v11296_v24 = vld [vmem:[#allocation41_spill] sm:$0xff]  ;;  %v11298_v25 = vld [vmem:[#allocation31_spill] sm:$0xff] }
 0x600   :  { %v6846_v7 = vmul.f32 -1.442695, %v3414_v36  ;;  %v8063_v36 = vpop.eup %8062  ;;  %v3416_v18 = vadd.f32 %v3408_v38, %v11298_v25  ;;  %v11299_v20 = vld [vmem:[#allocation43_spill] sm:$0xff] }
 0x601   :  { %8066 = vpow2.f32 %v6845_v41 }
 0x602   :  { %8068 = vpow2.f32 %v6846_v7  ;;  %3582 = vmatpush1.bf16.msra.mxu0 %v9753_v43  ;;  %3623 = vmatpush1.bf16.msra.mxu1 %v11292_v33  ;;  %v6847_v7 = vmul.f32 -1.442695, %v3415_v58  ;;  %v11300_v58 = vld [vmem:[#allocation52_spill] sm:$0xff] }
 0x603   :  { %3583 = vmatprep.subr.bf16.mxu0 %v11293_v8  ;;  %3624 = vmatprep.subr.bf16.mxu1 %v11294_v22  ;;  %8070 = vtanh.f32 %v3416_v18  ;;  %v11303_v18 = vld [vmem:[#allocation35_spill] sm:$0xff] }
 0x604   :  { %8072 = vpow2.f32 %v6847_v7  ;;  %v10004_v7 = vld [vmem:[#allocation5 + $0x244] ss:$16 sps:$4 sm:$0xff]  }
 0x605   :  { %11305 = vst [vmem:[#allocation70_spill] sm:$0xff] %v10004_v7 }
 0x606   :  { %3584 = vmatpush1.bf16.msra.mxu0 %v11296_v24  ;;  %3625 = vmatpush1.bf16.msra.mxu1 %v11297_v52 }
 0x607   :  { %3585 = vmatprep.subr.bf16.mxu0 %v11299_v20  ;;  %3626 = vmatprep.subr.bf16.mxu1 %v9775_v39 }
 0x608   :  { %v8065_v41 = vpop.eup %8064 }
 0x609   :  { %v3326_v0 = vmul.f32 %v8065_v41, %v8063_v36  ;;  %v11301_v36 = vld [vmem:[#allocation53_spill] sm:$0xff] }
 0x60a   :  { %3586 = vmatpush1.bf16.msra.mxu0 %v9778_v4  ;;  %3627 = vmatpush1.bf16.msra.mxu1 %v9781_v46  ;;  %v11304_v41 = vld [vmem:[#allocation37_spill] sm:$0xff] }
 0x60b   :  { %v8067_v33 = vpop.eup %8066  ;;  %v3570_v24 = vpack.c.bf16 %v3326_v0, %v3326_v0  ;;  %3697 = vmatprep.subr.bf16.mxu0 %v9784_v48  ;;  %3738 = vmatprep.subr.bf16.mxu1 %v9787_v50  ;;  %v10029_v50 = vld [vmem:[#allocation5 + $0x284] ss:$16 sps:$4 sm:$0xff]  }
 0x60c   :  { %v3426_v62 = vadd.f32 1.0, %v8067_v33  ;;  %v8069_v38 = vpop.eup %8068  ;;  %v11302_v33 = vld [vmem:[#allocation54_spill] sm:$0xff]  ;;  %11310 = vst [vmem:[#allocation75_spill] sm:$0xff] %v10029_v50 }
 0x60d   :  { %v3427_v20 = vadd.f32 1.0, %v8069_v38  ;;  %3604 = vmatmul.mubr.bf16.vlgmr.msra.gmra.mrb[76].mxu0 %v3570_v24  ;;  %3645 = vmatmul.mubr.bf16.vlgmr.msra.gmra.mrb[76].mxu1 %v3570_v24  ;;  %v10007_v24 = vld [vmem:[#allocation5 + $0x24c] ss:$16 sps:$4 sm:$0xff]   ;;  %v10013_v38 = vld [vmem:[#allocation5 + $0x248] ss:$16 sps:$4 sm:$0xff]  }
 0x60e   :  { %8074 = vrcp.f32 %v3426_v62  ;;  %3698 = vmatpush1.bf16.msra.mxu0 %v9790_v12  ;;  %3739 = vmatpush1.bf16.msra.mxu1 %v11300_v58  ;;  %11306 = vst [vmem:[#allocation71_spill] sm:$0xff] %v10007_v24  ;;  %v10010_v62 = vld [vmem:[#allocation5 + $0x240] ss:$16 sps:$4 sm:$0xff]   ;;  %11308 = vst [vmem:[#allocation73_spill] sm:$0xff] %v10013_v38 }
 0x60f   :  { %8076 = vrcp.f32 %v3427_v20  ;;  %3699 = vmatprep.subr.bf16.mxu0 %v11301_v36  ;;  %3740 = vmatprep.subr.bf16.mxu1 %v11302_v33  ;;  %v8071_v20 = vpop.eup %8070  ;;  %11307 = vst [vmem:[#allocation72_spill] sm:$0xff] %v10010_v62 }
 0x610   :  { %3729 = vmatprep.mubr.bf16.mxu0 %v11046_v51  ;;  %3770 = vmatprep.mubr.bf16.mxu1 %v11046_v51  ;;  %v8073_v0 = vpop.eup %8072 }
 0x611   :  { %v3428_v58 = vadd.f32 1.0, %v8073_v0  ;;  %v10059_v0 = vld [vmem:[#allocation5 + $0x2cc] ss:$16 sps:$4 sm:$0xff]  }
 0x612   :  { %3700 = vmatpush1.bf16.msra.mxu0 %v11303_v18  ;;  %3741 = vmatpush1.bf16.msra.mxu1 %v11304_v41  ;;  %v10016_v41 = vld [vmem:[#allocation5 + $0x264] ss:$16 sps:$4 sm:$0xff]   ;;  %11319 = vst [vmem:[#allocation84_spill] sm:$0xff] %v10059_v0 }
 0x613   :  { %3701 = vmatprep.subr.bf16.mxu0 %v10004_v7  ;;  %3742 = vmatprep.subr.bf16.mxu1 %v10007_v24  ;;  %11309 = vst [vmem:[#allocation74_spill] sm:$0xff] %v10016_v41  ;;  %v10019_v7 = vld [vmem:[#allocation5 + $0x26c] ss:$16 sps:$4 sm:$0xff]   ;;  %v3437_v24 = vrot.slane %v9817_v31, 6  ;;  %8078 = vrcp.f32 %v3428_v58  ;;  %v10053_v58 = vld [vmem:[#allocation5 + $0x2a8] ss:$16 sps:$4 sm:$0xff]  }
 0x614   :  { %11317 = vst [vmem:[#allocation82_spill] sm:$0xff] %v10053_v58 }
 0x616   :  { %3702 = vmatpush1.bf16.msra.mxu0 %v10010_v62  ;;  %3743 = vmatpush1.bf16.msra.mxu1 %v10013_v38  ;;  %v10023_v62 = vld [vmem:[#allocation5 + $0x260] ss:$16 sps:$4 sm:$0xff]   ;;  %v10026_v38 = vld [vmem:[#allocation5 + $0x268] ss:$16 sps:$4 sm:$0xff]  }
 0x617   :  { %3703 = vmatprep.subr.bf16.mxu0 %v10016_v41  ;;  %3744 = vmatprep.subr.bf16.mxu1 %v10019_v7  ;;  %v10032_v41 = vld [vmem:[#allocation5 + $0x28c] ss:$16 sps:$4 sm:$0xff]  }
 0x618   :  { %v8075_v18 = vpop.eup %8074  ;;  %11311 = vst [vmem:[#allocation76_spill] sm:$0xff] %v10032_v41 }
 0x619   :  { %v3440_v33 = vmul.f32 %v8075_v18, %v8071_v20  ;;  %v8077_v36 = vpop.eup %8076  ;;  %v10041_v18 = vld [vmem:[#allocation5 + $0x288] ss:$16 sps:$4 sm:$0xff]   ;;  %v10047_v20 = vld [vmem:[#allocation5 + $0x2ac] ss:$16 sps:$4 sm:$0xff]  }
 0x61a   :  { %v3439_v12 = vmul.f32 %v8077_v36, %v3437_v24  ;;  %3704 = vmatpush1.bf16.msra.mxu0 %v10023_v62  ;;  %3745 = vmatpush1.bf16.msra.mxu1 %v10026_v38  ;;  %v10038_v36 = vld [vmem:[#allocation5 + $0x280] ss:$16 sps:$4 sm:$0xff]   ;;  %11313 = vst [vmem:[#allocation78_spill] sm:$0xff] %v10041_v18  ;;  %v10044_v24 = vld [vmem:[#allocation5 + $0x2a4] ss:$16 sps:$4 sm:$0xff]   ;;  %11315 = vst [vmem:[#allocation80_spill] sm:$0xff] %v10047_v20 }
 0x61b   :  { %3705 = vmatprep.subr.bf16.mxu0 %v10029_v50  ;;  %3746 = vmatprep.subr.bf16.mxu1 %v10032_v41  ;;  %11312 = vst [vmem:[#allocation77_spill] sm:$0xff] %v10038_v36  ;;  %11314 = vst [vmem:[#allocation79_spill] sm:$0xff] %v10044_v24 }
 0x61c   :  { %v10035_v31 = vadd.f32 %v3440_v33, %v3439_v12  ;;  %v10050_v12 = vld [vmem:[#allocation5 + $0x2a0] ss:$16 sps:$4 sm:$0xff]   ;;  %v10056_v33 = vld [vmem:[#allocation5 + $0x2c4] ss:$16 sps:$4 sm:$0xff]  }
 0x61d   :  { %11316 = vst [vmem:[#allocation81_spill] sm:$0xff] %v10050_v12  ;;  %11318 = vst [vmem:[#allocation83_spill] sm:$0xff] %v10056_v33 }
 0x61e   :  { %8080 = vtanh.f32 %v10035_v31  ;;  %3706 = vmatpush1.bf16.msra.mxu0 %v10038_v36  ;;  %3747 = vmatpush1.bf16.msra.mxu1 %v10041_v18  ;;  %v10068_v18 = vld [vmem:[#allocation5 + $0x2e4] ss:$16 sps:$4 sm:$0xff]  }
 0x61f   :  { %3707 = vmatprep.subr.bf16.mxu0 %v10044_v24  ;;  %3748 = vmatprep.subr.bf16.mxu1 %v10047_v20  ;;  %v10062_v24 = vld [vmem:[#allocation5 + $0x2c0] ss:$16 sps:$4 sm:$0xff]   ;;  %v10065_v20 = vld [vmem:[#allocation5 + $0x2c8] ss:$16 sps:$4 sm:$0xff]   ;;  %11322 = vst [vmem:[#allocation87_spill] sm:$0xff] %v10068_v18 }
 0x620   :  { %11320 = vst [vmem:[#allocation85_spill] sm:$0xff] %v10062_v24  ;;  %11321 = vst [vmem:[#allocation86_spill] sm:$0xff] %v10065_v20 }
 0x622   :  { %3708 = vmatpush1.bf16.msra.mxu0 %v10050_v12  ;;  %3749 = vmatpush1.bf16.msra.mxu1 %v10053_v58  ;;  %v8079_v12 = vpop.eup %8078  ;;  %v10071_v58 = vld [vmem:[#allocation5 + $0x2ec] ss:$16 sps:$4 sm:$0xff]  }
 0x623   :  { %3709 = vmatprep.subr.bf16.mxu0 %v10056_v33  ;;  %3750 = vmatprep.subr.bf16.mxu1 %v10059_v0  ;;  %11323 = vst [vmem:[#allocation88_spill] sm:$0xff] %v10071_v58  ;;  %v10074_v0 = vld [vmem:[#allocation5 + $0x2e0] ss:$16 sps:$4 sm:$0xff]  }
 0x624   :  { %11324 = vst [vmem:[#allocation32_spill] sm:$0xff] %v10074_v0 }
 0x626   :  { %3710 = vmatpush1.bf16.msra.mxu0 %v10062_v24  ;;  %3751 = vmatpush1.bf16.msra.mxu1 %v10065_v20  ;;  %v10077_v24 = vld [vmem:[#allocation5 + $0x2e8] ss:$16 sps:$4 sm:$0xff]  }
 0x627   :  { %3711 = vmatprep.subr.bf16.mxu0 %v10068_v18  ;;  %3752 = vmatprep.subr.bf16.mxu1 %v10071_v58  ;;  %11325 = vst [vmem:[#allocation33_spill] sm:$0xff] %v10077_v24  ;;  %v11350_v58 = vld [vmem:[#allocation20_spill] sm:$0xff] }
 0x628   :  { %v8081_v33 = vpop.eup %8080 }
 0x629   :  { %v3443_v36 = vmul.f32 %v8081_v33, %v8079_v12  ;;  %v11328_v12 = vld [vmem:[#allocation94_spill] sm:$0xff]  ;;  %v11329_v33 = vld [vmem:[#allocation95_spill] sm:$0xff] }
 0x62a   :  { %3712 = vmatpush1.bf16.msra.mxu0 %v10074_v0  ;;  %3753 = vmatpush1.bf16.msra.mxu1 %v10077_v24  ;;  %v11349_v24 = vld [vmem:[#allocation21_spill] sm:$0xff] }
 0x62b   :  { %v3696_v20 = vpack.c.bf16 %v3443_v36, %v3443_v36  ;;  %3826 = vmatprep.subr.bf16.mxu0 %v9838_v40  ;;  %3867 = vmatprep.subr.bf16.mxu1 %v9841_v28  ;;  %v11326_v36 = vld [vmem:[#allocation92_spill] sm:$0xff]  ;;  %v11348_v28 = vld [vmem:[#allocation19_spill] sm:$0xff] }
 0x62d   :  { %3730 = vmatmul.mubr.bf16.vlgmr.msra.gmra.mrb[80].mxu0 %v3696_v20  ;;  %3771 = vmatmul.mubr.bf16.vlgmr.msra.gmra.mrb[80].mxu1 %v3696_v20  ;;  %v11327_v20 = vld [vmem:[#allocation93_spill] sm:$0xff] }
 0x62e   :  { %3827 = vmatpush1.bf16.msra.mxu0 %v9844_v14  ;;  %3868 = vmatpush1.bf16.msra.mxu1 %v9847_v17 }
 0x62f   :  { %3828 = vmatprep.subr.bf16.mxu0 %v9850_v61  ;;  %3869 = vmatprep.subr.bf16.mxu1 %v9853_v29  ;;  %v11330_v29 = vld [vmem:[#allocation96_spill] sm:$0xff] }
 0x630   :  { %3858 = vmatprep.mubr.bf16.mxu0 %v11046_v51  ;;  %3899 = vmatprep.mubr.bf16.mxu1 %v11046_v51 }
 0x632   :  { %3829 = vmatpush1.bf16.msra.mxu0 %v9858_v44  ;;  %3870 = vmatpush1.bf16.msra.mxu1 %v9861_v23  ;;  %v11331_v44 = vld [vmem:[#allocation97_spill] sm:$0xff]  ;;  %v11332_v23 = vld [vmem:[#allocation98_spill] sm:$0xff] }
 0x633   :  { %3830 = vmatprep.subr.bf16.mxu0 %v9864_v57  ;;  %3871 = vmatprep.subr.bf16.mxu1 %v9867_v34  ;;  %v11333_v57 = vld [vmem:[#allocation55_spill] sm:$0xff]  ;;  %v11334_v34 = vld [vmem:[#allocation56_spill] sm:$0xff] }
 0x636   :  { %3831 = vmatpush1.bf16.msra.mxu0 %v9870_v3  ;;  %3872 = vmatpush1.bf16.msra.mxu1 %v9873_v30  ;;  %v11335_v3 = vld [vmem:[#allocation57_spill] sm:$0xff]  ;;  %v11336_v30 = vld [vmem:[#allocation58_spill] sm:$0xff] }
 0x637   :  { %3832 = vmatprep.subr.bf16.mxu0 %v11326_v36  ;;  %3873 = vmatprep.subr.bf16.mxu1 %v11327_v20  ;;  %v11337_v36 = vld [vmem:[#allocation59_spill] sm:$0xff]  ;;  %v11338_v20 = vld [vmem:[#allocation60_spill] sm:$0xff] }
 0x63a   :  { %3833 = vmatpush1.bf16.msra.mxu0 %v11328_v12  ;;  %3874 = vmatpush1.bf16.msra.mxu1 %v11329_v33  ;;  %v11339_v12 = vld [vmem:[#allocation61_spill] sm:$0xff]  ;;  %v11340_v33 = vld [vmem:[#allocation62_spill] sm:$0xff] }
 0x63b   :  { %3834 = vmatprep.subr.bf16.mxu0 %v11330_v29  ;;  %3875 = vmatprep.subr.bf16.mxu1 %v11331_v44  ;;  %v11341_v29 = vld [vmem:[#allocation63_spill] sm:$0xff]  ;;  %v11342_v44 = vld [vmem:[#allocation64_spill] sm:$0xff] }
 0x63e   :  { %3835 = vmatpush1.bf16.msra.mxu0 %v11332_v23  ;;  %3876 = vmatpush1.bf16.msra.mxu1 %v11333_v57  ;;  %v11343_v23 = vld [vmem:[#allocation65_spill] sm:$0xff]  ;;  %v11344_v57 = vld [vmem:[#allocation66_spill] sm:$0xff] }
 0x63f   :  { %3836 = vmatprep.subr.bf16.mxu0 %v11334_v34  ;;  %3877 = vmatprep.subr.bf16.mxu1 %v11335_v3  ;;  %v11345_v34 = vld [vmem:[#allocation67_spill] sm:$0xff]  ;;  %v11346_v3 = vld [vmem:[#allocation68_spill] sm:$0xff] }
 0x642   :  { %3837 = vmatpush1.bf16.msra.mxu0 %v11336_v30  ;;  %3878 = vmatpush1.bf16.msra.mxu1 %v11337_v36  ;;  %v11347_v30 = vld [vmem:[#allocation69_spill] sm:$0xff] }
 0x643   :  { %3838 = vmatprep.subr.bf16.mxu0 %v11338_v20  ;;  %3879 = vmatprep.subr.bf16.mxu1 %v11339_v12 }
 0x646   :  { %3839 = vmatpush1.bf16.msra.mxu0 %v11340_v33  ;;  %3880 = vmatpush1.bf16.msra.mxu1 %v11341_v29 }
 0x647   :  { %3840 = vmatprep.subr.bf16.mxu0 %v11342_v44  ;;  %3881 = vmatprep.subr.bf16.mxu1 %v11343_v23 }
 0x64a   :  { %3841 = vmatpush1.bf16.msra.mxu0 %v11344_v57  ;;  %3882 = vmatpush1.bf16.msra.mxu1 %v11345_v34 }
 0x64b   :  { %3955 = vmatprep.subr.bf16.mxu0 %v11346_v3  ;;  %3996 = vmatprep.subr.bf16.mxu1 %v11347_v30 }
 0x6c0   :  { %v3479_v36 = vpop.f32.mrb[72].mxu0  ;;  %v3520_v20 = vpop.f32.mrb[72].mxu1 }
 0x6c1   :  { %v3531_v61 = vrot.slane %v3479_v36, 6  ;;  %v3481_v12 = vpop.f32.mrb[73].mxu0  ;;  %v3522_v17 = vpop.f32.mrb[73].mxu1  ;;  %v3533_v3 = vrot.slane %v3520_v20, 6  ;;  %v11351_v36 = vld [vmem:[#allocation22_spill] sm:$0xff] }
 0x6c2   :  { %v3532_v33 = vrot.slane %v3481_v12, 6  ;;  %v3483_v14 = vpop.f32.mrb[74].mxu0  ;;  %v3524_v29 = vpop.f32.mrb[74].mxu1  ;;  %v3534_v30 = vrot.slane %v3522_v17, 6 }
 0x6c3   :  { %v3539_v44 = vadd.f32 %v3531_v61, %v11348_v28  ;;  %v3484_v40 = vpop.f32.mrb[75].mxu0  ;;  %v3525_v23 = vpop.f32.mrb[75].mxu1  ;;  %v3541_v18 = vadd.f32 %v3533_v3, %v11350_v58 }
 0x6c4   :  { %v3540_v57 = vadd.f32 %v3532_v33, %v11349_v24  ;;  %v3542_v41 = vadd.f32 %v3534_v30, %v11351_v36 }
 0x6c5   :  { %v6848_v0 = vmul.f32 -1.442695, %v3539_v44  ;;  %v6850_v50 = vmul.f32 -1.442695, %v3541_v18 }
 0x6c6   :  { %v6849_v34 = vmul.f32 -1.442695, %v3540_v57  ;;  %v3563_v57 = vrot.slane %v9947_v21, 6 }
 0x6c7   :  { %8082 = vpow2.f32 %v6848_v0 }
 0x6c8   :  { %8084 = vpow2.f32 %v6849_v34 }
 0x6c9   :  { %8086 = vtanh.f32 %v3542_v41 }
 0x6ca   :  { %8088 = vpow2.f32 %v6850_v50 }
 0x6d1   :  { %v8083_v12 = vpop.eup %8082 }
 0x6d2   :  { %v3552_v14 = vadd.f32 1.0, %v8083_v12  ;;  %v8085_v29 = vpop.eup %8084 }
 0x6d3   :  { %v3553_v40 = vadd.f32 1.0, %v8085_v29  ;;  %v8087_v61 = vpop.eup %8086  ;;  %v11352_v29 = vld [vmem:[#allocation23_spill] sm:$0xff] }
 0x6d4   :  { %8090 = vrcp.f32 %v3552_v14  ;;  %v8089_v44 = vpop.eup %8088 }
 0x6d5   :  { %8092 = vrcp.f32 %v3553_v40  ;;  %v3554_v0 = vadd.f32 1.0, %v8089_v44 }
 0x6d7   :  { %8094 = vrcp.f32 %v3554_v0 }
 0x6de   :  { %v8091_v23 = vpop.eup %8090 }
 0x6df   :  { %v3566_v34 = vmul.f32 %v8091_v23, %v8087_v61  ;;  %v8093_v17 = vpop.eup %8092 }
 0x6e0   :  { %v3605_v3 = vpop.f32.mrb[76].mxu0  ;;  %v3646_v20 = vpop.f32.mrb[76].mxu1  ;;  %v3565_v30 = vmul.f32 %v8093_v17, %v3563_v57 }
 0x6e1   :  { %v3657_v18 = vrot.slane %v3605_v3, 6  ;;  %v3607_v33 = vpop.f32.mrb[77].mxu0  ;;  %v3648_v12 = vpop.f32.mrb[77].mxu1  ;;  %v3659_v23 = vrot.slane %v3646_v20, 6 }
 0x6e2   :  { %v3658_v41 = vrot.slane %v3607_v33, 6  ;;  %v3609_v36 = vpop.f32.mrb[78].mxu0  ;;  %v3650_v50 = vpop.f32.mrb[78].mxu1  ;;  %v10121_v14 = vadd.f32 %v3566_v34, %v3565_v30  ;;  %v3660_v57 = vrot.slane %v3648_v12, 6 }
 0x6e3   :  { %v3665_v40 = vadd.f32 %v3657_v18, %v11352_v29  ;;  %v3610_v58 = vpop.f32.mrb[79].mxu0  ;;  %v3651_v24 = vpop.f32.mrb[79].mxu1  ;;  %v3667_v36 = vadd.f32 %v3659_v23, %v11288_v49 }
 0x6e4   :  { %v3666_v21 = vadd.f32 %v3658_v41, %v11287_v32  ;;  %8096 = vtanh.f32 %v10121_v14  ;;  %v8095_v17 = vpop.eup %8094  ;;  %v3668_v34 = vadd.f32 %v3660_v57, %v11289_v1 }
 0x6e5   :  { %v6851_v61 = vmul.f32 -1.442695, %v3665_v40  ;;  %v6853_v30 = vmul.f32 -1.442695, %v3667_v36 }
 0x6e6   :  { %v6852_v44 = vmul.f32 -1.442695, %v3666_v21 }
 0x6e7   :  { %8098 = vpow2.f32 %v6851_v61 }
 0x6e8   :  { %8100 = vpow2.f32 %v6852_v44 }
 0x6e9   :  { %8102 = vtanh.f32 %v3668_v34 }
 0x6ea   :  { %8104 = vpow2.f32 %v6853_v30 }
 0x6ee   :  { %v8097_v3 = vpop.eup %8096 }
 0x6ef   :  { %v3569_v58 = vmul.f32 %v8097_v3, %v8095_v17 }
 0x6f1   :  { %v8099_v24 = vpop.eup %8098  ;;  %v3822_v18 = vpack.c.bf16 %v3569_v58, %v3569_v58 }
 0x6f2   :  { %v3678_v0 = vadd.f32 1.0, %v8099_v24  ;;  %v8101_v33 = vpop.eup %8100 }
 0x6f3   :  { %v3679_v41 = vadd.f32 1.0, %v8101_v33  ;;  %v3824_v50 = vrot.slane %v3822_v18, 1  ;;  %v8103_v20 = vpop.eup %8102  ;;  %v11358_v18 = vld [vmem:[#allocation52_spill] sm:$0xff]  ;;  %v11359_v33 = vld [vmem:[#allocation53_spill] sm:$0xff] }
 0x6f4   :  { %8106 = vrcp.f32 %v3678_v0 }
 0x6f5   :  { %8108 = vrcp.f32 %v3679_v41  ;;  %3859 = vmatmul.mubr.bf16.vlgmr.msra.gmra.mrb[84].mxu0 %v3824_v50  ;;  %3900 = vmatmul.mubr.bf16.vlgmr.msra.gmra.mrb[84].mxu1 %v3824_v50  ;;  %v11360_v41 = vld [vmem:[#allocation54_spill] sm:$0xff] }
 0x6f6   :  { %3956 = vmatpush1.bf16.msra.mxu0 %v9684_v60  ;;  %3997 = vmatpush1.bf16.msra.mxu1 %v9687_v5  ;;  %v8105_v60 = vpop.eup %8104  ;;  %v3689_v5 = vrot.slane %v9973_v19, 6  ;;  %v11363_v50 = vld [vmem:[#allocation70_spill] sm:$0xff] }
 0x6f7   :  { %3957 = vmatprep.subr.bf16.mxu0 %v9690_v45  ;;  %3998 = vmatprep.subr.bf16.mxu1 %v9693_v6  ;;  %v3680_v40 = vadd.f32 1.0, %v8105_v60 }
 0x6f8   :  { %3987 = vmatprep.mubr.bf16.mxu0 %v11046_v51  ;;  %4028 = vmatprep.mubr.bf16.mxu1 %v11046_v51 }
 0x6f9   :  { %8110 = vrcp.f32 %v3680_v40  ;;  %v11366_v40 = vld [vmem:[#allocation73_spill] sm:$0xff] }
 0x6fa   :  { %3958 = vmatpush1.bf16.msra.mxu0 %v9698_v13  ;;  %3999 = vmatpush1.bf16.msra.mxu1 %v9701_v47 }
 0x6fb   :  { %3959 = vmatprep.subr.bf16.mxu0 %v9704_v35  ;;  %4000 = vmatprep.subr.bf16.mxu1 %v9707_v15 }
 0x6fe   :  { %v8107_v12 = vpop.eup %8106  ;;  %3960 = vmatpush1.bf16.msra.mxu0 %v9711_v11  ;;  %4001 = vmatpush1.bf16.msra.mxu1 %v9714_v53 }
 0x6ff   :  { %v3692_v45 = vmul.f32 %v8107_v12, %v8103_v20  ;;  %v8109_v6 = vpop.eup %8108  ;;  %3961 = vmatprep.subr.bf16.mxu0 %v9717_v63  ;;  %4002 = vmatprep.subr.bf16.mxu1 %v9720_v10  ;;  %v11364_v20 = vld [vmem:[#allocation71_spill] sm:$0xff] }
 0x700   :  { %v3731_v21 = vpop.f32.mrb[80].mxu0  ;;  %v3772_v13 = vpop.f32.mrb[80].mxu1  ;;  %v3691_v47 = vmul.f32 %v8109_v6, %v3689_v5  ;;  %v3815_v5 = vrot.slane %v10035_v31, 6  ;;  %v11365_v6 = vld [vmem:[#allocation72_spill] sm:$0xff]  ;;  %v11368_v31 = vld [vmem:[#allocation75_spill] sm:$0xff] }
 0x701   :  { %v3783_v35 = vrot.slane %v3731_v21, 6  ;;  %v3733_v15 = vpop.f32.mrb[81].mxu0  ;;  %v3774_v61 = vpop.f32.mrb[81].mxu1  ;;  %v3785_v34 = vrot.slane %v3772_v13, 6 }
 0x702   :  { %v3784_v44 = vrot.slane %v3733_v15, 6  ;;  %v3735_v23 = vpop.f32.mrb[82].mxu0  ;;  %v3776_v19 = vpop.f32.mrb[82].mxu1  ;;  %v10143_v57 = vadd.f32 %v3692_v45, %v3691_v47  ;;  %3962 = vmatpush1.bf16.msra.mxu0 %v9726_v9  ;;  %4003 = vmatpush1.bf16.msra.mxu1 %v9729_v37  ;;  %v3786_v9 = vrot.slane %v3774_v61, 6  ;;  %v11367_v47 = vld [vmem:[#allocation74_spill] sm:$0xff]  ;;  %v11369_v61 = vld [vmem:[#allocation76_spill] sm:$0xff] }
 0x703   :  { %v3791_v11 = vadd.f32 %v3783_v35, %v11290_v42  ;;  %v3736_v53 = vpop.f32.mrb[83].mxu0  ;;  %v3777_v36 = vpop.f32.mrb[83].mxu1  ;;  %3963 = vmatprep.subr.bf16.mxu0 %v9733_v27  ;;  %4004 = vmatprep.subr.bf16.mxu1 %v9736_v59  ;;  %v3793_v37 = vadd.f32 %v3785_v34, %v11295_v2  ;;  %v11353_v27 = vld [vmem:[#allocation34_spill] sm:$0xff]  ;;  %v11372_v19 = vld [vmem:[#allocation79_spill] sm:$0xff] }
 0x704   :  { %v3792_v63 = vadd.f32 %v3784_v44, %v11291_v55  ;;  %8112 = vtanh.f32 %v10143_v57  ;;  %v8111_v59 = vpop.eup %8110  ;;  %v11370_v44 = vld [vmem:[#allocation77_spill] sm:$0xff]  ;;  %v11371_v23 = vld [vmem:[#allocation78_spill] sm:$0xff] }
 0x705   :  { %v6854_v10 = vmul.f32 -1.442695, %v3791_v11  ;;  %v6856_v3 = vmul.f32 -1.442695, %v3793_v37  ;;  %v11373_v11 = vld [vmem:[#allocation80_spill] sm:$0xff]  ;;  %v11374_v53 = vld [vmem:[#allocation81_spill] sm:$0xff] }
 0x706   :  { %v6855_v17 = vmul.f32 -1.442695, %v3792_v63  ;;  %3964 = vmatpush1.bf16.msra.mxu0 %v9740_v54  ;;  %4005 = vmatpush1.bf16.msra.mxu1 %v9743_v56  ;;  %v3794_v54 = vadd.f32 %v3786_v9, %v11298_v25  ;;  %v11375_v36 = vld [vmem:[#allocation82_spill] sm:$0xff]  ;;  %v11376_v63 = vld [vmem:[#allocation83_spill] sm:$0xff]  ;;  %v11378_v9 = vld [vmem:[#allocation85_spill] sm:$0xff] }
 0x707   :  { %8114 = vpow2.f32 %v6854_v10  ;;  %3965 = vmatprep.subr.bf16.mxu0 %v9746_v16  ;;  %4006 = vmatprep.subr.bf16.mxu1 %v9749_v26  ;;  %v11354_v16 = vld [vmem:[#allocation41_spill] sm:$0xff]  ;;  %v11355_v26 = vld [vmem:[#allocation43_spill] sm:$0xff]  ;;  %v11377_v10 = vld [vmem:[#allocation84_spill] sm:$0xff] }
 0x708   :  { %8116 = vpow2.f32 %v6855_v17  ;;  %v11379_v37 = vld [vmem:[#allocation86_spill] sm:$0xff] }
 0x709   :  { %8118 = vtanh.f32 %v3794_v54 }
 0x70a   :  { %3966 = vmatpush1.bf16.msra.mxu0 %v9753_v43  ;;  %4007 = vmatpush1.bf16.msra.mxu1 %v11353_v27  ;;  %8120 = vpow2.f32 %v6856_v3  ;;  %v11380_v27 = vld [vmem:[#allocation87_spill] sm:$0xff]  ;;  %v11382_v3 = vld [vmem:[#allocation32_spill] sm:$0xff] }
 0x70b   :  { %3967 = vmatprep.subr.bf16.mxu0 %v11293_v8  ;;  %4008 = vmatprep.subr.bf16.mxu1 %v11294_v22 }
 0x70e   :  { %v8113_v56 = vpop.eup %8112  ;;  %3968 = vmatpush1.bf16.msra.mxu0 %v11354_v16  ;;  %4009 = vmatpush1.bf16.msra.mxu1 %v11297_v52  ;;  %v11356_v52 = vld [vmem:[#allocation44_spill] sm:$0xff]  ;;  %v11383_v16 = vld [vmem:[#allocation33_spill] sm:$0xff] }
 0x70f   :  { %3969 = vmatprep.subr.bf16.mxu0 %v11355_v26  ;;  %4010 = vmatprep.subr.bf16.mxu1 %v9775_v39  ;;  %v3695_v43 = vmul.f32 %v8113_v56, %v8111_v59  ;;  %v11357_v39 = vld [vmem:[#allocation51_spill] sm:$0xff]  ;;  %v11381_v59 = vld [vmem:[#allocation88_spill] sm:$0xff] }
 0x711   :  { %v8115_v30 = vpop.eup %8114  ;;  %v3951_v8 = vpack.c.bf16 %v3695_v43, %v3695_v43  ;;  %v11384_v43 = vld [vmem:[#allocation38_spill] sm:$0xff] }
 0x712   :  { %v3804_v58 = vadd.f32 1.0, %v8115_v30  ;;  %v8117_v24 = vpop.eup %8116  ;;  %3970 = vmatpush1.bf16.msra.mxu0 %v9778_v4  ;;  %4011 = vmatpush1.bf16.msra.mxu1 %v9781_v46  ;;  %v11361_v4 = vld [vmem:[#allocation35_spill] sm:$0xff] }
 0x713   :  { %v3805_v22 = vadd.f32 1.0, %v8117_v24  ;;  %v3953_v0 = vrot.slane %v3951_v8, 1  ;;  %4084 = vmatprep.subr.bf16.mxu0 %v9784_v48  ;;  %4125 = vmatprep.subr.bf16.mxu1 %v11356_v52  ;;  %v11362_v48 = vld [vmem:[#allocation37_spill] sm:$0xff]  ;;  %v8119_v46 = vpop.eup %8118  ;;  %v11385_v30 = vld [vmem:[#allocation39_spill] sm:$0xff]  ;;  %v11388_v24 = vld [vmem:[#allocation46_spill] sm:$0xff] }
 0x714   :  { %8122 = vrcp.f32 %v3804_v58  ;;  %v8121_v60 = vpop.eup %8120  ;;  %v11386_v58 = vld [vmem:[#allocation45_spill] sm:$0xff]  ;;  %v11387_v8 = vld [vmem:[#allocation27_spill] sm:$0xff] }
 0x715   :  { %8124 = vrcp.f32 %v3805_v22  ;;  %3988 = vmatmul.mubr.bf16.vlgmr.msra.gmra.mrb[88].mxu0 %v3953_v0  ;;  %4029 = vmatmul.mubr.bf16.vlgmr.msra.gmra.mrb[88].mxu1 %v3953_v0  ;;  %v3806_v13 = vadd.f32 1.0, %v8121_v60  ;;  %v11389_v22 = vld [vmem:[#allocation47_spill] sm:$0xff]  ;;  %v11390_v0 = vld [vmem:[#allocation48_spill] sm:$0xff]  ;;  %v11391_v52 = vld [vmem:[#allocation49_spill] sm:$0xff] }
 0x716   :  { %4085 = vmatpush1.bf16.msra.mxu0 %v11357_v39  ;;  %4126 = vmatpush1.bf16.msra.mxu1 %v11358_v18  ;;  %v11392_v39 = vld [vmem:[#allocation50_spill] sm:$0xff]  ;;  %v11393_v18 = vld [vmem:[#allocation89_spill] sm:$0xff]  ;;  %v11399_v60 = vld [vmem:[#allocation95_spill] sm:$0xff] }
 0x717   :  { %4086 = vmatprep.subr.bf16.mxu0 %v11359_v33  ;;  %4127 = vmatprep.subr.bf16.mxu1 %v11360_v41  ;;  %8126 = vrcp.f32 %v3806_v13  ;;  %v11394_v33 = vld [vmem:[#allocation90_spill] sm:$0xff]  ;;  %v11395_v41 = vld [vmem:[#allocation91_spill] sm:$0xff]  ;;  %v11404_v13 = vld [vmem:[#allocation56_spill] sm:$0xff] }
 0x718   :  { %4116 = vmatprep.mubr.bf16.mxu0 %v11046_v51  ;;  %4157 = vmatprep.mubr.bf16.mxu1 %v11046_v51 }
 0x71a   :  { %4087 = vmatpush1.bf16.msra.mxu0 %v11361_v4  ;;  %4128 = vmatpush1.bf16.msra.mxu1 %v11362_v48  ;;  %v11396_v4 = vld [vmem:[#allocation92_spill] sm:$0xff]  ;;  %v11397_v48 = vld [vmem:[#allocation93_spill] sm:$0xff] }
 0x71b   :  { %4088 = vmatprep.subr.bf16.mxu0 %v11363_v50  ;;  %4129 = vmatprep.subr.bf16.mxu1 %v11364_v20 }
 0x71e   :  { %v8123_v12 = vpop.eup %8122  ;;  %4089 = vmatpush1.bf16.msra.mxu0 %v11365_v6  ;;  %4130 = vmatpush1.bf16.msra.mxu1 %v11366_v40 }
 0x71f   :  { %v3818_v45 = vmul.f32 %v8123_v12, %v8119_v46  ;;  %v8125_v21 = vpop.eup %8124  ;;  %4090 = vmatprep.subr.bf16.mxu0 %v11367_v47  ;;  %4131 = vmatprep.subr.bf16.mxu1 %v10019_v7  ;;  %v11398_v46 = vld [vmem:[#allocation94_spill] sm:$0xff]  ;;  %v11400_v12 = vld [vmem:[#allocation96_spill] sm:$0xff] }
 0x720   :  { %v3817_v35 = vmul.f32 %v8125_v21, %v3815_v5  ;;  %v11401_v5 = vld [vmem:[#allocation97_spill] sm:$0xff]  ;;  %v11403_v21 = vld [vmem:[#allocation55_spill] sm:$0xff] }
 0x721   :  { %v8127_v17 = vpop.eup %8126 }
 0x722   :  { %v10185_v15 = vadd.f32 %v3818_v45, %v3817_v35  ;;  %4091 = vmatpush1.bf16.msra.mxu0 %v10023_v62  ;;  %4132 = vmatpush1.bf16.msra.mxu1 %v10026_v38  ;;  %v11402_v45 = vld [vmem:[#allocation98_spill] sm:$0xff]  ;;  %v11405_v35 = vld [vmem:[#allocation57_spill] sm:$0xff] }
 0x723   :  { %4092 = vmatprep.subr.bf16.mxu0 %v11368_v31  ;;  %4133 = vmatprep.subr.bf16.mxu1 %v11369_v61 }
 0x724   :  { %8128 = vtanh.f32 %v10185_v15 }
 0x726   :  { %4093 = vmatpush1.bf16.msra.mxu0 %v11370_v44  ;;  %4134 = vmatpush1.bf16.msra.mxu1 %v11371_v23 }
 0x727   :  { %4094 = vmatprep.subr.bf16.mxu0 %v11372_v19  ;;  %4135 = vmatprep.subr.bf16.mxu1 %v11373_v11 }
 0x72a   :  { %4095 = vmatpush1.bf16.msra.mxu0 %v11374_v53  ;;  %4136 = vmatpush1.bf16.msra.mxu1 %v11375_v36 }
 0x72b   :  { %4096 = vmatprep.subr.bf16.mxu0 %v11376_v63  ;;  %4137 = vmatprep.subr.bf16.mxu1 %v11377_v10 }
 0x72e   :  { %v8129_v34 = vpop.eup %8128  ;;  %4097 = vmatpush1.bf16.msra.mxu0 %v11378_v9  ;;  %4138 = vmatpush1.bf16.msra.mxu1 %v11379_v37 }
 0x72f   :  { %4098 = vmatprep.subr.bf16.mxu0 %v11380_v27  ;;  %4139 = vmatprep.subr.bf16.mxu1 %v11381_v59  ;;  %v3821_v54 = vmul.f32 %v8129_v34, %v8127_v17  ;;  %v11406_v17 = vld [vmem:[#allocation58_spill] sm:$0xff]  ;;  %v11407_v34 = vld [vmem:[#allocation59_spill] sm:$0xff] }
 0x731   :  { %v4080_v56 = vpack.c.bf16 %v3821_v54, %v3821_v54  ;;  %v11408_v54 = vld [vmem:[#allocation60_spill] sm:$0xff] }
 0x732   :  { %4099 = vmatpush1.bf16.msra.mxu0 %v11382_v3  ;;  %4140 = vmatpush1.bf16.msra.mxu1 %v11383_v16 }
 0x733   :  { %v4082_v26 = vrot.slane %v4080_v56, 1  ;;  %4213 = vmatprep.subr.bf16.mxu0 %v11384_v43  ;;  %4254 = vmatprep.subr.bf16.mxu1 %v11385_v30  ;;  %v11409_v56 = vld [vmem:[#allocation61_spill] sm:$0xff]  ;;  %v11411_v43 = vld [vmem:[#allocation63_spill] sm:$0xff]  ;;  %v11412_v30 = vld [vmem:[#allocation64_spill] sm:$0xff] }
 0x735   :  { %4117 = vmatmul.mubr.bf16.vlgmr.msra.gmra.mrb[92].mxu0 %v4082_v26  ;;  %4158 = vmatmul.mubr.bf16.vlgmr.msra.gmra.mrb[92].mxu1 %v4082_v26  ;;  %v11410_v26 = vld [vmem:[#allocation62_spill] sm:$0xff] }
 0x736   :  { %4214 = vmatpush1.bf16.msra.mxu0 %v11386_v58  ;;  %4255 = vmatpush1.bf16.msra.mxu1 %v11387_v8  ;;  %v11413_v58 = vld [vmem:[#allocation65_spill] sm:$0xff]  ;;  %v11414_v8 = vld [vmem:[#allocation66_spill] sm:$0xff] }
 0x737   :  { %4215 = vmatprep.subr.bf16.mxu0 %v11388_v24  ;;  %4256 = vmatprep.subr.bf16.mxu1 %v11389_v22  ;;  %v11415_v24 = vld [vmem:[#allocation67_spill] sm:$0xff]  ;;  %v11416_v22 = vld [vmem:[#allocation68_spill] sm:$0xff] }
 0x738   :  { %4245 = vmatprep.mubr.bf16.mxu0 %v11046_v51  ;;  %4286 = vmatprep.mubr.bf16.mxu1 %v11046_v51 }
 0x73a   :  { %4216 = vmatpush1.bf16.msra.mxu0 %v11390_v0  ;;  %4257 = vmatpush1.bf16.msra.mxu1 %v11391_v52  ;;  %v11417_v0 = vld [vmem:[#allocation69_spill] sm:$0xff] }
 0x73b   :  { %4217 = vmatprep.subr.bf16.mxu0 %v11392_v39  ;;  %4258 = vmatprep.subr.bf16.mxu1 %v11393_v18 }
 0x73e   :  { %4218 = vmatpush1.bf16.msra.mxu0 %v11394_v33  ;;  %4259 = vmatpush1.bf16.msra.mxu1 %v11395_v41 }
 0x73f   :  { %4219 = vmatprep.subr.bf16.mxu0 %v11396_v4  ;;  %4260 = vmatprep.subr.bf16.mxu1 %v11397_v48 }
 0x742   :  { %4220 = vmatpush1.bf16.msra.mxu0 %v11398_v46  ;;  %4261 = vmatpush1.bf16.msra.mxu1 %v11399_v60 }
 0x743   :  { %4221 = vmatprep.subr.bf16.mxu0 %v11400_v12  ;;  %4262 = vmatprep.subr.bf16.mxu1 %v11401_v5 }
 0x746   :  { %4222 = vmatpush1.bf16.msra.mxu0 %v11402_v45  ;;  %4263 = vmatpush1.bf16.msra.mxu1 %v11403_v21  ;;  %v11418_v45 = vld [vmem:[#allocation21_spill] sm:$0xff] }
 0x747   :  { %4223 = vmatprep.subr.bf16.mxu0 %v11404_v13  ;;  %4264 = vmatprep.subr.bf16.mxu1 %v11405_v35 }
 0x74a   :  { %4224 = vmatpush1.bf16.msra.mxu0 %v11406_v17  ;;  %4265 = vmatpush1.bf16.msra.mxu1 %v11407_v34 }
 0x74b   :  { %4225 = vmatprep.subr.bf16.mxu0 %v11408_v54  ;;  %4266 = vmatprep.subr.bf16.mxu1 %v11409_v56  ;;  %v11419_v54 = vld [vmem:[#allocation20_spill] sm:$0xff] }
 0x74e   :  { %4226 = vmatpush1.bf16.msra.mxu0 %v11410_v26  ;;  %4267 = vmatpush1.bf16.msra.mxu1 %v11411_v43  ;;  %v11420_v26 = vld [vmem:[#allocation22_spill] sm:$0xff] }
 0x74f   :  { %4227 = vmatprep.subr.bf16.mxu0 %v11412_v30  ;;  %4268 = vmatprep.subr.bf16.mxu1 %v11413_v58 }
 0x752   :  { %4228 = vmatpush1.bf16.msra.mxu0 %v11414_v8  ;;  %4269 = vmatpush1.bf16.msra.mxu1 %v11415_v24 }
 0x753   :  { %4342 = vmatprep.subr.bf16.mxu0 %v11416_v22  ;;  %4383 = vmatprep.subr.bf16.mxu1 %v11417_v0 }
 0x7c8   :  { %v3860_v52 = vpop.f32.mrb[84].mxu0  ;;  %v3901_v39 = vpop.f32.mrb[84].mxu1 }
 0x7c9   :  { %v3912_v18 = vrot.slane %v3860_v52, 4  ;;  %v3862_v33 = vpop.f32.mrb[85].mxu0  ;;  %v3903_v41 = vpop.f32.mrb[85].mxu1  ;;  %v3914_v17 = vrot.slane %v3901_v39, 4  ;;  %v3944_v39 = vrot.slane %v10121_v14, 6 }
 0x7ca   :  { %v3913_v4 = vrot.slane %v3862_v33, 4  ;;  %v3864_v48 = vpop.f32.mrb[86].mxu0  ;;  %v3905_v46 = vpop.f32.mrb[86].mxu1  ;;  %v3915_v34 = vrot.slane %v3903_v41, 4 }
 0x7cb   :  { %v3920_v60 = vadd.f32 %v3912_v18, %v11348_v28  ;;  %v3865_v12 = vpop.f32.mrb[87].mxu0  ;;  %v3906_v5 = vpop.f32.mrb[87].mxu1  ;;  %v3922_v56 = vadd.f32 %v3914_v17, %v11419_v54 }
 0x7cc   :  { %v3921_v21 = vadd.f32 %v3913_v4, %v11418_v45  ;;  %v3923_v43 = vadd.f32 %v3915_v34, %v11420_v26 }
 0x7cd   :  { %v6857_v13 = vmul.f32 -1.442695, %v3920_v60  ;;  %v6859_v30 = vmul.f32 -1.442695, %v3922_v56 }
 0x7ce   :  { %v6858_v35 = vmul.f32 -1.442695, %v3921_v21 }
 0x7cf   :  { %8130 = vpow2.f32 %v6857_v13 }
 0x7d0   :  { %8132 = vpow2.f32 %v6858_v35 }
 0x7d1   :  { %8134 = vtanh.f32 %v3923_v43 }
 0x7d2   :  { %8136 = vpow2.f32 %v6859_v30 }
 0x7d9   :  { %v8131_v58 = vpop.eup %8130 }
 0x7da   :  { %v3933_v8 = vadd.f32 1.0, %v8131_v58  ;;  %v8133_v24 = vpop.eup %8132 }
 0x7db   :  { %v3934_v22 = vadd.f32 1.0, %v8133_v24  ;;  %v8135_v0 = vpop.eup %8134 }
 0x7dc   :  { %8138 = vrcp.f32 %v3933_v8  ;;  %v8137_v52 = vpop.eup %8136 }
 0x7dd   :  { %8140 = vrcp.f32 %v3934_v22  ;;  %v3935_v4 = vadd.f32 1.0, %v8137_v52 }
 0x7df   :  { %8142 = vrcp.f32 %v3935_v4 }
 0x7e6   :  { %v8139_v18 = vpop.eup %8138 }
 0x7e7   :  { %v3947_v33 = vmul.f32 %v8139_v18, %v8135_v0  ;;  %v8141_v41 = vpop.eup %8140 }
 0x7e8   :  { %v3989_v48 = vpop.f32.mrb[88].mxu0  ;;  %v4030_v46 = vpop.f32.mrb[88].mxu1  ;;  %v3946_v60 = vmul.f32 %v8141_v41, %v3944_v39 }
 0x7e9   :  { %v4041_v12 = vrot.slane %v3989_v48, 4  ;;  %v3991_v5 = vpop.f32.mrb[89].mxu0  ;;  %v4032_v21 = vpop.f32.mrb[89].mxu1  ;;  %v4043_v24 = vrot.slane %v4030_v46, 4  ;;  %v8426_v46 = vld [vmem:[#allocation5 + $0x100] ss:$16 sps:$4 sm:$0xff]  }
 0x7ea   :  { %v4042_v13 = vrot.slane %v3991_v5, 4  ;;  %v3993_v35 = vpop.f32.mrb[90].mxu0  ;;  %v4034_v17 = vpop.f32.mrb[90].mxu1  ;;  %v10247_v34 = vadd.f32 %v3947_v33, %v3946_v60  ;;  %v4044_v22 = vrot.slane %v4032_v21, 4  ;;  %v8427_v21 = vld [vmem:[#allocation5 + $0x108] ss:$16 sps:$4 sm:$0xff]  }
 0x7eb   :  { %v4049_v56 = vadd.f32 %v4041_v12, %v11352_v29  ;;  %v3994_v43 = vpop.f32.mrb[91].mxu0  ;;  %v4035_v30 = vpop.f32.mrb[91].mxu1  ;;  %v4051_v0 = vadd.f32 %v4043_v24, %v11288_v49  ;;  %v8428_v35 = vld [vmem:[#allocation5 + $0x124] ss:$16 sps:$4 sm:$0xff]   ;;  %v8429_v17 = vld [vmem:[#allocation5 + $0x12c] ss:$16 sps:$4 sm:$0xff]  }
 0x7ec   :  { %v4050_v14 = vadd.f32 %v4042_v13, %v11287_v32  ;;  %8144 = vtanh.f32 %v10247_v34  ;;  %v8143_v52 = vpop.eup %8142  ;;  %v4052_v18 = vadd.f32 %v4044_v22, %v11289_v1  ;;  %v8431_v43 = vld [vmem:[#allocation5 + $0x128] ss:$16 sps:$4 sm:$0xff]   ;;  %v4073_v22 = vrot.slane %v10143_v57, 6 }
 0x7ed   :  { %v6860_v58 = vmul.f32 -1.442695, %v4049_v56  ;;  %v6862_v33 = vmul.f32 -1.442695, %v4051_v0  ;;  %v8430_v56 = vld [vmem:[#allocation5 + $0x120] ss:$16 sps:$4 sm:$0xff]  }
 0x7ee   :  { %v6861_v8 = vmul.f32 -1.442695, %v4050_v14  ;;  %v8432_v14 = vld [vmem:[#allocation5 + $0x144] ss:$16 sps:$4 sm:$0xff]  }
 0x7ef   :  { %8146 = vpow2.f32 %v6860_v58  ;;  %v8433_v58 = vld [vmem:[#allocation5 + $0x14c] ss:$16 sps:$4 sm:$0xff]  }
 0x7f0   :  { %8148 = vpow2.f32 %v6861_v8 }
 0x7f1   :  { %8150 = vtanh.f32 %v4052_v18  ;;  %v8435_v18 = vld [vmem:[#allocation5 + $0x148] ss:$16 sps:$4 sm:$0xff]  }
 0x7f2   :  { %8152 = vpow2.f32 %v6862_v33 }
 0x7f6   :  { %v8145_v39 = vpop.eup %8144 }
 0x7f7   :  { %v3950_v41 = vmul.f32 %v8145_v39, %v8143_v52  ;;  %v8434_v52 = vld [vmem:[#allocation5 + $0x140] ss:$16 sps:$4 sm:$0xff]  }
 0x7f9   :  { %v8147_v48 = vpop.eup %8146  ;;  %v4209_v60 = vpack.c.bf16 %v3950_v41, %v3950_v41 }
 0x7fa   :  { %v4062_v4 = vadd.f32 1.0, %v8147_v48  ;;  %v8149_v12 = vpop.eup %8148 }
 0x7fb   :  { %v4063_v5 = vadd.f32 1.0, %v8149_v12  ;;  %v4211_v13 = vrot.slane %v4209_v60, 2  ;;  %v8151_v30 = vpop.eup %8150  ;;  %v8437_v60 = vld [vmem:[#allocation5 + $0x16c] ss:$16 sps:$4 sm:$0xff]  }
 0x7fc   :  { %8154 = vrcp.f32 %v4062_v4  ;;  %v8153_v8 = vpop.eup %8152  ;;  %v8436_v4 = vld [vmem:[#allocation5 + $0x164] ss:$16 sps:$4 sm:$0xff]  }
 0x7fd   :  { %8156 = vrcp.f32 %v4063_v5  ;;  %4246 = vmatmul.mubr.bf16.vlgmr.msra.gmra.mrb[96].mxu0 %v4211_v13  ;;  %4287 = vmatmul.mubr.bf16.vlgmr.msra.gmra.mrb[96].mxu1 %v4211_v13  ;;  %v4064_v33 = vadd.f32 1.0, %v8153_v8 }
 0x7fe   :  { %4343 = vmatpush1.bf16.msra.mxu0 %v8426_v46  ;;  %4384 = vmatpush1.bf16.msra.mxu1 %v8427_v21 }
 0x7ff   :  { %4344 = vmatprep.subr.bf16.mxu0 %v8428_v35  ;;  %4385 = vmatprep.subr.bf16.mxu1 %v8429_v17  ;;  %8158 = vrcp.f32 %v4064_v33 }
 0x800   :  { %4374 = vmatprep.mubr.bf16.mxu0 %v11046_v51  ;;  %4415 = vmatprep.mubr.bf16.mxu1 %v11046_v51 }
 0x802   :  { %4345 = vmatpush1.bf16.msra.mxu0 %v8430_v56  ;;  %4386 = vmatpush1.bf16.msra.mxu1 %v8431_v43  ;;  %v8438_v43 = vld [vmem:[#allocation5 + $0x160] ss:$16 sps:$4 sm:$0xff]  }
 0x803   :  { %4346 = vmatprep.subr.bf16.mxu0 %v8432_v14  ;;  %4387 = vmatprep.subr.bf16.mxu1 %v8433_v58 }
 0x806   :  { %v8155_v24 = vpop.eup %8154  ;;  %4347 = vmatpush1.bf16.msra.mxu0 %v8434_v52  ;;  %4388 = vmatpush1.bf16.msra.mxu1 %v8435_v18 }
 0x807   :  { %v4076_v0 = vmul.f32 %v8155_v24, %v8151_v30  ;;  %v8157_v39 = vpop.eup %8156  ;;  %4348 = vmatprep.subr.bf16.mxu0 %v8436_v4  ;;  %4389 = vmatprep.subr.bf16.mxu1 %v8437_v60  ;;  %v8439_v30 = vld [vmem:[#allocation5 + $0x168] ss:$16 sps:$4 sm:$0xff]   ;;  %v8440_v24 = vld [vmem:[#allocation5 + $0x184] ss:$16 sps:$4 sm:$0xff]   ;;  %v8445_v60 = vld [vmem:[#allocation5 + $0x1ac] ss:$16 sps:$4 sm:$0xff]  }
 0x808   :  { %v4118_v41 = vpop.f32.mrb[92].mxu0  ;;  %v4159_v48 = vpop.f32.mrb[92].mxu1  ;;  %v4075_v12 = vmul.f32 %v8157_v39, %v4073_v22  ;;  %v8441_v22 = vld [vmem:[#allocation5 + $0x18c] ss:$16 sps:$4 sm:$0xff]   ;;  %v8442_v39 = vld [vmem:[#allocation5 + $0x180] ss:$16 sps:$4 sm:$0xff]  }
 0x809   :  { %v4170_v5 = vrot.slane %v4118_v41, 4  ;;  %v4120_v13 = vpop.f32.mrb[93].mxu0  ;;  %v4161_v46 = vpop.f32.mrb[93].mxu1  ;;  %v4172_v18 = vrot.slane %v4159_v48, 4  ;;  %v8443_v41 = vld [vmem:[#allocation5 + $0x188] ss:$16 sps:$4 sm:$0xff]  }
 0x80a   :  { %v4171_v21 = vrot.slane %v4120_v13, 4  ;;  %v4122_v35 = vpop.f32.mrb[94].mxu0  ;;  %v4163_v57 = vpop.f32.mrb[94].mxu1  ;;  %v10257_v17 = vadd.f32 %v4076_v0, %v4075_v12  ;;  %4349 = vmatpush1.bf16.msra.mxu0 %v8438_v43  ;;  %4390 = vmatpush1.bf16.msra.mxu1 %v8439_v30  ;;  %v8444_v4 = vld [vmem:[#allocation5 + $0x1a4] ss:$16 sps:$4 sm:$0xff]   ;;  %v4173_v33 = vrot.slane %v4161_v46, 4 }
 0x80b   :  { %v4178_v56 = vadd.f32 %v4170_v5, %v11290_v42  ;;  %v4123_v14 = vpop.f32.mrb[95].mxu0  ;;  %v4164_v58 = vpop.f32.mrb[95].mxu1  ;;  %4350 = vmatprep.subr.bf16.mxu0 %v8440_v24  ;;  %4391 = vmatprep.subr.bf16.mxu1 %v8441_v22  ;;  %v4180_v12 = vadd.f32 %v4172_v18, %v11295_v2  ;;  %v8446_v5 = vld [vmem:[#allocation5 + $0x1a0] ss:$16 sps:$4 sm:$0xff]   ;;  %v8447_v13 = vld [vmem:[#allocation5 + $0x1a8] ss:$16 sps:$4 sm:$0xff]  }
 0x80c   :  { %v4179_v8 = vadd.f32 %v4171_v21, %v11291_v55  ;;  %8160 = vtanh.f32 %v10257_v17  ;;  %v8448_v21 = vld [vmem:[#allocation5 + $0x1c4] ss:$16 sps:$4 sm:$0xff]   ;;  %v8449_v35 = vld [vmem:[#allocation5 + $0x1cc] ss:$16 sps:$4 sm:$0xff]   ;;  %v8159_v48 = vpop.eup %8158  ;;  %v4181_v57 = vadd.f32 %v4173_v33, %v11298_v25  ;;  %v8450_v30 = vld [vmem:[#allocation5 + $0x1c0] ss:$16 sps:$4 sm:$0xff]  }
 0x80d   :  { %v6863_v52 = vmul.f32 -1.442695, %v4178_v56  ;;  %v6865_v43 = vmul.f32 -1.442695, %v4180_v12  ;;  %v8451_v14 = vld [vmem:[#allocation5 + $0x1c8] ss:$16 sps:$4 sm:$0xff]  }
 0x80e   :  { %v6864_v0 = vmul.f32 -1.442695, %v4179_v8  ;;  %4351 = vmatpush1.bf16.msra.mxu0 %v8442_v39  ;;  %4392 = vmatpush1.bf16.msra.mxu1 %v8443_v41  ;;  %v8452_v46 = vld [vmem:[#allocation5 + $0x1e4] ss:$16 sps:$4 sm:$0xff]   ;;  %v8453_v58 = vld [vmem:[#allocation5 + $0x1ec] ss:$16 sps:$4 sm:$0xff]  }
 0x80f   :  { %8162 = vpow2.f32 %v6863_v52  ;;  %4352 = vmatprep.subr.bf16.mxu0 %v8444_v4  ;;  %4393 = vmatprep.subr.bf16.mxu1 %v8445_v60  ;;  %v8454_v18 = vld [vmem:[#allocation5 + $0x1e0] ss:$16 sps:$4 sm:$0xff]   ;;  %v8455_v39 = vld [vmem:[#allocation5 + $0x1e8] ss:$16 sps:$4 sm:$0xff]   ;;  %v8456_v60 = vld [vmem:[#allocation5 + $0x204] ss:$16 sps:$4 sm:$0xff]  }
 0x810   :  { %8164 = vpow2.f32 %v6864_v0  ;;  %v8457_v33 = vld [vmem:[#allocation5 + $0x20c] ss:$16 sps:$4 sm:$0xff]   ;;  %v8458_v12 = vld [vmem:[#allocation5 + $0x200] ss:$16 sps:$4 sm:$0xff]  }
 0x811   :  { %8166 = vtanh.f32 %v4181_v57 }
 0x812   :  { %4353 = vmatpush1.bf16.msra.mxu0 %v8446_v5  ;;  %4394 = vmatpush1.bf16.msra.mxu1 %v8447_v13  ;;  %8168 = vpow2.f32 %v6865_v43  ;;  %v8459_v5 = vld [vmem:[#allocation5 + $0x208] ss:$16 sps:$4 sm:$0xff]   ;;  %v8460_v13 = vld [vmem:[#allocation5 + $0x224] ss:$16 sps:$4 sm:$0xff]  }
 0x813   :  { %4354 = vmatprep.subr.bf16.mxu0 %v8448_v21  ;;  %4395 = vmatprep.subr.bf16.mxu1 %v8449_v35  ;;  %v8461_v21 = vld [vmem:[#allocation5 + $0x22c] ss:$16 sps:$4 sm:$0xff]   ;;  %v8462_v35 = vld [vmem:[#allocation5 + $0x220] ss:$16 sps:$4 sm:$0xff]  }
 0x816   :  { %v8161_v56 = vpop.eup %8160  ;;  %4355 = vmatpush1.bf16.msra.mxu0 %v8450_v30  ;;  %4396 = vmatpush1.bf16.msra.mxu1 %v8451_v14  ;;  %v4202_v30 = vrot.slane %v10185_v15, 6  ;;  %v8593_v15 = vmov 0.0  }
 0x817   :  { %4356 = vmatprep.subr.bf16.mxu0 %v8452_v46  ;;  %4397 = vmatprep.subr.bf16.mxu1 %v8453_v58  ;;  %v4079_v8 = vmul.f32 %v8161_v56, %v8159_v48  ;;  %v8463_v48 = vld [vmem:[#allocation5 + $0x228] ss:$16 sps:$4 sm:$0xff]  }
 0x819   :  { %v8163_v24 = vpop.eup %8162  ;;  %v4338_v52 = vpack.c.bf16 %v4079_v8, %v4079_v8 }
 0x81a   :  { %v4191_v22 = vadd.f32 1.0, %v8163_v24  ;;  %v8165_v0 = vpop.eup %8164  ;;  %4357 = vmatpush1.bf16.msra.mxu0 %v8454_v18  ;;  %4398 = vmatpush1.bf16.msra.mxu1 %v8455_v39  ;;  %v7678_v18 = vld [vmem:[#allocation7 + $0xa8] ss:$12 sps:$4 sm:$0xff]   ;;  %v7681_v39 = vld [vmem:[#allocation7 + $0xb0] ss:$12 sps:$4 sm:$0xff]  }
 0x81b   :  { %v4192_v41 = vadd.f32 1.0, %v8165_v0  ;;  %v4340_v4 = vrot.slane %v4338_v52, 2  ;;  %4471 = vmatprep.subr.bf16.mxu0 %v8456_v60  ;;  %4512 = vmatprep.subr.bf16.mxu1 %v8457_v33  ;;  %v8167_v57 = vpop.eup %8166  ;;  %v7677_v52 = vld [vmem:[#allocation7 + $0x98] ss:$12 sps:$4 sm:$0xff]  }
 0x81c   :  { %8170 = vrcp.f32 %v4191_v22  ;;  %v8169_v56 = vpop.eup %8168  ;;  %v7674_v22 = vld [vmem:[#allocation7 + $0x90] ss:$12 sps:$4 sm:$0xff]   ;;  %v7680_v0 = vld [vmem:[#allocation7 + $0xac] ss:$12 sps:$4 sm:$0xff]  }
 0x81d   :  { %8172 = vrcp.f32 %v4192_v41  ;;  %4375 = vmatmul.mubr.bf16.vlgmr.msra.gmra.mrb[100].mxu0 %v4340_v4  ;;  %4416 = vmatmul.mubr.bf16.vlgmr.msra.gmra.mrb[100].mxu1 %v4340_v4  ;;  %v4193_v58 = vadd.f32 1.0, %v8169_v56  ;;  %v7683_v41 = vld [vmem:[%s10731_s6 + $0x40] sm:$0xff]  }
 0x81e   :  { %4472 = vmatpush1.bf16.msra.mxu0 %v8458_v12  ;;  %4513 = vmatpush1.bf16.msra.mxu1 %v8459_v5 }
 0x81f   :  { %4473 = vmatprep.subr.bf16.mxu0 %v8460_v13  ;;  %4514 = vmatprep.subr.bf16.mxu1 %v8461_v21  ;;  %8174 = vrcp.f32 %v4193_v58 }
 0x820   :  { %4503 = vmatprep.mubr.bf16.mxu0 %v11046_v51  ;;  %4544 = vmatprep.mubr.bf16.mxu1 %v11046_v51 }
 0x822   :  { %4474 = vmatpush1.bf16.msra.mxu0 %v8462_v35  ;;  %4515 = vmatpush1.bf16.msra.mxu1 %v8463_v48 }
 0x823   :  { %4475 = vmatprep.subr.bf16.mxu0 %v11363_v50  ;;  %4516 = vmatprep.subr.bf16.mxu1 %v11364_v20 }
 0x826   :  { %v8171_v43 = vpop.eup %8170  ;;  %4476 = vmatpush1.bf16.msra.mxu0 %v11365_v6  ;;  %4517 = vmatpush1.bf16.msra.mxu1 %v11366_v40  ;;  %v7652_v6 = vld [vmem:[#allocation7 + $0x4] ss:$12 sps:$4 sm:$0xff]   ;;  %v7650_v40 = vld [vmem:[#allocation7] ss:$12 sps:$4 sm:$0xff]  }
 0x827   :  { %v4205_v14 = vmul.f32 %v8171_v43, %v8167_v57  ;;  %v8173_v46 = vpop.eup %8172  ;;  %4477 = vmatprep.subr.bf16.mxu0 %v11367_v47  ;;  %4518 = vmatprep.subr.bf16.mxu1 %v10019_v7  ;;  %v7653_v47 = vld [vmem:[#allocation7 + $0x8] ss:$12 sps:$4 sm:$0xff]  }
 0x828   :  { %v4204_v8 = vmul.f32 %v8173_v46, %v4202_v30 }
 0x829   :  { %v8175_v7 = vpop.eup %8174 }
 0x82a   :  { %v10273_v24 = vadd.f32 %v4205_v14, %v4204_v8  ;;  %4478 = vmatpush1.bf16.msra.mxu0 %v10023_v62  ;;  %4519 = vmatpush1.bf16.msra.mxu1 %v10026_v38 }
 0x82b   :  { %4479 = vmatprep.subr.bf16.mxu0 %v11368_v31  ;;  %4520 = vmatprep.subr.bf16.mxu1 %v11369_v61  ;;  %v7656_v31 = vld [vmem:[#allocation7 + $0x1c] ss:$12 sps:$4 sm:$0xff]   ;;  %v7654_v61 = vld [vmem:[#allocation7 + $0x18] ss:$12 sps:$4 sm:$0xff]  }
 0x82c   :  { %8176 = vtanh.f32 %v10273_v24 }
 0x82e   :  { %4480 = vmatpush1.bf16.msra.mxu0 %v11370_v44  ;;  %4521 = vmatpush1.bf16.msra.mxu1 %v11371_v23  ;;  %v7657_v44 = vld [vmem:[#allocation7 + $0x20] ss:$12 sps:$4 sm:$0xff]  }
 0x82f   :  { %4481 = vmatprep.subr.bf16.mxu0 %v11372_v19  ;;  %4522 = vmatprep.subr.bf16.mxu1 %v11373_v11  ;;  %v7660_v23 = vld [vmem:[#allocation7 + $0x34] ss:$12 sps:$4 sm:$0xff]   ;;  %v7658_v19 = vld [vmem:[#allocation7 + $0x30] ss:$12 sps:$4 sm:$0xff]   ;;  %v7661_v11 = vld [vmem:[#allocation7 + $0x38] ss:$12 sps:$4 sm:$0xff]  }
 0x832   :  { %4482 = vmatpush1.bf16.msra.mxu0 %v11374_v53  ;;  %4523 = vmatpush1.bf16.msra.mxu1 %v11375_v36  ;;  %v7664_v53 = vld [vmem:[#allocation7 + $0x4c] ss:$12 sps:$4 sm:$0xff]   ;;  %v7662_v36 = vld [vmem:[#allocation7 + $0x48] ss:$12 sps:$4 sm:$0xff]  }
 0x833   :  { %4483 = vmatprep.subr.bf16.mxu0 %v11376_v63  ;;  %4524 = vmatprep.subr.bf16.mxu1 %v11377_v10  ;;  %v7665_v63 = vld [vmem:[#allocation7 + $0x50] ss:$12 sps:$4 sm:$0xff]  }
 0x834   :  { %v7668_v10 = vld [vmem:[#allocation7 + $0x64] ss:$12 sps:$4 sm:$0xff]  }
 0x836   :  { %v8177_v62 = vpop.eup %8176  ;;  %4484 = vmatpush1.bf16.msra.mxu0 %v11378_v9  ;;  %4525 = vmatpush1.bf16.msra.mxu1 %v11379_v37  ;;  %v7666_v9 = vld [vmem:[#allocation7 + $0x60] ss:$12 sps:$4 sm:$0xff]   ;;  %v7669_v37 = vld [vmem:[#allocation7 + $0x68] ss:$12 sps:$4 sm:$0xff]  }
 0x837   :  { %4485 = vmatprep.subr.bf16.mxu0 %v11380_v27  ;;  %4526 = vmatprep.subr.bf16.mxu1 %v11381_v59  ;;  %v4208_v38 = vmul.f32 %v8177_v62, %v8175_v7  ;;  %v7672_v27 = vld [vmem:[#allocation7 + $0x7c] ss:$12 sps:$4 sm:$0xff]   ;;  %v7670_v59 = vld [vmem:[#allocation7 + $0x78] ss:$12 sps:$4 sm:$0xff]  }
 0x839   :  { %v4467_v50 = vpack.c.bf16 %v4208_v38, %v4208_v38 }
 0x83a   :  { %4486 = vmatpush1.bf16.msra.mxu0 %v11382_v3  ;;  %4527 = vmatpush1.bf16.msra.mxu1 %v11383_v16  ;;  %v7673_v3 = vld [vmem:[#allocation7 + $0x80] ss:$12 sps:$4 sm:$0xff]  }
 0x83b   :  { %v4469_v20 = vrot.slane %v4467_v50, 2  ;;  %4777 = vmatprep.subr.bf16.mxu0 %v7652_v6  ;;  %7204 = vmatprep.subr.bf16.mxu1 %v8593_v15  ;;  %v7676_v16 = vld [vmem:[#allocation7 + $0x94] ss:$12 sps:$4 sm:$0xff]  }
 0x83d   :  { %4504 = vmatmul.mubr.bf16.vlgmr.msra.gmra.mrb[104].mxu0 %v4469_v20  ;;  %4545 = vmatmul.mubr.bf16.vlgmr.msra.gmra.mrb[104].mxu1 %v4469_v20 }
 0x83e   :  { %4809 = vmatprep.mubr.bf16.mxu0 %v11046_v51  ;;  %4778 = vmatpush1.bf16.msra.mxu0 %v7650_v40 }
 0x83f   :  { %7205 = vmatpush3.bf16.msra.mxu1 %v7653_v47  ;;  %4779 = vmatprep.subr.bf16.mxu0 %v7656_v31  ;;  %v4331_v47 = vrot.slane %v10247_v34, 6 }
 0x840   :  { %7206 = vmatprep.subr.bf16.mxu1 %v8593_v15  ;;  %7220 = vmatprep.mubr.msk.bf16.mxu1 %vm8594_vm0, %v8593_v15 }
 0x842   :  { %4780 = vmatpush1.bf16.msra.mxu0 %v7654_v61 }
 0x843   :  { %7207 = vmatpush3.bf16.msra.mxu1 %v7657_v44  ;;  %4781 = vmatprep.subr.bf16.mxu0 %v7660_v23 }
 0x844   :  { %7208 = vmatprep.subr.bf16.mxu1 %v8593_v15 }
 0x846   :  { %4782 = vmatpush1.bf16.msra.mxu0 %v7658_v19 }
 0x847   :  { %7209 = vmatpush3.bf16.msra.mxu1 %v7661_v11  ;;  %4783 = vmatprep.subr.bf16.mxu0 %v7664_v53 }
 0x848   :  { %7210 = vmatprep.subr.bf16.mxu1 %v8593_v15 }
 0x84a   :  { %4784 = vmatpush1.bf16.msra.mxu0 %v7662_v36 }
 0x84b   :  { %7211 = vmatpush3.bf16.msra.mxu1 %v7665_v63  ;;  %4785 = vmatprep.subr.bf16.mxu0 %v7668_v10 }
 0x84c   :  { %7212 = vmatprep.subr.bf16.mxu1 %v8593_v15 }
 0x84e   :  { %4786 = vmatpush1.bf16.msra.mxu0 %v7666_v9 }
 0x84f   :  { %7213 = vmatpush3.bf16.msra.mxu1 %v7669_v37  ;;  %4787 = vmatprep.subr.bf16.mxu0 %v7672_v27 }
 0x850   :  { %7214 = vmatprep.subr.bf16.mxu1 %v8593_v15 }
 0x852   :  { %4788 = vmatpush1.bf16.msra.mxu0 %v7670_v59 }
 0x853   :  { %7215 = vmatpush3.bf16.msra.mxu1 %v7673_v3  ;;  %4789 = vmatprep.subr.bf16.mxu0 %v7676_v16 }
 0x854   :  { %7216 = vmatprep.subr.bf16.mxu1 %v8593_v15 }
 0x856   :  { %4790 = vmatpush1.bf16.msra.mxu0 %v7674_v22 }
 0x857   :  { %7217 = vmatpush3.bf16.msra.mxu1 %v7677_v52  ;;  %4791 = vmatprep.subr.bf16.mxu0 %v7680_v0 }
 0x858   :  { %7218 = vmatprep.subr.bf16.mxu1 %v8593_v15 }
 0x85a   :  { %4792 = vmatpush1.bf16.msra.mxu0 %v7678_v18 }
 0x85b   :  { %7219 = vmatpush3.bf16.msra.mxu1 %v7681_v39  ;;  %7062 = vmatprep.subr.bf16.mxu0 %v7683_v41 }
 0x85c   :  { %7224 = vmatprep.subr.bf16.mxu1 %v8593_v15 }
 0x8d0   :  { %v4247_v4 = vpop.f32.mrb[96].mxu0  ;;  %v4288_v60 = vpop.f32.mrb[96].mxu1 }
 0x8d1   :  { %v4299_v33 = vrot.slane %v4247_v4, 2  ;;  %v4249_v12 = vpop.f32.mrb[97].mxu0  ;;  %v4290_v5 = vpop.f32.mrb[97].mxu1  ;;  %v4301_v46 = vrot.slane %v4288_v60, 2 }
 0x8d2   :  { %v4300_v13 = vrot.slane %v4249_v12, 2  ;;  %v4251_v21 = vpop.f32.mrb[98].mxu0  ;;  %v4292_v35 = vpop.f32.mrb[98].mxu1  ;;  %v4302_v58 = vrot.slane %v4290_v5, 2  ;;  %v7682_v5 = vld [vmem:[%s10731_s6 + $0x80] sm:$0xff]  }
 0x8d3   :  { %v4307_v48 = vadd.f32 %v4299_v33, %v11348_v28  ;;  %v4252_v57 = vpop.f32.mrb[99].mxu0  ;;  %v4293_v56 = vpop.f32.mrb[99].mxu1  ;;  %v4309_v8 = vadd.f32 %v4301_v46, %v11419_v54  ;;  %v7686_v21 = vld [vmem:[%s10731_s6 + $0x48] sm:$0xff]  }
 0x8d4   :  { %v4308_v43 = vadd.f32 %v4300_v13, %v11418_v45  ;;  %v4310_v7 = vadd.f32 %v4302_v58, %v11420_v26  ;;  %v7685_v35 = vld [vmem:[%s10731_s6 + $0x88] sm:$0xff]   ;;  %v7689_v57 = vld [vmem:[%s10731_s6 + $0x50] sm:$0xff]  }
 0x8d5   :  { %v6866_v30 = vmul.f32 -1.442695, %v4307_v48  ;;  %v6868_v62 = vmul.f32 -1.442695, %v4309_v8  ;;  %v7687_v48 = vld [vmem:[%s10731_s6 + $0x8] sm:$0xff]   ;;  %v7688_v56 = vld [vmem:[%s10731_s6 + $0x90] sm:$0xff]  }
 0x8d6   :  { %v6867_v14 = vmul.f32 -1.442695, %v4308_v43  ;;  %v7690_v43 = vld [vmem:[%s10731_s6 + $0x10] sm:$0xff]   ;;  %v4460_v8 = vrot.slane %v10257_v17, 6  ;;  %v7695_v17 = vld [vmem:[%s10731_s6 + $0x60] sm:$0xff]  }
 0x8d7   :  { %8178 = vpow2.f32 %v6866_v30 }
 0x8d8   :  { %8180 = vpow2.f32 %v6867_v14  ;;  %v7692_v14 = vld [vmem:[%s10731_s6 + $0x58] sm:$0xff]  }
 0x8d9   :  { %8182 = vtanh.f32 %v4310_v7 }
 0x8da   :  { %8184 = vpow2.f32 %v6868_v62  ;;  %v7691_v62 = vld [vmem:[%s10731_s6 + $0x98] sm:$0xff]  }
 0x8e1   :  { %v8179_v38 = vpop.eup %8178 }
 0x8e2   :  { %v4320_v50 = vadd.f32 1.0, %v8179_v38  ;;  %v8181_v20 = vpop.eup %8180  ;;  %v7693_v38 = vld [vmem:[%s10731_s6 + $0x18] sm:$0xff]  }
 0x8e3   :  { %v4321_v28 = vadd.f32 1.0, %v8181_v20  ;;  %v8183_v45 = vpop.eup %8182 }
 0x8e4   :  { %8186 = vrcp.f32 %v4320_v50  ;;  %v8185_v6 = vpop.eup %8184 }
 0x8e5   :  { %8188 = vrcp.f32 %v4321_v28  ;;  %v4322_v44 = vadd.f32 1.0, %v8185_v6 }
 0x8e7   :  { %8190 = vrcp.f32 %v4322_v44 }
 0x8ee   :  { %v8187_v40 = vpop.eup %8186 }
 0x8ef   :  { %v4334_v31 = vmul.f32 %v8187_v40, %v8183_v45  ;;  %v8189_v61 = vpop.eup %8188 }
 0x8f0   :  { %v4376_v54 = vpop.f32.mrb[100].mxu0  ;;  %v4417_v23 = vpop.f32.mrb[100].mxu1  ;;  %v4333_v26 = vmul.f32 %v8189_v61, %v4331_v47 }
 0x8f1   :  { %v4428_v19 = vrot.slane %v4376_v54, 2  ;;  %v4378_v11 = vpop.f32.mrb[101].mxu0  ;;  %v4419_v53 = vpop.f32.mrb[101].mxu1  ;;  %v4430_v22 = vrot.slane %v4417_v23, 2 }
 0x8f2   :  { %v4429_v36 = vrot.slane %v4378_v11, 2  ;;  %v4380_v63 = vpop.f32.mrb[102].mxu0  ;;  %v4421_v10 = vpop.f32.mrb[102].mxu1  ;;  %v4335_v9 = vadd.f32 %v4334_v31, %v4333_v26  ;;  %v4431_v52 = vrot.slane %v4419_v53, 2  ;;  %v7694_v53 = vld [vmem:[%s10731_s6 + $0xa0] sm:$0xff]  }
 0x8f3   :  { %v4436_v37 = vadd.f32 %v4428_v19, %v11352_v29  ;;  %v4381_v27 = vpop.f32.mrb[103].mxu0  ;;  %v4422_v59 = vpop.f32.mrb[103].mxu1  ;;  %v4438_v0 = vadd.f32 %v4430_v22, %v11288_v49  ;;  %v7684_v49 = vld [vmem:[%s10731_s6] sm:$0xff]   ;;  %v7702_v22 = vld [vmem:[%s10731_s6 + $0x30] sm:$0xff]  }
 0x8f4   :  { %v4437_v34 = vadd.f32 %v4429_v36, %v11287_v32  ;;  %8192 = vtanh.f32 %v4335_v9  ;;  %v8191_v18 = vpop.eup %8190  ;;  %v4439_v39 = vadd.f32 %v4431_v52, %v11289_v1  ;;  %v7696_v36 = vld [vmem:[%s10731_s6 + $0x20] sm:$0xff]   ;;  %v7697_v27 = vld [vmem:[%s10731_s6 + $0xa8] sm:$0xff]   ;;  %v7701_v59 = vld [vmem:[%s10731_s6 + $0x70] sm:$0xff]  }
 0x8f5   :  { %v6869_v3 = vmul.f32 -1.442695, %v4436_v37  ;;  %v6871_v4 = vmul.f32 -1.442695, %v4438_v0 }
 0x8f6   :  { %v6870_v16 = vmul.f32 -1.442695, %v4437_v34 }
 0x8f7   :  { %8194 = vpow2.f32 %v6869_v3 }
 0x8f8   :  { %8196 = vpow2.f32 %v6870_v16  ;;  %v7700_v16 = vld [vmem:[%s10731_s6 + $0xb0] sm:$0xff]  }
 0x8f9   :  { %8198 = vtanh.f32 %v4439_v39 }
 0x8fa   :  { %8200 = vpow2.f32 %v6871_v4 }
 0x8fe   :  { %v8193_v41 = vpop.eup %8192 }
 0x8ff   :  { %v4337_v29 = vmul.f32 %v8193_v41, %v8191_v18 }
 0x901   :  { %v8195_v60 = vpop.eup %8194  ;;  %v4596_v12 = vpack.c.bf16 %v4337_v29, %v4337_v29 }
 0x902   :  { %v4449_v33 = vadd.f32 1.0, %v8195_v60  ;;  %v8197_v32 = vpop.eup %8196 }
 0x903   :  { %v4450_v13 = vadd.f32 1.0, %v8197_v32  ;;  %v4647_v1 = vrot.slane %v4596_v12, 3  ;;  %v8199_v30 = vpop.eup %8198 }
 0x904   :  { %8202 = vrcp.f32 %v4449_v33  ;;  %v8201_v46 = vpop.eup %8200 }
 0x905   :  { %8204 = vrcp.f32 %v4450_v13  ;;  %4810 = vmatmul.mubr.bf16.vlgmr.msra.gmra.mrb[108].mxu0 %v4647_v1  ;;  %7221 = vmatmul.mubr.bf16.vlgmr.msra.gmra.mrb[108].mxu1 %v4647_v1  ;;  %v4451_v20 = vadd.f32 1.0, %v8201_v46  ;;  %v11421_v46 = vld [vmem:[#allocation16_spill] sm:$0xff] }
 0x906   :  { %7225 = vmatpush3.bf16.msra.mxu1 %v7682_v5  ;;  %7063 = vmatpush3.bf16.msra.mxu0 %v7684_v49 }
 0x907   :  { %7226 = vmatprep.subr.bf16.mxu1 %v8593_v15  ;;  %7064 = vmatprep.subr.bf16.mxu0 %v7686_v21  ;;  %8206 = vrcp.f32 %v4451_v20 }
 0x908   :  { %7240 = vmatprep.mubr.msk.bf16.mxu1 %vm8594_vm0, %v8593_v15 }
 0x90a   :  { %7227 = vmatpush3.bf16.msra.mxu1 %v7685_v35  ;;  %7065 = vmatpush3.bf16.msra.mxu0 %v7687_v48 }
 0x90b   :  { %7228 = vmatprep.subr.bf16.mxu1 %v8593_v15  ;;  %7066 = vmatprep.subr.bf16.mxu0 %v7689_v57 }
 0x90e   :  { %v8203_v58 = vpop.eup %8202  ;;  %7229 = vmatpush3.bf16.msra.mxu1 %v7688_v56  ;;  %7067 = vmatpush3.bf16.msra.mxu0 %v7690_v43  ;;  %v7703_v56 = vld [vmem:[%s10731_s6 + $0xb8] sm:$0xff]  }
 0x90f   :  { %v4463_v7 = vmul.f32 %v8203_v58, %v8199_v30  ;;  %v8205_v50 = vpop.eup %8204  ;;  %7230 = vmatprep.subr.bf16.mxu1 %v8593_v15  ;;  %7068 = vmatprep.subr.bf16.mxu0 %v7692_v14  ;;  %v7704_v43 = vld [vmem:[%s10731_s6 + $0x78] sm:$0xff]   ;;  %v7709_v30 = vld [vmem:[#allocation7 + $0xc4] ss:$12 sps:$4 sm:$0xff]   ;;  %v4629_v14 = vld [vmem:[%s10730_s5] sm:$0x7] }
 0x910   :  { %v4505_v28 = vpop.f32.mrb[104].mxu0  ;;  %v4546_v45 = vpop.f32.mrb[104].mxu1  ;;  %v4462_v6 = vmul.f32 %v8205_v50, %v4460_v8  ;;  %v4634_v58 = vrot.slane %v4629_v14, %v11421_v46  ;;  %v11422_v8 = vld [vmem:[#allocation17_spill] sm:$0xff] }
 0x911   :  { %v4557_v40 = vrot.slane %v4505_v28, 2  ;;  %v4507_v47 = vpop.f32.mrb[105].mxu0  ;;  %v4548_v31 = vpop.f32.mrb[105].mxu1  ;;  %v4559_v37 = vrot.slane %v4546_v45, 2 }
 0x912   :  { %v4558_v61 = vrot.slane %v4507_v47, 2  ;;  %v4509_v44 = vpop.f32.mrb[106].mxu0  ;;  %v4550_v54 = vpop.f32.mrb[106].mxu1  ;;  %v4464_v23 = vadd.f32 %v4463_v7, %v4462_v6  ;;  %7231 = vmatpush3.bf16.msra.mxu1 %v7691_v62  ;;  %7069 = vmatpush3.bf16.msra.mxu0 %v7693_v38  ;;  %v4560_v34 = vrot.slane %v4548_v31, 2  ;;  %v4642_v7 = vrot.slane %v4629_v14, %v11422_v8  ;;  %v11423_v62 = vld [vmem:[#allocation18_spill] sm:$0xff] }
 0x913   :  { %v4565_v26 = vadd.f32 %v4557_v40, %v11290_v42  ;;  %v4510_v19 = vpop.f32.mrb[107].mxu0  ;;  %v4551_v11 = vpop.f32.mrb[107].mxu1  ;;  %7232 = vmatprep.subr.bf16.mxu1 %v8593_v15  ;;  %7070 = vmatprep.subr.bf16.mxu0 %v7695_v17  ;;  %v7698_v42 = vld [vmem:[%s10731_s6 + $0x68] sm:$0xff]   ;;  %v4567_v3 = vadd.f32 %v4559_v37, %v11295_v2  ;;  %v4638_v38 = vrot.slane %v4629_v14, %v11423_v62 }
 0x914   :  { %v4566_v63 = vadd.f32 %v4558_v61, %v11291_v55  ;;  %8208 = vtanh.f32 %v4464_v23  ;;  %v7699_v55 = vld [vmem:[%s10731_s6 + $0x28] sm:$0xff]   ;;  %v8207_v52 = vpop.eup %8206  ;;  %v4568_v0 = vadd.f32 %v4560_v34, %v11298_v25  ;;  %v4589_v25 = vrot.slane %v10273_v24, 6  ;;  %v7705_v24 = vld [vmem:[%s10731_s6 + $0x38] sm:$0xff]  }
 0x915   :  { %v6872_v10 = vmul.f32 -1.442695, %v4565_v26  ;;  %v6874_v39 = vmul.f32 -1.442695, %v4567_v3  ;;  %v7706_v61 = vld [vmem:[#allocation7 + $0xc8] ss:$12 sps:$4 sm:$0xff]  }
 0x916   :  { %v6873_v9 = vmul.f32 -1.442695, %v4566_v63  ;;  %7233 = vmatpush3.bf16.msra.mxu1 %v7694_v53  ;;  %7071 = vmatpush3.bf16.msra.mxu0 %v7696_v36  ;;  %v7707_v19 = vld [vmem:[#allocation7 + $0xc0] ss:$12 sps:$4 sm:$0xff]   ;;  %v7713_v53 = vld [vmem:[#allocation7 + $0xdc] ss:$12 sps:$4 sm:$0xff]  }
 0x917   :  { %8210 = vpow2.f32 %v6872_v10  ;;  %7234 = vmatprep.subr.bf16.mxu1 %v8593_v15  ;;  %7072 = vmatprep.subr.bf16.mxu0 %v7698_v42  ;;  %v7710_v36 = vld [vmem:[#allocation7 + $0xe0] ss:$12 sps:$4 sm:$0xff]   ;;  %v7711_v63 = vld [vmem:[#allocation7 + $0xd8] ss:$12 sps:$4 sm:$0xff]   ;;  %v7722_v34 = vld [vmem:[#allocation7 + $0x128] ss:$12 sps:$4 sm:$0xff]  }
 0x918   :  { %8212 = vpow2.f32 %v6873_v9  ;;  %v7717_v42 = vld [vmem:[#allocation7 + $0xf4] ss:$12 sps:$4 sm:$0xff]   ;;  %v7714_v10 = vld [vmem:[#allocation7 + $0xf8] ss:$12 sps:$4 sm:$0xff]   ;;  %v7715_v9 = vld [vmem:[#allocation7 + $0xf0] ss:$12 sps:$4 sm:$0xff]  }
 0x919   :  { %8214 = vtanh.f32 %v4568_v0  ;;  %v7721_v37 = vld [vmem:[#allocation7 + $0x10c] ss:$12 sps:$4 sm:$0xff]   ;;  %v7733_v0 = vld [vmem:[#allocation7 + $0x154] ss:$12 sps:$4 sm:$0xff]  }
 0x91a   :  { %7235 = vmatpush3.bf16.msra.mxu1 %v7697_v27  ;;  %7073 = vmatpush3.bf16.msra.mxu0 %v7699_v55  ;;  %8216 = vpow2.f32 %v6874_v39  ;;  %v7718_v27 = vld [vmem:[#allocation7 + $0x110] ss:$12 sps:$4 sm:$0xff]   ;;  %v7719_v55 = vld [vmem:[#allocation7 + $0x108] ss:$12 sps:$4 sm:$0xff]   ;;  %v7723_v3 = vld [vmem:[#allocation7 + $0x120] ss:$12 sps:$4 sm:$0xff]  }
 0x91b   :  { %7236 = vmatprep.subr.bf16.mxu1 %v8593_v15  ;;  %7074 = vmatprep.subr.bf16.mxu0 %v7701_v59  ;;  %v7725_v59 = vld [vmem:[#allocation7 + $0x124] ss:$12 sps:$4 sm:$0xff]   ;;  %v7753_v14 = vld [vmem:[%s10731_s6 + $0xa8] sm:$0xff]  }
 0x91c   :  { %v7731_v39 = vld [vmem:[#allocation7 + $0x150] ss:$12 sps:$4 sm:$0xff]  }
 0x91e   :  { %v8209_v18 = vpop.eup %8208  ;;  %7237 = vmatpush3.bf16.msra.mxu1 %v7700_v16  ;;  %7075 = vmatpush3.bf16.msra.mxu0 %v7702_v22  ;;  %v7729_v16 = vld [vmem:[#allocation7 + $0x13c] ss:$12 sps:$4 sm:$0xff]   ;;  %v7726_v22 = vld [vmem:[#allocation7 + $0x140] ss:$12 sps:$4 sm:$0xff]  }
 0x91f   :  { %7238 = vmatprep.subr.bf16.mxu1 %v8593_v15  ;;  %v10392_v2 = vmul.f32 %v8209_v18, %v8207_v52  ;;  %7076 = vmatprep.subr.bf16.mxu0 %v7704_v43  ;;  %v7727_v52 = vld [vmem:[#allocation7 + $0x138] ss:$12 sps:$4 sm:$0xff]  }
 0x920   :  { %v7730_v18 = vld [vmem:[#allocation7 + $0x158] ss:$12 sps:$4 sm:$0xff]  }
 0x921   :  { %v8211_v41 = vpop.eup %8210  ;;  %v7750_v43 = vld [vmem:[%s10731_s6 + $0xa0] sm:$0xff]  }
 0x922   :  { %v4578_v4 = vadd.f32 1.0, %v8211_v41  ;;  %v8213_v29 = vpop.eup %8212  ;;  %7239 = vmatpush3.bf16.msra.mxu1 %v7703_v56  ;;  %7077 = vmatpush3.bf16.msra.mxu0 %v7705_v24  ;;  %v7737_v41 = vld [vmem:[#allocation7 + $0x16c] ss:$12 sps:$4 sm:$0xff]   ;;  %v7751_v24 = vld [vmem:[%s10731_s6 + $0x60] sm:$0xff]  }
 0x923   :  { %v4579_v60 = vadd.f32 1.0, %v8213_v29  ;;  %v8215_v33 = vpop.eup %8214  ;;  %7244 = vmatprep.subr.bf16.mxu1 %v8593_v15  ;;  %5332 = vmatprep.subr.bf16.mxu0 %v7709_v30  ;;  %v5149_v29 = vpack.c.bf16 %v10392_v2, %v10392_v2  ;;  %v7739_v2 = vld [vmem:[%s10731_s6 + $0x40] sm:$0xff]   ;;  %v7749_v56 = vld [vmem:[%s10731_s6 + $0x18] sm:$0xff]  }
 0x924   :  { %8218 = vrcp.f32 %v4578_v4  ;;  %v8217_v12 = vpop.eup %8216  ;;  %v7734_v4 = vld [vmem:[#allocation7 + $0x170] ss:$12 sps:$4 sm:$0xff]   ;;  %v7752_v30 = vld [vmem:[%s10731_s6 + $0x20] sm:$0xff]  }
 0x925   :  { %8220 = vrcp.f32 %v4579_v60  ;;  %v4580_v13 = vadd.f32 1.0, %v8217_v12  ;;  %v7735_v60 = vld [vmem:[#allocation7 + $0x168] ss:$12 sps:$4 sm:$0xff]   ;;  %v7738_v12 = vld [vmem:[%s10731_s6 + $0x80] sm:$0xff]  }
 0x927   :  { %8222 = vrcp.f32 %v4580_v13  ;;  %v7744_v13 = vld [vmem:[%s10731_s6 + $0x90] sm:$0xff]  }
 0x92e   :  { %v8219_v32 = vpop.eup %8218 }
 0x92f   :  { %v4592_v5 = vmul.f32 %v8219_v32, %v8215_v33  ;;  %v8221_v49 = vpop.eup %8220  ;;  %v5202_v33 = vrot.slane %v5149_v29, 3  ;;  %v7740_v32 = vld [vmem:[%s10731_s6] sm:$0xff]  }
 0x930   :  { %v4591_v1 = vmul.f32 %v8221_v49, %v4589_v25  ;;  %v7741_v25 = vld [vmem:[%s10731_s6 + $0x88] sm:$0xff]  }
 0x931   :  { %v8223_v35 = vpop.eup %8222  ;;  %v7743_v49 = vld [vmem:[%s10731_s6 + $0x8] sm:$0xff]  }
 0x932   :  { %v4593_v21 = vadd.f32 %v4592_v5, %v4591_v1  ;;  %v7742_v5 = vld [vmem:[%s10731_s6 + $0x48] sm:$0xff]   ;;  %v7745_v1 = vld [vmem:[%s10731_s6 + $0x50] sm:$0xff]  }
 0x933   :  { %v7763_v29 = vld [vmem:[#allocation7 + $0x180] ss:$12 sps:$4 sm:$0xff]  }
 0x934   :  { %8224 = vtanh.f32 %v4593_v21  ;;  %v7746_v21 = vld [vmem:[%s10731_s6 + $0x10] sm:$0xff]  }
 0x93e   :  { %v8225_v48 = vpop.eup %8224 }
 0x93f   :  { %v10395_v57 = vmul.f32 %v8225_v48, %v8223_v35  ;;  %v7747_v35 = vld [vmem:[%s10731_s6 + $0x98] sm:$0xff]  }
 0x940   :  { %v7748_v48 = vld [vmem:[%s10731_s6 + $0x58] sm:$0xff]  }
 0x9d8   :  { %v4811_v50 = vpop.f32.mrb[108].mxu0  ;;  %v4852_v20 = vpop.f32.mrb[108].mxu1 }
 0x9d9   :  { %v4812_v28 = vadd.f32 %v4811_v50, %v4634_v58  ;;  %v4853_v45 = vadd.f32 %v4852_v20, %v4642_v7  ;;  %v4813_v17 = vpop.f32.mrb[109].mxu0  ;;  %v7222_v6 = vpop.f32.mrb[109].mxu1  ;;  %v7754_v58 = vld [vmem:[%s10731_s6 + $0x68] sm:$0xff]   ;;  %v7757_v50 = vld [vmem:[%s10731_s6 + $0x70] sm:$0xff]  }
 0x9da   :  { %v4814_v40 = vadd.f32 %v4813_v17, %v4638_v38  ;;  %v4815_v47 = vpop.f32.mrb[110].mxu0  ;;  %v4855_v31 = vpop.f32.mrb[110].mxu1  ;;  %v7755_v7 = vld [vmem:[%s10731_s6 + $0x28] sm:$0xff]   ;;  %v7756_v38 = vld [vmem:[%s10731_s6 + $0xb0] sm:$0xff]   ;;  %v7761_v17 = vld [vmem:[%s10731_s6 + $0x38] sm:$0xff]  }
 0x9db   :  { %v4860_v44 = vpack.c.bf16 %v4853_v45, %v4853_v45  ;;  %v4816_v54 = vpop.f32.mrb[111].mxu0  ;;  %v7223_v23 = vpop.f32.mrb[111].mxu1  ;;  %v4858_v11 = vpack.c.bf16 %v4812_v28, %v4812_v28  ;;  %v7758_v20 = vld [vmem:[%s10731_s6 + $0x30] sm:$0xff]   ;;  %v7759_v28 = vld [vmem:[%s10731_s6 + $0xb8] sm:$0xff]  }
 0x9dc   :  { %v4859_v26 = vpack.c.bf16 %v4814_v40, %v4814_v40  ;;  %v7760_v45 = vld [vmem:[%s10731_s6 + $0x78] sm:$0xff]   ;;  %v7765_v6 = vld [vmem:[#allocation7 + $0x184] ss:$12 sps:$4 sm:$0xff]  }
 0x9dd   :  { %7241 = vmatmul.mubr.bf16.vlgmr.msra.gmra.mrb[112].mxu1 %v4860_v44  ;;  %v10511_v44 = vld [vmem:[%s10732_s7] ss:$0 sm:$0xff] }
 0x9de   :  { %7245 = vmatpush3.bf16.msra.mxu1 %v7706_v61  ;;  %5092 = vmatprep.mubr.bf16.mxu0 %v4859_v26 }
 0x9df   :  { %5093 = vmatmul.mubr.bf16.vlgmr.msra.gmra.mrb[112].mxu0 %v4858_v11  ;;  %7246 = vmatprep.subr.bf16.mxu1 %v8593_v15 }
 0x9e0   :  { %5333 = vmatpush1.bf16.msra.mxu0 %v7707_v19  ;;  %7260 = vmatprep.mubr.msk.bf16.mxu1 %vm8594_vm0, %v8593_v15 }
 0x9e1   :  { %5334 = vmatprep.subr.bf16.mxu0 %v7713_v53  ;;  %5364 = vmatprep.mubr.bf16.mxu0 %v11046_v51 }
 0x9e2   :  { %7247 = vmatpush3.bf16.msra.mxu1 %v7710_v36 }
 0x9e3   :  { %7248 = vmatprep.subr.bf16.mxu1 %v8593_v15 }
 0x9e4   :  { %5335 = vmatpush1.bf16.msra.mxu0 %v7711_v63  ;;  %v6924_v63 = vld [vmem:[%s10730_s5 + $0x3] sm:$0x7] }
 0x9e5   :  { %5336 = vmatprep.subr.bf16.mxu0 %v7717_v42  ;;  %v5197_v42 = vrot.slane %v6924_v63, %v11422_v8 }
 0x9e6   :  { %7249 = vmatpush3.bf16.msra.mxu1 %v7714_v10  ;;  %v5189_v10 = vrot.slane %v6924_v63, %v11421_v46 }
 0x9e7   :  { %7250 = vmatprep.subr.bf16.mxu1 %v8593_v15 }
 0x9e8   :  { %5337 = vmatpush1.bf16.msra.mxu0 %v7715_v9 }
 0x9e9   :  { %5338 = vmatprep.subr.bf16.mxu0 %v7721_v37  ;;  %v5193_v37 = vrot.slane %v6924_v63, %v11423_v62  ;;  %v7809_v63 = vld [vmem:[%s10731_s6 + $0x20] sm:$0xff]  }
 0x9ea   :  { %7251 = vmatpush3.bf16.msra.mxu1 %v7718_v27 }
 0x9eb   :  { %7252 = vmatprep.subr.bf16.mxu1 %v8593_v15 }
 0x9ec   :  { %5339 = vmatpush1.bf16.msra.mxu0 %v7719_v55 }
 0x9ed   :  { %5340 = vmatprep.subr.bf16.mxu0 %v7725_v59 }
 0x9ee   :  { %7253 = vmatpush3.bf16.msra.mxu1 %v7722_v34 }
 0x9ef   :  { %7254 = vmatprep.subr.bf16.mxu1 %v8593_v15 }
 0x9f0   :  { %5341 = vmatpush1.bf16.msra.mxu0 %v7723_v3  ;;  %v7762_v3 = vld [vmem:[#allocation7 + $0x188] ss:$12 sps:$4 sm:$0xff]  }
 0x9f1   :  { %5342 = vmatprep.subr.bf16.mxu0 %v7729_v16 }
 0x9f2   :  { %7255 = vmatpush3.bf16.msra.mxu1 %v7726_v22 }
 0x9f3   :  { %7256 = vmatprep.subr.bf16.mxu1 %v8593_v15 }
 0x9f4   :  { %5343 = vmatpush1.bf16.msra.mxu0 %v7727_v52 }
 0x9f5   :  { %5344 = vmatprep.subr.bf16.mxu0 %v7733_v0 }
 0x9f6   :  { %7257 = vmatpush3.bf16.msra.mxu1 %v7730_v18 }
 0x9f7   :  { %7258 = vmatprep.subr.bf16.mxu1 %v8593_v15 }
 0x9f8   :  { %5345 = vmatpush1.bf16.msra.mxu0 %v7731_v39 }
 0x9f9   :  { %5346 = vmatprep.subr.bf16.mxu0 %v7737_v41 }
 0x9fa   :  { %7259 = vmatpush3.bf16.msra.mxu1 %v7734_v4 }
 0x9fb   :  { %7264 = vmatprep.subr.bf16.mxu1 %v8593_v15 }
 0x9fc   :  { %5347 = vmatpush1.bf16.msra.mxu0 %v7735_v60  ;;  %v7766_v60 = vld [vmem:[#allocation7 + $0x1a0] ss:$12 sps:$4 sm:$0xff]  }
 0x9fd   :  { %7261 = vmatmul.mubr.bf16.vlgmr.msra.gmra.mrb[116].mxu1 %v5202_v33  ;;  %7102 = vmatprep.subr.bf16.mxu0 %v7739_v2  ;;  %v7767_v2 = vld [vmem:[#allocation7 + $0x198] ss:$12 sps:$4 sm:$0xff]  }
 0x9fe   :  { %7280 = vmatprep.mubr.msk.bf16.mxu1 %vm8594_vm0, %v8593_v15  ;;  %7265 = vmatpush3.bf16.msra.mxu1 %v7738_v12  ;;  %v7769_v12 = vld [vmem:[#allocation7 + $0x19c] ss:$12 sps:$4 sm:$0xff]  }
 0x9ff   :  { %5365 = vmatmul.mubr.bf16.vlgmr.msra.gmra.mrb[116].mxu0 %v5202_v33  ;;  %7266 = vmatprep.subr.bf16.mxu1 %v8593_v15 }
 0xa00   :  { %7103 = vmatpush3.bf16.msra.mxu0 %v7740_v32  ;;  %v7770_v32 = vld [vmem:[#allocation7 + $0x1b8] ss:$12 sps:$4 sm:$0xff]  }
 0xa01   :  { %7104 = vmatprep.subr.bf16.mxu0 %v7742_v5  ;;  %v7771_v5 = vld [vmem:[#allocation7 + $0x1b0] ss:$12 sps:$4 sm:$0xff]  }
 0xa02   :  { %7267 = vmatpush3.bf16.msra.mxu1 %v7741_v25  ;;  %v7773_v25 = vld [vmem:[#allocation7 + $0x1b4] ss:$12 sps:$4 sm:$0xff]  }
 0xa03   :  { %7268 = vmatprep.subr.bf16.mxu1 %v8593_v15 }
 0xa04   :  { %7105 = vmatpush3.bf16.msra.mxu0 %v7743_v49  ;;  %v7774_v49 = vld [vmem:[#allocation7 + $0x1d0] ss:$12 sps:$4 sm:$0xff]  }
 0xa05   :  { %7106 = vmatprep.subr.bf16.mxu0 %v7745_v1  ;;  %v7775_v1 = vld [vmem:[#allocation7 + $0x1c8] ss:$12 sps:$4 sm:$0xff]  }
 0xa06   :  { %7269 = vmatpush3.bf16.msra.mxu1 %v7744_v13  ;;  %v7777_v13 = vld [vmem:[#allocation7 + $0x1cc] ss:$12 sps:$4 sm:$0xff]  }
 0xa07   :  { %7270 = vmatprep.subr.bf16.mxu1 %v8593_v15 }
 0xa08   :  { %7107 = vmatpush3.bf16.msra.mxu0 %v7746_v21  ;;  %v7778_v21 = vld [vmem:[#allocation7 + $0x1e8] ss:$12 sps:$4 sm:$0xff]  }
 0xa09   :  { %7108 = vmatprep.subr.bf16.mxu0 %v7748_v48  ;;  %v7779_v48 = vld [vmem:[#allocation7 + $0x1e0] ss:$12 sps:$4 sm:$0xff]  }
 0xa0a   :  { %7271 = vmatpush3.bf16.msra.mxu1 %v7747_v35  ;;  %v7781_v35 = vld [vmem:[#allocation7 + $0x1e4] ss:$12 sps:$4 sm:$0xff]  }
 0xa0b   :  { %7272 = vmatprep.subr.bf16.mxu1 %v8593_v15 }
 0xa0c   :  { %7109 = vmatpush3.bf16.msra.mxu0 %v7749_v56  ;;  %v7785_v56 = vld [vmem:[#allocation7 + $0x1fc] ss:$12 sps:$4 sm:$0xff]  }
 0xa0d   :  { %7110 = vmatprep.subr.bf16.mxu0 %v7751_v24  ;;  %v7786_v24 = vld [vmem:[#allocation7 + $0x218] ss:$12 sps:$4 sm:$0xff]  }
 0xa0e   :  { %7273 = vmatpush3.bf16.msra.mxu1 %v7750_v43  ;;  %v7783_v43 = vld [vmem:[#allocation7 + $0x1f8] ss:$12 sps:$4 sm:$0xff]  }
 0xa0f   :  { %7274 = vmatprep.subr.bf16.mxu1 %v8593_v15 }
 0xa10   :  { %7111 = vmatpush3.bf16.msra.mxu0 %v7752_v30  ;;  %v7789_v30 = vld [vmem:[#allocation7 + $0x214] ss:$12 sps:$4 sm:$0xff]  }
 0xa11   :  { %7112 = vmatprep.subr.bf16.mxu0 %v7754_v58  ;;  %v7790_v58 = vld [vmem:[#allocation7 + $0x230] ss:$12 sps:$4 sm:$0xff]  }
 0xa12   :  { %7275 = vmatpush3.bf16.msra.mxu1 %v7753_v14  ;;  %v7787_v14 = vld [vmem:[#allocation7 + $0x210] ss:$12 sps:$4 sm:$0xff]  }
 0xa13   :  { %7276 = vmatprep.subr.bf16.mxu1 %v8593_v15 }
 0xa14   :  { %7113 = vmatpush3.bf16.msra.mxu0 %v7755_v7  ;;  %v7793_v7 = vld [vmem:[#allocation7 + $0x22c] ss:$12 sps:$4 sm:$0xff]  }
 0xa15   :  { %7114 = vmatprep.subr.bf16.mxu0 %v7757_v50  ;;  %v7791_v50 = vld [vmem:[#allocation7 + $0x228] ss:$12 sps:$4 sm:$0xff]  }
 0xa16   :  { %7277 = vmatpush3.bf16.msra.mxu1 %v7756_v38  ;;  %v5704_v38 = vpack.c.bf16 %v10395_v57, %v10395_v57  ;;  %v7795_v57 = vld [vmem:[%s10731_s6 + $0x40] sm:$0xff]  }
 0xa17   :  { %7278 = vmatprep.subr.bf16.mxu1 %v8593_v15 }
 0xa18   :  { %7115 = vmatpush3.bf16.msra.mxu0 %v7758_v20  ;;  %v5757_v20 = vrot.slane %v5704_v38, 3 }
 0xa19   :  { %7116 = vmatprep.subr.bf16.mxu0 %v7760_v45  ;;  %v7796_v45 = vld [vmem:[%s10731_s6 + $0x88] sm:$0xff]  }
 0xa1a   :  { %7279 = vmatpush3.bf16.msra.mxu1 %v7759_v28  ;;  %v7794_v28 = vld [vmem:[%s10731_s6 + $0x80] sm:$0xff]  }
 0xa1b   :  { %7284 = vmatprep.subr.bf16.mxu1 %v8593_v15 }
 0xa1c   :  { %7117 = vmatpush3.bf16.msra.mxu0 %v7761_v17  ;;  %v7797_v17 = vld [vmem:[%s10731_s6] sm:$0xff]  }
 0xa1d   :  { %5887 = vmatprep.subr.bf16.mxu0 %v7765_v6  ;;  %v7798_v6 = vld [vmem:[%s10731_s6 + $0x48] sm:$0xff]  }
 0xab0   :  { %v5134_v40 = vpop.f32.mrb[112].mxu1 }
 0xab1   :  { %v7242_v47 = vpop.f32.mrb[113].mxu1 }
 0xab2   :  { %v7078_v31 = vpop.f32.mrb[112].mxu0  ;;  %v5137_v61 = vpop.f32.mrb[114].mxu1  ;;  %v7800_v47 = vld [vmem:[%s10731_s6 + $0x8] sm:$0xff]  }
 0xab3   :  { %v7079_v54 = vpop.f32.mrb[113].mxu0  ;;  %v7243_v23 = vpop.f32.mrb[115].mxu1  ;;  %v7802_v61 = vld [vmem:[%s10731_s6 + $0x98] sm:$0xff]  }
 0xab4   :  { %v7080_v26 = vadd.f32 %v7079_v54, %v7078_v31  ;;  %v7081_v19 = vpop.f32.mrb[114].mxu0  ;;  %v7801_v31 = vld [vmem:[%s10731_s6 + $0x50] sm:$0xff]   ;;  %v7804_v23 = vld [vmem:[%s10731_s6 + $0x58] sm:$0xff]  }
 0xab5   :  { %v7082_v11 = vpop.f32.mrb[115].mxu0  ;;  %v7803_v54 = vld [vmem:[%s10731_s6 + $0x10] sm:$0xff]   ;;  %v7806_v19 = vld [vmem:[%s10731_s6 + $0x18] sm:$0xff]  }
 0xab6   :  { %v5095_v53 = vadd.f32 %v7080_v26, %v10511_v44  ;;  %v7805_v26 = vld [vmem:[%s10731_s6 + $0xa0] sm:$0xff]  }
 0xab7   :  { %v7807_v11 = vld [vmem:[%s10731_s6 + $0x60] sm:$0xff]  }
 0xab8   :  { %v10514_v36 = vadd.f32 %v5134_v40, %v5095_v53  ;;  %v7799_v40 = vld [vmem:[%s10731_s6 + $0x90] sm:$0xff]   ;;  %v7808_v53 = vld [vmem:[%s10731_s6 + $0xa8] sm:$0xff]  }
 0xad0   :  { %v5407_v9 = vpop.f32.mrb[116].mxu1 }
 0xad1   :  { %v5408_v27 = vadd.f32 %v5407_v9, %v5197_v42  ;;  %v7262_v55 = vpop.f32.mrb[117].mxu1  ;;  %v7810_v42 = vld [vmem:[%s10731_s6 + $0x68] sm:$0xff]  }
 0xad2   :  { %v5366_v59 = vpop.f32.mrb[116].mxu0  ;;  %v5410_v34 = vpop.f32.mrb[118].mxu1  ;;  %v7812_v9 = vld [vmem:[%s10731_s6 + $0x28] sm:$0xff]   ;;  %v7815_v55 = vld [vmem:[%s10731_s6 + $0x30] sm:$0xff]  }
 0xad3   :  { %v5415_v16 = vpack.c.bf16 %v5408_v27, %v5408_v27  ;;  %v5367_v22 = vadd.f32 %v5366_v59, %v5189_v10  ;;  %v5368_v52 = vpop.f32.mrb[117].mxu0  ;;  %v7263_v0 = vpop.f32.mrb[119].mxu1  ;;  %v7811_v10 = vld [vmem:[%s10731_s6 + $0xb0] sm:$0xff]   ;;  %v7814_v27 = vld [vmem:[%s10731_s6 + $0xb8] sm:$0xff]  }
 0xad4   :  { %v5369_v18 = vadd.f32 %v5368_v52, %v5193_v37  ;;  %v5370_v39 = vpop.f32.mrb[118].mxu0  ;;  %v7813_v37 = vld [vmem:[%s10731_s6 + $0x70] sm:$0xff]   ;;  %v7816_v59 = vld [vmem:[%s10731_s6 + $0x78] sm:$0xff]  }
 0xad5   :  { %v5371_v41 = vpop.f32.mrb[119].mxu0  ;;  %7281 = vmatmul.mubr.bf16.vlgmr.msra.gmra.mrb[120].mxu1 %v5415_v16  ;;  %v5413_v33 = vpack.c.bf16 %v5367_v22, %v5367_v22  ;;  %v7817_v34 = vld [vmem:[%s10731_s6 + $0x38] sm:$0xff]  }
 0xad6   :  { %v5414_v4 = vpack.c.bf16 %v5369_v18, %v5369_v18  ;;  %7285 = vmatpush3.bf16.msra.mxu1 %v7762_v3  ;;  %7300 = vmatprep.mubr.msk.bf16.mxu1 %vm8594_vm0, %v8593_v15  ;;  %v7818_v3 = vld [vmem:[%s10734_s9 + $0x40] sm:$0xff]  }
 0xad7   :  { %7286 = vmatprep.subr.bf16.mxu1 %v8593_v15 }
 0xad8   :  { %5647 = vmatprep.mubr.bf16.mxu0 %v5414_v4 }
 0xad9   :  { %5648 = vmatmul.mubr.bf16.vlgmr.msra.gmra.mrb[120].mxu0 %v5413_v33 }
 0xada   :  { %5888 = vmatpush1.bf16.msra.mxu0 %v7763_v29  ;;  %7287 = vmatpush3.bf16.msra.mxu1 %v7766_v60 }
 0xadb   :  { %5889 = vmatprep.subr.bf16.mxu0 %v7769_v12  ;;  %7288 = vmatprep.subr.bf16.mxu1 %v8593_v15 }
 0xadc   :  { %5919 = vmatprep.mubr.bf16.mxu0 %v11046_v51  ;;  %v7782_v51 = vld [vmem:[#allocation7 + $0x200] ss:$12 sps:$4 sm:$0xff]  }
 0xade   :  { %5890 = vmatpush1.bf16.msra.mxu0 %v7767_v2  ;;  %7289 = vmatpush3.bf16.msra.mxu1 %v7770_v32  ;;  %v6975_v32 = vld [vmem:[%s10730_s5 + $0x6] sm:$0x7] }
 0xadf   :  { %5891 = vmatprep.subr.bf16.mxu0 %v7773_v25  ;;  %7290 = vmatprep.subr.bf16.mxu1 %v8593_v15  ;;  %v8595_v25 = vmov 1966171168  }
 0xae2   :  { %5892 = vmatpush1.bf16.msra.mxu0 %v7771_v5  ;;  %7291 = vmatpush3.bf16.msra.mxu1 %v7774_v49  ;;  %v6309_v5 = vunpack.c.l.s4 %v8595_v25  ;;  %v5752_v49 = vrot.slane %v6975_v32, %v11422_v8 }
 0xae3   :  { %5893 = vmatprep.subr.bf16.mxu0 %v7777_v13  ;;  %7292 = vmatprep.subr.bf16.mxu1 %v8593_v15 }
 0xae6   :  { %5894 = vmatpush1.bf16.msra.mxu0 %v7775_v1  ;;  %7293 = vmatpush3.bf16.msra.mxu1 %v7778_v21  ;;  %v6310_v1 = vunpack.c.0.s8 %v6309_v5 }
 0xae7   :  { %5895 = vmatprep.subr.bf16.mxu0 %v7781_v35  ;;  %7294 = vmatprep.subr.bf16.mxu1 %v8593_v15 }
 0xaea   :  { %5896 = vmatpush1.bf16.msra.mxu0 %v7779_v48  ;;  %7295 = vmatpush3.bf16.msra.mxu1 %v7782_v51  ;;  %v5744_v48 = vrot.slane %v6975_v32, %v11421_v46  ;;  %v7027_v51 = vld.sshfl [vmem:[%s10733_s8] sm:$0x11 pattern:$0x75316420] }
 0xaeb   :  { %5897 = vmatprep.subr.bf16.mxu0 %v7785_v56  ;;  %7296 = vmatprep.subr.bf16.mxu1 %v8593_v15 }
 0xaee   :  { %5898 = vmatpush1.bf16.msra.mxu0 %v7783_v43  ;;  %7297 = vmatpush3.bf16.msra.mxu1 %v7786_v24  ;;  %v5748_v43 = vrot.slane %v6975_v32, %v11423_v62  ;;  %v7819_v62 = vld [vmem:[%s10734_s9] sm:$0xff]  }
 0xaef   :  { %5899 = vmatprep.subr.bf16.mxu0 %v7789_v30  ;;  %7298 = vmatprep.subr.bf16.mxu1 %v8593_v15 }
 0xaf2   :  { %5900 = vmatpush1.bf16.msra.mxu0 %v7787_v14  ;;  %7299 = vmatpush3.bf16.msra.mxu1 %v7790_v58  ;;  %v6307_v58 = vcombine.high %v7027_v51, %v7027_v51 }
 0xaf3   :  { %5901 = vmatprep.subr.bf16.mxu0 %v7793_v7  ;;  %7304 = vmatprep.subr.bf16.mxu1 %v8593_v15  ;;  %v11424_v7 = vld [vmem:[#allocation15_spill] sm:$0xff] }
 0xaf4   :  { %v6313_v38 = vsub.s32 %v6310_v1, %v11424_v7 }
 0xaf5   :  { %7301 = vmatmul.mubr.bf16.vlgmr.msra.gmra.mrb[124].mxu1 %v5757_v20 }
 0xaf6   :  { %5902 = vmatpush1.bf16.msra.mxu0 %v7791_v50  ;;  %7320 = vmatprep.mubr.msk.bf16.mxu1 %vm8594_vm0, %v8593_v15 }
 0xaf7   :  { %7305 = vmatpush3.bf16.msra.mxu1 %v7794_v28  ;;  %7142 = vmatprep.subr.bf16.mxu0 %v7795_v57 }
 0xaf8   :  { %7306 = vmatprep.subr.bf16.mxu1 %v8593_v15 }
 0xaf9   :  { %5920 = vmatmul.mubr.bf16.vlgmr.msra.gmra.mrb[124].mxu0 %v5757_v20 }
 0xafa   :  { %7143 = vmatpush3.bf16.msra.mxu0 %v7797_v17 }
 0xafb   :  { %7307 = vmatpush3.bf16.msra.mxu1 %v7796_v45  ;;  %7144 = vmatprep.subr.bf16.mxu0 %v7798_v6  ;;  %v6321_v45 = vrot.slane %v6307_v58, %v6313_v38  ;;  %v7820_v6 = vld [vmem:[%s10734_s9 + $0x48] sm:$0xff]  }
 0xafc   :  { %7308 = vmatprep.subr.bf16.mxu1 %v8593_v15 }
 0xafe   :  { %7145 = vmatpush3.bf16.msra.mxu0 %v7800_v47  ;;  %v7822_v47 = vld [vmem:[%s10734_s9 + $0x50] sm:$0xff]  }
 0xaff   :  { %7309 = vmatpush3.bf16.msra.mxu1 %v7799_v40  ;;  %7146 = vmatprep.subr.bf16.mxu0 %v7801_v31  ;;  %v7821_v40 = vld [vmem:[%s10734_s9 + $0x8] sm:$0xff]   ;;  %v7823_v31 = vld [vmem:[%s10734_s9 + $0x10] sm:$0xff]  }
 0xb00   :  { %7310 = vmatprep.subr.bf16.mxu1 %v8593_v15 }
 0xb02   :  { %7147 = vmatpush3.bf16.msra.mxu0 %v7803_v54  ;;  %v7825_v54 = vld [vmem:[%s10734_s9 + $0x18] sm:$0xff]  }
 0xb03   :  { %7311 = vmatpush3.bf16.msra.mxu1 %v7802_v61  ;;  %7148 = vmatprep.subr.bf16.mxu0 %v7804_v23  ;;  %v7824_v61 = vld [vmem:[%s10734_s9 + $0x58] sm:$0xff]   ;;  %v7826_v23 = vld [vmem:[%s10734_s9 + $0x60] sm:$0xff]  }
 0xb04   :  { %7312 = vmatprep.subr.bf16.mxu1 %v8593_v15 }
 0xb06   :  { %7149 = vmatpush3.bf16.msra.mxu0 %v7806_v19  ;;  %v7828_v19 = vld [vmem:[%s10734_s9 + $0x68] sm:$0xff]  }
 0xb07   :  { %7313 = vmatpush3.bf16.msra.mxu1 %v7805_v26  ;;  %7150 = vmatprep.subr.bf16.mxu0 %v7807_v11  ;;  %v7827_v26 = vld [vmem:[%s10734_s9 + $0x20] sm:$0xff]   ;;  %v7829_v11 = vld [vmem:[%s10734_s9 + $0x28] sm:$0xff]  }
 0xb08   :  { %7314 = vmatprep.subr.bf16.mxu1 %v8593_v15 }
 0xb0a   :  { %7151 = vmatpush3.bf16.msra.mxu0 %v7809_v63  ;;  %v7831_v63 = vld [vmem:[%s10734_s9 + $0x30] sm:$0xff]  }
 0xb0b   :  { %7315 = vmatpush3.bf16.msra.mxu1 %v7808_v53  ;;  %7152 = vmatprep.subr.bf16.mxu0 %v7810_v42  ;;  %v7830_v53 = vld [vmem:[%s10734_s9 + $0x70] sm:$0xff]   ;;  %v7832_v42 = vld [vmem:[%s10734_s9 + $0x78] sm:$0xff]  }
 0xb0c   :  { %7316 = vmatprep.subr.bf16.mxu1 %v8593_v15 }
 0xb0e   :  { %7153 = vmatpush3.bf16.msra.mxu0 %v7812_v9  ;;  %v6314_v9 = vrot.slane %v7027_v51, %v6313_v38  ;;  %v7044_v38 = vld [vmem:[%s10737_s12] ss:$0 sm:$0xff] }
 0xb0f   :  { %7317 = vmatpush3.bf16.msra.mxu1 %v7811_v10  ;;  %7154 = vmatprep.subr.bf16.mxu0 %v7813_v37  ;;  %v7833_v10 = vld [vmem:[%s10734_s9 + $0x38] sm:$0xff]   ;;  %v7834_v37 = vld [vmem:[#allocation8] sm:$0xff]  }
 0xb10   :  { %7318 = vmatprep.subr.bf16.mxu1 %v8593_v15 }
 0xb12   :  { %7155 = vmatpush3.bf16.msra.mxu0 %v7815_v55  ;;  %v7836_v55 = vld [vmem:[#allocation8 + $0x10] sm:$0xff]  }
 0xb13   :  { %7319 = vmatpush3.bf16.msra.mxu1 %v7814_v27  ;;  %7156 = vmatprep.subr.bf16.mxu0 %v7816_v59  ;;  %v7835_v27 = vld [vmem:[#allocation8 + $0x8] sm:$0xff]   ;;  %v7837_v59 = vld [vmem:[#allocation8 + $0x18] sm:$0xff]  }
 0xb14   :  { %7324 = vmatprep.subr.bf16.mxu1 %v8593_v15 }
 0xb16   :  { %7157 = vmatpush3.bf16.msra.mxu0 %v7817_v34  ;;  %v7838_v34 = vld [vmem:[#allocation8 + $0x20] sm:$0xff]  }
 0xb17   :  { %7173 = vmatprep.subr.bf16.mxu0 %v7818_v3  ;;  %v7839_v3 = vld [vmem:[#allocation8 + $0x28] sm:$0xff]  }
 0xba8   :  { %v5689_v16 = vpop.f32.mrb[120].mxu1 }
 0xba9   :  { %v7282_v22 = vpop.f32.mrb[121].mxu1 }
 0xbaa   :  { %v5692_v52 = vpop.f32.mrb[122].mxu1 }
 0xbab   :  { %v7283_v0 = vpop.f32.mrb[123].mxu1  ;;  %v7840_v52 = vld [vmem:[#allocation8 + $0x30] sm:$0xff]  }
 0xbac   :  { %v7118_v18 = vpop.f32.mrb[120].mxu0  ;;  %v7841_v0 = vld [vmem:[#allocation8 + $0x38] sm:$0xff]  }
 0xbad   :  { %v7119_v39 = vpop.f32.mrb[121].mxu0 }
 0xbae   :  { %v7120_v41 = vadd.f32 %v7119_v39, %v7118_v18  ;;  %v7121_v4 = vpop.f32.mrb[122].mxu0 }
 0xbaf   :  { %v7122_v29 = vpop.f32.mrb[123].mxu0 }
 0xbb0   :  { %v5650_v60 = vadd.f32 %v7120_v41, %v10511_v44 }
 0xbb2   :  { %v10621_v33 = vadd.f32 %v5689_v16, %v5650_v60 }
 0xbb4   :  { %v5695_v12 = vmul.f32 %v10621_v33, %v10621_v33 }
 0xbb6   :  { %v5696_v2 = vsel %vm5141_vm1, %v5695_v12, 0.0 }
 0xbb7   :  { %5697 = vadd.xlane.f32.xlu1 %v5696_v2 }
 0xbc8   :  { %v5962_v13 = vpop.f32.mrb[124].mxu1 }
 0xbc9   :  { %v5963_v21 = vadd.f32 %v5962_v13, %v5752_v49  ;;  %v7302_v35 = vpop.f32.mrb[125].mxu1 }
 0xbca   :  { %v5965_v56 = vpop.f32.mrb[126].mxu1 }
 0xbcb   :  { %v5970_v24 = vpack.c.bf16 %v5963_v21, %v5963_v21  ;;  %v7303_v30 = vpop.f32.mrb[127].mxu1  ;;  %v7026_v21 = vld [vmem:[%s10735_s10] ss:$0 sm:$0xff]  ;;  %s8596_s10 = smov [#allocation10]  }
 0xbcc   :  { %v5921_v14 = vpop.f32.mrb[124].mxu0  ;;  %s6589_s12 = sshll.u32 %s8596_s10, 4  ;;  %s6590_s12 = int_to_ptr.vmem [resolvable:$true] %s6589_s12 }
 0xbcd   :  { %v5922_v8 = vadd.f32 %v5921_v14, %v5744_v48  ;;  %v5923_v50 = vpop.f32.mrb[125].mxu0  ;;  %7321 = vmatmul.mubr.bf16.vlgmr.msra.gmra.mrb[128].mxu1 %v5970_v24  ;;  %s8552_s24 = scalar_lea.vmem %s6590_s12, 32  ;;  %p8557_p5 = scmp.lt.s32.totalorder %s6590_s12, %s6590_s12 }
 0xbce   :  { %v5924_v20 = vadd.f32 %v5923_v50, %v5748_v43  ;;  %v5925_v28 = vpop.f32.mrb[126].mxu0  ;;  %7340 = vmatprep.mubr.msk.bf16.mxu1 %vm8594_vm0, %v8593_v15  ;;  %7325 = vmatpush3.bf16.msra.mxu1 %v7834_v37  ;;  %p8553_p4 = scmp.ne.s32.totalorder %s6590_s12, %s8552_s24  ;;  %p8558_p6 = scmp.lt.s32.totalorder %s8552_s24, %s8552_s24 }
 0xbcf   :  { %v5926_v46 = vpop.f32.mrb[127].mxu0  ;;  %v5968_v17 = vpack.c.bf16 %v5922_v8, %v5922_v8  ;;  %7326 = vmatprep.subr.bf16.mxu1 %v8593_v15 }
 0xbd0   :  { %v5969_v57 = vpack.c.bf16 %v5924_v20, %v5924_v20  ;;  %p8559_p7 = por %p8558_p6, %p8557_p5 }
 0xbd2   :  { %6202 = vmatprep.mubr.bf16.mxu0 %v5969_v57  ;;  %7327 = vmatpush3.bf16.msra.mxu1 %v7835_v27  ;;  %p8560_p8 = pnand %p8559_p7, %p8553_p4 }
 0xbd3   :  { %6203 = vmatmul.mubr.bf16.vlgmr.msra.gmra.mrb[128].mxu0 %v5968_v17  ;;  %7328 = vmatprep.subr.bf16.mxu1 %v8593_v15 }
 0xbd4   :  { %7174 = vmatpush3.bf16.msra.mxu0 %v7819_v62  ;;  %6452 = vmatprep.mubr.bf16.mxu0 %v6321_v45  ;;  %v5140_v45 = vmul.f32 %v10514_v36, %v10514_v36 }
 0xbd5   :  { %7175 = vmatprep.subr.bf16.mxu0 %v7820_v6 }
 0xbd6   :  { %7329 = vmatpush3.bf16.msra.mxu1 %v7836_v55  ;;  %v5142_v17 = vsel %vm5141_vm1, %v5140_v45, 0.0 }
 0xbd7   :  { %7330 = vmatprep.subr.bf16.mxu1 %v8593_v15 }
 0xbd8   :  { %7176 = vmatpush3.bf16.msra.mxu0 %v7821_v40 }
 0xbd9   :  { %7177 = vmatprep.subr.bf16.mxu0 %v7822_v47 }
 0xbda   :  { %7331 = vmatpush3.bf16.msra.mxu1 %v7837_v59 }
 0xbdb   :  { %7332 = vmatprep.subr.bf16.mxu1 %v8593_v15 }
 0xbdc   :  { %7178 = vmatpush3.bf16.msra.mxu0 %v7823_v31 }
 0xbdd   :  { %7179 = vmatprep.subr.bf16.mxu0 %v7824_v61 }
 0xbde   :  { %7333 = vmatpush3.bf16.msra.mxu1 %v7838_v34 }
 0xbdf   :  { %7334 = vmatprep.subr.bf16.mxu1 %v8593_v15 }
 0xbe0   :  { %7180 = vmatpush3.bf16.msra.mxu0 %v7825_v54 }
 0xbe1   :  { %7181 = vmatprep.subr.bf16.mxu0 %v7826_v23 }
 0xbe2   :  { %7335 = vmatpush3.bf16.msra.mxu1 %v7839_v3 }
 0xbe3   :  { %7336 = vmatprep.subr.bf16.mxu1 %v8593_v15 }
 0xbe4   :  { %7182 = vmatpush3.bf16.msra.mxu0 %v7827_v26 }
 0xbe5   :  { %7183 = vmatprep.subr.bf16.mxu0 %v7828_v19 }
 0xbe6   :  { %7337 = vmatpush3.bf16.msra.mxu1 %v7840_v52 }
 0xbe7   :  { %7338 = vmatprep.subr.bf16.mxu1 %v8593_v15 }
 0xbe8   :  { %7184 = vmatpush3.bf16.msra.mxu0 %v7829_v11 }
 0xbe9   :  { %7185 = vmatprep.subr.bf16.mxu0 %v7830_v53 }
 0xbea   :  { %7339 = vmatpush3.bf16.msra.mxu1 %v7841_v0 }
 0xbec   :  { %7186 = vmatpush3.bf16.msra.mxu0 %v7831_v63 }
 0xbed   :  { %7187 = vmatprep.subr.bf16.mxu0 %v7832_v42 }
 0xbf0   :  { %7188 = vmatpush3.bf16.msra.mxu0 %v7833_v10 }
 0xbf3   :  { %6453 = vmatmul.mubr.bf16.vlgmr.msra.gmra.mrb[132].mxu0 %v6314_v9 }
 0xc44   :  { %v5698_v16 = vpop.xlane.xlu1 %5697 }
 0xc45   :  { %v5699_v22 = vmax.f32 %v5698_v16, 1e-24 }
 0xc47   :  { %8226 = vrsqrt.f32 %v5699_v22 }
 0xc51   :  { %v8227_v18 = vpop.eup %8226 }
 0xc52   :  { %v5701_v39 = vmul.f32 %v8227_v18, %v10621_v33 }
 0xc54   :  { %6974 = vst [vmem:[%s10738_s13 + $0x2] sm:$0x3] %v5701_v39 }
 0xca0   :  { %v6244_v41 = vpop.f32.mrb[128].mxu1 }
 0xca1   :  { %v7322_v4 = vpop.f32.mrb[129].mxu1 }
 0xca2   :  { %v6247_v29 = vpop.f32.mrb[130].mxu1 }
 0xca3   :  { %v7323_v60 = vpop.f32.mrb[131].mxu1 }
 0xca6   :  { %v7158_v12 = vpop.f32.mrb[128].mxu0 }
 0xca7   :  { %v7159_v2 = vpop.f32.mrb[129].mxu0 }
 0xca8   :  { %v7160_v32 = vadd.f32 %v7159_v2, %v7158_v12  ;;  %v7161_v25 = vpop.f32.mrb[130].mxu0 }
 0xca9   :  { %v7162_v5 = vpop.f32.mrb[131].mxu0 }
 0xcaa   :  { %v6205_v15 = vadd.f32 %v7160_v32, %v10511_v44 }
 0xcac   :  { %v6245_v49 = vadd.f32 %v6244_v41, %v6205_v15 }
 0xcae   :  { %v6250_v13 = vmul.f32 %v6245_v49, %v6245_v49 }
 0xcb0   :  { %v6251_v1 = vsel %vm5141_vm1, %v6250_v13, 0.0 }
 0xcb1   :  { %6252 = vadd.xlane.f32.xlu1 %v6251_v1 }
 0xcc6   :  { %v7189_v33 = vpop.f32.mrb[132].mxu0 }
 0xcc7   :  { %v7190_v35 = vpop.f32.mrb[133].mxu0 }
 0xcc8   :  { %v7191_v48 = vadd.f32 %v7190_v35, %v7189_v33  ;;  %v7192_v51 = vpop.f32.mrb[134].mxu0 }
 0xcc9   :  { %v7193_v56 = vpop.f32.mrb[135].mxu0 }
 0xcca   :  { %v6455_v43 = vadd.f32 %v7191_v48, %v7026_v21 }
 0xccc   :  { %v6460_v24 = vmax.f32 %v6455_v43, 0.0 }
 0xcce   :  { %v6461_v30 = vpack.c.bf16 %v6460_v24, %v6460_v24 }
 0xcd0   :  { %7341 = vmatmul.mubr.bf16.vlgmr.msra.gmra.mrb[132].mxu1 %v6461_v30 }
 0xd3e   :  { %v6253_v14 = vpop.xlane.xlu1 %6252 }
 0xd3f   :  { %v6254_v44 = vmax.f32 %v6253_v14, 1e-24 }
 0xd41   :  { %8228 = vrsqrt.f32 %v6254_v44 }
 0xd4b   :  { %v8229_v58 = vpop.eup %8228 }
 0xd4c   :  { %v6256_v7 = vmul.f32 %v8229_v58, %v6245_v49 }
 0xd4e   :  { %7025 = vst [vmem:[%s10738_s13 + $0x4] sm:$0x3] %v6256_v7 }
 0xda3   :  { %v6567_v8 = vpop.f32.mrb[132].mxu1 }
 0xda4   :  { %v6568_v50 = vadd.f32 %v7044_v38, %v6567_v8  ;;  %v7342_v20 = vpop.f32.mrb[133].mxu1 }
 0xda5   :  { %v6570_v28 = vpop.f32.mrb[134].mxu1 }
 0xda6   :  { %v7343_v46 = vpop.f32.mrb[135].mxu1  ;;  %v6573_v57 = vmul.f32 %v6568_v50, %v6568_v50 }
 0xda8   :  { %v6574_v62 = vsel %vm5141_vm1, %v6573_v57, 0.0 }
 0xda9   :  { %6575 = vadd.xlane.f32.xlu0 %v6574_v62 }
 0xdad   :  { %5143 = vadd.xlane.f32.xlu0 %v5142_v17 }
 0xe36   :  { %v6576_v6 = vpop.xlane.xlu0 %6575 }
 0xe37   :  { %v6577_v40 = vmax.f32 %v6576_v6, 1e-24 }
 0xe39   :  { %8230 = vrsqrt.f32 %v6577_v40 }
 0xe3a   :  { %v5144_v47 = vpop.xlane.xlu0 %5143 }
 0xe3b   :  { %v5145_v31 = vmax.f32 %v5144_v47, 1e-24 }
 0xe3d   :  { %8232 = vrsqrt.f32 %v5145_v31 }
 0xe43   :  { %v8231_v61 = vpop.eup %8230 }
 0xe44   :  { %v6579_v54 = vmul.f32 %v8231_v61, %v6568_v50 }
 0xe46   :  { %6580 = vst [vmem:[#allocation10] sm:$0x3] %v6579_v54 }
 0xe47   :  { %v8233_v23 = vpop.eup %8232 }
 0xe48   :  { %8563 = shalt.err (!%p8560_p8)
}
 0xe49   :  { %s8564_s11 = scalar_lea.hbm %s10739_s14, 32 }
 0xe4a   :  { %p8565_p9 = scmp.ne.s32.totalorder %s10739_s14, %s8564_s11  ;;  %p8568_p10 = scmp.lt.u32.totalorder %s8564_s11, %s10739_s14 }
 0xe4c   :  { %p8570_p11 = pnand %p8568_p10, %p8565_p9 }
 0xe4e   :  { %8573 = shalt.err (!%p8570_p11)
}
 0xe4f   :  { %6592 = dma.vmem_to_hbm [thread:$0]  %s6590_s12, 32, %s10739_s14, [#allocation4]   ;;  %v5147_v26 = vmul.f32 %v8233_v23, %v10514_v36 }
 0xe51   :  { %5148 = vst [vmem:[%s10738_s13] sm:$0x3] %v5147_v26 }
 0xe52   :  { %8580 = dma.done.wait [#allocation4], 32  }
 0xe53   :  { %8581 = vsyncadd [#allocation4], 4294967264 }
 0xe54   :  { %6598 = vsyncpa [#allocation3], 1 }
 0xe55   :  { %6599 = vsyncpa [#allocation6], 1 }
 0xe56   :  { %6600 = vsyncpa [#allocation9], 1 }
 0xe57   :  { %6601 = vsyncpa [#allocation4], 1 }

</bundles_post_ra>
